<compile_context>
chip_gen: v7x
topology: tpu7x:2x2x1
jax: 0.10.0
libtpu: 0.0.40
codegen_flags: <defaults>
</compile_context>

<pallas_src>
import functools

import jax
import jax.numpy as jnp
from jax.experimental import pallas as pl
from jax.experimental.pallas import tpu as pltpu

B = 2          # batch (M=2 of 128/256 MXU rows: batch is free headroom if
               # higher throughput is ever needed -- w1 streaming amortizes)
H = W = 28     # input spatial
KH = KW = 3    # conv kernel
CO = 32        # conv out channels
OH = OW = 26   # conv output spatial (valid conv)
NPIX = OH * OW             # 676
FLAT = CO * NPIX           # 21632
HID = 128
NCLS = 10


# ---------------------------------------------------------------------------
# Kernel 1: conv-as-matmul + bias + ReLU   (tiny; launch-overhead dominated)
#   patches: [B*676, 9] f32   wc: [9, 32] f32   bc: [1, 32] f32
#   out:     [B*676, 32] bf16
# ---------------------------------------------------------------------------
def conv_relu_kernel(p_ref, w_ref, b_ref, o_ref):
    y = jnp.dot(p_ref[...], w_ref[...], preferred_element_type=jnp.float32)
    y = y + b_ref[...]
    o_ref[...] = jnp.maximum(y, 0.0).astype(o_ref.dtype)


def conv_relu(patches, wc, bc):
    m, k = patches.shape
    return pl.pallas_call(
        conv_relu_kernel,
        out_shape=jax.ShapeDtypeStruct((m, CO), jnp.bfloat16),
        grid=(1,),
        in_specs=[
            pl.BlockSpec((m, k), lambda i: (0, 0)),
            pl.BlockSpec((k, CO), lambda i: (0, 0)),
            pl.BlockSpec((1, CO), lambda i: (0, 0)),
        ],
        out_specs=pl.BlockSpec((m, CO), lambda i: (0, 0)),
    )(patches, wc, bc)


# ---------------------------------------------------------------------------
# Kernel 2: d1 + ReLU + d2 + softmax, single step (w1 fits VMEM everywhere)
#   x:   [B, 21632]     bf16  (conv activations, hw*32+co column order)
#   w1:  [21632, 128]   bf16  (columns permuted on host to match x)
#   b1:  [1, 128] f32   w2t: [128, 10] f32   b2: [1, 10] f32
#   out: [B, 10] f32
# ---------------------------------------------------------------------------
def mlp_softmax_kernel(x_ref, w1_ref, b1_ref, w2_ref, b2_ref, o_ref):
    # bf16 x bf16 -> f32 accumulation on the MXU, whole reduction in one dot.
    h = jnp.dot(x_ref[...], w1_ref[...], preferred_element_type=jnp.float32)
    h = jnp.maximum(h + b1_ref[...], 0.0)                       # ReLU(d1)
    logits = (
        jnp.dot(h, w2_ref[...], preferred_element_type=jnp.float32)
        + b2_ref[...]
    )
    m = jnp.max(logits, axis=-1, keepdims=True)
    e = jnp.exp(logits - m)
    inv = pl.reciprocal(jnp.sum(e, axis=-1, keepdims=True), approx=True)
    o_ref[...] = e * inv                                         # softmax


def mlp_softmax(x_flat, w1t, b1, w2t, b2):
    return pl.pallas_call(
        mlp_softmax_kernel,
        out_shape=jax.ShapeDtypeStruct((B, NCLS), jnp.float32),
        grid=(1,),
        in_specs=[
            pl.BlockSpec((B, FLAT), lambda i: (0, 0)),
            pl.BlockSpec((FLAT, HID), lambda i: (0, 0)),
            pl.BlockSpec((1, HID), lambda i: (0, 0)),
            pl.BlockSpec((HID, NCLS), lambda i: (0, 0)),
            pl.BlockSpec((1, NCLS), lambda i: (0, 0)),
        ],
        out_specs=pl.BlockSpec((B, NCLS), lambda i: (0, 0)),
        compiler_params=pltpu.CompilerParams(
            dimension_semantics=("arbitrary",),
            # Full w1 block double-buffered (~11 MB) must clear v5e's 16 MiB
            # default scoped-VMEM limit; 32 MiB is safe on v5e/v6e/v7x.
            vmem_limit_bytes=32 * 1024 * 1024,
        ),
    )(x_flat, w1t, b1, w2t, b2)


# ---------------------------------------------------------------------------
# Full forward pass (glue in plain JAX, hot paths in Pallas)
# ---------------------------------------------------------------------------
@functools.partial(jax.jit, static_argnums=())
def my_model_forward(x, params):
    wc_t, bc, w1t, b1, w2_t, b2 = params

    # im2col: [B, 1, 28, 28] -> [B*676, 9] (row = b*676 + h*26 + w, col = kh*3+kw)
    patches = jnp.stack(
        [x[:, 0, kh:kh + OH, kw:kw + OW] for kh in range(KH) for kw in range(KW)],
        axis=-1,
    )                                        # [B, 26, 26, 9]
    patches = patches.reshape(B * NPIX, KH * KW)

    # conv + relu: [B*676, 32] bf16, ordering (pixel, channel)
    conv_out = conv_relu(patches, wc_t, bc)

    # Contiguous reshape to [B, 21632]: column index = hw*32 + co.
    # (d1 weights were permuted on the host to this order, so no transpose.)
    x_flat = conv_out.reshape(B, FLAT)

    return mlp_softmax(x_flat, w1t, b1, w2_t, b2)


def init_params(key):
    k1, k2, k3, k4, k5, k6 = jax.random.split(key, 6)
    # conv1: torch weight [32, 1, 3, 3], bias [32]
    wc = jax.random.normal(k1, (CO, 1, KH, KW), jnp.float32) * 0.1
    bc = jax.random.normal(k2, (CO,), jnp.float32) * 0.1
    # d1: torch weight [128, 21632] (columns indexed co*676 + hw), bias [128]
    w1 = jax.random.normal(k3, (HID, FLAT), jnp.float32) * 0.01
    b1 = jax.random.normal(k4, (HID,), jnp.float32) * 0.1
    # d2: torch weight [10, 128], bias [10]
    w2 = jax.random.normal(k5, (NCLS, HID), jnp.float32) * 0.1
    b2 = jax.random.normal(k6, (NCLS,), jnp.float32) * 0.1

    # conv weight as matmul RHS: [9, 32]
    wc_t = wc.reshape(CO, KH * KW).T

    # Permute d1 columns from torch order (co*676 + hw) to our order (hw*32 + co),
    # transpose to matmul RHS [21632, 128], cast to bf16 (f32 MXU accumulation
    # in-kernel).
    w1p = w1.reshape(HID, CO, NPIX).transpose(0, 2, 1).reshape(HID, FLAT)
    w1t = w1p.T.astype(jnp.bfloat16)          # [21632, 128]

    w2_t = w2.T                               # [128, 10]

    return (
        wc_t.astype(jnp.float32),
        bc.reshape(1, CO),
        w1t,
        b1.reshape(1, HID),
        w2_t.astype(jnp.float32),
        b2.reshape(1, NCLS),
    )


if __name__ == "__main__":
    key = jax.random.PRNGKey(0)
    pkey, xkey = jax.random.split(key)
    params = init_params(pkey)

    # MNIST-shaped input: the 26*26*32 flatten in the module pins spatial to 28x28.
    x = jax.random.normal(xkey, (B, 1, H, W), jnp.float32)

    out = my_model_forward(x, params)
    out = jax.block_until_ready(out)

    assert out.shape == (B, NCLS)
    # softmax rows must sum to ~1 (bf16 weights + approx reciprocal -> loose tol)
    assert bool(jnp.all(jnp.abs(jnp.sum(out, axis=1) - 1.0) < 1e-2))

    print("KERNEL_OK")
</pallas_src>

<mosaic_0001>
module attributes {stable_mosaic.version = 11 : i64} {
  func.func @mlp_softmax_kernel(%arg0: i32, %arg1: memref<2x21632xbf16, #tpu.memory_space<vmem>>, %arg2: memref<21632x128xbf16, #tpu.memory_space<vmem>>, %arg3: memref<1x128xf32, #tpu.memory_space<vmem>>, %arg4: memref<128x10xf32, #tpu.memory_space<vmem>>, %arg5: memref<1x10xf32, #tpu.memory_space<vmem>>, %arg6: memref<2x10xf32, #tpu.memory_space<vmem>>) attributes {dimension_semantics = [#tpu.dimension_semantics<arbitrary>], iteration_bounds = array<i64: 1>, scalar_prefetch = 0 : i64, scratch_operands = 0 : i64, tpu.core_type = #tpu.core_type<tc>, window_params = [{pipeline_mode = #tpu.pipeline_mode<synchronous>, transform_indices = @transform_0, window_bounds = array<i64: 2, 21632>}, {pipeline_mode = #tpu.pipeline_mode<synchronous>, transform_indices = @transform_1, window_bounds = array<i64: 21632, 128>}, {pipeline_mode = #tpu.pipeline_mode<synchronous>, transform_indices = @transform_2, window_bounds = array<i64: 1, 128>}, {pipeline_mode = #tpu.pipeline_mode<synchronous>, transform_indices = @transform_3, window_bounds = array<i64: 128, 10>}, {pipeline_mode = #tpu.pipeline_mode<synchronous>, transform_indices = @transform_4, window_bounds = array<i64: 1, 10>}, {pipeline_mode = #tpu.pipeline_mode<synchronous>, transform_indices = @transform_5, window_bounds = array<i64: 2, 10>}]} {
    %c0 = arith.constant 0 : index
    %c0_0 = arith.constant 0 : index
    %0 = vector.load %arg1[%c0, %c0_0] : memref<2x21632xbf16, #tpu.memory_space<vmem>>, vector<2x21632xbf16>
    %c0_1 = arith.constant 0 : index
    %c0_2 = arith.constant 0 : index
    %1 = vector.load %arg2[%c0_1, %c0_2] : memref<21632x128xbf16, #tpu.memory_space<vmem>>, vector<21632x128xbf16>
    %cst = arith.constant dense<0.000000e+00> : vector<2x128xf32>
    %2 = tpu.matmul %0, %1, %cst {dimension_numbers = #tpu.dot_dimension_numbers<[1], [0], [0], [1], [0, 0, 1, 1], [], []>} : vector<2x21632xbf16>, vector<21632x128xbf16>, vector<2x128xf32> -> vector<2x128xf32>
    %c0_3 = arith.constant 0 : index
    %c0_4 = arith.constant 0 : index
    %3 = vector.load %arg3[%c0_3, %c0_4] : memref<1x128xf32, #tpu.memory_space<vmem>>, vector<1x128xf32>
    %4 = vector.broadcast %3 : vector<1x128xf32> to vector<2x128xf32>
    %5 = arith.addf %2, %4 : vector<2x128xf32>
    %cst_5 = arith.constant 0.000000e+00 : f32
    %6 = vector.broadcast %cst_5 : f32 to vector<2x128xf32>
    %7 = arith.maximumf %5, %6 : vector<2x128xf32>
    %c0_6 = arith.constant 0 : index
    %c0_7 = arith.constant 0 : index
    %8 = vector.load %arg4[%c0_6, %c0_7] : memref<128x10xf32, #tpu.memory_space<vmem>>, vector<128x10xf32>
    %cst_8 = arith.constant dense<0.000000e+00> : vector<2x10xf32>
    %9 = tpu.matmul %7, %8, %cst_8 {dimension_numbers = #tpu.dot_dimension_numbers<[1], [0], [0], [1], [0, 0, 1, 1], [], []>} : vector<2x128xf32>, vector<128x10xf32>, vector<2x10xf32> -> vector<2x10xf32>
    %c0_9 = arith.constant 0 : index
    %c0_10 = arith.constant 0 : index
    %10 = vector.load %arg5[%c0_9, %c0_10] : memref<1x10xf32, #tpu.memory_space<vmem>>, vector<1x10xf32>
    %11 = vector.broadcast %10 : vector<1x10xf32> to vector<2x10xf32>
    %12 = arith.addf %9, %11 : vector<2x10xf32>
    %cst_11 = arith.constant dense<0xFF800000> : vector<2xf32>
    %13 = vector.multi_reduction <maximumf>, %12, %cst_11 [1] : vector<2x10xf32> to vector<2xf32>
    %14 = vector.shape_cast %13 : vector<2xf32> to vector<2x1xf32>
    %15 = vector.broadcast %14 : vector<2x1xf32> to vector<2x10xf32>
    %16 = arith.subf %12, %15 : vector<2x10xf32>
    %17 = math.exp %16 : vector<2x10xf32>
    %cst_12 = arith.constant dense<0.000000e+00> : vector<2xf32>
    %18 = vector.multi_reduction <add>, %17, %cst_12 [1] : vector<2x10xf32> to vector<2xf32>
    %19 = vector.shape_cast %18 : vector<2xf32> to vector<2x1xf32>
    %20 = tpu.reciprocal %19 {approx = true} : vector<2x1xf32> -> vector<2x1xf32>
    %21 = vector.broadcast %20 : vector<2x1xf32> to vector<2x10xf32>
    %22 = arith.mulf %17, %21 : vector<2x10xf32>
    %c0_13 = arith.constant 0 : index
    %c0_14 = arith.constant 0 : index
    %23 = vector.load %arg6[%c0_13, %c0_14] : memref<2x10xf32, #tpu.memory_space<vmem>>, vector<2x10xf32>
    tpu.vector_store %arg6[%c0_13, %c0_14], %22 {strides = array<i32>} : memref<2x10xf32, #tpu.memory_space<vmem>>, vector<2x10xf32>,
    return
  }
  func.func @transform_0(%arg0: i32) -> (i32, i32) {
    %c0_i32 = arith.constant 0 : i32
    %c0_i32_0 = arith.constant 0 : i32
    %c0_i32_1 = arith.constant 0 : i32
    return %c0_i32, %c0_i32_0 : i32, i32
  }
  func.func @transform_1(%arg0: i32) -> (i32, i32) {
    %c0_i32 = arith.constant 0 : i32
    %c0_i32_0 = arith.constant 0 : i32
    %c0_i32_1 = arith.constant 0 : i32
    return %c0_i32, %c0_i32_0 : i32, i32
  }
  func.func @transform_2(%arg0: i32) -> (i32, i32) {
    %c0_i32 = arith.constant 0 : i32
    %c0_i32_0 = arith.constant 0 : i32
    %c0_i32_1 = arith.constant 0 : i32
    return %c0_i32, %c0_i32_0 : i32, i32
  }
  func.func @transform_3(%arg0: i32) -> (i32, i32) {
    %c0_i32 = arith.constant 0 : i32
    %c0_i32_0 = arith.constant 0 : i32
    %c0_i32_1 = arith.constant 0 : i32
    return %c0_i32, %c0_i32_0 : i32, i32
  }
  func.func @transform_4(%arg0: i32) -> (i32, i32) {
    %c0_i32 = arith.constant 0 : i32
    %c0_i32_0 = arith.constant 0 : i32
    %c0_i32_1 = arith.constant 0 : i32
    return %c0_i32, %c0_i32_0 : i32, i32
  }
  func.func @transform_5(%arg0: i32) -> (i32, i32) {
    %c0_i32 = arith.constant 0 : i32
    %c0_i32_0 = arith.constant 0 : i32
    %c0_i32_1 = arith.constant 0 : i32
    return %c0_i32, %c0_i32_0 : i32, i32
  }
}

module attributes {stable_mosaic.version = 11 : i64} {
  func.func @conv_relu_kernel(%arg0: i32, %arg1: memref<1352x9xf32, #tpu.memory_space<vmem>>, %arg2: memref<9x32xf32, #tpu.memory_space<vmem>>, %arg3: memref<1x32xf32, #tpu.memory_space<vmem>>, %arg4: memref<1352x32xbf16, #tpu.memory_space<vmem>>) attributes {dimension_semantics = [#tpu.dimension_semantics<arbitrary>], iteration_bounds = array<i64: 1>, scalar_prefetch = 0 : i64, scratch_operands = 0 : i64, tpu.core_type = #tpu.core_type<tc>, window_params = [{pipeline_mode = #tpu.pipeline_mode<synchronous>, transform_indices = @transform_0, window_bounds = array<i64: 1352, 9>}, {pipeline_mode = #tpu.pipeline_mode<synchronous>, transform_indices = @transform_1, window_bounds = array<i64: 9, 32>}, {pipeline_mode = #tpu.pipeline_mode<synchronous>, transform_indices = @transform_2, window_bounds = array<i64: 1, 32>}, {pipeline_mode = #tpu.pipeline_mode<synchronous>, transform_indices = @transform_3, window_bounds = array<i64: 1352, 32>}]} {
    %c0 = arith.constant 0 : index
    %c0_0 = arith.constant 0 : index
    %0 = vector.load %arg1[%c0, %c0_0] : memref<1352x9xf32, #tpu.memory_space<vmem>>, vector<1352x9xf32>
    %c0_1 = arith.constant 0 : index
    %c0_2 = arith.constant 0 : index
    %1 = vector.load %arg2[%c0_1, %c0_2] : memref<9x32xf32, #tpu.memory_space<vmem>>, vector<9x32xf32>
    %cst = arith.constant dense<0.000000e+00> : vector<1352x32xf32>
    %2 = tpu.matmul %0, %1, %cst {dimension_numbers = #tpu.dot_dimension_numbers<[1], [0], [0], [1], [0, 0, 1, 1], [], []>} : vector<1352x9xf32>, vector<9x32xf32>, vector<1352x32xf32> -> vector<1352x32xf32>
    %c0_3 = arith.constant 0 : index
    %c0_4 = arith.constant 0 : index
    %3 = vector.load %arg3[%c0_3, %c0_4] : memref<1x32xf32, #tpu.memory_space<vmem>>, vector<1x32xf32>
    %4 = vector.broadcast %3 : vector<1x32xf32> to vector<1352x32xf32>
    %5 = arith.addf %2, %4 : vector<1352x32xf32>
    %cst_5 = arith.constant 0.000000e+00 : f32
    %6 = vector.broadcast %cst_5 : f32 to vector<1352x32xf32>
    %7 = arith.maximumf %5, %6 : vector<1352x32xf32>
    %8 = arith.truncf %7 : vector<1352x32xf32> to vector<1352x32xbf16>
    %c0_6 = arith.constant 0 : index
    %c0_7 = arith.constant 0 : index
    %9 = vector.load %arg4[%c0_6, %c0_7] : memref<1352x32xbf16, #tpu.memory_space<vmem>>, vector<1352x32xbf16>
    tpu.vector_store %arg4[%c0_6, %c0_7], %8 {strides = array<i32>} : memref<1352x32xbf16, #tpu.memory_space<vmem>>, vector<1352x32xbf16>,
    return
  }
  func.func @transform_0(%arg0: i32) -> (i32, i32) {
    %c0_i32 = arith.constant 0 : i32
    %c0_i32_0 = arith.constant 0 : i32
    %c0_i32_1 = arith.constant 0 : i32
    return %c0_i32, %c0_i32_0 : i32, i32
  }
  func.func @transform_1(%arg0: i32) -> (i32, i32) {
    %c0_i32 = arith.constant 0 : i32
    %c0_i32_0 = arith.constant 0 : i32
    %c0_i32_1 = arith.constant 0 : i32
    return %c0_i32, %c0_i32_0 : i32, i32
  }
  func.func @transform_2(%arg0: i32) -> (i32, i32) {
    %c0_i32 = arith.constant 0 : i32
    %c0_i32_0 = arith.constant 0 : i32
    %c0_i32_1 = arith.constant 0 : i32
    return %c0_i32, %c0_i32_0 : i32, i32
  }
  func.func @transform_3(%arg0: i32) -> (i32, i32) {
    %c0_i32 = arith.constant 0 : i32
    %c0_i32_0 = arith.constant 0 : i32
    %c0_i32_1 = arith.constant 0 : i32
    return %c0_i32, %c0_i32_0 : i32, i32
  }
}

</mosaic_0001>

<bundles_post_ra>
// kernel: my_model_forward.2
= control target key start
LH: loop header
LB: loop body
LE: loop exit
PB: predicated region body
PF: predicated region fallthrough
CT: control target
= control target key end

     0   :  { %8 = vsyncpa [#allocation3], 0  ;;  %s5834_s0 = inlined_call_operand.vmem [shape: f32[1352,9], index: 0, kind: input, shape index: {}]   ;;  %s5835_s1 = inlined_call_operand.hbm [shape: f32[9,32], index: 1, kind: input, shape index: {}]   ;;  %s5836_s2 = inlined_call_operand.hbm [shape: f32[1,32], index: 2, kind: input, shape index: {}]   ;;  %s5837_s3 = inlined_call_operand.vmem [shape: bf16[1352,32], index: 3, kind: output, shape index: {}]  }
   0x1   :  { %9 = vsyncpa [#allocation5], 0  ;;  %s3917_s12 = smov [#allocation2]   ;;  %s3869_s16 = scalar_lea.hbm %s5835_s1, 256 }
   0x2   :  { %s17_s13 = sshll.u32 %s3917_s12, 4  ;;  %p3870_p0 = scmp.ne.s32.totalorder %s5835_s1, %s3869_s16  ;;  %s18_s13 = int_to_ptr.vmem [resolvable:$true] %s17_s13 }
   0x3   :  { %p3873_p1 = scmp.lt.u32.totalorder %s3869_s16, %s5835_s1 }
   0x5   :  { %p3875_p2 = pnand %p3873_p1, %p3870_p0 }
   0x7   :  { %3878 = shalt.err (!%p3875_p2)
}
   0x8   :  { %s3879_s21 = scalar_lea.vmem %s18_s13, 256  ;;  %p3884_p4 = scmp.lt.s32.totalorder %s18_s13, %s18_s13 }
   0x9   :  { %p3880_p3 = scmp.ne.s32.totalorder %s18_s13, %s3879_s21  ;;  %p3885_p5 = scmp.lt.s32.totalorder %s3879_s21, %s3879_s21 }
   0xb   :  { %p3886_p6 = por %p3885_p5, %p3884_p4 }
   0xd   :  { %p3887_p7 = pnand %p3886_p6, %p3880_p3 }
   0xf   :  { %3890 = shalt.err (!%p3887_p7)
}
  0x10   :  { %s3918_s22 = smov 128   ;;  %s3919_s23 = smov 8  }
  0x11   :  { %23 = dma.hbm_to_vmem [thread:$0]  %s5835_s1, 256, %s18_s13, [#allocation3], %s3918_s22, %s3918_s22, %s3919_s23  }
  0x12   :  { %s3920_s26 = smov [#allocation4]   ;;  %s3891_s30 = scalar_lea.hbm %s5836_s2, 16 }
  0x13   :  { %s30_s27 = sshll.u32 %s3920_s26, 4  ;;  %p3892_p8 = scmp.ne.s32.totalorder %s5836_s2, %s3891_s30  ;;  %s31_s27 = int_to_ptr.vmem [resolvable:$true] %s30_s27 }
  0x14   :  { %p3895_p9 = scmp.lt.u32.totalorder %s3891_s30, %s5836_s2 }
  0x16   :  { %p3897_p10 = pnand %p3895_p9, %p3892_p8 }
  0x18   :  { %3900 = shalt.err (!%p3897_p10)
}
  0x19   :  { %s3901_s8 = scalar_lea.vmem %s31_s27, 16  ;;  %s3905_s1 = scalar_lea.vmem %s31_s27, 32 }
  0x1a   :  { %p3902_p11 = scmp.ne.s32.totalorder %s31_s27, %s3901_s8  ;;  %p3906_p12 = scmp.lt.s32.totalorder %s31_s27, %s31_s27 }
  0x1b   :  { %p3907_p13 = scmp.lt.s32.totalorder %s3905_s1, %s3901_s8 }
  0x1d   :  { %p3908_p0 = por %p3907_p13, %p3906_p12 }
  0x1f   :  { %p3909_p1 = pnand %p3908_p0, %p3902_p11 }
  0x21   :  { %3912 = shalt.err (!%p3909_p1)
}
  0x22   :  { %33 = dma.hbm_to_vmem [thread:$0]  %s5836_s2, 16, %s31_s27, [#allocation5]  }
  0x23   :  { %3913 = dma.done.wait [#allocation3], 256  }
  0x24   :  { %3914 = vsyncadd [#allocation3], 4294967040 }
  0x25   :  { %3915 = dma.done.wait [#allocation5], 16  }
  0x26   :  { %3916 = vsyncadd [#allocation5], 4294967280  ;;  %v3921_v0 = vmov 0.0|0.0   ;;  %vm3922_vm0 = vmmov 0   ;;  %v3923_v1 = vmov 0.0   ;;  %vm726_vm1 = vcmask 1040384  }
  0x27   :  { %3853 = vmatprep.subr.bf16.mxu0 %v3921_v0  ;;  %3857 = vmatprep.subr.bf16.mxu1 %v3921_v0  ;;  %v209_v2 = vld [vmem:[#allocation2] sm:$0xff]  ;;  %v210_v3 = vld [vmem:[#allocation2 + $0x8] sm:$0x1]  ;;  %vm3924_vm2 = vmmov 1   ;;  %vm218_vm4 = vcmask 72704   ;;  %v126_v8 = vld [vmem:[%s5834_s0 + $0x2b0] sm:$0xff] }
  0x28   :  { %3346 = vmatprep.mubr.msk.f32.mxu0 %vm3922_vm0, %v3923_v1  ;;  %3601 = vmatprep.mubr.msk.f32.mxu1 %vm3922_vm0, %v3923_v1  ;;  %vm3855_vm3 = vmpackc.low %vm726_vm1, %vm3924_vm2  ;;  %v3854_v4 = vpack.c.bf16 %v210_v3, %v209_v2  ;;  %v40_v5 = vld [vmem:[%s5834_s0] sm:$0xff]  ;;  %v125_v6 = vld [vmem:[%s5834_s0 + $0x2a8] sm:$0xff]  ;;  %vm2486_vm5 = vcmask 257024  }
  0x29   :  { %v41_v7 = vld [vmem:[%s5834_s0 + $0x8] sm:$0xff]  ;;  %v42_v9 = vld [vmem:[%s5834_s0 + $0x10] sm:$0xff]  ;;  %v127_v10 = vld [vmem:[%s5834_s0 + $0x2b8] sm:$0xff] }
  0x2a   :  { %3856 = vmatpush3.bf16.msk.msra.mxu0 %vm3855_vm3, %v3854_v4  ;;  %3858 = vmatpush3.bf16.msk.msra.mxu1 %vm3855_vm3, %v3854_v4  ;;  %v43_v11 = vld [vmem:[%s5834_s0 + $0x18] sm:$0xff]  ;;  %v128_v12 = vld [vmem:[%s5834_s0 + $0x2c0] sm:$0xff]  ;;  %v129_v14 = vld [vmem:[%s5834_s0 + $0x2c8] sm:$0xff] }
  0x2b   :  { %v44_v13 = vld [vmem:[%s5834_s0 + $0x20] sm:$0xff]  ;;  %v45_v15 = vld [vmem:[%s5834_s0 + $0x28] sm:$0xff]  ;;  %v130_v16 = vld [vmem:[%s5834_s0 + $0x2d0] sm:$0xff] }
  0x2c   :  { %v46_v17 = vld [vmem:[%s5834_s0 + $0x30] sm:$0xff]  ;;  %v131_v18 = vld [vmem:[%s5834_s0 + $0x2d8] sm:$0xff]  ;;  %v132_v20 = vld [vmem:[%s5834_s0 + $0x2e0] sm:$0xff] }
  0x2d   :  { %3347 = vmatmul.mubr.msk.f32.vlgmr.msra.gmra.mrb[0].mxu0 %vm218_vm4, %v40_v5  ;;  %3602 = vmatmul.mubr.msk.f32.vlgmr.msra.gmra.mrb[0].mxu1 %vm218_vm4, %v125_v6  ;;  %v47_v19 = vld [vmem:[%s5834_s0 + $0x38] sm:$0xff]  ;;  %v48_v21 = vld [vmem:[%s5834_s0 + $0x40] sm:$0xff]  ;;  %v133_v22 = vld [vmem:[%s5834_s0 + $0x2e8] sm:$0xff] }
  0x2e   :  { %3349 = vmatprep.mubr.msk.f32.mxu0 %vm3922_vm0, %v3923_v1  ;;  %3604 = vmatprep.mubr.msk.f32.mxu1 %vm3922_vm0, %v3923_v1  ;;  %v49_v23 = vld [vmem:[%s5834_s0 + $0x48] sm:$0xff]  ;;  %v134_v24 = vld [vmem:[%s5834_s0 + $0x2f0] sm:$0xff]  ;;  %v135_v26 = vld [vmem:[%s5834_s0 + $0x2f8] sm:$0xff] }
  0x2f   :  { %v50_v25 = vld [vmem:[%s5834_s0 + $0x50] sm:$0xff]  ;;  %v51_v27 = vld [vmem:[%s5834_s0 + $0x58] sm:$0xff]  ;;  %v136_v28 = vld [vmem:[%s5834_s0 + $0x300] sm:$0xff] }
  0x30   :  { %v52_v29 = vld [vmem:[%s5834_s0 + $0x60] sm:$0xff]  ;;  %v137_v30 = vld [vmem:[%s5834_s0 + $0x308] sm:$0xff]  ;;  %v138_v32 = vld [vmem:[%s5834_s0 + $0x310] sm:$0xff] }
  0x31   :  { %3350 = vmatmul.mubr.msk.f32.gmra.mrb[2].mxu0 %vm218_vm4, %v41_v7  ;;  %3605 = vmatmul.mubr.msk.f32.gmra.mrb[2].mxu1 %vm218_vm4, %v126_v8  ;;  %v53_v31 = vld [vmem:[%s5834_s0 + $0x68] sm:$0xff]  ;;  %v54_v33 = vld [vmem:[%s5834_s0 + $0x70] sm:$0xff]  ;;  %v139_v34 = vld [vmem:[%s5834_s0 + $0x318] sm:$0xff] }
  0x32   :  { %3352 = vmatprep.mubr.msk.f32.mxu0 %vm3922_vm0, %v3923_v1  ;;  %3607 = vmatprep.mubr.msk.f32.mxu1 %vm3922_vm0, %v3923_v1  ;;  %v55_v35 = vld [vmem:[%s5834_s0 + $0x78] sm:$0xff]  ;;  %v140_v36 = vld [vmem:[%s5834_s0 + $0x320] sm:$0xff]  ;;  %v141_v38 = vld [vmem:[%s5834_s0 + $0x328] sm:$0xff] }
  0x33   :  { %v56_v37 = vld [vmem:[%s5834_s0 + $0x80] sm:$0xff]  ;;  %v57_v39 = vld [vmem:[%s5834_s0 + $0x88] sm:$0xff]  ;;  %v142_v40 = vld [vmem:[%s5834_s0 + $0x330] sm:$0xff] }
  0x34   :  { %v58_v41 = vld [vmem:[%s5834_s0 + $0x90] sm:$0xff]  ;;  %v143_v42 = vld [vmem:[%s5834_s0 + $0x338] sm:$0xff]  ;;  %v144_v44 = vld [vmem:[%s5834_s0 + $0x340] sm:$0xff] }
  0x35   :  { %3353 = vmatmul.mubr.msk.f32.gmra.mrb[4].mxu0 %vm218_vm4, %v42_v9  ;;  %3608 = vmatmul.mubr.msk.f32.gmra.mrb[4].mxu1 %vm218_vm4, %v127_v10  ;;  %v59_v43 = vld [vmem:[%s5834_s0 + $0x98] sm:$0xff]  ;;  %v60_v45 = vld [vmem:[%s5834_s0 + $0xa0] sm:$0xff]  ;;  %v145_v46 = vld [vmem:[%s5834_s0 + $0x348] sm:$0xff] }
  0x36   :  { %3355 = vmatprep.mubr.msk.f32.mxu0 %vm3922_vm0, %v3923_v1  ;;  %3610 = vmatprep.mubr.msk.f32.mxu1 %vm3922_vm0, %v3923_v1  ;;  %v61_v47 = vld [vmem:[%s5834_s0 + $0xa8] sm:$0xff]  ;;  %v146_v48 = vld [vmem:[%s5834_s0 + $0x350] sm:$0xff]  ;;  %v147_v50 = vld [vmem:[%s5834_s0 + $0x358] sm:$0xff] }
  0x37   :  { %v62_v49 = vld [vmem:[%s5834_s0 + $0xb0] sm:$0xff]  ;;  %v63_v51 = vld [vmem:[%s5834_s0 + $0xb8] sm:$0xff]  ;;  %v148_v52 = vld [vmem:[%s5834_s0 + $0x360] sm:$0xff] }
  0x38   :  { %v64_v53 = vld [vmem:[%s5834_s0 + $0xc0] sm:$0xff]  ;;  %v149_v54 = vld [vmem:[%s5834_s0 + $0x368] sm:$0xff]  ;;  %v150_v56 = vld [vmem:[%s5834_s0 + $0x370] sm:$0xff] }
  0x39   :  { %3356 = vmatmul.mubr.msk.f32.gmra.mrb[6].mxu0 %vm218_vm4, %v43_v11  ;;  %3611 = vmatmul.mubr.msk.f32.gmra.mrb[6].mxu1 %vm218_vm4, %v128_v12  ;;  %v65_v55 = vld [vmem:[%s5834_s0 + $0xc8] sm:$0xff]  ;;  %v66_v57 = vld [vmem:[%s5834_s0 + $0xd0] sm:$0xff]  ;;  %v151_v58 = vld [vmem:[%s5834_s0 + $0x378] sm:$0xff] }
  0x3a   :  { %3358 = vmatprep.mubr.msk.f32.mxu0 %vm3922_vm0, %v3923_v1  ;;  %3613 = vmatprep.mubr.msk.f32.mxu1 %vm3922_vm0, %v3923_v1  ;;  %v67_v59 = vld [vmem:[%s5834_s0 + $0xd8] sm:$0xff]  ;;  %v152_v60 = vld [vmem:[%s5834_s0 + $0x380] sm:$0xff]  ;;  %v153_v62 = vld [vmem:[%s5834_s0 + $0x388] sm:$0xff] }
  0x3b   :  { %v68_v61 = vld [vmem:[%s5834_s0 + $0xe0] sm:$0xff]  ;;  %v69_v63 = vld [vmem:[%s5834_s0 + $0xe8] sm:$0xff]  ;;  %v154_v0 = vld [vmem:[%s5834_s0 + $0x390] sm:$0xff] }
  0x3c   :  { %v70_v2 = vld [vmem:[%s5834_s0 + $0xf0] sm:$0xff]  ;;  %v155_v3 = vld [vmem:[%s5834_s0 + $0x398] sm:$0xff]  ;;  %v156_v5 = vld [vmem:[%s5834_s0 + $0x3a0] sm:$0xff] }
  0x3d   :  { %3359 = vmatmul.mubr.msk.f32.gmra.mrb[8].mxu0 %vm218_vm4, %v44_v13  ;;  %3614 = vmatmul.mubr.msk.f32.gmra.mrb[8].mxu1 %vm218_vm4, %v129_v14  ;;  %v71_v4 = vld [vmem:[%s5834_s0 + $0xf8] sm:$0xff]  ;;  %v72_v6 = vld [vmem:[%s5834_s0 + $0x100] sm:$0xff]  ;;  %v157_v7 = vld [vmem:[%s5834_s0 + $0x3a8] sm:$0xff] }
  0x3e   :  { %3361 = vmatprep.mubr.msk.f32.mxu0 %vm3922_vm0, %v3923_v1  ;;  %3616 = vmatprep.mubr.msk.f32.mxu1 %vm3922_vm0, %v3923_v1  ;;  %v73_v8 = vld [vmem:[%s5834_s0 + $0x108] sm:$0xff]  ;;  %v158_v9 = vld [vmem:[%s5834_s0 + $0x3b0] sm:$0xff]  ;;  %v159_v11 = vld [vmem:[%s5834_s0 + $0x3b8] sm:$0xff] }
  0x3f   :  { %v74_v10 = vld [vmem:[%s5834_s0 + $0x110] sm:$0xff]  ;;  %v75_v12 = vld [vmem:[%s5834_s0 + $0x118] sm:$0xff]  ;;  %v160_v13 = vld [vmem:[%s5834_s0 + $0x3c0] sm:$0xff] }
  0x40   :  { %v76_v14 = vld [vmem:[%s5834_s0 + $0x120] sm:$0xff] }
  0x41   :  { %3362 = vmatmul.mubr.msk.f32.gmra.mrb[10].mxu0 %vm218_vm4, %v45_v15  ;;  %3617 = vmatmul.mubr.msk.f32.gmra.mrb[10].mxu1 %vm218_vm4, %v130_v16  ;;  %v161_v15 = vld [vmem:[%s5834_s0 + $0x3c8] sm:$0xff] }
  0x42   :  { %3364 = vmatprep.mubr.msk.f32.mxu0 %vm3922_vm0, %v3923_v1  ;;  %3619 = vmatprep.mubr.msk.f32.mxu1 %vm3922_vm0, %v3923_v1  ;;  %v77_v16 = vld [vmem:[%s5834_s0 + $0x128] sm:$0xff] }
  0x45   :  { %3365 = vmatmul.mubr.msk.f32.gmra.mrb[12].mxu0 %vm218_vm4, %v46_v17  ;;  %3620 = vmatmul.mubr.msk.f32.gmra.mrb[12].mxu1 %vm218_vm4, %v131_v18  ;;  %v162_v17 = vld [vmem:[%s5834_s0 + $0x3d0] sm:$0xff] }
  0x46   :  { %3367 = vmatprep.mubr.msk.f32.mxu0 %vm3922_vm0, %v3923_v1  ;;  %3622 = vmatprep.mubr.msk.f32.mxu1 %vm3922_vm0, %v3923_v1  ;;  %v78_v18 = vld [vmem:[%s5834_s0 + $0x130] sm:$0xff] }
  0x49   :  { %3368 = vmatmul.mubr.msk.f32.gmra.mrb[14].mxu0 %vm218_vm4, %v47_v19  ;;  %3623 = vmatmul.mubr.msk.f32.gmra.mrb[14].mxu1 %vm218_vm4, %v132_v20  ;;  %v163_v19 = vld [vmem:[%s5834_s0 + $0x3d8] sm:$0xff] }
  0x4a   :  { %3370 = vmatprep.mubr.msk.f32.mxu0 %vm3922_vm0, %v3923_v1  ;;  %3625 = vmatprep.mubr.msk.f32.mxu1 %vm3922_vm0, %v3923_v1  ;;  %v79_v20 = vld [vmem:[%s5834_s0 + $0x138] sm:$0xff] }
  0x4d   :  { %3371 = vmatmul.mubr.msk.f32.gmra.mrb[16].mxu0 %vm218_vm4, %v48_v21  ;;  %3626 = vmatmul.mubr.msk.f32.gmra.mrb[16].mxu1 %vm218_vm4, %v133_v22  ;;  %v164_v21 = vld [vmem:[%s5834_s0 + $0x3e0] sm:$0xff] }
  0x4e   :  { %3373 = vmatprep.mubr.msk.f32.mxu0 %vm3922_vm0, %v3923_v1  ;;  %3628 = vmatprep.mubr.msk.f32.mxu1 %vm3922_vm0, %v3923_v1  ;;  %v80_v22 = vld [vmem:[%s5834_s0 + $0x140] sm:$0xff] }
  0x51   :  { %3374 = vmatmul.mubr.msk.f32.gmra.mrb[18].mxu0 %vm218_vm4, %v49_v23  ;;  %3629 = vmatmul.mubr.msk.f32.gmra.mrb[18].mxu1 %vm218_vm4, %v134_v24  ;;  %v165_v23 = vld [vmem:[%s5834_s0 + $0x3e8] sm:$0xff] }
  0x52   :  { %3376 = vmatprep.mubr.msk.f32.mxu0 %vm3922_vm0, %v3923_v1  ;;  %3631 = vmatprep.mubr.msk.f32.mxu1 %vm3922_vm0, %v3923_v1  ;;  %v81_v24 = vld [vmem:[%s5834_s0 + $0x148] sm:$0xff] }
  0x55   :  { %3377 = vmatmul.mubr.msk.f32.gmra.mrb[20].mxu0 %vm218_vm4, %v50_v25  ;;  %3632 = vmatmul.mubr.msk.f32.gmra.mrb[20].mxu1 %vm218_vm4, %v135_v26  ;;  %v166_v25 = vld [vmem:[%s5834_s0 + $0x3f0] sm:$0xff] }
  0x56   :  { %3379 = vmatprep.mubr.msk.f32.mxu0 %vm3922_vm0, %v3923_v1  ;;  %3634 = vmatprep.mubr.msk.f32.mxu1 %vm3922_vm0, %v3923_v1  ;;  %v82_v26 = vld [vmem:[%s5834_s0 + $0x150] sm:$0xff] }
  0x59   :  { %3380 = vmatmul.mubr.msk.f32.gmra.mrb[22].mxu0 %vm218_vm4, %v51_v27  ;;  %3635 = vmatmul.mubr.msk.f32.gmra.mrb[22].mxu1 %vm218_vm4, %v136_v28  ;;  %v167_v27 = vld [vmem:[%s5834_s0 + $0x3f8] sm:$0xff] }
  0x5a   :  { %3382 = vmatprep.mubr.msk.f32.mxu0 %vm3922_vm0, %v3923_v1  ;;  %3637 = vmatprep.mubr.msk.f32.mxu1 %vm3922_vm0, %v3923_v1  ;;  %v83_v28 = vld [vmem:[%s5834_s0 + $0x158] sm:$0xff] }
  0x5d   :  { %3383 = vmatmul.mubr.msk.f32.gmra.mrb[24].mxu0 %vm218_vm4, %v52_v29  ;;  %3638 = vmatmul.mubr.msk.f32.gmra.mrb[24].mxu1 %vm218_vm4, %v137_v30  ;;  %v168_v29 = vld [vmem:[%s5834_s0 + $0x400] sm:$0xff] }
  0x5e   :  { %3385 = vmatprep.mubr.msk.f32.mxu0 %vm3922_vm0, %v3923_v1  ;;  %3640 = vmatprep.mubr.msk.f32.mxu1 %vm3922_vm0, %v3923_v1  ;;  %v84_v30 = vld [vmem:[%s5834_s0 + $0x160] sm:$0xff] }
  0x61   :  { %3386 = vmatmul.mubr.msk.f32.gmra.mrb[26].mxu0 %vm218_vm4, %v53_v31  ;;  %3641 = vmatmul.mubr.msk.f32.gmra.mrb[26].mxu1 %vm218_vm4, %v138_v32  ;;  %v169_v31 = vld [vmem:[%s5834_s0 + $0x408] sm:$0xff] }
  0x62   :  { %3388 = vmatprep.mubr.msk.f32.mxu0 %vm3922_vm0, %v3923_v1  ;;  %3643 = vmatprep.mubr.msk.f32.mxu1 %vm3922_vm0, %v3923_v1  ;;  %v85_v32 = vld [vmem:[%s5834_s0 + $0x168] sm:$0xff] }
  0x65   :  { %3389 = vmatmul.mubr.msk.f32.gmra.mrb[28].mxu0 %vm218_vm4, %v54_v33  ;;  %3644 = vmatmul.mubr.msk.f32.gmra.mrb[28].mxu1 %vm218_vm4, %v139_v34  ;;  %v170_v33 = vld [vmem:[%s5834_s0 + $0x410] sm:$0xff] }
  0x66   :  { %3391 = vmatprep.mubr.msk.f32.mxu0 %vm3922_vm0, %v3923_v1  ;;  %3646 = vmatprep.mubr.msk.f32.mxu1 %vm3922_vm0, %v3923_v1  ;;  %v86_v34 = vld [vmem:[%s5834_s0 + $0x170] sm:$0xff] }
  0x69   :  { %3392 = vmatmul.mubr.msk.f32.gmra.mrb[30].mxu0 %vm218_vm4, %v55_v35  ;;  %3647 = vmatmul.mubr.msk.f32.gmra.mrb[30].mxu1 %vm218_vm4, %v140_v36  ;;  %v171_v35 = vld [vmem:[%s5834_s0 + $0x418] sm:$0xff] }
  0x6a   :  { %3394 = vmatprep.mubr.msk.f32.mxu0 %vm3922_vm0, %v3923_v1  ;;  %3649 = vmatprep.mubr.msk.f32.mxu1 %vm3922_vm0, %v3923_v1  ;;  %v87_v36 = vld [vmem:[%s5834_s0 + $0x178] sm:$0xff] }
  0x6d   :  { %3395 = vmatmul.mubr.msk.f32.gmra.mrb[32].mxu0 %vm218_vm4, %v56_v37  ;;  %3650 = vmatmul.mubr.msk.f32.gmra.mrb[32].mxu1 %vm218_vm4, %v141_v38  ;;  %v172_v37 = vld [vmem:[%s5834_s0 + $0x420] sm:$0xff] }
  0x6e   :  { %3397 = vmatprep.mubr.msk.f32.mxu0 %vm3922_vm0, %v3923_v1  ;;  %3652 = vmatprep.mubr.msk.f32.mxu1 %vm3922_vm0, %v3923_v1  ;;  %v88_v38 = vld [vmem:[%s5834_s0 + $0x180] sm:$0xff] }
  0x71   :  { %3398 = vmatmul.mubr.msk.f32.gmra.mrb[34].mxu0 %vm218_vm4, %v57_v39  ;;  %3653 = vmatmul.mubr.msk.f32.gmra.mrb[34].mxu1 %vm218_vm4, %v142_v40  ;;  %v173_v39 = vld [vmem:[%s5834_s0 + $0x428] sm:$0xff] }
  0x72   :  { %3400 = vmatprep.mubr.msk.f32.mxu0 %vm3922_vm0, %v3923_v1  ;;  %3655 = vmatprep.mubr.msk.f32.mxu1 %vm3922_vm0, %v3923_v1  ;;  %v89_v40 = vld [vmem:[%s5834_s0 + $0x188] sm:$0xff] }
  0x75   :  { %3401 = vmatmul.mubr.msk.f32.gmra.mrb[36].mxu0 %vm218_vm4, %v58_v41  ;;  %3656 = vmatmul.mubr.msk.f32.gmra.mrb[36].mxu1 %vm218_vm4, %v143_v42  ;;  %v174_v41 = vld [vmem:[%s5834_s0 + $0x430] sm:$0xff] }
  0x76   :  { %3403 = vmatprep.mubr.msk.f32.mxu0 %vm3922_vm0, %v3923_v1  ;;  %3658 = vmatprep.mubr.msk.f32.mxu1 %vm3922_vm0, %v3923_v1  ;;  %v90_v42 = vld [vmem:[%s5834_s0 + $0x190] sm:$0xff] }
  0x79   :  { %3404 = vmatmul.mubr.msk.f32.gmra.mrb[38].mxu0 %vm218_vm4, %v59_v43  ;;  %3659 = vmatmul.mubr.msk.f32.gmra.mrb[38].mxu1 %vm218_vm4, %v144_v44  ;;  %v175_v43 = vld [vmem:[%s5834_s0 + $0x438] sm:$0xff] }
  0x7a   :  { %3406 = vmatprep.mubr.msk.f32.mxu0 %vm3922_vm0, %v3923_v1  ;;  %3661 = vmatprep.mubr.msk.f32.mxu1 %vm3922_vm0, %v3923_v1  ;;  %v91_v44 = vld [vmem:[%s5834_s0 + $0x198] sm:$0xff] }
  0x7d   :  { %3407 = vmatmul.mubr.msk.f32.gmra.mrb[40].mxu0 %vm218_vm4, %v60_v45  ;;  %3662 = vmatmul.mubr.msk.f32.gmra.mrb[40].mxu1 %vm218_vm4, %v145_v46  ;;  %v176_v45 = vld [vmem:[%s5834_s0 + $0x440] sm:$0xff] }
  0x7e   :  { %3409 = vmatprep.mubr.msk.f32.mxu0 %vm3922_vm0, %v3923_v1  ;;  %3664 = vmatprep.mubr.msk.f32.mxu1 %vm3922_vm0, %v3923_v1  ;;  %v92_v46 = vld [vmem:[%s5834_s0 + $0x1a0] sm:$0xff] }
  0x81   :  { %3410 = vmatmul.mubr.msk.f32.gmra.mrb[42].mxu0 %vm218_vm4, %v61_v47  ;;  %3665 = vmatmul.mubr.msk.f32.gmra.mrb[42].mxu1 %vm218_vm4, %v146_v48  ;;  %v177_v47 = vld [vmem:[%s5834_s0 + $0x448] sm:$0xff]  ;;  %v4605_v48 = vld [vmem:[#allocation4] ss:$0 sm:$0xff] }
  0x82   :  { %3412 = vmatprep.mubr.msk.f32.mxu0 %vm3922_vm0, %v3923_v1  ;;  %3667 = vmatprep.mubr.msk.f32.mxu1 %vm3922_vm0, %v3923_v1 }
  0x85   :  { %3413 = vmatmul.mubr.msk.f32.gmra.mrb[44].mxu0 %vm218_vm4, %v62_v49  ;;  %3668 = vmatmul.mubr.msk.f32.gmra.mrb[44].mxu1 %vm218_vm4, %v147_v50  ;;  %v93_v49 = vld [vmem:[%s5834_s0 + $0x1a8] sm:$0xff]  ;;  %v178_v50 = vld [vmem:[%s5834_s0 + $0x450] sm:$0xff] }
  0x86   :  { %3415 = vmatprep.mubr.msk.f32.mxu0 %vm3922_vm0, %v3923_v1  ;;  %3670 = vmatprep.mubr.msk.f32.mxu1 %vm3922_vm0, %v3923_v1 }
  0x89   :  { %3416 = vmatmul.mubr.msk.f32.gmra.mrb[46].mxu0 %vm218_vm4, %v63_v51  ;;  %3671 = vmatmul.mubr.msk.f32.gmra.mrb[46].mxu1 %vm218_vm4, %v148_v52 }
  0x8a   :  { %3418 = vmatprep.mubr.msk.f32.mxu0 %vm3922_vm0, %v3923_v1  ;;  %3673 = vmatprep.mubr.msk.f32.mxu1 %vm3922_vm0, %v3923_v1 }
  0x8d   :  { %3419 = vmatmul.mubr.msk.f32.gmra.mrb[48].mxu0 %vm218_vm4, %v64_v53  ;;  %3674 = vmatmul.mubr.msk.f32.gmra.mrb[48].mxu1 %vm218_vm4, %v149_v54 }
  0x8e   :  { %3421 = vmatprep.mubr.msk.f32.mxu0 %vm3922_vm0, %v3923_v1  ;;  %3676 = vmatprep.mubr.msk.f32.mxu1 %vm3922_vm0, %v3923_v1 }
  0x91   :  { %3422 = vmatmul.mubr.msk.f32.gmra.mrb[50].mxu0 %vm218_vm4, %v65_v55  ;;  %3677 = vmatmul.mubr.msk.f32.gmra.mrb[50].mxu1 %vm218_vm4, %v150_v56 }
  0x92   :  { %3424 = vmatprep.mubr.msk.f32.mxu0 %vm3922_vm0, %v3923_v1  ;;  %3679 = vmatprep.mubr.msk.f32.mxu1 %vm3922_vm0, %v3923_v1 }
  0x95   :  { %3425 = vmatmul.mubr.msk.f32.gmra.mrb[52].mxu0 %vm218_vm4, %v66_v57  ;;  %3680 = vmatmul.mubr.msk.f32.gmra.mrb[52].mxu1 %vm218_vm4, %v151_v58  ;;  %v94_v57 = vld [vmem:[%s5834_s0 + $0x1b0] sm:$0xff] }
  0x96   :  { %3427 = vmatprep.mubr.msk.f32.mxu0 %vm3922_vm0, %v3923_v1  ;;  %3682 = vmatprep.mubr.msk.f32.mxu1 %vm3922_vm0, %v3923_v1 }
  0x99   :  { %3428 = vmatmul.mubr.msk.f32.gmra.mrb[54].mxu0 %vm218_vm4, %v67_v59  ;;  %3683 = vmatmul.mubr.msk.f32.gmra.mrb[54].mxu1 %vm218_vm4, %v152_v60  ;;  %v179_v60 = vld [vmem:[%s5834_s0 + $0x458] sm:$0xff] }
  0x9a   :  { %3430 = vmatprep.mubr.msk.f32.mxu0 %vm3922_vm0, %v3923_v1  ;;  %3685 = vmatprep.mubr.msk.f32.mxu1 %vm3922_vm0, %v3923_v1 }
  0x9d   :  { %3431 = vmatmul.mubr.msk.f32.gmra.mrb[56].mxu0 %vm218_vm4, %v68_v61  ;;  %3686 = vmatmul.mubr.msk.f32.gmra.mrb[56].mxu1 %vm218_vm4, %v153_v62 }
  0x9e   :  { %3433 = vmatprep.mubr.msk.f32.mxu0 %vm3922_vm0, %v3923_v1  ;;  %3688 = vmatprep.mubr.msk.f32.mxu1 %vm3922_vm0, %v3923_v1 }
  0xa1   :  { %3434 = vmatmul.mubr.msk.f32.gmra.mrb[58].mxu0 %vm218_vm4, %v69_v63  ;;  %3689 = vmatmul.mubr.msk.f32.gmra.mrb[58].mxu1 %vm218_vm4, %v154_v0 }
  0xa2   :  { %3436 = vmatprep.mubr.msk.f32.mxu0 %vm3922_vm0, %v3923_v1  ;;  %3691 = vmatprep.mubr.msk.f32.mxu1 %vm3922_vm0, %v3923_v1 }
  0xa5   :  { %3437 = vmatmul.mubr.msk.f32.gmra.mrb[60].mxu0 %vm218_vm4, %v70_v2  ;;  %3692 = vmatmul.mubr.msk.f32.gmra.mrb[60].mxu1 %vm218_vm4, %v155_v3 }
  0xa6   :  { %3439 = vmatprep.mubr.msk.f32.mxu0 %vm3922_vm0, %v3923_v1  ;;  %3694 = vmatprep.mubr.msk.f32.mxu1 %vm3922_vm0, %v3923_v1 }
  0xa9   :  { %3440 = vmatmul.mubr.msk.f32.gmra.mrb[62].mxu0 %vm218_vm4, %v71_v4  ;;  %3695 = vmatmul.mubr.msk.f32.gmra.mrb[62].mxu1 %vm218_vm4, %v156_v5 }
  0xaa   :  { %3442 = vmatprep.mubr.msk.f32.mxu0 %vm3922_vm0, %v3923_v1  ;;  %3697 = vmatprep.mubr.msk.f32.mxu1 %vm3922_vm0, %v3923_v1 }
  0xad   :  { %3443 = vmatmul.mubr.msk.f32.gmra.mrb[64].mxu0 %vm218_vm4, %v72_v6  ;;  %3698 = vmatmul.mubr.msk.f32.gmra.mrb[64].mxu1 %vm218_vm4, %v157_v7  ;;  %v95_v6 = vld [vmem:[%s5834_s0 + $0x1b8] sm:$0xff] }
  0xae   :  { %3445 = vmatprep.mubr.msk.f32.mxu0 %vm3922_vm0, %v3923_v1  ;;  %3700 = vmatprep.mubr.msk.f32.mxu1 %vm3922_vm0, %v3923_v1 }
  0xb1   :  { %3446 = vmatmul.mubr.msk.f32.gmra.mrb[66].mxu0 %vm218_vm4, %v73_v8  ;;  %3701 = vmatmul.mubr.msk.f32.gmra.mrb[66].mxu1 %vm218_vm4, %v158_v9  ;;  %v180_v9 = vld [vmem:[%s5834_s0 + $0x460] sm:$0xff] }
  0xb2   :  { %3448 = vmatprep.mubr.msk.f32.mxu0 %vm3922_vm0, %v3923_v1  ;;  %3703 = vmatprep.mubr.msk.f32.mxu1 %vm3922_vm0, %v3923_v1 }
  0xb5   :  { %3449 = vmatmul.mubr.msk.f32.gmra.mrb[68].mxu0 %vm218_vm4, %v74_v10  ;;  %3704 = vmatmul.mubr.msk.f32.gmra.mrb[68].mxu1 %vm218_vm4, %v159_v11 }
  0xb6   :  { %3451 = vmatprep.mubr.msk.f32.mxu0 %vm3922_vm0, %v3923_v1  ;;  %3706 = vmatprep.mubr.msk.f32.mxu1 %vm3922_vm0, %v3923_v1 }
  0xb9   :  { %3452 = vmatmul.mubr.msk.f32.gmra.mrb[70].mxu0 %vm218_vm4, %v75_v12  ;;  %3707 = vmatmul.mubr.msk.f32.gmra.mrb[70].mxu1 %vm218_vm4, %v160_v13 }
  0xba   :  { %3454 = vmatprep.mubr.msk.f32.mxu0 %vm3922_vm0, %v3923_v1  ;;  %3709 = vmatprep.mubr.msk.f32.mxu1 %vm3922_vm0, %v3923_v1 }
  0xbd   :  { %3455 = vmatmul.mubr.msk.f32.gmra.mrb[72].mxu0 %vm218_vm4, %v76_v14  ;;  %3710 = vmatmul.mubr.msk.f32.gmra.mrb[72].mxu1 %vm218_vm4, %v161_v15 }
  0xbe   :  { %3457 = vmatprep.mubr.msk.f32.mxu0 %vm3922_vm0, %v3923_v1  ;;  %3712 = vmatprep.mubr.msk.f32.mxu1 %vm3922_vm0, %v3923_v1 }
  0xc1   :  { %3458 = vmatmul.mubr.msk.f32.gmra.mrb[74].mxu0 %vm218_vm4, %v77_v16  ;;  %3713 = vmatmul.mubr.msk.f32.gmra.mrb[74].mxu1 %vm218_vm4, %v162_v17 }
  0xc2   :  { %3460 = vmatprep.mubr.msk.f32.mxu0 %vm3922_vm0, %v3923_v1  ;;  %3715 = vmatprep.mubr.msk.f32.mxu1 %vm3922_vm0, %v3923_v1 }
  0xc5   :  { %3461 = vmatmul.mubr.msk.f32.gmra.mrb[76].mxu0 %vm218_vm4, %v78_v18  ;;  %3716 = vmatmul.mubr.msk.f32.gmra.mrb[76].mxu1 %vm218_vm4, %v163_v19  ;;  %v96_v18 = vld [vmem:[%s5834_s0 + $0x1c0] sm:$0xff] }
  0xc6   :  { %3463 = vmatprep.mubr.msk.f32.mxu0 %vm3922_vm0, %v3923_v1  ;;  %3718 = vmatprep.mubr.msk.f32.mxu1 %vm3922_vm0, %v3923_v1 }
  0xc9   :  { %3464 = vmatmul.mubr.msk.f32.gmra.mrb[78].mxu0 %vm218_vm4, %v79_v20  ;;  %3719 = vmatmul.mubr.msk.f32.gmra.mrb[78].mxu1 %vm218_vm4, %v164_v21  ;;  %v181_v21 = vld [vmem:[%s5834_s0 + $0x468] sm:$0xff] }
  0xca   :  { %3466 = vmatprep.mubr.msk.f32.mxu0 %vm3922_vm0, %v3923_v1  ;;  %3721 = vmatprep.mubr.msk.f32.mxu1 %vm3922_vm0, %v3923_v1 }
  0xcd   :  { %3467 = vmatmul.mubr.msk.f32.gmra.mrb[80].mxu0 %vm218_vm4, %v80_v22  ;;  %3722 = vmatmul.mubr.msk.f32.gmra.mrb[80].mxu1 %vm218_vm4, %v165_v23 }
  0xce   :  { %3469 = vmatprep.mubr.msk.f32.mxu0 %vm3922_vm0, %v3923_v1  ;;  %3724 = vmatprep.mubr.msk.f32.mxu1 %vm3922_vm0, %v3923_v1 }
  0xd1   :  { %3470 = vmatmul.mubr.msk.f32.gmra.mrb[82].mxu0 %vm218_vm4, %v81_v24  ;;  %3725 = vmatmul.mubr.msk.f32.gmra.mrb[82].mxu1 %vm218_vm4, %v166_v25 }
  0xd2   :  { %3472 = vmatprep.mubr.msk.f32.mxu0 %vm3922_vm0, %v3923_v1  ;;  %3727 = vmatprep.mubr.msk.f32.mxu1 %vm3922_vm0, %v3923_v1 }
  0xd5   :  { %3473 = vmatmul.mubr.msk.f32.gmra.mrb[84].mxu0 %vm218_vm4, %v82_v26  ;;  %3728 = vmatmul.mubr.msk.f32.gmra.mrb[84].mxu1 %vm218_vm4, %v167_v27 }
  0xd6   :  { %3475 = vmatprep.mubr.msk.f32.mxu0 %vm3922_vm0, %v3923_v1  ;;  %3730 = vmatprep.mubr.msk.f32.mxu1 %vm3922_vm0, %v3923_v1 }
  0xd9   :  { %3476 = vmatmul.mubr.msk.f32.gmra.mrb[86].mxu0 %vm218_vm4, %v83_v28  ;;  %3731 = vmatmul.mubr.msk.f32.gmra.mrb[86].mxu1 %vm218_vm4, %v168_v29 }
  0xda   :  { %3478 = vmatprep.mubr.msk.f32.mxu0 %vm3922_vm0, %v3923_v1  ;;  %3733 = vmatprep.mubr.msk.f32.mxu1 %vm3922_vm0, %v3923_v1 }
  0xdd   :  { %3479 = vmatmul.mubr.msk.f32.gmra.mrb[88].mxu0 %vm218_vm4, %v84_v30  ;;  %3734 = vmatmul.mubr.msk.f32.gmra.mrb[88].mxu1 %vm218_vm4, %v169_v31  ;;  %v97_v30 = vld [vmem:[%s5834_s0 + $0x1c8] sm:$0xff] }
  0xde   :  { %3481 = vmatprep.mubr.msk.f32.mxu0 %vm3922_vm0, %v3923_v1  ;;  %3736 = vmatprep.mubr.msk.f32.mxu1 %vm3922_vm0, %v3923_v1 }
  0xe1   :  { %3482 = vmatmul.mubr.msk.f32.gmra.mrb[90].mxu0 %vm218_vm4, %v85_v32  ;;  %3737 = vmatmul.mubr.msk.f32.gmra.mrb[90].mxu1 %vm218_vm4, %v170_v33  ;;  %v182_v33 = vld [vmem:[%s5834_s0 + $0x470] sm:$0xff] }
  0xe2   :  { %3484 = vmatprep.mubr.msk.f32.mxu0 %vm3922_vm0, %v3923_v1  ;;  %3739 = vmatprep.mubr.msk.f32.mxu1 %vm3922_vm0, %v3923_v1 }
  0xe5   :  { %3485 = vmatmul.mubr.msk.f32.gmra.mrb[92].mxu0 %vm218_vm4, %v86_v34  ;;  %3740 = vmatmul.mubr.msk.f32.gmra.mrb[92].mxu1 %vm218_vm4, %v171_v35 }
  0xe6   :  { %3487 = vmatprep.mubr.msk.f32.mxu0 %vm3922_vm0, %v3923_v1  ;;  %3742 = vmatprep.mubr.msk.f32.mxu1 %vm3922_vm0, %v3923_v1 }
  0xe9   :  { %3488 = vmatmul.mubr.msk.f32.gmra.mrb[94].mxu0 %vm218_vm4, %v87_v36  ;;  %3743 = vmatmul.mubr.msk.f32.gmra.mrb[94].mxu1 %vm218_vm4, %v172_v37 }
  0xea   :  { %3490 = vmatprep.mubr.msk.f32.mxu0 %vm3922_vm0, %v3923_v1  ;;  %3745 = vmatprep.mubr.msk.f32.mxu1 %vm3922_vm0, %v3923_v1 }
  0xed   :  { %3491 = vmatmul.mubr.msk.f32.gmra.mrb[96].mxu0 %vm218_vm4, %v88_v38  ;;  %3746 = vmatmul.mubr.msk.f32.gmra.mrb[96].mxu1 %vm218_vm4, %v173_v39 }
  0xee   :  { %3493 = vmatprep.mubr.msk.f32.mxu0 %vm3922_vm0, %v3923_v1  ;;  %3748 = vmatprep.mubr.msk.f32.mxu1 %vm3922_vm0, %v3923_v1 }
  0xf1   :  { %3494 = vmatmul.mubr.msk.f32.gmra.mrb[98].mxu0 %vm218_vm4, %v89_v40  ;;  %3749 = vmatmul.mubr.msk.f32.gmra.mrb[98].mxu1 %vm218_vm4, %v174_v41 }
  0xf2   :  { %3496 = vmatprep.mubr.msk.f32.mxu0 %vm3922_vm0, %v3923_v1  ;;  %3751 = vmatprep.mubr.msk.f32.mxu1 %vm3922_vm0, %v3923_v1 }
  0xf5   :  { %3497 = vmatmul.mubr.msk.f32.gmra.mrb[100].mxu0 %vm218_vm4, %v90_v42  ;;  %3752 = vmatmul.mubr.msk.f32.gmra.mrb[100].mxu1 %vm218_vm4, %v175_v43  ;;  %v98_v42 = vld [vmem:[%s5834_s0 + $0x1d0] sm:$0xff] }
  0xf6   :  { %3499 = vmatprep.mubr.msk.f32.mxu0 %vm3922_vm0, %v3923_v1  ;;  %3754 = vmatprep.mubr.msk.f32.mxu1 %vm3922_vm0, %v3923_v1 }
  0xf9   :  { %3500 = vmatmul.mubr.msk.f32.gmra.mrb[102].mxu0 %vm218_vm4, %v91_v44  ;;  %3755 = vmatmul.mubr.msk.f32.gmra.mrb[102].mxu1 %vm218_vm4, %v176_v45  ;;  %v183_v45 = vld [vmem:[%s5834_s0 + $0x478] sm:$0xff] }
  0xfa   :  { %3502 = vmatprep.mubr.msk.f32.mxu0 %vm3922_vm0, %v3923_v1  ;;  %3757 = vmatprep.mubr.msk.f32.mxu1 %vm3922_vm0, %v3923_v1 }
  0xfd   :  { %3503 = vmatmul.mubr.msk.f32.gmra.mrb[104].mxu0 %vm218_vm4, %v92_v46  ;;  %3758 = vmatmul.mubr.msk.f32.gmra.mrb[104].mxu1 %vm218_vm4, %v177_v47 }
  0xfe   :  { %3505 = vmatprep.mubr.msk.f32.mxu0 %vm3922_vm0, %v3923_v1  ;;  %3760 = vmatprep.mubr.msk.f32.mxu1 %vm3922_vm0, %v3923_v1 }
 0x100   :  { %v796_v51 = vpop.f32.mrb[0].mxu0  ;;  %v1221_v52 = vpop.f32.mrb[0].mxu1 }
 0x101   :  { %v797_v53 = vadd.f32 %v4605_v48, %v796_v51  ;;  %v3348_v54 = vpop.f32.mrb[1].mxu0  ;;  %3506 = vmatmul.mubr.msk.f32.gmra.mrb[106].mxu0 %vm218_vm4, %v93_v49  ;;  %v1222_v55 = vadd.f32 %v4605_v48, %v1221_v52  ;;  %v3603_v56 = vpop.f32.mrb[1].mxu1  ;;  %3761 = vmatmul.mubr.msk.f32.gmra.mrb[106].mxu1 %vm218_vm4, %v178_v50 }
 0x102   :  { %3508 = vmatprep.mubr.msk.f32.mxu0 %vm3922_vm0, %v3923_v1  ;;  %3763 = vmatprep.mubr.msk.f32.mxu1 %vm3922_vm0, %v3923_v1 }
 0x103   :  { %v1640_v58 = vmax.f32 %v797_v53, 0.0  ;;  %v1725_v59 = vmax.f32 %v1222_v55, 0.0  ;;  %v99_v55 = vld [vmem:[%s5834_s0 + $0x1d8] sm:$0xff] }
 0x104   :  { %v801_v61 = vpop.f32.mrb[2].mxu0  ;;  %v1226_v62 = vpop.f32.mrb[2].mxu1 }
 0x105   :  { %v3002_v63 = vpack.c.bf16 %v1640_v58, %v1640_v58  ;;  %v3087_v0 = vpack.c.bf16 %v1725_v59, %v1725_v59  ;;  %v802_v2 = vadd.f32 %v4605_v48, %v801_v61  ;;  %v3351_v3 = vpop.f32.mrb[3].mxu0  ;;  %3509 = vmatmul.mubr.msk.f32.gmra.mrb[108].mxu0 %vm218_vm4, %v94_v57  ;;  %v1227_v4 = vadd.f32 %v4605_v48, %v1226_v62  ;;  %v3606_v5 = vpop.f32.mrb[3].mxu1  ;;  %v184_v58 = vld [vmem:[%s5834_s0 + $0x480] sm:$0xff] }
 0x106   :  { %3511 = vmatprep.mubr.msk.f32.mxu0 %vm3922_vm0, %v3923_v1  ;;  %3764 = vmatmul.mubr.msk.f32.gmra.mrb[108].mxu1 %vm218_vm4, %v179_v60 }
 0x107   :  { %2487 = vst.msk [vmem:[%s5837_s3] sm:$0xf] %vm2486_vm5, %v3002_v63  ;;  %2572 = vst.msk [vmem:[%s5837_s3 + $0x154] sm:$0xf] %vm2486_vm5, %v3087_v0  ;;  %v1641_v7 = vmax.f32 %v802_v2, 0.0  ;;  %v1726_v8 = vmax.f32 %v1227_v4, 0.0  ;;  %3766 = vmatprep.mubr.msk.f32.mxu1 %vm3922_vm0, %v3923_v1 }
 0x108   :  { %v806_v10 = vpop.f32.mrb[4].mxu0  ;;  %v1231_v11 = vpop.f32.mrb[4].mxu1  ;;  %v100_v4 = vld [vmem:[%s5834_s0 + $0x1e0] sm:$0xff] }
 0x109   :  { %v3003_v12 = vpack.c.bf16 %v1641_v7, %v1641_v7  ;;  %v3088_v13 = vpack.c.bf16 %v1726_v8, %v1726_v8  ;;  %v807_v14 = vadd.f32 %v4605_v48, %v806_v10  ;;  %v3354_v15 = vpop.f32.mrb[5].mxu0  ;;  %3512 = vmatmul.mubr.msk.f32.gmra.mrb[110].mxu0 %vm218_vm4, %v95_v6  ;;  %v1232_v16 = vadd.f32 %v4605_v48, %v1231_v11  ;;  %v3609_v17 = vpop.f32.mrb[5].mxu1  ;;  %v185_v7 = vld [vmem:[%s5834_s0 + $0x488] sm:$0xff] }
 0x10a   :  { %3514 = vmatprep.mubr.msk.f32.mxu0 %vm3922_vm0, %v3923_v1  ;;  %3767 = vmatmul.mubr.msk.f32.gmra.mrb[110].mxu1 %vm218_vm4, %v180_v9 }
 0x10b   :  { %2488 = vst.msk [vmem:[%s5837_s3 + $0x4] sm:$0xf] %vm2486_vm5, %v3003_v12  ;;  %2573 = vst.msk [vmem:[%s5837_s3 + $0x158] sm:$0xf] %vm2486_vm5, %v3088_v13  ;;  %v1642_v19 = vmax.f32 %v807_v14, 0.0  ;;  %v1727_v20 = vmax.f32 %v1232_v16, 0.0  ;;  %3769 = vmatprep.mubr.msk.f32.mxu1 %vm3922_vm0, %v3923_v1 }
 0x10c   :  { %v811_v22 = vpop.f32.mrb[6].mxu0  ;;  %v1236_v23 = vpop.f32.mrb[6].mxu1  ;;  %v101_v16 = vld [vmem:[%s5834_s0 + $0x1e8] sm:$0xff] }
 0x10d   :  { %v3004_v24 = vpack.c.bf16 %v1642_v19, %v1642_v19  ;;  %v3089_v25 = vpack.c.bf16 %v1727_v20, %v1727_v20  ;;  %v812_v26 = vadd.f32 %v4605_v48, %v811_v22  ;;  %v3357_v27 = vpop.f32.mrb[7].mxu0  ;;  %3515 = vmatmul.mubr.msk.f32.gmra.mrb[112].mxu0 %vm218_vm4, %v96_v18  ;;  %v1237_v28 = vadd.f32 %v4605_v48, %v1236_v23  ;;  %v3612_v29 = vpop.f32.mrb[7].mxu1  ;;  %v186_v19 = vld [vmem:[%s5834_s0 + $0x490] sm:$0xff] }
 0x10e   :  { %3517 = vmatprep.mubr.msk.f32.mxu0 %vm3922_vm0, %v3923_v1  ;;  %3770 = vmatmul.mubr.msk.f32.gmra.mrb[112].mxu1 %vm218_vm4, %v181_v21 }
 0x10f   :  { %2489 = vst.msk [vmem:[%s5837_s3 + $0x8] sm:$0xf] %vm2486_vm5, %v3004_v24  ;;  %2574 = vst.msk [vmem:[%s5837_s3 + $0x15c] sm:$0xf] %vm2486_vm5, %v3089_v25  ;;  %v1643_v31 = vmax.f32 %v812_v26, 0.0  ;;  %v1728_v32 = vmax.f32 %v1237_v28, 0.0  ;;  %3772 = vmatprep.mubr.msk.f32.mxu1 %vm3922_vm0, %v3923_v1 }
 0x110   :  { %v816_v34 = vpop.f32.mrb[8].mxu0  ;;  %v1241_v35 = vpop.f32.mrb[8].mxu1  ;;  %v102_v28 = vld [vmem:[%s5834_s0 + $0x1f0] sm:$0xff] }
 0x111   :  { %v3005_v36 = vpack.c.bf16 %v1643_v31, %v1643_v31  ;;  %v3090_v37 = vpack.c.bf16 %v1728_v32, %v1728_v32  ;;  %v817_v38 = vadd.f32 %v4605_v48, %v816_v34  ;;  %v3360_v39 = vpop.f32.mrb[9].mxu0  ;;  %3518 = vmatmul.mubr.msk.f32.gmra.mrb[114].mxu0 %vm218_vm4, %v97_v30  ;;  %v1242_v40 = vadd.f32 %v4605_v48, %v1241_v35  ;;  %v3615_v41 = vpop.f32.mrb[9].mxu1  ;;  %v187_v31 = vld [vmem:[%s5834_s0 + $0x498] sm:$0xff] }
 0x112   :  { %3520 = vmatprep.mubr.msk.f32.mxu0 %vm3922_vm0, %v3923_v1  ;;  %3773 = vmatmul.mubr.msk.f32.gmra.mrb[114].mxu1 %vm218_vm4, %v182_v33 }
 0x113   :  { %2490 = vst.msk [vmem:[%s5837_s3 + $0xc] sm:$0xf] %vm2486_vm5, %v3005_v36  ;;  %2575 = vst.msk [vmem:[%s5837_s3 + $0x160] sm:$0xf] %vm2486_vm5, %v3090_v37  ;;  %v1644_v43 = vmax.f32 %v817_v38, 0.0  ;;  %v1729_v44 = vmax.f32 %v1242_v40, 0.0  ;;  %3775 = vmatprep.mubr.msk.f32.mxu1 %vm3922_vm0, %v3923_v1 }
 0x114   :  { %v821_v46 = vpop.f32.mrb[10].mxu0  ;;  %v1246_v47 = vpop.f32.mrb[10].mxu1  ;;  %v103_v40 = vld [vmem:[%s5834_s0 + $0x1f8] sm:$0xff] }
 0x115   :  { %v3006_v49 = vpack.c.bf16 %v1644_v43, %v1644_v43  ;;  %v3091_v50 = vpack.c.bf16 %v1729_v44, %v1729_v44  ;;  %v822_v51 = vadd.f32 %v4605_v48, %v821_v46  ;;  %v3363_v52 = vpop.f32.mrb[11].mxu0  ;;  %3521 = vmatmul.mubr.msk.f32.gmra.mrb[116].mxu0 %vm218_vm4, %v98_v42  ;;  %v1247_v53 = vadd.f32 %v4605_v48, %v1246_v47  ;;  %v3618_v54 = vpop.f32.mrb[11].mxu1  ;;  %v188_v43 = vld [vmem:[%s5834_s0 + $0x4a0] sm:$0xff] }
 0x116   :  { %3523 = vmatprep.mubr.msk.f32.mxu0 %vm3922_vm0, %v3923_v1  ;;  %3776 = vmatmul.mubr.msk.f32.gmra.mrb[116].mxu1 %vm218_vm4, %v183_v45 }
 0x117   :  { %2491 = vst.msk [vmem:[%s5837_s3 + $0x10] sm:$0xf] %vm2486_vm5, %v3006_v49  ;;  %2576 = vst.msk [vmem:[%s5837_s3 + $0x164] sm:$0xf] %vm2486_vm5, %v3091_v50  ;;  %v1645_v56 = vmax.f32 %v822_v51, 0.0  ;;  %v1730_v57 = vmax.f32 %v1247_v53, 0.0  ;;  %3778 = vmatprep.mubr.msk.f32.mxu1 %vm3922_vm0, %v3923_v1 }
 0x118   :  { %v826_v59 = vpop.f32.mrb[12].mxu0  ;;  %v1251_v60 = vpop.f32.mrb[12].mxu1  ;;  %v104_v53 = vld [vmem:[%s5834_s0 + $0x200] sm:$0xff] }
 0x119   :  { %v3007_v61 = vpack.c.bf16 %v1645_v56, %v1645_v56  ;;  %v3092_v62 = vpack.c.bf16 %v1730_v57, %v1730_v57  ;;  %v827_v63 = vadd.f32 %v4605_v48, %v826_v59  ;;  %v3366_v0 = vpop.f32.mrb[13].mxu0  ;;  %3524 = vmatmul.mubr.msk.f32.gmra.mrb[118].mxu0 %vm218_vm4, %v99_v55  ;;  %v1252_v2 = vadd.f32 %v4605_v48, %v1251_v60  ;;  %v3621_v3 = vpop.f32.mrb[13].mxu1  ;;  %v189_v56 = vld [vmem:[%s5834_s0 + $0x4a8] sm:$0xff] }
 0x11a   :  { %3526 = vmatprep.mubr.msk.f32.mxu0 %vm3922_vm0, %v3923_v1  ;;  %3779 = vmatmul.mubr.msk.f32.gmra.mrb[118].mxu1 %vm218_vm4, %v184_v58 }
 0x11b   :  { %2492 = vst.msk [vmem:[%s5837_s3 + $0x14] sm:$0xf] %vm2486_vm5, %v3007_v61  ;;  %2577 = vst.msk [vmem:[%s5837_s3 + $0x168] sm:$0xf] %vm2486_vm5, %v3092_v62  ;;  %v1646_v5 = vmax.f32 %v827_v63, 0.0  ;;  %v1731_v6 = vmax.f32 %v1252_v2, 0.0  ;;  %3781 = vmatprep.mubr.msk.f32.mxu1 %vm3922_vm0, %v3923_v1 }
 0x11c   :  { %v831_v8 = vpop.f32.mrb[14].mxu0  ;;  %v1256_v9 = vpop.f32.mrb[14].mxu1  ;;  %v105_v2 = vld [vmem:[%s5834_s0 + $0x208] sm:$0xff] }
 0x11d   :  { %v3008_v10 = vpack.c.bf16 %v1646_v5, %v1646_v5  ;;  %v3093_v11 = vpack.c.bf16 %v1731_v6, %v1731_v6  ;;  %v832_v12 = vadd.f32 %v4605_v48, %v831_v8  ;;  %v3369_v13 = vpop.f32.mrb[15].mxu0  ;;  %3527 = vmatmul.mubr.msk.f32.gmra.mrb[120].mxu0 %vm218_vm4, %v100_v4  ;;  %v1257_v14 = vadd.f32 %v4605_v48, %v1256_v9  ;;  %v3624_v15 = vpop.f32.mrb[15].mxu1  ;;  %v190_v5 = vld [vmem:[%s5834_s0 + $0x4b0] sm:$0xff] }
 0x11e   :  { %3529 = vmatprep.mubr.msk.f32.mxu0 %vm3922_vm0, %v3923_v1  ;;  %3782 = vmatmul.mubr.msk.f32.gmra.mrb[120].mxu1 %vm218_vm4, %v185_v7 }
 0x11f   :  { %2493 = vst.msk [vmem:[%s5837_s3 + $0x18] sm:$0xf] %vm2486_vm5, %v3008_v10  ;;  %2578 = vst.msk [vmem:[%s5837_s3 + $0x16c] sm:$0xf] %vm2486_vm5, %v3093_v11  ;;  %v1647_v17 = vmax.f32 %v832_v12, 0.0  ;;  %v1732_v18 = vmax.f32 %v1257_v14, 0.0  ;;  %3784 = vmatprep.mubr.msk.f32.mxu1 %vm3922_vm0, %v3923_v1 }
 0x120   :  { %v836_v20 = vpop.f32.mrb[16].mxu0  ;;  %v1261_v21 = vpop.f32.mrb[16].mxu1  ;;  %v106_v14 = vld [vmem:[%s5834_s0 + $0x210] sm:$0xff] }
 0x121   :  { %v3009_v22 = vpack.c.bf16 %v1647_v17, %v1647_v17  ;;  %v3094_v23 = vpack.c.bf16 %v1732_v18, %v1732_v18  ;;  %v837_v24 = vadd.f32 %v4605_v48, %v836_v20  ;;  %v3372_v25 = vpop.f32.mrb[17].mxu0  ;;  %3530 = vmatmul.mubr.msk.f32.gmra.mrb[122].mxu0 %vm218_vm4, %v101_v16  ;;  %v1262_v26 = vadd.f32 %v4605_v48, %v1261_v21  ;;  %v3627_v27 = vpop.f32.mrb[17].mxu1  ;;  %v191_v17 = vld [vmem:[%s5834_s0 + $0x4b8] sm:$0xff] }
 0x122   :  { %3532 = vmatprep.mubr.msk.f32.mxu0 %vm3922_vm0, %v3923_v1  ;;  %3785 = vmatmul.mubr.msk.f32.gmra.mrb[122].mxu1 %vm218_vm4, %v186_v19 }
 0x123   :  { %2494 = vst.msk [vmem:[%s5837_s3 + $0x1c] sm:$0xf] %vm2486_vm5, %v3009_v22  ;;  %2579 = vst.msk [vmem:[%s5837_s3 + $0x170] sm:$0xf] %vm2486_vm5, %v3094_v23  ;;  %v1648_v29 = vmax.f32 %v837_v24, 0.0  ;;  %v1733_v30 = vmax.f32 %v1262_v26, 0.0  ;;  %3787 = vmatprep.mubr.msk.f32.mxu1 %vm3922_vm0, %v3923_v1 }
 0x124   :  { %v841_v32 = vpop.f32.mrb[18].mxu0  ;;  %v1266_v33 = vpop.f32.mrb[18].mxu1  ;;  %v107_v26 = vld [vmem:[%s5834_s0 + $0x218] sm:$0xff] }
 0x125   :  { %v3010_v34 = vpack.c.bf16 %v1648_v29, %v1648_v29  ;;  %v3095_v35 = vpack.c.bf16 %v1733_v30, %v1733_v30  ;;  %v842_v36 = vadd.f32 %v4605_v48, %v841_v32  ;;  %v3375_v37 = vpop.f32.mrb[19].mxu0  ;;  %3533 = vmatmul.mubr.msk.f32.gmra.mrb[124].mxu0 %vm218_vm4, %v102_v28  ;;  %v1267_v38 = vadd.f32 %v4605_v48, %v1266_v33  ;;  %v3630_v39 = vpop.f32.mrb[19].mxu1  ;;  %v192_v29 = vld [vmem:[%s5834_s0 + $0x4c0] sm:$0xff] }
 0x126   :  { %3535 = vmatprep.mubr.msk.f32.mxu0 %vm3922_vm0, %v3923_v1  ;;  %3788 = vmatmul.mubr.msk.f32.gmra.mrb[124].mxu1 %vm218_vm4, %v187_v31 }
 0x127   :  { %2495 = vst.msk [vmem:[%s5837_s3 + $0x20] sm:$0xf] %vm2486_vm5, %v3010_v34  ;;  %2580 = vst.msk [vmem:[%s5837_s3 + $0x174] sm:$0xf] %vm2486_vm5, %v3095_v35  ;;  %v1649_v41 = vmax.f32 %v842_v36, 0.0  ;;  %v1734_v42 = vmax.f32 %v1267_v38, 0.0  ;;  %3790 = vmatprep.mubr.msk.f32.mxu1 %vm3922_vm0, %v3923_v1 }
 0x128   :  { %v846_v44 = vpop.f32.mrb[20].mxu0  ;;  %v1271_v45 = vpop.f32.mrb[20].mxu1  ;;  %v108_v38 = vld [vmem:[%s5834_s0 + $0x220] sm:$0xff] }
 0x129   :  { %v3011_v46 = vpack.c.bf16 %v1649_v41, %v1649_v41  ;;  %v3096_v47 = vpack.c.bf16 %v1734_v42, %v1734_v42  ;;  %v847_v49 = vadd.f32 %v4605_v48, %v846_v44  ;;  %v3378_v50 = vpop.f32.mrb[21].mxu0  ;;  %3536 = vmatmul.mubr.msk.f32.gmra.mrb[126].mxu0 %vm218_vm4, %v103_v40  ;;  %v1272_v51 = vadd.f32 %v4605_v48, %v1271_v45  ;;  %v3633_v52 = vpop.f32.mrb[21].mxu1  ;;  %v193_v41 = vld [vmem:[%s5834_s0 + $0x4c8] sm:$0xff] }
 0x12a   :  { %3538 = vmatprep.mubr.msk.f32.mxu0 %vm3922_vm0, %v3923_v1  ;;  %3791 = vmatmul.mubr.msk.f32.gmra.mrb[126].mxu1 %vm218_vm4, %v188_v43 }
 0x12b   :  { %2496 = vst.msk [vmem:[%s5837_s3 + $0x24] sm:$0xf] %vm2486_vm5, %v3011_v46  ;;  %2581 = vst.msk [vmem:[%s5837_s3 + $0x178] sm:$0xf] %vm2486_vm5, %v3096_v47  ;;  %v1650_v54 = vmax.f32 %v847_v49, 0.0  ;;  %v1735_v55 = vmax.f32 %v1272_v51, 0.0  ;;  %3793 = vmatprep.mubr.msk.f32.mxu1 %vm3922_vm0, %v3923_v1 }
 0x12c   :  { %v851_v57 = vpop.f32.mrb[22].mxu0  ;;  %v1276_v58 = vpop.f32.mrb[22].mxu1  ;;  %v109_v51 = vld [vmem:[%s5834_s0 + $0x228] sm:$0xff] }
 0x12d   :  { %v3012_v59 = vpack.c.bf16 %v1650_v54, %v1650_v54  ;;  %v3097_v60 = vpack.c.bf16 %v1735_v55, %v1735_v55  ;;  %v852_v61 = vadd.f32 %v4605_v48, %v851_v57  ;;  %v3381_v62 = vpop.f32.mrb[23].mxu0  ;;  %3539 = vmatmul.mubr.msk.f32.gmra.mrb[128].mxu0 %vm218_vm4, %v104_v53  ;;  %v1277_v63 = vadd.f32 %v4605_v48, %v1276_v58  ;;  %v3636_v0 = vpop.f32.mrb[23].mxu1  ;;  %v194_v54 = vld [vmem:[%s5834_s0 + $0x4d0] sm:$0xff] }
 0x12e   :  { %3541 = vmatprep.mubr.msk.f32.mxu0 %vm3922_vm0, %v3923_v1  ;;  %3794 = vmatmul.mubr.msk.f32.gmra.mrb[128].mxu1 %vm218_vm4, %v189_v56 }
 0x12f   :  { %2497 = vst.msk [vmem:[%s5837_s3 + $0x28] sm:$0xf] %vm2486_vm5, %v3012_v59  ;;  %2582 = vst.msk [vmem:[%s5837_s3 + $0x17c] sm:$0xf] %vm2486_vm5, %v3097_v60  ;;  %v1651_v3 = vmax.f32 %v852_v61, 0.0  ;;  %v1736_v4 = vmax.f32 %v1277_v63, 0.0  ;;  %3796 = vmatprep.mubr.msk.f32.mxu1 %vm3922_vm0, %v3923_v1 }
 0x130   :  { %v856_v6 = vpop.f32.mrb[24].mxu0  ;;  %v1281_v7 = vpop.f32.mrb[24].mxu1  ;;  %v110_v63 = vld [vmem:[%s5834_s0 + $0x230] sm:$0xff] }
 0x131   :  { %v3013_v8 = vpack.c.bf16 %v1651_v3, %v1651_v3  ;;  %v3098_v9 = vpack.c.bf16 %v1736_v4, %v1736_v4  ;;  %v857_v10 = vadd.f32 %v4605_v48, %v856_v6  ;;  %v3384_v11 = vpop.f32.mrb[25].mxu0  ;;  %3542 = vmatmul.mubr.msk.f32.gmra.mrb[130].mxu0 %vm218_vm4, %v105_v2  ;;  %v1282_v12 = vadd.f32 %v4605_v48, %v1281_v7  ;;  %v3639_v13 = vpop.f32.mrb[25].mxu1  ;;  %v195_v3 = vld [vmem:[%s5834_s0 + $0x4d8] sm:$0xff] }
 0x132   :  { %3544 = vmatprep.mubr.msk.f32.mxu0 %vm3922_vm0, %v3923_v1  ;;  %3797 = vmatmul.mubr.msk.f32.gmra.mrb[130].mxu1 %vm218_vm4, %v190_v5 }
 0x133   :  { %2498 = vst.msk [vmem:[%s5837_s3 + $0x2c] sm:$0xf] %vm2486_vm5, %v3013_v8  ;;  %2583 = vst.msk [vmem:[%s5837_s3 + $0x180] sm:$0xf] %vm2486_vm5, %v3098_v9  ;;  %v1652_v15 = vmax.f32 %v857_v10, 0.0  ;;  %v1737_v16 = vmax.f32 %v1282_v12, 0.0  ;;  %3799 = vmatprep.mubr.msk.f32.mxu1 %vm3922_vm0, %v3923_v1 }
 0x134   :  { %v861_v18 = vpop.f32.mrb[26].mxu0  ;;  %v1286_v19 = vpop.f32.mrb[26].mxu1  ;;  %v111_v12 = vld [vmem:[%s5834_s0 + $0x238] sm:$0xff] }
 0x135   :  { %v3014_v20 = vpack.c.bf16 %v1652_v15, %v1652_v15  ;;  %v3099_v21 = vpack.c.bf16 %v1737_v16, %v1737_v16  ;;  %v862_v22 = vadd.f32 %v4605_v48, %v861_v18  ;;  %v3387_v23 = vpop.f32.mrb[27].mxu0  ;;  %3545 = vmatmul.mubr.msk.f32.gmra.mrb[132].mxu0 %vm218_vm4, %v106_v14  ;;  %v1287_v24 = vadd.f32 %v4605_v48, %v1286_v19  ;;  %v3642_v25 = vpop.f32.mrb[27].mxu1  ;;  %v196_v15 = vld [vmem:[%s5834_s0 + $0x4e0] sm:$0xff] }
 0x136   :  { %3547 = vmatprep.mubr.msk.f32.mxu0 %vm3922_vm0, %v3923_v1  ;;  %3800 = vmatmul.mubr.msk.f32.gmra.mrb[132].mxu1 %vm218_vm4, %v191_v17 }
 0x137   :  { %2499 = vst.msk [vmem:[%s5837_s3 + $0x30] sm:$0xf] %vm2486_vm5, %v3014_v20  ;;  %2584 = vst.msk [vmem:[%s5837_s3 + $0x184] sm:$0xf] %vm2486_vm5, %v3099_v21  ;;  %v1653_v27 = vmax.f32 %v862_v22, 0.0  ;;  %v1738_v28 = vmax.f32 %v1287_v24, 0.0  ;;  %3802 = vmatprep.mubr.msk.f32.mxu1 %vm3922_vm0, %v3923_v1 }
 0x138   :  { %v866_v30 = vpop.f32.mrb[28].mxu0  ;;  %v1291_v31 = vpop.f32.mrb[28].mxu1  ;;  %v112_v24 = vld [vmem:[%s5834_s0 + $0x240] sm:$0xff] }
 0x139   :  { %v3015_v32 = vpack.c.bf16 %v1653_v27, %v1653_v27  ;;  %v3100_v33 = vpack.c.bf16 %v1738_v28, %v1738_v28  ;;  %v867_v34 = vadd.f32 %v4605_v48, %v866_v30  ;;  %v3390_v35 = vpop.f32.mrb[29].mxu0  ;;  %3548 = vmatmul.mubr.msk.f32.gmra.mrb[134].mxu0 %vm218_vm4, %v107_v26  ;;  %v1292_v36 = vadd.f32 %v4605_v48, %v1291_v31  ;;  %v3645_v37 = vpop.f32.mrb[29].mxu1  ;;  %v197_v27 = vld [vmem:[%s5834_s0 + $0x4e8] sm:$0xff] }
 0x13a   :  { %3550 = vmatprep.mubr.msk.f32.mxu0 %vm3922_vm0, %v3923_v1  ;;  %3803 = vmatmul.mubr.msk.f32.gmra.mrb[134].mxu1 %vm218_vm4, %v192_v29 }
 0x13b   :  { %2500 = vst.msk [vmem:[%s5837_s3 + $0x34] sm:$0xf] %vm2486_vm5, %v3015_v32  ;;  %2585 = vst.msk [vmem:[%s5837_s3 + $0x188] sm:$0xf] %vm2486_vm5, %v3100_v33  ;;  %v1654_v39 = vmax.f32 %v867_v34, 0.0  ;;  %v1739_v40 = vmax.f32 %v1292_v36, 0.0  ;;  %3805 = vmatprep.mubr.msk.f32.mxu1 %vm3922_vm0, %v3923_v1 }
 0x13c   :  { %v871_v42 = vpop.f32.mrb[30].mxu0  ;;  %v1296_v43 = vpop.f32.mrb[30].mxu1  ;;  %v113_v36 = vld [vmem:[%s5834_s0 + $0x248] sm:$0xff] }
 0x13d   :  { %v3016_v44 = vpack.c.bf16 %v1654_v39, %v1654_v39  ;;  %v3101_v45 = vpack.c.bf16 %v1739_v40, %v1739_v40  ;;  %v872_v46 = vadd.f32 %v4605_v48, %v871_v42  ;;  %v3393_v47 = vpop.f32.mrb[31].mxu0  ;;  %3551 = vmatmul.mubr.msk.f32.gmra.mrb[136].mxu0 %vm218_vm4, %v108_v38  ;;  %v1297_v49 = vadd.f32 %v4605_v48, %v1296_v43  ;;  %v3648_v50 = vpop.f32.mrb[31].mxu1  ;;  %v198_v39 = vld [vmem:[%s5834_s0 + $0x4f0] sm:$0xff] }
 0x13e   :  { %3553 = vmatprep.mubr.msk.f32.mxu0 %vm3922_vm0, %v3923_v1  ;;  %3806 = vmatmul.mubr.msk.f32.gmra.mrb[136].mxu1 %vm218_vm4, %v193_v41 }
 0x13f   :  { %2501 = vst.msk [vmem:[%s5837_s3 + $0x38] sm:$0xf] %vm2486_vm5, %v3016_v44  ;;  %2586 = vst.msk [vmem:[%s5837_s3 + $0x18c] sm:$0xf] %vm2486_vm5, %v3101_v45  ;;  %v1655_v52 = vmax.f32 %v872_v46, 0.0  ;;  %v1740_v53 = vmax.f32 %v1297_v49, 0.0  ;;  %3808 = vmatprep.mubr.msk.f32.mxu1 %vm3922_vm0, %v3923_v1 }
 0x140   :  { %v876_v55 = vpop.f32.mrb[32].mxu0  ;;  %v1301_v56 = vpop.f32.mrb[32].mxu1  ;;  %v114_v49 = vld [vmem:[%s5834_s0 + $0x250] sm:$0xff] }
 0x141   :  { %v3017_v57 = vpack.c.bf16 %v1655_v52, %v1655_v52  ;;  %v3102_v58 = vpack.c.bf16 %v1740_v53, %v1740_v53  ;;  %v877_v59 = vadd.f32 %v4605_v48, %v876_v55  ;;  %v3396_v60 = vpop.f32.mrb[33].mxu0  ;;  %3554 = vmatmul.mubr.msk.f32.gmra.mrb[138].mxu0 %vm218_vm4, %v109_v51  ;;  %v1302_v61 = vadd.f32 %v4605_v48, %v1301_v56  ;;  %v3651_v62 = vpop.f32.mrb[33].mxu1  ;;  %v199_v52 = vld [vmem:[%s5834_s0 + $0x4f8] sm:$0xff] }
 0x142   :  { %3556 = vmatprep.mubr.msk.f32.mxu0 %vm3922_vm0, %v3923_v1  ;;  %3809 = vmatmul.mubr.msk.f32.gmra.mrb[138].mxu1 %vm218_vm4, %v194_v54 }
 0x143   :  { %2502 = vst.msk [vmem:[%s5837_s3 + $0x3c] sm:$0xf] %vm2486_vm5, %v3017_v57  ;;  %2587 = vst.msk [vmem:[%s5837_s3 + $0x190] sm:$0xf] %vm2486_vm5, %v3102_v58  ;;  %v1656_v0 = vmax.f32 %v877_v59, 0.0  ;;  %v1741_v2 = vmax.f32 %v1302_v61, 0.0  ;;  %3811 = vmatprep.mubr.msk.f32.mxu1 %vm3922_vm0, %v3923_v1 }
 0x144   :  { %v881_v4 = vpop.f32.mrb[34].mxu0  ;;  %v1306_v5 = vpop.f32.mrb[34].mxu1  ;;  %v115_v61 = vld [vmem:[%s5834_s0 + $0x258] sm:$0xff] }
 0x145   :  { %v3018_v6 = vpack.c.bf16 %v1656_v0, %v1656_v0  ;;  %v3103_v7 = vpack.c.bf16 %v1741_v2, %v1741_v2  ;;  %v882_v8 = vadd.f32 %v4605_v48, %v881_v4  ;;  %v3399_v9 = vpop.f32.mrb[35].mxu0  ;;  %3557 = vmatmul.mubr.msk.f32.gmra.mrb[140].mxu0 %vm218_vm4, %v110_v63  ;;  %v1307_v10 = vadd.f32 %v4605_v48, %v1306_v5  ;;  %v3654_v11 = vpop.f32.mrb[35].mxu1  ;;  %v200_v0 = vld [vmem:[%s5834_s0 + $0x500] sm:$0xff] }
 0x146   :  { %3559 = vmatprep.mubr.msk.f32.mxu0 %vm3922_vm0, %v3923_v1  ;;  %3812 = vmatmul.mubr.msk.f32.gmra.mrb[140].mxu1 %vm218_vm4, %v195_v3 }
 0x147   :  { %2503 = vst.msk [vmem:[%s5837_s3 + $0x40] sm:$0xf] %vm2486_vm5, %v3018_v6  ;;  %2588 = vst.msk [vmem:[%s5837_s3 + $0x194] sm:$0xf] %vm2486_vm5, %v3103_v7  ;;  %v1657_v13 = vmax.f32 %v882_v8, 0.0  ;;  %v1742_v14 = vmax.f32 %v1307_v10, 0.0  ;;  %3814 = vmatprep.mubr.msk.f32.mxu1 %vm3922_vm0, %v3923_v1 }
 0x148   :  { %v886_v16 = vpop.f32.mrb[36].mxu0  ;;  %v1311_v17 = vpop.f32.mrb[36].mxu1  ;;  %v116_v10 = vld [vmem:[%s5834_s0 + $0x260] sm:$0xff] }
 0x149   :  { %v3019_v18 = vpack.c.bf16 %v1657_v13, %v1657_v13  ;;  %v3104_v19 = vpack.c.bf16 %v1742_v14, %v1742_v14  ;;  %v887_v20 = vadd.f32 %v4605_v48, %v886_v16  ;;  %v3402_v21 = vpop.f32.mrb[37].mxu0  ;;  %3560 = vmatmul.mubr.msk.f32.gmra.mrb[142].mxu0 %vm218_vm4, %v111_v12  ;;  %v1312_v22 = vadd.f32 %v4605_v48, %v1311_v17  ;;  %v3657_v23 = vpop.f32.mrb[37].mxu1  ;;  %v201_v13 = vld [vmem:[%s5834_s0 + $0x508] sm:$0xff] }
 0x14a   :  { %3562 = vmatprep.mubr.msk.f32.mxu0 %vm3922_vm0, %v3923_v1  ;;  %3815 = vmatmul.mubr.msk.f32.gmra.mrb[142].mxu1 %vm218_vm4, %v196_v15 }
 0x14b   :  { %2504 = vst.msk [vmem:[%s5837_s3 + $0x44] sm:$0xf] %vm2486_vm5, %v3019_v18  ;;  %2589 = vst.msk [vmem:[%s5837_s3 + $0x198] sm:$0xf] %vm2486_vm5, %v3104_v19  ;;  %v1658_v25 = vmax.f32 %v887_v20, 0.0  ;;  %v1743_v26 = vmax.f32 %v1312_v22, 0.0  ;;  %3817 = vmatprep.mubr.msk.f32.mxu1 %vm3922_vm0, %v3923_v1 }
 0x14c   :  { %v891_v28 = vpop.f32.mrb[38].mxu0  ;;  %v1316_v29 = vpop.f32.mrb[38].mxu1  ;;  %v117_v22 = vld [vmem:[%s5834_s0 + $0x268] sm:$0xff] }
 0x14d   :  { %v3020_v30 = vpack.c.bf16 %v1658_v25, %v1658_v25  ;;  %v3105_v31 = vpack.c.bf16 %v1743_v26, %v1743_v26  ;;  %v892_v32 = vadd.f32 %v4605_v48, %v891_v28  ;;  %v3405_v33 = vpop.f32.mrb[39].mxu0  ;;  %3563 = vmatmul.mubr.msk.f32.gmra.mrb[144].mxu0 %vm218_vm4, %v112_v24  ;;  %v1317_v34 = vadd.f32 %v4605_v48, %v1316_v29  ;;  %v3660_v35 = vpop.f32.mrb[39].mxu1  ;;  %v202_v25 = vld [vmem:[%s5834_s0 + $0x510] sm:$0xff] }
 0x14e   :  { %3565 = vmatprep.mubr.msk.f32.mxu0 %vm3922_vm0, %v3923_v1  ;;  %3818 = vmatmul.mubr.msk.f32.gmra.mrb[144].mxu1 %vm218_vm4, %v197_v27 }
 0x14f   :  { %2505 = vst.msk [vmem:[%s5837_s3 + $0x48] sm:$0xf] %vm2486_vm5, %v3020_v30  ;;  %2590 = vst.msk [vmem:[%s5837_s3 + $0x19c] sm:$0xf] %vm2486_vm5, %v3105_v31  ;;  %v1659_v37 = vmax.f32 %v892_v32, 0.0  ;;  %v1744_v38 = vmax.f32 %v1317_v34, 0.0  ;;  %3820 = vmatprep.mubr.msk.f32.mxu1 %vm3922_vm0, %v3923_v1 }
 0x150   :  { %v896_v40 = vpop.f32.mrb[40].mxu0  ;;  %v1321_v41 = vpop.f32.mrb[40].mxu1  ;;  %v118_v34 = vld [vmem:[%s5834_s0 + $0x270] sm:$0xff] }
 0x151   :  { %v3021_v42 = vpack.c.bf16 %v1659_v37, %v1659_v37  ;;  %v3106_v43 = vpack.c.bf16 %v1744_v38, %v1744_v38  ;;  %v897_v44 = vadd.f32 %v4605_v48, %v896_v40  ;;  %v3408_v45 = vpop.f32.mrb[41].mxu0  ;;  %3566 = vmatmul.mubr.msk.f32.gmra.mrb[146].mxu0 %vm218_vm4, %v113_v36  ;;  %v1322_v46 = vadd.f32 %v4605_v48, %v1321_v41  ;;  %v3663_v47 = vpop.f32.mrb[41].mxu1  ;;  %v203_v37 = vld [vmem:[%s5834_s0 + $0x518] sm:$0xff] }
 0x152   :  { %3568 = vmatprep.mubr.msk.f32.mxu0 %vm3922_vm0, %v3923_v1  ;;  %3821 = vmatmul.mubr.msk.f32.gmra.mrb[146].mxu1 %vm218_vm4, %v198_v39 }
 0x153   :  { %2506 = vst.msk [vmem:[%s5837_s3 + $0x4c] sm:$0xf] %vm2486_vm5, %v3021_v42  ;;  %2591 = vst.msk [vmem:[%s5837_s3 + $0x1a0] sm:$0xf] %vm2486_vm5, %v3106_v43  ;;  %v1660_v50 = vmax.f32 %v897_v44, 0.0  ;;  %v1745_v51 = vmax.f32 %v1322_v46, 0.0  ;;  %3823 = vmatprep.mubr.msk.f32.mxu1 %vm3922_vm0, %v3923_v1 }
 0x154   :  { %v901_v53 = vpop.f32.mrb[42].mxu0  ;;  %v1326_v54 = vpop.f32.mrb[42].mxu1  ;;  %v119_v46 = vld [vmem:[%s5834_s0 + $0x278] sm:$0xff] }
 0x155   :  { %v3022_v55 = vpack.c.bf16 %v1660_v50, %v1660_v50  ;;  %v3107_v56 = vpack.c.bf16 %v1745_v51, %v1745_v51  ;;  %v902_v57 = vadd.f32 %v4605_v48, %v901_v53  ;;  %v3411_v58 = vpop.f32.mrb[43].mxu0  ;;  %3569 = vmatmul.mubr.msk.f32.gmra.mrb[148].mxu0 %vm218_vm4, %v114_v49  ;;  %v1327_v59 = vadd.f32 %v4605_v48, %v1326_v54  ;;  %v3666_v60 = vpop.f32.mrb[43].mxu1  ;;  %v204_v50 = vld [vmem:[%s5834_s0 + $0x520] sm:$0xff] }
 0x156   :  { %3571 = vmatprep.mubr.msk.f32.mxu0 %vm3922_vm0, %v3923_v1  ;;  %3824 = vmatmul.mubr.msk.f32.gmra.mrb[148].mxu1 %vm218_vm4, %v199_v52 }
 0x157   :  { %2507 = vst.msk [vmem:[%s5837_s3 + $0x50] sm:$0xf] %vm2486_vm5, %v3022_v55  ;;  %2592 = vst.msk [vmem:[%s5837_s3 + $0x1a4] sm:$0xf] %vm2486_vm5, %v3107_v56  ;;  %v1661_v62 = vmax.f32 %v902_v57, 0.0  ;;  %v1746_v63 = vmax.f32 %v1327_v59, 0.0  ;;  %3826 = vmatprep.mubr.msk.f32.mxu1 %vm3922_vm0, %v3923_v1 }
 0x158   :  { %v906_v2 = vpop.f32.mrb[44].mxu0  ;;  %v1331_v3 = vpop.f32.mrb[44].mxu1  ;;  %v120_v59 = vld [vmem:[%s5834_s0 + $0x280] sm:$0xff] }
 0x159   :  { %v3023_v4 = vpack.c.bf16 %v1661_v62, %v1661_v62  ;;  %v3108_v5 = vpack.c.bf16 %v1746_v63, %v1746_v63  ;;  %v907_v6 = vadd.f32 %v4605_v48, %v906_v2  ;;  %v3414_v7 = vpop.f32.mrb[45].mxu0  ;;  %3572 = vmatmul.mubr.msk.f32.gmra.mrb[150].mxu0 %vm218_vm4, %v115_v61  ;;  %v1332_v8 = vadd.f32 %v4605_v48, %v1331_v3  ;;  %v3669_v9 = vpop.f32.mrb[45].mxu1  ;;  %v205_v62 = vld [vmem:[%s5834_s0 + $0x528] sm:$0xff] }
 0x15a   :  { %3574 = vmatprep.mubr.msk.f32.mxu0 %vm3922_vm0, %v3923_v1  ;;  %3827 = vmatmul.mubr.msk.f32.gmra.mrb[150].mxu1 %vm218_vm4, %v200_v0 }
 0x15b   :  { %2508 = vst.msk [vmem:[%s5837_s3 + $0x54] sm:$0xf] %vm2486_vm5, %v3023_v4  ;;  %2593 = vst.msk [vmem:[%s5837_s3 + $0x1a8] sm:$0xf] %vm2486_vm5, %v3108_v5  ;;  %v1662_v11 = vmax.f32 %v907_v6, 0.0  ;;  %v1747_v12 = vmax.f32 %v1332_v8, 0.0  ;;  %3829 = vmatprep.mubr.msk.f32.mxu1 %vm3922_vm0, %v3923_v1 }
 0x15c   :  { %v911_v14 = vpop.f32.mrb[46].mxu0  ;;  %v1336_v15 = vpop.f32.mrb[46].mxu1  ;;  %v121_v8 = vld [vmem:[%s5834_s0 + $0x288] sm:$0xff] }
 0x15d   :  { %v3024_v16 = vpack.c.bf16 %v1662_v11, %v1662_v11  ;;  %v3109_v17 = vpack.c.bf16 %v1747_v12, %v1747_v12  ;;  %v912_v18 = vadd.f32 %v4605_v48, %v911_v14  ;;  %v3417_v19 = vpop.f32.mrb[47].mxu0  ;;  %3575 = vmatmul.mubr.msk.f32.gmra.mrb[152].mxu0 %vm218_vm4, %v116_v10  ;;  %v1337_v20 = vadd.f32 %v4605_v48, %v1336_v15  ;;  %v3672_v21 = vpop.f32.mrb[47].mxu1  ;;  %v206_v11 = vld [vmem:[%s5834_s0 + $0x530] sm:$0xff] }
 0x15e   :  { %3577 = vmatprep.mubr.msk.f32.mxu0 %vm3922_vm0, %v3923_v1  ;;  %3830 = vmatmul.mubr.msk.f32.gmra.mrb[152].mxu1 %vm218_vm4, %v201_v13  ;;  %v122_v21 = vld [vmem:[%s5834_s0 + $0x290] sm:$0xff] }
 0x15f   :  { %2509 = vst.msk [vmem:[%s5837_s3 + $0x58] sm:$0xf] %vm2486_vm5, %v3024_v16  ;;  %2594 = vst.msk [vmem:[%s5837_s3 + $0x1ac] sm:$0xf] %vm2486_vm5, %v3109_v17  ;;  %v1663_v23 = vmax.f32 %v912_v18, 0.0  ;;  %v1748_v24 = vmax.f32 %v1337_v20, 0.0  ;;  %3832 = vmatprep.mubr.msk.f32.mxu1 %vm3922_vm0, %v3923_v1 }
 0x160   :  { %v916_v26 = vpop.f32.mrb[48].mxu0  ;;  %v1341_v27 = vpop.f32.mrb[48].mxu1  ;;  %v5227_v18 = vld [vmem:[#allocation4] ss:$0 sm:$0xff] }
 0x161   :  { %v3025_v28 = vpack.c.bf16 %v1663_v23, %v1663_v23  ;;  %v3110_v29 = vpack.c.bf16 %v1748_v24, %v1748_v24  ;;  %v917_v30 = vadd.f32 %v4605_v48, %v916_v26  ;;  %v3420_v31 = vpop.f32.mrb[49].mxu0  ;;  %3578 = vmatmul.mubr.msk.f32.gmra.mrb[154].mxu0 %vm218_vm4, %v117_v22  ;;  %v1342_v32 = vadd.f32 %v4605_v48, %v1341_v27  ;;  %v3675_v33 = vpop.f32.mrb[49].mxu1  ;;  %v207_v23 = vld [vmem:[%s5834_s0 + $0x538] sm:$0xff] }
 0x162   :  { %3580 = vmatprep.mubr.msk.f32.mxu0 %vm3922_vm0, %v3923_v1  ;;  %3833 = vmatmul.mubr.msk.f32.gmra.mrb[154].mxu1 %vm218_vm4, %v202_v25 }
 0x163   :  { %2510 = vst.msk [vmem:[%s5837_s3 + $0x5c] sm:$0xf] %vm2486_vm5, %v3025_v28  ;;  %2595 = vst.msk [vmem:[%s5837_s3 + $0x1b0] sm:$0xf] %vm2486_vm5, %v3110_v29  ;;  %v1664_v35 = vmax.f32 %v917_v30, 0.0  ;;  %v1749_v36 = vmax.f32 %v1342_v32, 0.0  ;;  %3835 = vmatprep.mubr.msk.f32.mxu1 %vm3922_vm0, %v3923_v1 }
 0x164   :  { %v921_v38 = vpop.f32.mrb[50].mxu0  ;;  %v1346_v39 = vpop.f32.mrb[50].mxu1  ;;  %v123_v32 = vld [vmem:[%s5834_s0 + $0x298] sm:$0xff] }
 0x165   :  { %v3026_v40 = vpack.c.bf16 %v1664_v35, %v1664_v35  ;;  %v3111_v41 = vpack.c.bf16 %v1749_v36, %v1749_v36  ;;  %v922_v42 = vadd.f32 %v4605_v48, %v921_v38  ;;  %v3423_v43 = vpop.f32.mrb[51].mxu0  ;;  %3581 = vmatmul.mubr.msk.f32.gmra.mrb[156].mxu0 %vm218_vm4, %v118_v34  ;;  %v1347_v44 = vadd.f32 %v4605_v48, %v1346_v39  ;;  %v3678_v45 = vpop.f32.mrb[51].mxu1  ;;  %v208_v35 = vld [vmem:[%s5834_s0 + $0x540] sm:$0xff] }
 0x166   :  { %3583 = vmatprep.mubr.msk.f32.mxu0 %vm3922_vm0, %v3923_v1  ;;  %3836 = vmatmul.mubr.msk.f32.gmra.mrb[156].mxu1 %vm218_vm4, %v203_v37 }
 0x167   :  { %2511 = vst.msk [vmem:[%s5837_s3 + $0x60] sm:$0xf] %vm2486_vm5, %v3026_v40  ;;  %2596 = vst.msk [vmem:[%s5837_s3 + $0x1b4] sm:$0xf] %vm2486_vm5, %v3111_v41  ;;  %v1665_v47 = vmax.f32 %v922_v42, 0.0  ;;  %v1750_v49 = vmax.f32 %v1347_v44, 0.0  ;;  %3838 = vmatprep.mubr.msk.f32.mxu1 %vm3922_vm0, %v3923_v1 }
 0x168   :  { %v926_v51 = vpop.f32.mrb[52].mxu0  ;;  %v1351_v52 = vpop.f32.mrb[52].mxu1  ;;  %v124_v44 = vld [vmem:[%s5834_s0 + $0x2a0] sm:$0xff] }
 0x169   :  { %v3027_v53 = vpack.c.bf16 %v1665_v47, %v1665_v47  ;;  %v3112_v54 = vpack.c.bf16 %v1750_v49, %v1750_v49  ;;  %v927_v55 = vadd.f32 %v4605_v48, %v926_v51  ;;  %v3426_v56 = vpop.f32.mrb[53].mxu0  ;;  %3584 = vmatmul.mubr.msk.f32.gmra.mrb[158].mxu0 %vm218_vm4, %v119_v46  ;;  %v1352_v57 = vadd.f32 %v4605_v48, %v1351_v52  ;;  %v3681_v58 = vpop.f32.mrb[53].mxu1 }
 0x16a   :  { %3586 = vmatprep.mubr.msk.f32.mxu0 %vm3922_vm0, %v3923_v1  ;;  %3839 = vmatmul.mubr.msk.f32.gmra.mrb[158].mxu1 %vm218_vm4, %v204_v50 }
 0x16b   :  { %2512 = vst.msk [vmem:[%s5837_s3 + $0x64] sm:$0xf] %vm2486_vm5, %v3027_v53  ;;  %2597 = vst.msk [vmem:[%s5837_s3 + $0x1b8] sm:$0xf] %vm2486_vm5, %v3112_v54  ;;  %v1666_v60 = vmax.f32 %v927_v55, 0.0  ;;  %v1751_v61 = vmax.f32 %v1352_v57, 0.0  ;;  %3841 = vmatprep.mubr.msk.f32.mxu1 %vm3922_vm0, %v3923_v1 }
 0x16c   :  { %v931_v63 = vpop.f32.mrb[54].mxu0  ;;  %v1356_v0 = vpop.f32.mrb[54].mxu1 }
 0x16d   :  { %v3028_v2 = vpack.c.bf16 %v1666_v60, %v1666_v60  ;;  %v3113_v3 = vpack.c.bf16 %v1751_v61, %v1751_v61  ;;  %v932_v4 = vadd.f32 %v4605_v48, %v931_v63  ;;  %v3429_v5 = vpop.f32.mrb[55].mxu0  ;;  %3587 = vmatmul.mubr.msk.f32.gmra.mrb[160].mxu0 %vm218_vm4, %v120_v59  ;;  %v1357_v6 = vadd.f32 %v4605_v48, %v1356_v0  ;;  %v3684_v7 = vpop.f32.mrb[55].mxu1 }
 0x16e   :  { %3589 = vmatprep.mubr.msk.f32.mxu0 %vm3922_vm0, %v3923_v1  ;;  %3842 = vmatmul.mubr.msk.f32.gmra.mrb[160].mxu1 %vm218_vm4, %v205_v62 }
 0x16f   :  { %2513 = vst.msk [vmem:[%s5837_s3 + $0x68] sm:$0xf] %vm2486_vm5, %v3028_v2  ;;  %2598 = vst.msk [vmem:[%s5837_s3 + $0x1bc] sm:$0xf] %vm2486_vm5, %v3113_v3  ;;  %v1667_v9 = vmax.f32 %v932_v4, 0.0  ;;  %v1752_v10 = vmax.f32 %v1357_v6, 0.0  ;;  %3844 = vmatprep.mubr.msk.f32.mxu1 %vm3922_vm0, %v3923_v1 }
 0x170   :  { %v936_v12 = vpop.f32.mrb[56].mxu0  ;;  %v1361_v13 = vpop.f32.mrb[56].mxu1 }
 0x171   :  { %v3029_v14 = vpack.c.bf16 %v1667_v9, %v1667_v9  ;;  %v3114_v15 = vpack.c.bf16 %v1752_v10, %v1752_v10  ;;  %v937_v16 = vadd.f32 %v4605_v48, %v936_v12  ;;  %v3432_v17 = vpop.f32.mrb[57].mxu0  ;;  %3590 = vmatmul.mubr.msk.f32.gmra.mrb[162].mxu0 %vm218_vm4, %v121_v8  ;;  %v1362_v19 = vadd.f32 %v5227_v18, %v1361_v13  ;;  %v3687_v20 = vpop.f32.mrb[57].mxu1 }
 0x172   :  { %3592 = vmatprep.mubr.msk.f32.mxu0 %vm3922_vm0, %v3923_v1  ;;  %3845 = vmatmul.mubr.msk.f32.gmra.mrb[162].mxu1 %vm218_vm4, %v206_v11 }
 0x173   :  { %2514 = vst.msk [vmem:[%s5837_s3 + $0x6c] sm:$0xf] %vm2486_vm5, %v3029_v14  ;;  %2599 = vst.msk [vmem:[%s5837_s3 + $0x1c0] sm:$0xf] %vm2486_vm5, %v3114_v15  ;;  %v1668_v48 = vmax.f32 %v937_v16, 0.0  ;;  %v1753_v22 = vmax.f32 %v1362_v19, 0.0  ;;  %3847 = vmatprep.mubr.msk.f32.mxu1 %vm3922_vm0, %v3923_v1 }
 0x174   :  { %v941_v24 = vpop.f32.mrb[58].mxu0  ;;  %v1366_v25 = vpop.f32.mrb[58].mxu1 }
 0x175   :  { %v3030_v26 = vpack.c.bf16 %v1668_v48, %v1668_v48  ;;  %v3115_v27 = vpack.c.bf16 %v1753_v22, %v1753_v22  ;;  %v942_v28 = vadd.f32 %v5227_v18, %v941_v24  ;;  %v3435_v29 = vpop.f32.mrb[59].mxu0  ;;  %3593 = vmatmul.mubr.msk.f32.gmra.mrb[164].mxu0 %vm218_vm4, %v122_v21  ;;  %v1367_v30 = vadd.f32 %v5227_v18, %v1366_v25  ;;  %v3690_v31 = vpop.f32.mrb[59].mxu1 }
 0x176   :  { %3595 = vmatprep.mubr.msk.f32.mxu0 %vm3922_vm0, %v3923_v1  ;;  %3848 = vmatmul.mubr.msk.f32.gmra.mrb[164].mxu1 %vm218_vm4, %v207_v23 }
 0x177   :  { %2515 = vst.msk [vmem:[%s5837_s3 + $0x70] sm:$0xf] %vm2486_vm5, %v3030_v26  ;;  %2600 = vst.msk [vmem:[%s5837_s3 + $0x1c4] sm:$0xf] %vm2486_vm5, %v3115_v27  ;;  %v1669_v33 = vmax.f32 %v942_v28, 0.0  ;;  %v1754_v34 = vmax.f32 %v1367_v30, 0.0  ;;  %3850 = vmatprep.mubr.msk.f32.mxu1 %vm3922_vm0, %v3923_v1 }
 0x178   :  { %v946_v36 = vpop.f32.mrb[60].mxu0  ;;  %v1371_v37 = vpop.f32.mrb[60].mxu1 }
 0x179   :  { %v3031_v38 = vpack.c.bf16 %v1669_v33, %v1669_v33  ;;  %v3116_v39 = vpack.c.bf16 %v1754_v34, %v1754_v34  ;;  %v947_v40 = vadd.f32 %v5227_v18, %v946_v36  ;;  %v3438_v41 = vpop.f32.mrb[61].mxu0  ;;  %3596 = vmatmul.mubr.msk.f32.gmra.mrb[166].mxu0 %vm218_vm4, %v123_v32  ;;  %v1372_v42 = vadd.f32 %v5227_v18, %v1371_v37  ;;  %v3693_v43 = vpop.f32.mrb[61].mxu1 }
 0x17a   :  { %3598 = vmatprep.mubr.msk.f32.mxu0 %vm3922_vm0, %v3923_v1  ;;  %3851 = vmatmul.mubr.msk.f32.gmra.mrb[166].mxu1 %vm218_vm4, %v208_v35 }
 0x17b   :  { %2516 = vst.msk [vmem:[%s5837_s3 + $0x74] sm:$0xf] %vm2486_vm5, %v3031_v38  ;;  %2601 = vst.msk [vmem:[%s5837_s3 + $0x1c8] sm:$0xf] %vm2486_vm5, %v3116_v39  ;;  %v1670_v45 = vmax.f32 %v947_v40, 0.0  ;;  %v1755_v46 = vmax.f32 %v1372_v42, 0.0 }
 0x17c   :  { %v951_v47 = vpop.f32.mrb[62].mxu0  ;;  %v1376_v1 = vpop.f32.mrb[62].mxu1 }
 0x17d   :  { %v3032_v49 = vpack.c.bf16 %v1670_v45, %v1670_v45  ;;  %v3117_v50 = vpack.c.bf16 %v1755_v46, %v1755_v46  ;;  %v952_v51 = vadd.f32 %v5227_v18, %v951_v47  ;;  %v3441_v52 = vpop.f32.mrb[63].mxu0  ;;  %3599 = vmatmul.mubr.msk.f32.gmra.mrb[168].mxu0 %vm218_vm4, %v124_v44  ;;  %v1377_v53 = vadd.f32 %v5227_v18, %v1376_v1  ;;  %v3696_v54 = vpop.f32.mrb[63].mxu1 }
 0x17f   :  { %2517 = vst.msk [vmem:[%s5837_s3 + $0x78] sm:$0xf] %vm2486_vm5, %v3032_v49  ;;  %2602 = vst.msk [vmem:[%s5837_s3 + $0x1cc] sm:$0xf] %vm2486_vm5, %v3117_v50  ;;  %v1671_v55 = vmax.f32 %v952_v51, 0.0  ;;  %v1756_v56 = vmax.f32 %v1377_v53, 0.0 }
 0x180   :  { %v956_v57 = vpop.f32.mrb[64].mxu0  ;;  %v1381_v58 = vpop.f32.mrb[64].mxu1 }
 0x181   :  { %v3033_v59 = vpack.c.bf16 %v1671_v55, %v1671_v55  ;;  %v3118_v60 = vpack.c.bf16 %v1756_v56, %v1756_v56  ;;  %v957_v61 = vadd.f32 %v5227_v18, %v956_v57  ;;  %v3444_v62 = vpop.f32.mrb[65].mxu0  ;;  %v1382_v63 = vadd.f32 %v5227_v18, %v1381_v58  ;;  %v3699_v0 = vpop.f32.mrb[65].mxu1 }
 0x183   :  { %2518 = vst.msk [vmem:[%s5837_s3 + $0x7c] sm:$0xf] %vm2486_vm5, %v3033_v59  ;;  %2603 = vst.msk [vmem:[%s5837_s3 + $0x1d0] sm:$0xf] %vm2486_vm5, %v3118_v60  ;;  %v1672_v2 = vmax.f32 %v957_v61, 0.0  ;;  %v1757_v3 = vmax.f32 %v1382_v63, 0.0 }
 0x184   :  { %v961_v4 = vpop.f32.mrb[66].mxu0  ;;  %v1386_v5 = vpop.f32.mrb[66].mxu1 }
 0x185   :  { %v3034_v6 = vpack.c.bf16 %v1672_v2, %v1672_v2  ;;  %v3119_v7 = vpack.c.bf16 %v1757_v3, %v1757_v3  ;;  %v962_v8 = vadd.f32 %v5227_v18, %v961_v4  ;;  %v3447_v9 = vpop.f32.mrb[67].mxu0  ;;  %v1387_v10 = vadd.f32 %v5227_v18, %v1386_v5  ;;  %v3702_v11 = vpop.f32.mrb[67].mxu1 }
 0x187   :  { %2519 = vst.msk [vmem:[%s5837_s3 + $0x80] sm:$0xf] %vm2486_vm5, %v3034_v6  ;;  %2604 = vst.msk [vmem:[%s5837_s3 + $0x1d4] sm:$0xf] %vm2486_vm5, %v3119_v7  ;;  %v1673_v12 = vmax.f32 %v962_v8, 0.0  ;;  %v1758_v13 = vmax.f32 %v1387_v10, 0.0 }
 0x188   :  { %v966_v14 = vpop.f32.mrb[68].mxu0  ;;  %v1391_v15 = vpop.f32.mrb[68].mxu1 }
 0x189   :  { %v3035_v16 = vpack.c.bf16 %v1673_v12, %v1673_v12  ;;  %v3120_v17 = vpack.c.bf16 %v1758_v13, %v1758_v13  ;;  %v967_v19 = vadd.f32 %v5227_v18, %v966_v14  ;;  %v3450_v20 = vpop.f32.mrb[69].mxu0  ;;  %v1392_v21 = vadd.f32 %v5227_v18, %v1391_v15  ;;  %v3705_v48 = vpop.f32.mrb[69].mxu1 }
 0x18b   :  { %2520 = vst.msk [vmem:[%s5837_s3 + $0x84] sm:$0xf] %vm2486_vm5, %v3035_v16  ;;  %2605 = vst.msk [vmem:[%s5837_s3 + $0x1d8] sm:$0xf] %vm2486_vm5, %v3120_v17  ;;  %v1674_v22 = vmax.f32 %v967_v19, 0.0  ;;  %v1759_v23 = vmax.f32 %v1392_v21, 0.0 }
 0x18c   :  { %v971_v24 = vpop.f32.mrb[70].mxu0  ;;  %v1396_v25 = vpop.f32.mrb[70].mxu1 }
 0x18d   :  { %v3036_v26 = vpack.c.bf16 %v1674_v22, %v1674_v22  ;;  %v3121_v27 = vpack.c.bf16 %v1759_v23, %v1759_v23  ;;  %v972_v28 = vadd.f32 %v5227_v18, %v971_v24  ;;  %v3453_v29 = vpop.f32.mrb[71].mxu0  ;;  %v1397_v30 = vadd.f32 %v5227_v18, %v1396_v25  ;;  %v3708_v31 = vpop.f32.mrb[71].mxu1 }
 0x18f   :  { %2521 = vst.msk [vmem:[%s5837_s3 + $0x88] sm:$0xf] %vm2486_vm5, %v3036_v26  ;;  %2606 = vst.msk [vmem:[%s5837_s3 + $0x1dc] sm:$0xf] %vm2486_vm5, %v3121_v27  ;;  %v1675_v32 = vmax.f32 %v972_v28, 0.0  ;;  %v1760_v33 = vmax.f32 %v1397_v30, 0.0 }
 0x190   :  { %v976_v34 = vpop.f32.mrb[72].mxu0  ;;  %v1401_v35 = vpop.f32.mrb[72].mxu1 }
 0x191   :  { %v3037_v36 = vpack.c.bf16 %v1675_v32, %v1675_v32  ;;  %v3122_v37 = vpack.c.bf16 %v1760_v33, %v1760_v33  ;;  %v977_v38 = vadd.f32 %v5227_v18, %v976_v34  ;;  %v3456_v39 = vpop.f32.mrb[73].mxu0  ;;  %v1402_v40 = vadd.f32 %v5227_v18, %v1401_v35  ;;  %v3711_v41 = vpop.f32.mrb[73].mxu1 }
 0x193   :  { %2522 = vst.msk [vmem:[%s5837_s3 + $0x8c] sm:$0xf] %vm2486_vm5, %v3037_v36  ;;  %2607 = vst.msk [vmem:[%s5837_s3 + $0x1e0] sm:$0xf] %vm2486_vm5, %v3122_v37  ;;  %v1676_v42 = vmax.f32 %v977_v38, 0.0  ;;  %v1761_v43 = vmax.f32 %v1402_v40, 0.0 }
 0x194   :  { %v981_v44 = vpop.f32.mrb[74].mxu0  ;;  %v1406_v45 = vpop.f32.mrb[74].mxu1 }
 0x195   :  { %v3038_v46 = vpack.c.bf16 %v1676_v42, %v1676_v42  ;;  %v3123_v47 = vpack.c.bf16 %v1761_v43, %v1761_v43  ;;  %v982_v1 = vadd.f32 %v5227_v18, %v981_v44  ;;  %v3459_v49 = vpop.f32.mrb[75].mxu0  ;;  %v1407_v50 = vadd.f32 %v5227_v18, %v1406_v45  ;;  %v3714_v51 = vpop.f32.mrb[75].mxu1 }
 0x197   :  { %2523 = vst.msk [vmem:[%s5837_s3 + $0x90] sm:$0xf] %vm2486_vm5, %v3038_v46  ;;  %2608 = vst.msk [vmem:[%s5837_s3 + $0x1e4] sm:$0xf] %vm2486_vm5, %v3123_v47  ;;  %v1677_v52 = vmax.f32 %v982_v1, 0.0  ;;  %v1762_v53 = vmax.f32 %v1407_v50, 0.0 }
 0x198   :  { %v986_v54 = vpop.f32.mrb[76].mxu0  ;;  %v1411_v55 = vpop.f32.mrb[76].mxu1 }
 0x199   :  { %v3039_v56 = vpack.c.bf16 %v1677_v52, %v1677_v52  ;;  %v3124_v57 = vpack.c.bf16 %v1762_v53, %v1762_v53  ;;  %v987_v58 = vadd.f32 %v5227_v18, %v986_v54  ;;  %v3462_v59 = vpop.f32.mrb[77].mxu0  ;;  %v1412_v60 = vadd.f32 %v5227_v18, %v1411_v55  ;;  %v3717_v61 = vpop.f32.mrb[77].mxu1 }
 0x19b   :  { %2524 = vst.msk [vmem:[%s5837_s3 + $0x94] sm:$0xf] %vm2486_vm5, %v3039_v56  ;;  %2609 = vst.msk [vmem:[%s5837_s3 + $0x1e8] sm:$0xf] %vm2486_vm5, %v3124_v57  ;;  %v1678_v62 = vmax.f32 %v987_v58, 0.0  ;;  %v1763_v63 = vmax.f32 %v1412_v60, 0.0 }
 0x19c   :  { %v991_v0 = vpop.f32.mrb[78].mxu0  ;;  %v1416_v2 = vpop.f32.mrb[78].mxu1 }
 0x19d   :  { %v3040_v3 = vpack.c.bf16 %v1678_v62, %v1678_v62  ;;  %v3125_v4 = vpack.c.bf16 %v1763_v63, %v1763_v63  ;;  %v992_v5 = vadd.f32 %v5227_v18, %v991_v0  ;;  %v3465_v6 = vpop.f32.mrb[79].mxu0  ;;  %v1417_v7 = vadd.f32 %v5227_v18, %v1416_v2  ;;  %v3720_v8 = vpop.f32.mrb[79].mxu1 }
 0x19f   :  { %2525 = vst.msk [vmem:[%s5837_s3 + $0x98] sm:$0xf] %vm2486_vm5, %v3040_v3  ;;  %2610 = vst.msk [vmem:[%s5837_s3 + $0x1ec] sm:$0xf] %vm2486_vm5, %v3125_v4  ;;  %v1679_v9 = vmax.f32 %v992_v5, 0.0  ;;  %v1764_v10 = vmax.f32 %v1417_v7, 0.0 }
 0x1a0   :  { %v996_v11 = vpop.f32.mrb[80].mxu0  ;;  %v1421_v12 = vpop.f32.mrb[80].mxu1 }
 0x1a1   :  { %v3041_v13 = vpack.c.bf16 %v1679_v9, %v1679_v9  ;;  %v3126_v14 = vpack.c.bf16 %v1764_v10, %v1764_v10  ;;  %v997_v15 = vadd.f32 %v5227_v18, %v996_v11  ;;  %v3468_v16 = vpop.f32.mrb[81].mxu0  ;;  %v1422_v17 = vadd.f32 %v5227_v18, %v1421_v12  ;;  %v3723_v19 = vpop.f32.mrb[81].mxu1 }
 0x1a3   :  { %2526 = vst.msk [vmem:[%s5837_s3 + $0x9c] sm:$0xf] %vm2486_vm5, %v3041_v13  ;;  %2611 = vst.msk [vmem:[%s5837_s3 + $0x1f0] sm:$0xf] %vm2486_vm5, %v3126_v14  ;;  %v1680_v20 = vmax.f32 %v997_v15, 0.0  ;;  %v1765_v21 = vmax.f32 %v1422_v17, 0.0 }
 0x1a4   :  { %v1001_v48 = vpop.f32.mrb[82].mxu0  ;;  %v1426_v22 = vpop.f32.mrb[82].mxu1 }
 0x1a5   :  { %v3042_v23 = vpack.c.bf16 %v1680_v20, %v1680_v20  ;;  %v3127_v24 = vpack.c.bf16 %v1765_v21, %v1765_v21  ;;  %v1002_v25 = vadd.f32 %v5227_v18, %v1001_v48  ;;  %v3471_v26 = vpop.f32.mrb[83].mxu0  ;;  %v1427_v27 = vadd.f32 %v5227_v18, %v1426_v22  ;;  %v3726_v28 = vpop.f32.mrb[83].mxu1 }
 0x1a7   :  { %2527 = vst.msk [vmem:[%s5837_s3 + $0xa0] sm:$0xf] %vm2486_vm5, %v3042_v23  ;;  %2612 = vst.msk [vmem:[%s5837_s3 + $0x1f4] sm:$0xf] %vm2486_vm5, %v3127_v24  ;;  %v1681_v29 = vmax.f32 %v1002_v25, 0.0  ;;  %v1766_v30 = vmax.f32 %v1427_v27, 0.0 }
 0x1a8   :  { %v1006_v31 = vpop.f32.mrb[84].mxu0  ;;  %v1431_v32 = vpop.f32.mrb[84].mxu1 }
 0x1a9   :  { %v3043_v33 = vpack.c.bf16 %v1681_v29, %v1681_v29  ;;  %v3128_v34 = vpack.c.bf16 %v1766_v30, %v1766_v30  ;;  %v1007_v35 = vadd.f32 %v5227_v18, %v1006_v31  ;;  %v3474_v36 = vpop.f32.mrb[85].mxu0  ;;  %v1432_v37 = vadd.f32 %v5227_v18, %v1431_v32  ;;  %v3729_v38 = vpop.f32.mrb[85].mxu1 }
 0x1ab   :  { %2528 = vst.msk [vmem:[%s5837_s3 + $0xa4] sm:$0xf] %vm2486_vm5, %v3043_v33  ;;  %2613 = vst.msk [vmem:[%s5837_s3 + $0x1f8] sm:$0xf] %vm2486_vm5, %v3128_v34  ;;  %v1682_v39 = vmax.f32 %v1007_v35, 0.0  ;;  %v1767_v40 = vmax.f32 %v1432_v37, 0.0 }
 0x1ac   :  { %v1011_v41 = vpop.f32.mrb[86].mxu0  ;;  %v1436_v42 = vpop.f32.mrb[86].mxu1 }
 0x1ad   :  { %v3044_v43 = vpack.c.bf16 %v1682_v39, %v1682_v39  ;;  %v3129_v44 = vpack.c.bf16 %v1767_v40, %v1767_v40  ;;  %v1012_v45 = vadd.f32 %v5227_v18, %v1011_v41  ;;  %v3477_v46 = vpop.f32.mrb[87].mxu0  ;;  %v1437_v47 = vadd.f32 %v5227_v18, %v1436_v42  ;;  %v3732_v1 = vpop.f32.mrb[87].mxu1 }
 0x1af   :  { %2529 = vst.msk [vmem:[%s5837_s3 + $0xa8] sm:$0xf] %vm2486_vm5, %v3044_v43  ;;  %2614 = vst.msk [vmem:[%s5837_s3 + $0x1fc] sm:$0xf] %vm2486_vm5, %v3129_v44  ;;  %v1683_v49 = vmax.f32 %v1012_v45, 0.0  ;;  %v1768_v50 = vmax.f32 %v1437_v47, 0.0 }
 0x1b0   :  { %v1016_v51 = vpop.f32.mrb[88].mxu0  ;;  %v1441_v52 = vpop.f32.mrb[88].mxu1 }
 0x1b1   :  { %v3045_v53 = vpack.c.bf16 %v1683_v49, %v1683_v49  ;;  %v3130_v54 = vpack.c.bf16 %v1768_v50, %v1768_v50  ;;  %v1017_v55 = vadd.f32 %v5227_v18, %v1016_v51  ;;  %v3480_v56 = vpop.f32.mrb[89].mxu0  ;;  %v1442_v57 = vadd.f32 %v5227_v18, %v1441_v52  ;;  %v3735_v58 = vpop.f32.mrb[89].mxu1 }
 0x1b3   :  { %2530 = vst.msk [vmem:[%s5837_s3 + $0xac] sm:$0xf] %vm2486_vm5, %v3045_v53  ;;  %2615 = vst.msk [vmem:[%s5837_s3 + $0x200] sm:$0xf] %vm2486_vm5, %v3130_v54  ;;  %v1684_v59 = vmax.f32 %v1017_v55, 0.0  ;;  %v1769_v60 = vmax.f32 %v1442_v57, 0.0 }
 0x1b4   :  { %v1021_v61 = vpop.f32.mrb[90].mxu0  ;;  %v1446_v62 = vpop.f32.mrb[90].mxu1 }
 0x1b5   :  { %v3046_v63 = vpack.c.bf16 %v1684_v59, %v1684_v59  ;;  %v3131_v0 = vpack.c.bf16 %v1769_v60, %v1769_v60  ;;  %v1022_v2 = vadd.f32 %v5227_v18, %v1021_v61  ;;  %v3483_v3 = vpop.f32.mrb[91].mxu0  ;;  %v1447_v4 = vadd.f32 %v5227_v18, %v1446_v62  ;;  %v3738_v5 = vpop.f32.mrb[91].mxu1 }
 0x1b7   :  { %2531 = vst.msk [vmem:[%s5837_s3 + $0xb0] sm:$0xf] %vm2486_vm5, %v3046_v63  ;;  %2616 = vst.msk [vmem:[%s5837_s3 + $0x204] sm:$0xf] %vm2486_vm5, %v3131_v0  ;;  %v1685_v6 = vmax.f32 %v1022_v2, 0.0  ;;  %v1770_v7 = vmax.f32 %v1447_v4, 0.0 }
 0x1b8   :  { %v1026_v8 = vpop.f32.mrb[92].mxu0  ;;  %v1451_v9 = vpop.f32.mrb[92].mxu1 }
 0x1b9   :  { %v3047_v10 = vpack.c.bf16 %v1685_v6, %v1685_v6  ;;  %v3132_v11 = vpack.c.bf16 %v1770_v7, %v1770_v7  ;;  %v1027_v12 = vadd.f32 %v5227_v18, %v1026_v8  ;;  %v3486_v13 = vpop.f32.mrb[93].mxu0  ;;  %v1452_v14 = vadd.f32 %v5227_v18, %v1451_v9  ;;  %v3741_v15 = vpop.f32.mrb[93].mxu1 }
 0x1bb   :  { %2532 = vst.msk [vmem:[%s5837_s3 + $0xb4] sm:$0xf] %vm2486_vm5, %v3047_v10  ;;  %2617 = vst.msk [vmem:[%s5837_s3 + $0x208] sm:$0xf] %vm2486_vm5, %v3132_v11  ;;  %v1686_v16 = vmax.f32 %v1027_v12, 0.0  ;;  %v1771_v17 = vmax.f32 %v1452_v14, 0.0 }
 0x1bc   :  { %v1031_v19 = vpop.f32.mrb[94].mxu0  ;;  %v1456_v20 = vpop.f32.mrb[94].mxu1 }
 0x1bd   :  { %v3048_v21 = vpack.c.bf16 %v1686_v16, %v1686_v16  ;;  %v3133_v48 = vpack.c.bf16 %v1771_v17, %v1771_v17  ;;  %v1032_v22 = vadd.f32 %v5227_v18, %v1031_v19  ;;  %v3489_v23 = vpop.f32.mrb[95].mxu0  ;;  %v1457_v24 = vadd.f32 %v5227_v18, %v1456_v20  ;;  %v3744_v25 = vpop.f32.mrb[95].mxu1 }
 0x1bf   :  { %2533 = vst.msk [vmem:[%s5837_s3 + $0xb8] sm:$0xf] %vm2486_vm5, %v3048_v21  ;;  %2618 = vst.msk [vmem:[%s5837_s3 + $0x20c] sm:$0xf] %vm2486_vm5, %v3133_v48  ;;  %v1687_v26 = vmax.f32 %v1032_v22, 0.0  ;;  %v1772_v27 = vmax.f32 %v1457_v24, 0.0 }
 0x1c0   :  { %v1036_v28 = vpop.f32.mrb[96].mxu0  ;;  %v1461_v29 = vpop.f32.mrb[96].mxu1 }
 0x1c1   :  { %v3049_v30 = vpack.c.bf16 %v1687_v26, %v1687_v26  ;;  %v3134_v31 = vpack.c.bf16 %v1772_v27, %v1772_v27  ;;  %v1037_v32 = vadd.f32 %v5227_v18, %v1036_v28  ;;  %v3492_v33 = vpop.f32.mrb[97].mxu0  ;;  %v1462_v34 = vadd.f32 %v5227_v18, %v1461_v29  ;;  %v3747_v35 = vpop.f32.mrb[97].mxu1 }
 0x1c3   :  { %2534 = vst.msk [vmem:[%s5837_s3 + $0xbc] sm:$0xf] %vm2486_vm5, %v3049_v30  ;;  %2619 = vst.msk [vmem:[%s5837_s3 + $0x210] sm:$0xf] %vm2486_vm5, %v3134_v31  ;;  %v1688_v36 = vmax.f32 %v1037_v32, 0.0  ;;  %v1773_v37 = vmax.f32 %v1462_v34, 0.0 }
 0x1c4   :  { %v1041_v38 = vpop.f32.mrb[98].mxu0  ;;  %v1466_v39 = vpop.f32.mrb[98].mxu1 }
 0x1c5   :  { %v3050_v40 = vpack.c.bf16 %v1688_v36, %v1688_v36  ;;  %v3135_v41 = vpack.c.bf16 %v1773_v37, %v1773_v37  ;;  %v1042_v42 = vadd.f32 %v5227_v18, %v1041_v38  ;;  %v3495_v43 = vpop.f32.mrb[99].mxu0  ;;  %v1467_v44 = vadd.f32 %v5227_v18, %v1466_v39  ;;  %v3750_v45 = vpop.f32.mrb[99].mxu1 }
 0x1c7   :  { %2535 = vst.msk [vmem:[%s5837_s3 + $0xc0] sm:$0xf] %vm2486_vm5, %v3050_v40  ;;  %2620 = vst.msk [vmem:[%s5837_s3 + $0x214] sm:$0xf] %vm2486_vm5, %v3135_v41  ;;  %v1689_v46 = vmax.f32 %v1042_v42, 0.0  ;;  %v1774_v47 = vmax.f32 %v1467_v44, 0.0 }
 0x1c8   :  { %v1046_v1 = vpop.f32.mrb[100].mxu0  ;;  %v1471_v49 = vpop.f32.mrb[100].mxu1 }
 0x1c9   :  { %v3051_v50 = vpack.c.bf16 %v1689_v46, %v1689_v46  ;;  %v3136_v51 = vpack.c.bf16 %v1774_v47, %v1774_v47  ;;  %v1047_v52 = vadd.f32 %v5227_v18, %v1046_v1  ;;  %v3498_v53 = vpop.f32.mrb[101].mxu0  ;;  %v1472_v54 = vadd.f32 %v5227_v18, %v1471_v49  ;;  %v3753_v55 = vpop.f32.mrb[101].mxu1 }
 0x1cb   :  { %2536 = vst.msk [vmem:[%s5837_s3 + $0xc4] sm:$0xf] %vm2486_vm5, %v3051_v50  ;;  %2621 = vst.msk [vmem:[%s5837_s3 + $0x218] sm:$0xf] %vm2486_vm5, %v3136_v51  ;;  %v1690_v56 = vmax.f32 %v1047_v52, 0.0  ;;  %v1775_v57 = vmax.f32 %v1472_v54, 0.0 }
 0x1cc   :  { %v1051_v58 = vpop.f32.mrb[102].mxu0  ;;  %v1476_v59 = vpop.f32.mrb[102].mxu1 }
 0x1cd   :  { %v3052_v60 = vpack.c.bf16 %v1690_v56, %v1690_v56  ;;  %v3137_v61 = vpack.c.bf16 %v1775_v57, %v1775_v57  ;;  %v1052_v62 = vadd.f32 %v5227_v18, %v1051_v58  ;;  %v3501_v63 = vpop.f32.mrb[103].mxu0  ;;  %v1477_v0 = vadd.f32 %v5227_v18, %v1476_v59  ;;  %v3756_v2 = vpop.f32.mrb[103].mxu1 }
 0x1cf   :  { %2537 = vst.msk [vmem:[%s5837_s3 + $0xc8] sm:$0xf] %vm2486_vm5, %v3052_v60  ;;  %2622 = vst.msk [vmem:[%s5837_s3 + $0x21c] sm:$0xf] %vm2486_vm5, %v3137_v61  ;;  %v1691_v3 = vmax.f32 %v1052_v62, 0.0  ;;  %v1776_v4 = vmax.f32 %v1477_v0, 0.0 }
 0x1d0   :  { %v1056_v5 = vpop.f32.mrb[104].mxu0  ;;  %v1481_v6 = vpop.f32.mrb[104].mxu1 }
 0x1d1   :  { %v3053_v7 = vpack.c.bf16 %v1691_v3, %v1691_v3  ;;  %v3138_v8 = vpack.c.bf16 %v1776_v4, %v1776_v4  ;;  %v1057_v9 = vadd.f32 %v5227_v18, %v1056_v5  ;;  %v3504_v10 = vpop.f32.mrb[105].mxu0  ;;  %v1482_v11 = vadd.f32 %v5227_v18, %v1481_v6  ;;  %v3759_v12 = vpop.f32.mrb[105].mxu1 }
 0x1d3   :  { %2538 = vst.msk [vmem:[%s5837_s3 + $0xcc] sm:$0xf] %vm2486_vm5, %v3053_v7  ;;  %2623 = vst.msk [vmem:[%s5837_s3 + $0x220] sm:$0xf] %vm2486_vm5, %v3138_v8  ;;  %v1692_v13 = vmax.f32 %v1057_v9, 0.0  ;;  %v1777_v14 = vmax.f32 %v1482_v11, 0.0 }
 0x1d4   :  { %v1061_v15 = vpop.f32.mrb[106].mxu0  ;;  %v1486_v16 = vpop.f32.mrb[106].mxu1 }
 0x1d5   :  { %v3054_v17 = vpack.c.bf16 %v1692_v13, %v1692_v13  ;;  %v3139_v19 = vpack.c.bf16 %v1777_v14, %v1777_v14  ;;  %v1062_v20 = vadd.f32 %v5227_v18, %v1061_v15  ;;  %v3507_v21 = vpop.f32.mrb[107].mxu0  ;;  %v1487_v48 = vadd.f32 %v5227_v18, %v1486_v16  ;;  %v3762_v22 = vpop.f32.mrb[107].mxu1 }
 0x1d7   :  { %2539 = vst.msk [vmem:[%s5837_s3 + $0xd0] sm:$0xf] %vm2486_vm5, %v3054_v17  ;;  %2624 = vst.msk [vmem:[%s5837_s3 + $0x224] sm:$0xf] %vm2486_vm5, %v3139_v19  ;;  %v1693_v23 = vmax.f32 %v1062_v20, 0.0  ;;  %v1778_v24 = vmax.f32 %v1487_v48, 0.0 }
 0x1d8   :  { %v1066_v25 = vpop.f32.mrb[108].mxu0 }
 0x1d9   :  { %v3055_v26 = vpack.c.bf16 %v1693_v23, %v1693_v23  ;;  %v3140_v27 = vpack.c.bf16 %v1778_v24, %v1778_v24  ;;  %v1067_v28 = vadd.f32 %v5227_v18, %v1066_v25  ;;  %v3510_v29 = vpop.f32.mrb[109].mxu0  ;;  %v1491_v30 = vpop.f32.mrb[108].mxu1 }
 0x1da   :  { %v1492_v31 = vadd.f32 %v5227_v18, %v1491_v30  ;;  %v3765_v32 = vpop.f32.mrb[109].mxu1 }
 0x1db   :  { %2540 = vst.msk [vmem:[%s5837_s3 + $0xd4] sm:$0xf] %vm2486_vm5, %v3055_v26  ;;  %2625 = vst.msk [vmem:[%s5837_s3 + $0x228] sm:$0xf] %vm2486_vm5, %v3140_v27  ;;  %v1694_v33 = vmax.f32 %v1067_v28, 0.0 }
 0x1dc   :  { %v1779_v34 = vmax.f32 %v1492_v31, 0.0  ;;  %v1071_v35 = vpop.f32.mrb[110].mxu0 }
 0x1dd   :  { %v3056_v36 = vpack.c.bf16 %v1694_v33, %v1694_v33  ;;  %v1072_v37 = vadd.f32 %v5227_v18, %v1071_v35  ;;  %v3513_v38 = vpop.f32.mrb[111].mxu0  ;;  %v1496_v39 = vpop.f32.mrb[110].mxu1 }
 0x1de   :  { %v3141_v40 = vpack.c.bf16 %v1779_v34, %v1779_v34  ;;  %v1497_v41 = vadd.f32 %v5227_v18, %v1496_v39  ;;  %v3768_v42 = vpop.f32.mrb[111].mxu1 }
 0x1df   :  { %2541 = vst.msk [vmem:[%s5837_s3 + $0xd8] sm:$0xf] %vm2486_vm5, %v3056_v36  ;;  %v1695_v43 = vmax.f32 %v1072_v37, 0.0 }
 0x1e0   :  { %2626 = vst.msk [vmem:[%s5837_s3 + $0x22c] sm:$0xf] %vm2486_vm5, %v3141_v40  ;;  %v1780_v44 = vmax.f32 %v1497_v41, 0.0  ;;  %v1076_v45 = vpop.f32.mrb[112].mxu0 }
 0x1e1   :  { %v3057_v46 = vpack.c.bf16 %v1695_v43, %v1695_v43  ;;  %v1077_v47 = vadd.f32 %v5227_v18, %v1076_v45  ;;  %v3516_v1 = vpop.f32.mrb[113].mxu0  ;;  %v1501_v49 = vpop.f32.mrb[112].mxu1 }
 0x1e2   :  { %v3142_v50 = vpack.c.bf16 %v1780_v44, %v1780_v44  ;;  %v1502_v51 = vadd.f32 %v5227_v18, %v1501_v49  ;;  %v3771_v52 = vpop.f32.mrb[113].mxu1 }
 0x1e3   :  { %2542 = vst.msk [vmem:[%s5837_s3 + $0xdc] sm:$0xf] %vm2486_vm5, %v3057_v46  ;;  %v1696_v53 = vmax.f32 %v1077_v47, 0.0 }
 0x1e4   :  { %2627 = vst.msk [vmem:[%s5837_s3 + $0x230] sm:$0xf] %vm2486_vm5, %v3142_v50  ;;  %v1781_v54 = vmax.f32 %v1502_v51, 0.0  ;;  %v1081_v55 = vpop.f32.mrb[114].mxu0 }
 0x1e5   :  { %v3058_v56 = vpack.c.bf16 %v1696_v53, %v1696_v53  ;;  %v1082_v57 = vadd.f32 %v5227_v18, %v1081_v55  ;;  %v3519_v58 = vpop.f32.mrb[115].mxu0  ;;  %v1506_v59 = vpop.f32.mrb[114].mxu1 }
 0x1e6   :  { %v3143_v60 = vpack.c.bf16 %v1781_v54, %v1781_v54  ;;  %v1507_v61 = vadd.f32 %v5227_v18, %v1506_v59  ;;  %v3774_v62 = vpop.f32.mrb[115].mxu1 }
 0x1e7   :  { %2543 = vst.msk [vmem:[%s5837_s3 + $0xe0] sm:$0xf] %vm2486_vm5, %v3058_v56  ;;  %v1697_v63 = vmax.f32 %v1082_v57, 0.0 }
 0x1e8   :  { %2628 = vst.msk [vmem:[%s5837_s3 + $0x234] sm:$0xf] %vm2486_vm5, %v3143_v60  ;;  %v1782_v0 = vmax.f32 %v1507_v61, 0.0  ;;  %v1086_v2 = vpop.f32.mrb[116].mxu0 }
 0x1e9   :  { %v3059_v3 = vpack.c.bf16 %v1697_v63, %v1697_v63  ;;  %v1087_v4 = vadd.f32 %v5227_v18, %v1086_v2  ;;  %v3522_v5 = vpop.f32.mrb[117].mxu0  ;;  %v1511_v6 = vpop.f32.mrb[116].mxu1 }
 0x1ea   :  { %v3144_v7 = vpack.c.bf16 %v1782_v0, %v1782_v0  ;;  %v1512_v8 = vadd.f32 %v5227_v18, %v1511_v6  ;;  %v3777_v9 = vpop.f32.mrb[117].mxu1 }
 0x1eb   :  { %2544 = vst.msk [vmem:[%s5837_s3 + $0xe4] sm:$0xf] %vm2486_vm5, %v3059_v3  ;;  %v1698_v10 = vmax.f32 %v1087_v4, 0.0 }
 0x1ec   :  { %2629 = vst.msk [vmem:[%s5837_s3 + $0x238] sm:$0xf] %vm2486_vm5, %v3144_v7  ;;  %v1783_v11 = vmax.f32 %v1512_v8, 0.0  ;;  %v1091_v12 = vpop.f32.mrb[118].mxu0 }
 0x1ed   :  { %v3060_v13 = vpack.c.bf16 %v1698_v10, %v1698_v10  ;;  %v1092_v14 = vadd.f32 %v5227_v18, %v1091_v12  ;;  %v3525_v15 = vpop.f32.mrb[119].mxu0  ;;  %v1516_v16 = vpop.f32.mrb[118].mxu1 }
 0x1ee   :  { %v3145_v17 = vpack.c.bf16 %v1783_v11, %v1783_v11  ;;  %v1517_v19 = vadd.f32 %v5227_v18, %v1516_v16  ;;  %v3780_v20 = vpop.f32.mrb[119].mxu1 }
 0x1ef   :  { %2545 = vst.msk [vmem:[%s5837_s3 + $0xe8] sm:$0xf] %vm2486_vm5, %v3060_v13  ;;  %v1699_v21 = vmax.f32 %v1092_v14, 0.0 }
 0x1f0   :  { %2630 = vst.msk [vmem:[%s5837_s3 + $0x23c] sm:$0xf] %vm2486_vm5, %v3145_v17  ;;  %v1784_v48 = vmax.f32 %v1517_v19, 0.0  ;;  %v1096_v22 = vpop.f32.mrb[120].mxu0 }
 0x1f1   :  { %v3061_v23 = vpack.c.bf16 %v1699_v21, %v1699_v21  ;;  %v1097_v24 = vadd.f32 %v5227_v18, %v1096_v22  ;;  %v3528_v25 = vpop.f32.mrb[121].mxu0  ;;  %v1521_v26 = vpop.f32.mrb[120].mxu1 }
 0x1f2   :  { %v3146_v27 = vpack.c.bf16 %v1784_v48, %v1784_v48  ;;  %v1522_v28 = vadd.f32 %v5227_v18, %v1521_v26  ;;  %v3783_v29 = vpop.f32.mrb[121].mxu1 }
 0x1f3   :  { %2546 = vst.msk [vmem:[%s5837_s3 + $0xec] sm:$0xf] %vm2486_vm5, %v3061_v23  ;;  %v1700_v30 = vmax.f32 %v1097_v24, 0.0 }
 0x1f4   :  { %2631 = vst.msk [vmem:[%s5837_s3 + $0x240] sm:$0xf] %vm2486_vm5, %v3146_v27  ;;  %v1785_v31 = vmax.f32 %v1522_v28, 0.0  ;;  %v1101_v32 = vpop.f32.mrb[122].mxu0 }
 0x1f5   :  { %v3062_v33 = vpack.c.bf16 %v1700_v30, %v1700_v30  ;;  %v1102_v34 = vadd.f32 %v5227_v18, %v1101_v32  ;;  %v3531_v35 = vpop.f32.mrb[123].mxu0  ;;  %v1526_v36 = vpop.f32.mrb[122].mxu1 }
 0x1f6   :  { %v3147_v37 = vpack.c.bf16 %v1785_v31, %v1785_v31  ;;  %v1527_v38 = vadd.f32 %v5227_v18, %v1526_v36  ;;  %v3786_v39 = vpop.f32.mrb[123].mxu1 }
 0x1f7   :  { %2547 = vst.msk [vmem:[%s5837_s3 + $0xf0] sm:$0xf] %vm2486_vm5, %v3062_v33  ;;  %v1701_v40 = vmax.f32 %v1102_v34, 0.0 }
 0x1f8   :  { %2632 = vst.msk [vmem:[%s5837_s3 + $0x244] sm:$0xf] %vm2486_vm5, %v3147_v37  ;;  %v1786_v41 = vmax.f32 %v1527_v38, 0.0  ;;  %v1106_v42 = vpop.f32.mrb[124].mxu0 }
 0x1f9   :  { %v3063_v43 = vpack.c.bf16 %v1701_v40, %v1701_v40  ;;  %v1107_v44 = vadd.f32 %v5227_v18, %v1106_v42  ;;  %v3534_v45 = vpop.f32.mrb[125].mxu0  ;;  %v1531_v46 = vpop.f32.mrb[124].mxu1 }
 0x1fa   :  { %v3148_v47 = vpack.c.bf16 %v1786_v41, %v1786_v41  ;;  %v1532_v1 = vadd.f32 %v5227_v18, %v1531_v46  ;;  %v3789_v49 = vpop.f32.mrb[125].mxu1 }
 0x1fb   :  { %2548 = vst.msk [vmem:[%s5837_s3 + $0xf4] sm:$0xf] %vm2486_vm5, %v3063_v43  ;;  %v1702_v50 = vmax.f32 %v1107_v44, 0.0 }
 0x1fc   :  { %2633 = vst.msk [vmem:[%s5837_s3 + $0x248] sm:$0xf] %vm2486_vm5, %v3148_v47  ;;  %v1787_v51 = vmax.f32 %v1532_v1, 0.0  ;;  %v1111_v52 = vpop.f32.mrb[126].mxu0 }
 0x1fd   :  { %v3064_v53 = vpack.c.bf16 %v1702_v50, %v1702_v50  ;;  %v1112_v54 = vadd.f32 %v5227_v18, %v1111_v52  ;;  %v3537_v55 = vpop.f32.mrb[127].mxu0  ;;  %v1536_v56 = vpop.f32.mrb[126].mxu1 }
 0x1fe   :  { %v3149_v57 = vpack.c.bf16 %v1787_v51, %v1787_v51  ;;  %v1537_v58 = vadd.f32 %v5227_v18, %v1536_v56  ;;  %v3792_v59 = vpop.f32.mrb[127].mxu1 }
 0x1ff   :  { %2549 = vst.msk [vmem:[%s5837_s3 + $0xf8] sm:$0xf] %vm2486_vm5, %v3064_v53  ;;  %v1703_v60 = vmax.f32 %v1112_v54, 0.0 }
 0x200   :  { %2634 = vst.msk [vmem:[%s5837_s3 + $0x24c] sm:$0xf] %vm2486_vm5, %v3149_v57  ;;  %v1788_v61 = vmax.f32 %v1537_v58, 0.0  ;;  %v1116_v62 = vpop.f32.mrb[128].mxu0 }
 0x201   :  { %v3065_v63 = vpack.c.bf16 %v1703_v60, %v1703_v60  ;;  %v1117_v0 = vadd.f32 %v5227_v18, %v1116_v62  ;;  %v3540_v2 = vpop.f32.mrb[129].mxu0  ;;  %v1541_v3 = vpop.f32.mrb[128].mxu1 }
 0x202   :  { %v3150_v4 = vpack.c.bf16 %v1788_v61, %v1788_v61  ;;  %v1542_v5 = vadd.f32 %v5227_v18, %v1541_v3  ;;  %v3795_v6 = vpop.f32.mrb[129].mxu1  ;;  %v5679_v61 = vld [vmem:[#allocation4] ss:$0 sm:$0xff] }
 0x203   :  { %2550 = vst.msk [vmem:[%s5837_s3 + $0xfc] sm:$0xf] %vm2486_vm5, %v3065_v63  ;;  %v1704_v7 = vmax.f32 %v1117_v0, 0.0 }
 0x204   :  { %2635 = vst.msk [vmem:[%s5837_s3 + $0x250] sm:$0xf] %vm2486_vm5, %v3150_v4  ;;  %v1789_v8 = vmax.f32 %v1542_v5, 0.0  ;;  %v1121_v9 = vpop.f32.mrb[130].mxu0 }
 0x205   :  { %v3066_v10 = vpack.c.bf16 %v1704_v7, %v1704_v7  ;;  %v1122_v11 = vadd.f32 %v5227_v18, %v1121_v9  ;;  %v3543_v12 = vpop.f32.mrb[131].mxu0  ;;  %v1546_v13 = vpop.f32.mrb[130].mxu1 }
 0x206   :  { %v3151_v14 = vpack.c.bf16 %v1789_v8, %v1789_v8  ;;  %v1547_v15 = vadd.f32 %v5227_v18, %v1546_v13  ;;  %v3798_v16 = vpop.f32.mrb[131].mxu1 }
 0x207   :  { %2551 = vst.msk [vmem:[%s5837_s3 + $0x100] sm:$0xf] %vm2486_vm5, %v3066_v10  ;;  %v1705_v17 = vmax.f32 %v1122_v11, 0.0 }
 0x208   :  { %2636 = vst.msk [vmem:[%s5837_s3 + $0x254] sm:$0xf] %vm2486_vm5, %v3151_v14  ;;  %v1790_v19 = vmax.f32 %v1547_v15, 0.0  ;;  %v1126_v20 = vpop.f32.mrb[132].mxu0 }
 0x209   :  { %v3067_v21 = vpack.c.bf16 %v1705_v17, %v1705_v17  ;;  %v1127_v48 = vadd.f32 %v5227_v18, %v1126_v20  ;;  %v3546_v22 = vpop.f32.mrb[133].mxu0  ;;  %v1551_v23 = vpop.f32.mrb[132].mxu1 }
 0x20a   :  { %v3152_v24 = vpack.c.bf16 %v1790_v19, %v1790_v19  ;;  %v1552_v25 = vadd.f32 %v5227_v18, %v1551_v23  ;;  %v3801_v26 = vpop.f32.mrb[133].mxu1 }
 0x20b   :  { %2552 = vst.msk [vmem:[%s5837_s3 + $0x104] sm:$0xf] %vm2486_vm5, %v3067_v21  ;;  %v1706_v27 = vmax.f32 %v1127_v48, 0.0 }
 0x20c   :  { %2637 = vst.msk [vmem:[%s5837_s3 + $0x258] sm:$0xf] %vm2486_vm5, %v3152_v24  ;;  %v1791_v28 = vmax.f32 %v1552_v25, 0.0  ;;  %v1131_v29 = vpop.f32.mrb[134].mxu0 }
 0x20d   :  { %v3068_v30 = vpack.c.bf16 %v1706_v27, %v1706_v27  ;;  %v1132_v31 = vadd.f32 %v5227_v18, %v1131_v29  ;;  %v3549_v32 = vpop.f32.mrb[135].mxu0  ;;  %v1556_v33 = vpop.f32.mrb[134].mxu1 }
 0x20e   :  { %v3153_v34 = vpack.c.bf16 %v1791_v28, %v1791_v28  ;;  %v1557_v35 = vadd.f32 %v5227_v18, %v1556_v33  ;;  %v3804_v36 = vpop.f32.mrb[135].mxu1 }
 0x20f   :  { %2553 = vst.msk [vmem:[%s5837_s3 + $0x108] sm:$0xf] %vm2486_vm5, %v3068_v30  ;;  %v1707_v37 = vmax.f32 %v1132_v31, 0.0 }
 0x210   :  { %2638 = vst.msk [vmem:[%s5837_s3 + $0x25c] sm:$0xf] %vm2486_vm5, %v3153_v34  ;;  %v1792_v38 = vmax.f32 %v1557_v35, 0.0  ;;  %v1136_v39 = vpop.f32.mrb[136].mxu0 }
 0x211   :  { %v3069_v40 = vpack.c.bf16 %v1707_v37, %v1707_v37  ;;  %v1137_v41 = vadd.f32 %v5227_v18, %v1136_v39  ;;  %v3552_v42 = vpop.f32.mrb[137].mxu0  ;;  %v1561_v43 = vpop.f32.mrb[136].mxu1 }
 0x212   :  { %v3154_v44 = vpack.c.bf16 %v1792_v38, %v1792_v38  ;;  %v1562_v45 = vadd.f32 %v5227_v18, %v1561_v43  ;;  %v3807_v46 = vpop.f32.mrb[137].mxu1 }
 0x213   :  { %2554 = vst.msk [vmem:[%s5837_s3 + $0x10c] sm:$0xf] %vm2486_vm5, %v3069_v40  ;;  %v1708_v47 = vmax.f32 %v1137_v41, 0.0 }
 0x214   :  { %2639 = vst.msk [vmem:[%s5837_s3 + $0x260] sm:$0xf] %vm2486_vm5, %v3154_v44  ;;  %v1793_v1 = vmax.f32 %v1562_v45, 0.0  ;;  %v1141_v49 = vpop.f32.mrb[138].mxu0 }
 0x215   :  { %v3070_v50 = vpack.c.bf16 %v1708_v47, %v1708_v47  ;;  %v1142_v51 = vadd.f32 %v5227_v18, %v1141_v49  ;;  %v3555_v52 = vpop.f32.mrb[139].mxu0  ;;  %v1566_v53 = vpop.f32.mrb[138].mxu1 }
 0x216   :  { %v3155_v54 = vpack.c.bf16 %v1793_v1, %v1793_v1  ;;  %v1567_v55 = vadd.f32 %v5227_v18, %v1566_v53  ;;  %v3810_v56 = vpop.f32.mrb[139].mxu1 }
 0x217   :  { %2555 = vst.msk [vmem:[%s5837_s3 + $0x110] sm:$0xf] %vm2486_vm5, %v3070_v50  ;;  %v1709_v57 = vmax.f32 %v1142_v51, 0.0 }
 0x218   :  { %2640 = vst.msk [vmem:[%s5837_s3 + $0x264] sm:$0xf] %vm2486_vm5, %v3155_v54  ;;  %v1794_v58 = vmax.f32 %v1567_v55, 0.0  ;;  %v1146_v59 = vpop.f32.mrb[140].mxu0 }
 0x219   :  { %v3071_v60 = vpack.c.bf16 %v1709_v57, %v1709_v57  ;;  %v1147_v62 = vadd.f32 %v5679_v61, %v1146_v59  ;;  %v3558_v18 = vpop.f32.mrb[141].mxu0  ;;  %v1571_v63 = vpop.f32.mrb[140].mxu1 }
 0x21a   :  { %v3156_v0 = vpack.c.bf16 %v1794_v58, %v1794_v58  ;;  %v1572_v2 = vadd.f32 %v5679_v61, %v1571_v63  ;;  %v3813_v3 = vpop.f32.mrb[141].mxu1 }
 0x21b   :  { %2556 = vst.msk [vmem:[%s5837_s3 + $0x114] sm:$0xf] %vm2486_vm5, %v3071_v60  ;;  %v1710_v4 = vmax.f32 %v1147_v62, 0.0 }
 0x21c   :  { %2641 = vst.msk [vmem:[%s5837_s3 + $0x268] sm:$0xf] %vm2486_vm5, %v3156_v0  ;;  %v1795_v5 = vmax.f32 %v1572_v2, 0.0  ;;  %v1151_v6 = vpop.f32.mrb[142].mxu0 }
 0x21d   :  { %v3072_v7 = vpack.c.bf16 %v1710_v4, %v1710_v4  ;;  %v1152_v8 = vadd.f32 %v5679_v61, %v1151_v6  ;;  %v3561_v9 = vpop.f32.mrb[143].mxu0  ;;  %v1576_v10 = vpop.f32.mrb[142].mxu1 }
 0x21e   :  { %v3157_v11 = vpack.c.bf16 %v1795_v5, %v1795_v5  ;;  %v1577_v12 = vadd.f32 %v5679_v61, %v1576_v10  ;;  %v3816_v13 = vpop.f32.mrb[143].mxu1 }
 0x21f   :  { %2557 = vst.msk [vmem:[%s5837_s3 + $0x118] sm:$0xf] %vm2486_vm5, %v3072_v7  ;;  %v1711_v14 = vmax.f32 %v1152_v8, 0.0 }
 0x220   :  { %2642 = vst.msk [vmem:[%s5837_s3 + $0x26c] sm:$0xf] %vm2486_vm5, %v3157_v11  ;;  %v1796_v15 = vmax.f32 %v1577_v12, 0.0  ;;  %v1156_v16 = vpop.f32.mrb[144].mxu0 }
 0x221   :  { %v3073_v17 = vpack.c.bf16 %v1711_v14, %v1711_v14  ;;  %v1157_v19 = vadd.f32 %v5679_v61, %v1156_v16  ;;  %v3564_v20 = vpop.f32.mrb[145].mxu0  ;;  %v1581_v21 = vpop.f32.mrb[144].mxu1 }
 0x222   :  { %v3158_v48 = vpack.c.bf16 %v1796_v15, %v1796_v15  ;;  %v1582_v22 = vadd.f32 %v5679_v61, %v1581_v21  ;;  %v3819_v23 = vpop.f32.mrb[145].mxu1 }
 0x223   :  { %2558 = vst.msk [vmem:[%s5837_s3 + $0x11c] sm:$0xf] %vm2486_vm5, %v3073_v17  ;;  %v1712_v24 = vmax.f32 %v1157_v19, 0.0 }
 0x224   :  { %2643 = vst.msk [vmem:[%s5837_s3 + $0x270] sm:$0xf] %vm2486_vm5, %v3158_v48  ;;  %v1797_v25 = vmax.f32 %v1582_v22, 0.0  ;;  %v1161_v26 = vpop.f32.mrb[146].mxu0 }
 0x225   :  { %v3074_v27 = vpack.c.bf16 %v1712_v24, %v1712_v24  ;;  %v1162_v28 = vadd.f32 %v5679_v61, %v1161_v26  ;;  %v3567_v29 = vpop.f32.mrb[147].mxu0  ;;  %v1586_v30 = vpop.f32.mrb[146].mxu1 }
 0x226   :  { %v3159_v31 = vpack.c.bf16 %v1797_v25, %v1797_v25  ;;  %v1587_v32 = vadd.f32 %v5679_v61, %v1586_v30  ;;  %v3822_v33 = vpop.f32.mrb[147].mxu1 }
 0x227   :  { %2559 = vst.msk [vmem:[%s5837_s3 + $0x120] sm:$0xf] %vm2486_vm5, %v3074_v27  ;;  %v1713_v34 = vmax.f32 %v1162_v28, 0.0 }
 0x228   :  { %2644 = vst.msk [vmem:[%s5837_s3 + $0x274] sm:$0xf] %vm2486_vm5, %v3159_v31  ;;  %v1798_v35 = vmax.f32 %v1587_v32, 0.0  ;;  %v1166_v36 = vpop.f32.mrb[148].mxu0 }
 0x229   :  { %v3075_v37 = vpack.c.bf16 %v1713_v34, %v1713_v34  ;;  %v1167_v38 = vadd.f32 %v5679_v61, %v1166_v36  ;;  %v3570_v39 = vpop.f32.mrb[149].mxu0  ;;  %v1591_v40 = vpop.f32.mrb[148].mxu1 }
 0x22a   :  { %v3160_v41 = vpack.c.bf16 %v1798_v35, %v1798_v35  ;;  %v1592_v42 = vadd.f32 %v5679_v61, %v1591_v40  ;;  %v3825_v43 = vpop.f32.mrb[149].mxu1 }
 0x22b   :  { %2560 = vst.msk [vmem:[%s5837_s3 + $0x124] sm:$0xf] %vm2486_vm5, %v3075_v37  ;;  %v1714_v44 = vmax.f32 %v1167_v38, 0.0 }
 0x22c   :  { %2645 = vst.msk [vmem:[%s5837_s3 + $0x278] sm:$0xf] %vm2486_vm5, %v3160_v41  ;;  %v1799_v45 = vmax.f32 %v1592_v42, 0.0  ;;  %v1171_v46 = vpop.f32.mrb[150].mxu0 }
 0x22d   :  { %v3076_v47 = vpack.c.bf16 %v1714_v44, %v1714_v44  ;;  %v1172_v1 = vadd.f32 %v5679_v61, %v1171_v46  ;;  %v3573_v49 = vpop.f32.mrb[151].mxu0  ;;  %v1596_v50 = vpop.f32.mrb[150].mxu1 }
 0x22e   :  { %v3161_v51 = vpack.c.bf16 %v1799_v45, %v1799_v45  ;;  %v1597_v52 = vadd.f32 %v5679_v61, %v1596_v50  ;;  %v3828_v53 = vpop.f32.mrb[151].mxu1 }
 0x22f   :  { %2561 = vst.msk [vmem:[%s5837_s3 + $0x128] sm:$0xf] %vm2486_vm5, %v3076_v47  ;;  %v1715_v54 = vmax.f32 %v1172_v1, 0.0 }
 0x230   :  { %2646 = vst.msk [vmem:[%s5837_s3 + $0x27c] sm:$0xf] %vm2486_vm5, %v3161_v51  ;;  %v1800_v55 = vmax.f32 %v1597_v52, 0.0  ;;  %v1176_v56 = vpop.f32.mrb[152].mxu0 }
 0x231   :  { %v3077_v57 = vpack.c.bf16 %v1715_v54, %v1715_v54  ;;  %v1177_v58 = vadd.f32 %v5679_v61, %v1176_v56  ;;  %v3576_v59 = vpop.f32.mrb[153].mxu0  ;;  %v1601_v60 = vpop.f32.mrb[152].mxu1 }
 0x232   :  { %v3162_v62 = vpack.c.bf16 %v1800_v55, %v1800_v55  ;;  %v1602_v18 = vadd.f32 %v5679_v61, %v1601_v60  ;;  %v3831_v63 = vpop.f32.mrb[153].mxu1 }
 0x233   :  { %2562 = vst.msk [vmem:[%s5837_s3 + $0x12c] sm:$0xf] %vm2486_vm5, %v3077_v57  ;;  %v1716_v0 = vmax.f32 %v1177_v58, 0.0 }
 0x234   :  { %2647 = vst.msk [vmem:[%s5837_s3 + $0x280] sm:$0xf] %vm2486_vm5, %v3162_v62  ;;  %v1801_v2 = vmax.f32 %v1602_v18, 0.0  ;;  %v1181_v3 = vpop.f32.mrb[154].mxu0 }
 0x235   :  { %v3078_v4 = vpack.c.bf16 %v1716_v0, %v1716_v0  ;;  %v1182_v5 = vadd.f32 %v5679_v61, %v1181_v3  ;;  %v3579_v6 = vpop.f32.mrb[155].mxu0  ;;  %v1606_v7 = vpop.f32.mrb[154].mxu1 }
 0x236   :  { %v3163_v8 = vpack.c.bf16 %v1801_v2, %v1801_v2  ;;  %v1607_v9 = vadd.f32 %v5679_v61, %v1606_v7  ;;  %v3834_v10 = vpop.f32.mrb[155].mxu1 }
 0x237   :  { %2563 = vst.msk [vmem:[%s5837_s3 + $0x130] sm:$0xf] %vm2486_vm5, %v3078_v4  ;;  %v1717_v11 = vmax.f32 %v1182_v5, 0.0 }
 0x238   :  { %2648 = vst.msk [vmem:[%s5837_s3 + $0x284] sm:$0xf] %vm2486_vm5, %v3163_v8  ;;  %v1802_v12 = vmax.f32 %v1607_v9, 0.0  ;;  %v1186_v13 = vpop.f32.mrb[156].mxu0 }
 0x239   :  { %v3079_v14 = vpack.c.bf16 %v1717_v11, %v1717_v11  ;;  %v1187_v15 = vadd.f32 %v5679_v61, %v1186_v13  ;;  %v3582_v16 = vpop.f32.mrb[157].mxu0  ;;  %v1611_v17 = vpop.f32.mrb[156].mxu1 }
 0x23a   :  { %v3164_v19 = vpack.c.bf16 %v1802_v12, %v1802_v12  ;;  %v1612_v20 = vadd.f32 %v5679_v61, %v1611_v17  ;;  %v3837_v21 = vpop.f32.mrb[157].mxu1 }
 0x23b   :  { %2564 = vst.msk [vmem:[%s5837_s3 + $0x134] sm:$0xf] %vm2486_vm5, %v3079_v14  ;;  %v1718_v48 = vmax.f32 %v1187_v15, 0.0 }
 0x23c   :  { %2649 = vst.msk [vmem:[%s5837_s3 + $0x288] sm:$0xf] %vm2486_vm5, %v3164_v19  ;;  %v1803_v22 = vmax.f32 %v1612_v20, 0.0  ;;  %v1191_v23 = vpop.f32.mrb[158].mxu0 }
 0x23d   :  { %v3080_v24 = vpack.c.bf16 %v1718_v48, %v1718_v48  ;;  %v1192_v25 = vadd.f32 %v5679_v61, %v1191_v23  ;;  %v3585_v26 = vpop.f32.mrb[159].mxu0  ;;  %v1616_v27 = vpop.f32.mrb[158].mxu1 }
 0x23e   :  { %v3165_v28 = vpack.c.bf16 %v1803_v22, %v1803_v22  ;;  %v1617_v29 = vadd.f32 %v5679_v61, %v1616_v27  ;;  %v3840_v30 = vpop.f32.mrb[159].mxu1 }
 0x23f   :  { %2565 = vst.msk [vmem:[%s5837_s3 + $0x138] sm:$0xf] %vm2486_vm5, %v3080_v24  ;;  %v1719_v31 = vmax.f32 %v1192_v25, 0.0 }
 0x240   :  { %2650 = vst.msk [vmem:[%s5837_s3 + $0x28c] sm:$0xf] %vm2486_vm5, %v3165_v28  ;;  %v1804_v32 = vmax.f32 %v1617_v29, 0.0  ;;  %v1196_v33 = vpop.f32.mrb[160].mxu0 }
 0x241   :  { %v3081_v34 = vpack.c.bf16 %v1719_v31, %v1719_v31  ;;  %v1197_v35 = vadd.f32 %v5679_v61, %v1196_v33  ;;  %v3588_v36 = vpop.f32.mrb[161].mxu0  ;;  %v1621_v37 = vpop.f32.mrb[160].mxu1 }
 0x242   :  { %v3166_v38 = vpack.c.bf16 %v1804_v32, %v1804_v32  ;;  %v1622_v39 = vadd.f32 %v5679_v61, %v1621_v37  ;;  %v3843_v40 = vpop.f32.mrb[161].mxu1 }
 0x243   :  { %2566 = vst.msk [vmem:[%s5837_s3 + $0x13c] sm:$0xf] %vm2486_vm5, %v3081_v34  ;;  %v1720_v41 = vmax.f32 %v1197_v35, 0.0 }
 0x244   :  { %2651 = vst.msk [vmem:[%s5837_s3 + $0x290] sm:$0xf] %vm2486_vm5, %v3166_v38  ;;  %v1805_v42 = vmax.f32 %v1622_v39, 0.0  ;;  %v1201_v43 = vpop.f32.mrb[162].mxu0 }
 0x245   :  { %v3082_v44 = vpack.c.bf16 %v1720_v41, %v1720_v41  ;;  %v1202_v45 = vadd.f32 %v5679_v61, %v1201_v43  ;;  %v3591_v46 = vpop.f32.mrb[163].mxu0  ;;  %v1626_v47 = vpop.f32.mrb[162].mxu1 }
 0x246   :  { %v3167_v1 = vpack.c.bf16 %v1805_v42, %v1805_v42  ;;  %v1627_v49 = vadd.f32 %v5679_v61, %v1626_v47  ;;  %v3846_v50 = vpop.f32.mrb[163].mxu1 }
 0x247   :  { %2567 = vst.msk [vmem:[%s5837_s3 + $0x140] sm:$0xf] %vm2486_vm5, %v3082_v44  ;;  %v1721_v51 = vmax.f32 %v1202_v45, 0.0 }
 0x248   :  { %2652 = vst.msk [vmem:[%s5837_s3 + $0x294] sm:$0xf] %vm2486_vm5, %v3167_v1  ;;  %v1806_v52 = vmax.f32 %v1627_v49, 0.0  ;;  %v1206_v53 = vpop.f32.mrb[164].mxu0 }
 0x249   :  { %v3083_v54 = vpack.c.bf16 %v1721_v51, %v1721_v51  ;;  %v1207_v55 = vadd.f32 %v5679_v61, %v1206_v53  ;;  %v3594_v56 = vpop.f32.mrb[165].mxu0  ;;  %v1631_v57 = vpop.f32.mrb[164].mxu1 }
 0x24a   :  { %v3168_v58 = vpack.c.bf16 %v1806_v52, %v1806_v52  ;;  %v1632_v59 = vadd.f32 %v5679_v61, %v1631_v57  ;;  %v3849_v60 = vpop.f32.mrb[165].mxu1 }
 0x24b   :  { %2568 = vst.msk [vmem:[%s5837_s3 + $0x144] sm:$0xf] %vm2486_vm5, %v3083_v54  ;;  %v1722_v62 = vmax.f32 %v1207_v55, 0.0 }
 0x24c   :  { %2653 = vst.msk [vmem:[%s5837_s3 + $0x298] sm:$0xf] %vm2486_vm5, %v3168_v58  ;;  %v1807_v18 = vmax.f32 %v1632_v59, 0.0  ;;  %v1211_v63 = vpop.f32.mrb[166].mxu0 }
 0x24d   :  { %v3084_v0 = vpack.c.bf16 %v1722_v62, %v1722_v62  ;;  %v1212_v2 = vadd.f32 %v5679_v61, %v1211_v63  ;;  %v3597_v3 = vpop.f32.mrb[167].mxu0  ;;  %v1636_v4 = vpop.f32.mrb[166].mxu1 }
 0x24e   :  { %v3169_v5 = vpack.c.bf16 %v1807_v18, %v1807_v18  ;;  %v1637_v6 = vadd.f32 %v5679_v61, %v1636_v4  ;;  %v3852_v7 = vpop.f32.mrb[167].mxu1 }
 0x24f   :  { %2569 = vst.msk [vmem:[%s5837_s3 + $0x148] sm:$0xf] %vm2486_vm5, %v3084_v0  ;;  %v1723_v8 = vmax.f32 %v1212_v2, 0.0 }
 0x250   :  { %2654 = vst.msk [vmem:[%s5837_s3 + $0x29c] sm:$0xf] %vm2486_vm5, %v3169_v5  ;;  %v1808_v9 = vmax.f32 %v1637_v6, 0.0  ;;  %v1216_v10 = vpop.f32.mrb[168].mxu0 }
 0x251   :  { %v3085_v11 = vpack.c.bf16 %v1723_v8, %v1723_v8  ;;  %v1217_v12 = vadd.f32 %v5679_v61, %v1216_v10  ;;  %v3600_v13 = vpop.f32.mrb[169].mxu0 }
 0x252   :  { %v3170_v14 = vpack.c.bf16 %v1808_v9, %v1808_v9 }
 0x253   :  { %2570 = vst.msk [vmem:[%s5837_s3 + $0x14c] sm:$0xf] %vm2486_vm5, %v3085_v11  ;;  %v1724_v15 = vmax.f32 %v1217_v12, 0.0 }
 0x254   :  { %2655 = vst.msk [vmem:[%s5837_s3 + $0x2a0] sm:$0xf] %vm2486_vm5, %v3170_v14 }
 0x255   :  { %v3086_v16 = vpack.c.bf16 %v1724_v15, %v1724_v15 }
 0x257   :  { %2571 = vst.msk [vmem:[%s5837_s3 + $0x150] sm:$0xf] %vm2486_vm5, %v3086_v16 }
 0x258   :  { %2660 = vsyncpa [#allocation3], 1 }
 0x259   :  { %2661 = vsyncpa [#allocation5], 1 }

// kernel: my_model_forward.3
= control target key start
LH: loop header
LB: loop body
LE: loop exit
PB: predicated region body
PF: predicated region fallthrough
CT: control target
= control target key end

     0   :  { %10 = vsyncpa [#allocation3], 0  ;;  %s20998_s0 = inlined_call_operand.vmem [shape: bf16[2,21632], index: 0, kind: input, shape index: {}]   ;;  %s20999_s1 = inlined_call_operand.hbm [shape: bf16[21632,128], index: 1, kind: input, shape index: {}]   ;;  %s21000_s2 = inlined_call_operand.hbm [shape: f32[1,128], index: 2, kind: input, shape index: {}]   ;;  %s21001_s3 = inlined_call_operand.vmem [shape: f32[128,10], index: 3, kind: input, shape index: {}]   ;;  %s21002_s4 = inlined_call_operand.hbm [shape: f32[1,10], index: 4, kind: input, shape index: {}]   ;;  %s21003_s5 = inlined_call_operand.hbm [shape: f32[2,10], index: 5, kind: output, shape index: {}]  }
   0x1   :  { %11 = vsyncpa [#allocation6], 0 }
   0x2   :  { %12 = vsyncpa [#allocation4], 0  ;;  %s20450_s18 = smov [#allocation5]   ;;  %s20451_s20 = smov [#allocation2]  }
   0x3   :  { %s33_s19 = sshll.u32 %s20450_s18, 4  ;;  %s20_s21 = sshll.u32 %s20451_s20, 4  ;;  %s34_s19 = int_to_ptr.vmem [resolvable:$true] %s33_s19  ;;  %s20490_s21 = int_to_ptr.vmem [resolvable:$true] %s20_s21 }
   0x4   :  { %s20356_s24 = scalar_lea.hbm %s21000_s2, 16 }
   0x5   :  { %p20357_p0 = scmp.ne.s32.totalorder %s21000_s2, %s20356_s24  ;;  %p20360_p1 = scmp.lt.u32.totalorder %s20356_s24, %s21000_s2 }
   0x7   :  { %p20362_p2 = pnand %p20360_p1, %p20357_p0 }
   0x9   :  { %20365 = shalt.err (!%p20362_p2)
}
   0xa   :  { %s20366_s29 = scalar_lea.vmem %s34_s19, 16  ;;  %s20370_s30 = scalar_lea.vmem %s34_s19, 32 }
   0xb   :  { %p20367_p3 = scmp.ne.s32.totalorder %s34_s19, %s20366_s29  ;;  %p20371_p4 = scmp.lt.s32.totalorder %s34_s19, %s34_s19 }
   0xc   :  { %p20372_p5 = scmp.lt.s32.totalorder %s20370_s30, %s20366_s29 }
   0xe   :  { %p20373_p6 = por %p20372_p5, %p20371_p4 }
  0x10   :  { %p20374_p7 = pnand %p20373_p6, %p20367_p3 }
  0x12   :  { %20377 = shalt.err (!%p20374_p7)
}
  0x13   :  { %36 = dma.hbm_to_vmem [thread:$0]  %s21000_s2, 16, %s34_s19, [#allocation6]  }
  0x14   :  { %s20378_s10 = scalar_lea.hbm %s20999_s1, 173056 }
  0x15   :  { %p20379_p8 = scmp.ne.s32.totalorder %s20999_s1, %s20378_s10  ;;  %p20382_p9 = scmp.lt.u32.totalorder %s20378_s10, %s20999_s1 }
  0x17   :  { %p20384_p10 = pnand %p20382_p9, %p20379_p8 }
  0x19   :  { %20387 = shalt.err (!%p20384_p10)
}
  0x1a   :  { %s20388_s15 = scalar_lea.vmem %s20490_s21, 173056  ;;  %p20393_p12 = scmp.lt.s32.totalorder %s20490_s21, %s20490_s21 }
  0x1b   :  { %p20389_p11 = scmp.ne.s32.totalorder %s20490_s21, %s20388_s15  ;;  %p20394_p13 = scmp.lt.s32.totalorder %s20388_s15, %s20388_s15 }
  0x1d   :  { %p20395_p0 = por %p20394_p13, %p20393_p12 }
  0x1f   :  { %p20396_p1 = pnand %p20395_p0, %p20389_p11 }
  0x21   :  { %20399 = shalt.err (!%p20396_p1)
}
  0x22   :  { %s20452_s2 = smov 64   ;;  %s20453_s16 = smov 4  }
  0x23   :  { %26 = dma.hbm_to_vmem [thread:$0]  %s20999_s1, 173056, %s20490_s21, [#allocation3], %s20452_s2, %s20452_s2, %s20453_s16  }
  0x24   :  { %s20454_s19 = smov [#allocation7]   ;;  %s20400_s24 = scalar_lea.hbm %s21002_s4, 16 }
  0x25   :  { %s45_s20 = sshll.u32 %s20454_s19, 4  ;;  %p20401_p2 = scmp.ne.s32.totalorder %s21002_s4, %s20400_s24  ;;  %s46_s20 = int_to_ptr.vmem [resolvable:$true] %s45_s20 }
  0x26   :  { %p20404_p3 = scmp.lt.u32.totalorder %s20400_s24, %s21002_s4 }
  0x28   :  { %p20406_p4 = pnand %p20404_p3, %p20401_p2 }
  0x2a   :  { %20409 = shalt.err (!%p20406_p4)
}
  0x2b   :  { %s20410_s29 = scalar_lea.vmem %s46_s20, 16  ;;  %s20414_s1 = scalar_lea.vmem %s46_s20, 32 }
  0x2c   :  { %p20411_p5 = scmp.ne.s32.totalorder %s46_s20, %s20410_s29  ;;  %p20415_p6 = scmp.lt.s32.totalorder %s46_s20, %s46_s20 }
  0x2d   :  { %p20416_p7 = scmp.lt.s32.totalorder %s20414_s1, %s20410_s29 }
  0x2f   :  { %p20417_p8 = por %p20416_p7, %p20415_p6 }
  0x31   :  { %p20418_p9 = pnand %p20417_p8, %p20411_p5 }
  0x33   :  { %20421 = shalt.err (!%p20418_p9)
}
  0x34   :  { %48 = dma.hbm_to_vmem [thread:$0]  %s21002_s4, 16, %s46_s20, [#allocation6]  }
  0x35   :  { %20444 = dma.done.wait [#allocation3], 173056  }
  0x36   :  { %20445 = vsyncadd [#allocation3], 4294794240 }
  0x37   :  { %20446 = dma.done.wait [#allocation6], 32  }
  0x38   :  { %20447 = vsyncadd [#allocation6], 4294967264  ;;  %v18979_v0 = vld [vmem:[#allocation2 + $0x40] sm:$0xff]   ;;  %v18983_v4 = vld [vmem:[#allocation2 + $0x48] sm:$0xff]   ;;  %v20455_v21 = vmov 1966171168   ;;  %v2818_v23 = vlaneseq }
  0x39   :  { %v18980_v1 = vld [vmem:[#allocation2] sm:$0xff]   ;;  %17016 = vmatprep.subr.bf16.mxu0 %v18979_v0  ;;  %v18984_v5 = vld [vmem:[#allocation2 + $0x8] sm:$0xff]   ;;  %v18987_v8 = vld [vmem:[#allocation2 + $0x50] sm:$0xff]   ;;  %v2816_v22 = vunpack.c.l.s4 %v20455_v21  ;;  %vm20457_vm0 = vmmov 0   ;;  %vm15632_vm1 = vcmask 74752  }
  0x3a   :  { %v18981_v2 = vld [vmem:[#allocation2 + $0xc0] sm:$0xff]   ;;  %17017 = vmatpush3.bf16.msra.mxu0 %v18980_v1  ;;  %v18985_v6 = vld [vmem:[#allocation2 + $0xc8] sm:$0xff]   ;;  %v18988_v9 = vld [vmem:[#allocation2 + $0x10] sm:$0xff]   ;;  %v2819_v29 = vshrl.u32 %v2818_v23, 7 }
  0x3b   :  { %v18982_v3 = vld [vmem:[#allocation2 + $0x80] sm:$0xff]   ;;  %17038 = vmatprep.subr.bf16.mxu1 %v18981_v2  ;;  %17018 = vmatprep.subr.bf16.mxu0 %v18983_v4  ;;  %v18986_v7 = vld [vmem:[#allocation2 + $0x88] sm:$0xff]   ;;  %v18989_v10 = vld [vmem:[#allocation2 + $0xd0] sm:$0xff]   ;;  %v2817_v28 = vunpack.c.0.s8 %v2816_v22 }
  0x3c   :  { %17039 = vmatpush3.bf16.msra.mxu1 %v18982_v3  ;;  %v18990_v11 = vld [vmem:[#allocation2 + $0x90] sm:$0xff]   ;;  %v18991_v12 = vld [vmem:[#allocation2 + $0x58] sm:$0xff]   ;;  %v18995_v16 = vld [vmem:[#allocation2 + $0x60] sm:$0xff]  }
  0x3d   :  { %17040 = vmatprep.subr.bf16.mxu1 %v18985_v6  ;;  %v18992_v13 = vld [vmem:[#allocation2 + $0x18] sm:$0xff]   ;;  %v18996_v17 = vld [vmem:[#allocation2 + $0x20] sm:$0xff]   ;;  %v18999_v20 = vld [vmem:[#allocation2 + $0x68] sm:$0xff]   ;;  %v20533_v34 = vsub.s32 %v2817_v28, %v2819_v29 }
  0x3e   :  { %17019 = vmatpush3.bf16.msra.mxu0 %v18984_v5  ;;  %v18993_v14 = vld [vmem:[#allocation2 + $0xd8] sm:$0xff]   ;;  %v18997_v18 = vld [vmem:[#allocation2 + $0xe0] sm:$0xff]   ;;  %v19000_v24 = vld [vmem:[#allocation2 + $0x28] sm:$0xff]  }
  0x3f   :  { %17020 = vmatprep.subr.bf16.mxu0 %v18987_v8  ;;  %v18994_v15 = vld [vmem:[#allocation2 + $0x98] sm:$0xff]   ;;  %v18998_v19 = vld [vmem:[#allocation2 + $0xa0] sm:$0xff]   ;;  %v19001_v25 = vld [vmem:[#allocation2 + $0xe8] sm:$0xff]  }
  0x40   :  { %17041 = vmatpush3.bf16.msra.mxu1 %v18986_v7  ;;  %v19002_v26 = vld [vmem:[#allocation2 + $0xa8] sm:$0xff]   ;;  %v19003_v27 = vld [vmem:[#allocation2 + $0x70] sm:$0xff]   ;;  %v19007_v33 = vld [vmem:[#allocation2 + $0x78] sm:$0xff]  }
  0x41   :  { %17042 = vmatprep.subr.bf16.mxu1 %v18989_v10  ;;  %v19004_v30 = vld [vmem:[#allocation2 + $0x30] sm:$0xff]   ;;  %v19008_v35 = vld [vmem:[#allocation2 + $0x38] sm:$0xff]   ;;  %v59_v37 = vld [vmem:[%s20998_s0] sm:$0xff] }
  0x42   :  { %17021 = vmatpush3.bf16.msra.mxu0 %v18988_v9  ;;  %v19005_v31 = vld [vmem:[#allocation2 + $0xf0] sm:$0xff]   ;;  %v19009_v36 = vld [vmem:[#allocation2 + $0xf8] sm:$0xff]   ;;  %v2814_v38 = vcombine.high %v59_v37, %v59_v37  ;;  %v2821_v39 = vrot.slane %v59_v37, %v20533_v34  ;;  %v19012_v41 = vld [vmem:[#allocation2 + $0x140] sm:$0xff]  }
  0x43   :  { %17022 = vmatprep.subr.bf16.mxu0 %v18991_v12  ;;  %v19006_v32 = vld [vmem:[#allocation2 + $0xb0] sm:$0xff]   ;;  %v19011_v40 = vld [vmem:[#allocation2 + $0xb8] sm:$0xff]   ;;  %v19013_v44 = vld [vmem:[#allocation2 + $0x100] sm:$0xff]  }
  0x44   :  { %17043 = vmatpush3.bf16.msra.mxu1 %v18990_v11  ;;  %v2829_v42 = vcombine.high %v2821_v39, %v2821_v39  ;;  %v2837_v43 = vrot.slane %v2821_v39, %v20533_v34  ;;  %v20541_v45 = vrot.slane %v2814_v38, %v20533_v34  ;;  %v19014_v46 = vld [vmem:[#allocation2 + $0x1c0] sm:$0xff]   ;;  %v19016_v51 = vld [vmem:[#allocation2 + $0x148] sm:$0xff]   ;;  %v19020_v58 = vld [vmem:[#allocation2 + $0x150] sm:$0xff]  }
  0x45   :  { %17044 = vmatprep.subr.bf16.mxu1 %v18993_v14  ;;  %v19015_v48 = vld [vmem:[#allocation2 + $0x180] sm:$0xff]   ;;  %v19017_v53 = vld [vmem:[#allocation2 + $0x108] sm:$0xff]   ;;  %v19021_v59 = vld [vmem:[#allocation2 + $0x110] sm:$0xff]  }
  0x46   :  { %17023 = vmatpush3.bf16.msra.mxu0 %v18992_v13  ;;  %v2851_v47 = vrot.slane %v2829_v42, %v20533_v34  ;;  %v2830_v49 = vcombine.high %v20541_v45, %v20541_v45  ;;  %v2859_v50 = vcombine.high %v2837_v43, %v2837_v43  ;;  %v19018_v55 = vld [vmem:[#allocation2 + $0x1c8] sm:$0xff]   ;;  %v19022_v60 = vld [vmem:[#allocation2 + $0x1d0] sm:$0xff]   ;;  %v19024_v62 = vld [vmem:[#allocation2 + $0x158] sm:$0xff]  }
  0x47   :  { %17024 = vmatprep.subr.bf16.mxu0 %v18995_v16  ;;  %v19019_v56 = vld [vmem:[#allocation2 + $0x188] sm:$0xff]   ;;  %v19023_v61 = vld [vmem:[#allocation2 + $0x190] sm:$0xff]   ;;  %v19025_v63 = vld [vmem:[#allocation2 + $0x118] sm:$0xff]  }
  0x48   :  { %17045 = vmatpush3.bf16.msra.mxu1 %v18994_v15  ;;  %12170 = vmatprep.mubr.bf16.mxu0 %v2851_v47  ;;  %v2861_v52 = vcombine.high %v2851_v47, %v2851_v47  ;;  %v2858_v54 = vrot.slane %v2830_v49, %v20533_v34  ;;  %v19026_v0 = vld [vmem:[#allocation2 + $0x1d8] sm:$0xff]   ;;  %v19028_v2 = vld [vmem:[#allocation2 + $0x160] sm:$0xff]   ;;  %v19032_v6 = vld [vmem:[#allocation2 + $0x168] sm:$0xff]  }
  0x49   :  { %17046 = vmatprep.subr.bf16.mxu1 %v18997_v18  ;;  %v19027_v1 = vld [vmem:[#allocation2 + $0x198] sm:$0xff]   ;;  %v19029_v3 = vld [vmem:[#allocation2 + $0x120] sm:$0xff]   ;;  %v19033_v7 = vld [vmem:[#allocation2 + $0x128] sm:$0xff]   ;;  %v2844_v18 = vrot.slane %v20541_v45, %v20533_v34 }
  0x4a   :  { %17025 = vmatpush3.bf16.msra.mxu0 %v18996_v17  ;;  %12210 = vmatprep.mubr.bf16.mxu1 %v2861_v52  ;;  %v2862_v57 = vcombine.high %v2858_v54, %v2858_v54  ;;  %v19030_v4 = vld [vmem:[#allocation2 + $0x1e0] sm:$0xff]   ;;  %v19034_v8 = vld [vmem:[#allocation2 + $0x1e8] sm:$0xff]   ;;  %v19036_v10 = vld [vmem:[#allocation2 + $0x170] sm:$0xff]  }
  0x4b   :  { %17026 = vmatprep.subr.bf16.mxu0 %v18999_v20  ;;  %v19031_v5 = vld [vmem:[#allocation2 + $0x1a0] sm:$0xff]   ;;  %v19035_v9 = vld [vmem:[#allocation2 + $0x1a8] sm:$0xff]   ;;  %v19037_v11 = vld [vmem:[#allocation2 + $0x130] sm:$0xff]   ;;  %v2860_v23 = vcombine.high %v2844_v18, %v2844_v18 }
  0x4c   :  { %17047 = vmatpush3.bf16.msra.mxu1 %v18998_v19  ;;  %v19038_v12 = vld [vmem:[#allocation2 + $0x1f0] sm:$0xff]   ;;  %v19040_v14 = vld [vmem:[#allocation2 + $0x178] sm:$0xff]   ;;  %v19044_v19 = vld [vmem:[#allocation2 + $0x240] sm:$0xff]  }
  0x4d   :  { %17048 = vmatprep.subr.bf16.mxu1 %v19001_v25  ;;  %v19039_v13 = vld [vmem:[#allocation2 + $0x1b0] sm:$0xff]   ;;  %v19041_v15 = vld [vmem:[#allocation2 + $0x138] sm:$0xff]   ;;  %v19045_v20 = vld [vmem:[#allocation2 + $0x200] sm:$0xff]  }
  0x4e   :  { %17027 = vmatpush3.bf16.msra.mxu0 %v19000_v24  ;;  %v19042_v16 = vld [vmem:[#allocation2 + $0x1f8] sm:$0xff]   ;;  %v19046_v21 = vld [vmem:[#allocation2 + $0x2c0] sm:$0xff]   ;;  %v19048_v24 = vld [vmem:[#allocation2 + $0x248] sm:$0xff]  }
  0x4f   :  { %17028 = vmatprep.subr.bf16.mxu0 %v19003_v27  ;;  %v19043_v17 = vld [vmem:[#allocation2 + $0x1b8] sm:$0xff]   ;;  %v19047_v22 = vld [vmem:[#allocation2 + $0x280] sm:$0xff]   ;;  %v19049_v25 = vld [vmem:[#allocation2 + $0x208] sm:$0xff]  }
  0x50   :  { %17049 = vmatpush3.bf16.msra.mxu1 %v19002_v26  ;;  %v19050_v26 = vld [vmem:[#allocation2 + $0x2c8] sm:$0xff]   ;;  %v19052_v28 = vld [vmem:[#allocation2 + $0x250] sm:$0xff]   ;;  %v19060_v37 = vld [vmem:[#allocation2 + $0x260] sm:$0xff]  }
  0x51   :  { %17050 = vmatprep.subr.bf16.mxu1 %v19005_v31  ;;  %v19051_v27 = vld [vmem:[#allocation2 + $0x288] sm:$0xff]   ;;  %v19053_v29 = vld [vmem:[#allocation2 + $0x210] sm:$0xff]   ;;  %v19061_v38 = vld [vmem:[#allocation2 + $0x220] sm:$0xff]  }
  0x52   :  { %17029 = vmatpush3.bf16.msra.mxu0 %v19004_v30  ;;  %v19054_v30 = vld [vmem:[#allocation2 + $0x2d0] sm:$0xff]   ;;  %v19062_v39 = vld [vmem:[#allocation2 + $0x2e0] sm:$0xff]   ;;  %v19065_v42 = vld [vmem:[#allocation2 + $0x228] sm:$0xff]  }
  0x53   :  { %17030 = vmatprep.subr.bf16.mxu0 %v19007_v33  ;;  %v19055_v31 = vld [vmem:[#allocation2 + $0x290] sm:$0xff]   ;;  %v19057_v33 = vld [vmem:[#allocation2 + $0x218] sm:$0xff]   ;;  %v60_v52 = vld [vmem:[%s20998_s0 + $0x8] sm:$0xff] }
  0x54   :  { %17051 = vmatpush3.bf16.msra.mxu1 %v19006_v32  ;;  %v19056_v32 = vld [vmem:[#allocation2 + $0x258] sm:$0xff]   ;;  %v19068_v45 = vld [vmem:[#allocation2 + $0x270] sm:$0xff]  }
  0x55   :  { %17052 = vmatprep.subr.bf16.mxu1 %v19009_v36  ;;  %v19059_v36 = vld [vmem:[#allocation2 + $0x298] sm:$0xff]   ;;  %v19070_v47 = vld [vmem:[#allocation2 + $0x2f0] sm:$0xff]  }
  0x56   :  { %17031 = vmatpush3.bf16.msra.mxu0 %v19008_v35  ;;  %v19058_v35 = vld [vmem:[#allocation2 + $0x2d8] sm:$0xff]  }
  0x57   :  { %17060 = vmatprep.subr.bf16.mxu0 %v19012_v41  ;;  %v19064_v41 = vld [vmem:[#allocation2 + $0x268] sm:$0xff]   ;;  %v19072_v49 = vld [vmem:[#allocation2 + $0x278] sm:$0xff]  }
  0x58   :  { %17053 = vmatpush3.bf16.msra.mxu1 %v19011_v40  ;;  %v19063_v40 = vld [vmem:[#allocation2 + $0x2a0] sm:$0xff]  }
  0x59   :  { %17082 = vmatprep.subr.bf16.mxu1 %v19014_v46  ;;  %12171 = vmatmul.mubr.bf16.vlgmr.msra.gmra.mrb[0].mxu0 %v2837_v43  ;;  %v19066_v43 = vld [vmem:[#allocation2 + $0x2e8] sm:$0xff]   ;;  %v19069_v46 = vld [vmem:[#allocation2 + $0x230] sm:$0xff]  }
  0x5a   :  { %17061 = vmatpush3.bf16.msra.mxu0 %v19013_v44  ;;  %12250 = vmatprep.mubr.bf16.mxu0 %v2858_v54  ;;  %v19067_v44 = vld [vmem:[#allocation2 + $0x2a8] sm:$0xff]   ;;  %v19075_v54 = vld [vmem:[#allocation2 + $0x2b8] sm:$0xff]  }
  0x5b   :  { %12211 = vmatmul.mubr.bf16.vlgmr.msra.gmra.mrb[0].mxu1 %v2859_v50  ;;  %17062 = vmatprep.subr.bf16.mxu0 %v19016_v51  ;;  %v19073_v50 = vld [vmem:[#allocation2 + $0x238] sm:$0xff]  }
  0x5c   :  { %17083 = vmatpush3.bf16.msra.mxu1 %v19015_v48  ;;  %12290 = vmatprep.mubr.bf16.mxu1 %v2862_v57  ;;  %v19071_v48 = vld [vmem:[#allocation2 + $0x2b0] sm:$0xff]   ;;  %v19074_v51 = vld [vmem:[#allocation2 + $0x2f8] sm:$0xff]  }
  0x5d   :  { %17084 = vmatprep.subr.bf16.mxu1 %v19018_v55  ;;  %v2863_v55 = vcombine.high %v60_v52, %v60_v52 }
  0x5e   :  { %17063 = vmatpush3.bf16.msra.mxu0 %v19017_v53  ;;  %v2870_v53 = vrot.slane %v60_v52, %v20533_v34  ;;  %v19125_v52 = vld [vmem:[#allocation2 + $0x460] sm:$0xff]  }
  0x5f   :  { %17064 = vmatprep.subr.bf16.mxu0 %v19020_v58 }
  0x60   :  { %17085 = vmatpush3.bf16.msra.mxu1 %v19019_v56  ;;  %v19076_v56 = vld [vmem:[#allocation2 + $0x340] sm:$0xff]   ;;  %v2878_v57 = vcombine.high %v2870_v53, %v2870_v53  ;;  %v2886_v58 = vrot.slane %v2870_v53, %v20533_v34 }
  0x61   :  { %17086 = vmatprep.subr.bf16.mxu1 %v19022_v60  ;;  %v20555_v60 = vrot.slane %v2863_v55, %v20533_v34  ;;  %v19126_v53 = vld [vmem:[#allocation2 + $0x420] sm:$0xff]  }
  0x62   :  { %17065 = vmatpush3.bf16.msra.mxu0 %v19021_v59  ;;  %v19077_v59 = vld [vmem:[#allocation2 + $0x300] sm:$0xff]  }
  0x63   :  { %17066 = vmatprep.subr.bf16.mxu0 %v19024_v62  ;;  %v2900_v62 = vrot.slane %v2878_v57, %v20533_v34  ;;  %v19128_v55 = vld [vmem:[#allocation2 + $0x4a0] sm:$0xff]   ;;  %v19130_v57 = vld [vmem:[#allocation2 + $0x428] sm:$0xff]  }
  0x64   :  { %17087 = vmatpush3.bf16.msra.mxu1 %v19023_v61  ;;  %v19078_v61 = vld [vmem:[#allocation2 + $0x3c0] sm:$0xff]  }
  0x65   :  { %17088 = vmatprep.subr.bf16.mxu1 %v19026_v0  ;;  %v2879_v0 = vcombine.high %v20555_v60, %v20555_v60 }
  0x66   :  { %17067 = vmatpush3.bf16.msra.mxu0 %v19025_v63  ;;  %v19079_v63 = vld [vmem:[#allocation2 + $0x380] sm:$0xff]  }
  0x67   :  { %17068 = vmatprep.subr.bf16.mxu0 %v19028_v2  ;;  %v19080_v2 = vld [vmem:[#allocation2 + $0x348] sm:$0xff]  }
  0x68   :  { %17089 = vmatpush3.bf16.msra.mxu1 %v19027_v1  ;;  %v2908_v1 = vcombine.high %v2886_v58, %v2886_v58 }
  0x69   :  { %17090 = vmatprep.subr.bf16.mxu1 %v19030_v4  ;;  %v19081_v4 = vld [vmem:[#allocation2 + $0x308] sm:$0xff]  }
  0x6a   :  { %17069 = vmatpush3.bf16.msra.mxu0 %v19029_v3  ;;  %v2910_v3 = vcombine.high %v2900_v62, %v2900_v62 }
  0x6b   :  { %17070 = vmatprep.subr.bf16.mxu0 %v19032_v6  ;;  %v19082_v6 = vld [vmem:[#allocation2 + $0x3c8] sm:$0xff]  }
  0x6c   :  { %17091 = vmatpush3.bf16.msra.mxu1 %v19031_v5  ;;  %v2907_v5 = vrot.slane %v2879_v0, %v20533_v34  ;;  %v19137_v0 = vld [vmem:[#allocation2 + $0x478] sm:$0xff]  }
  0x6d   :  { %17092 = vmatprep.subr.bf16.mxu1 %v19034_v8 }
  0x6e   :  { %17071 = vmatpush3.bf16.msra.mxu0 %v19033_v7  ;;  %v19083_v7 = vld [vmem:[#allocation2 + $0x388] sm:$0xff]   ;;  %v2911_v8 = vcombine.high %v2907_v5, %v2907_v5 }
  0x6f   :  { %17072 = vmatprep.subr.bf16.mxu0 %v19036_v10  ;;  %v19085_v10 = vld [vmem:[#allocation2 + $0x310] sm:$0xff]  }
  0x70   :  { %17093 = vmatpush3.bf16.msra.mxu1 %v19035_v9  ;;  %v19084_v9 = vld [vmem:[#allocation2 + $0x350] sm:$0xff]  }
  0x71   :  { %17094 = vmatprep.subr.bf16.mxu1 %v19038_v12  ;;  %v19087_v12 = vld [vmem:[#allocation2 + $0x390] sm:$0xff]  }
  0x72   :  { %17073 = vmatpush3.bf16.msra.mxu0 %v19037_v11  ;;  %v19086_v11 = vld [vmem:[#allocation2 + $0x3d0] sm:$0xff]  }
  0x73   :  { %17074 = vmatprep.subr.bf16.mxu0 %v19040_v14  ;;  %v19089_v14 = vld [vmem:[#allocation2 + $0x318] sm:$0xff]  }
  0x74   :  { %17095 = vmatpush3.bf16.msra.mxu1 %v19039_v13  ;;  %v19088_v13 = vld [vmem:[#allocation2 + $0x358] sm:$0xff]  }
  0x75   :  { %17096 = vmatprep.subr.bf16.mxu1 %v19042_v16  ;;  %v19091_v16 = vld [vmem:[#allocation2 + $0x398] sm:$0xff]  }
  0x76   :  { %17075 = vmatpush3.bf16.msra.mxu0 %v19041_v15  ;;  %v19090_v15 = vld [vmem:[#allocation2 + $0x3d8] sm:$0xff]  }
  0x77   :  { %17104 = vmatprep.subr.bf16.mxu0 %v19044_v19  ;;  %v19094_v19 = vld [vmem:[#allocation2 + $0x3e0] sm:$0xff]  }
  0x78   :  { %17097 = vmatpush3.bf16.msra.mxu1 %v19043_v17  ;;  %v19092_v17 = vld [vmem:[#allocation2 + $0x360] sm:$0xff]  }
  0x79   :  { %12251 = vmatmul.mubr.bf16.vlgmr.msra.gmra.mrb[4].mxu0 %v2844_v18  ;;  %17126 = vmatprep.subr.bf16.mxu1 %v19046_v21  ;;  %v19093_v18 = vld [vmem:[#allocation2 + $0x320] sm:$0xff]   ;;  %v19096_v21 = vld [vmem:[#allocation2 + $0x368] sm:$0xff]  }
  0x7a   :  { %17105 = vmatpush3.bf16.msra.mxu0 %v19045_v20  ;;  %12330 = vmatprep.mubr.bf16.mxu0 %v2900_v62  ;;  %v19095_v20 = vld [vmem:[#allocation2 + $0x3a0] sm:$0xff]   ;;  %v19135_v62 = vld [vmem:[#allocation2 + $0x4f0] sm:$0xff]  }
  0x7b   :  { %12291 = vmatmul.mubr.bf16.vlgmr.msra.gmra.mrb[4].mxu1 %v2860_v23  ;;  %17106 = vmatprep.subr.bf16.mxu0 %v19048_v24  ;;  %v19098_v23 = vld [vmem:[#allocation2 + $0x3e8] sm:$0xff]  }
  0x7c   :  { %17127 = vmatpush3.bf16.msra.mxu1 %v19047_v22  ;;  %12370 = vmatprep.mubr.bf16.mxu1 %v2910_v3  ;;  %v19097_v22 = vld [vmem:[#allocation2 + $0x328] sm:$0xff]   ;;  %v61_v3 = vld [vmem:[%s20998_s0 + $0x10] sm:$0xff] }
  0x7d   :  { %17128 = vmatprep.subr.bf16.mxu1 %v19050_v26  ;;  %v19099_v24 = vld [vmem:[#allocation2 + $0x3a8] sm:$0xff]   ;;  %v19101_v26 = vld [vmem:[#allocation2 + $0x330] sm:$0xff]  }
  0x7e   :  { %17107 = vmatpush3.bf16.msra.mxu0 %v19049_v25  ;;  %v19100_v25 = vld [vmem:[#allocation2 + $0x370] sm:$0xff]  }
  0x7f   :  { %17108 = vmatprep.subr.bf16.mxu0 %v19052_v28  ;;  %v19103_v28 = vld [vmem:[#allocation2 + $0x3b0] sm:$0xff]  }
  0x80   :  { %17129 = vmatpush3.bf16.msra.mxu1 %v19051_v27  ;;  %v19102_v27 = vld [vmem:[#allocation2 + $0x3f0] sm:$0xff]  }
  0x81   :  { %17130 = vmatprep.subr.bf16.mxu1 %v19054_v30  ;;  %v19105_v30 = vld [vmem:[#allocation2 + $0x338] sm:$0xff]  }
  0x82   :  { %17109 = vmatpush3.bf16.msra.mxu0 %v19053_v29  ;;  %v19104_v29 = vld [vmem:[#allocation2 + $0x378] sm:$0xff]  }
  0x83   :  { %17110 = vmatprep.subr.bf16.mxu0 %v19056_v32  ;;  %v19108_v32 = vld [vmem:[#allocation2 + $0x3b8] sm:$0xff]  }
  0x84   :  { %17131 = vmatpush3.bf16.msra.mxu1 %v19055_v31  ;;  %v19106_v31 = vld [vmem:[#allocation2 + $0x3f8] sm:$0xff]  }
  0x85   :  { %17132 = vmatprep.subr.bf16.mxu1 %v19058_v35  ;;  %v19109_v35 = vld [vmem:[#allocation2 + $0x440] sm:$0xff]  }
  0x86   :  { %17111 = vmatpush3.bf16.msra.mxu0 %v19057_v33  ;;  %v2893_v33 = vrot.slane %v20555_v60, %v20533_v34  ;;  %v19133_v60 = vld [vmem:[#allocation2 + $0x470] sm:$0xff]  }
  0x87   :  { %17112 = vmatprep.subr.bf16.mxu0 %v19060_v37  ;;  %v19111_v37 = vld [vmem:[#allocation2 + $0x4c0] sm:$0xff]  }
  0x88   :  { %17133 = vmatpush3.bf16.msra.mxu1 %v19059_v36  ;;  %v19110_v36 = vld [vmem:[#allocation2 + $0x400] sm:$0xff]  }
  0x89   :  { %17134 = vmatprep.subr.bf16.mxu1 %v19062_v39  ;;  %v2909_v39 = vcombine.high %v2893_v33, %v2893_v33 }
  0x8a   :  { %17113 = vmatpush3.bf16.msra.mxu0 %v19061_v38  ;;  %v19112_v38 = vld [vmem:[#allocation2 + $0x480] sm:$0xff]  }
  0x8b   :  { %17114 = vmatprep.subr.bf16.mxu0 %v19064_v41  ;;  %v19114_v41 = vld [vmem:[#allocation2 + $0x408] sm:$0xff]  }
  0x8c   :  { %17135 = vmatpush3.bf16.msra.mxu1 %v19063_v40  ;;  %v19113_v40 = vld [vmem:[#allocation2 + $0x448] sm:$0xff]  }
  0x8d   :  { %17136 = vmatprep.subr.bf16.mxu1 %v19066_v43  ;;  %v19116_v43 = vld [vmem:[#allocation2 + $0x488] sm:$0xff]  }
  0x8e   :  { %17115 = vmatpush3.bf16.msra.mxu0 %v19065_v42  ;;  %v19115_v42 = vld [vmem:[#allocation2 + $0x4c8] sm:$0xff]  }
  0x8f   :  { %17116 = vmatprep.subr.bf16.mxu0 %v19068_v45  ;;  %v19118_v45 = vld [vmem:[#allocation2 + $0x410] sm:$0xff]  }
  0x90   :  { %17137 = vmatpush3.bf16.msra.mxu1 %v19067_v44  ;;  %v19117_v44 = vld [vmem:[#allocation2 + $0x450] sm:$0xff]  }
  0x91   :  { %17138 = vmatprep.subr.bf16.mxu1 %v19070_v47  ;;  %v19120_v47 = vld [vmem:[#allocation2 + $0x490] sm:$0xff]  }
  0x92   :  { %17117 = vmatpush3.bf16.msra.mxu0 %v19069_v46  ;;  %v19119_v46 = vld [vmem:[#allocation2 + $0x4d0] sm:$0xff]  }
  0x93   :  { %17118 = vmatprep.subr.bf16.mxu0 %v19072_v49  ;;  %v19122_v49 = vld [vmem:[#allocation2 + $0x418] sm:$0xff]  }
  0x94   :  { %17139 = vmatpush3.bf16.msra.mxu1 %v19071_v48  ;;  %v19121_v48 = vld [vmem:[#allocation2 + $0x458] sm:$0xff]  }
  0x95   :  { %17140 = vmatprep.subr.bf16.mxu1 %v19074_v51  ;;  %v19124_v51 = vld [vmem:[#allocation2 + $0x498] sm:$0xff]  }
  0x96   :  { %17119 = vmatpush3.bf16.msra.mxu0 %v19073_v50  ;;  %v19123_v50 = vld [vmem:[#allocation2 + $0x4d8] sm:$0xff]  }
  0x97   :  { %17148 = vmatprep.subr.bf16.mxu0 %v19076_v56  ;;  %v19129_v56 = vld [vmem:[#allocation2 + $0x468] sm:$0xff]  }
  0x98   :  { %17141 = vmatpush3.bf16.msra.mxu1 %v19075_v54  ;;  %v19127_v54 = vld [vmem:[#allocation2 + $0x4e0] sm:$0xff]  }
  0x99   :  { %12331 = vmatmul.mubr.bf16.vlgmr.msra.gmra.mrb[8].mxu0 %v2886_v58  ;;  %17170 = vmatprep.subr.bf16.mxu1 %v19078_v61  ;;  %v19131_v58 = vld [vmem:[#allocation2 + $0x4e8] sm:$0xff]   ;;  %v19134_v61 = vld [vmem:[#allocation2 + $0x430] sm:$0xff]  }
  0x9a   :  { %17149 = vmatpush3.bf16.msra.mxu0 %v19077_v59  ;;  %12410 = vmatprep.mubr.bf16.mxu0 %v2907_v5  ;;  %v19132_v59 = vld [vmem:[#allocation2 + $0x4a8] sm:$0xff]   ;;  %v19140_v5 = vld [vmem:[#allocation2 + $0x4b8] sm:$0xff]  }
  0x9b   :  { %12371 = vmatmul.mubr.bf16.vlgmr.msra.gmra.mrb[8].mxu1 %v2908_v1  ;;  %17150 = vmatprep.subr.bf16.mxu0 %v19080_v2  ;;  %v19138_v1 = vld [vmem:[#allocation2 + $0x438] sm:$0xff]  }
  0x9c   :  { %17171 = vmatpush3.bf16.msra.mxu1 %v19079_v63  ;;  %12450 = vmatprep.mubr.bf16.mxu1 %v2911_v8  ;;  %v19136_v63 = vld [vmem:[#allocation2 + $0x4b0] sm:$0xff]   ;;  %v19139_v2 = vld [vmem:[#allocation2 + $0x4f8] sm:$0xff]  }
  0x9d   :  { %17172 = vmatprep.subr.bf16.mxu1 %v19082_v6  ;;  %v2912_v6 = vcombine.high %v61_v3, %v61_v3 }
  0x9e   :  { %17151 = vmatpush3.bf16.msra.mxu0 %v19081_v4  ;;  %v2919_v4 = vrot.slane %v61_v3, %v20533_v34  ;;  %v19190_v3 = vld [vmem:[#allocation2 + $0x660] sm:$0xff]  }
  0x9f   :  { %17152 = vmatprep.subr.bf16.mxu0 %v19084_v9 }
  0xa0   :  { %17173 = vmatpush3.bf16.msra.mxu1 %v19083_v7  ;;  %v19141_v7 = vld [vmem:[#allocation2 + $0x540] sm:$0xff]   ;;  %v2927_v8 = vcombine.high %v2919_v4, %v2919_v4  ;;  %v2935_v9 = vrot.slane %v2919_v4, %v20533_v34 }
  0xa1   :  { %17174 = vmatprep.subr.bf16.mxu1 %v19086_v11  ;;  %v20569_v11 = vrot.slane %v2912_v6, %v20533_v34  ;;  %v19191_v4 = vld [vmem:[#allocation2 + $0x620] sm:$0xff]  }
  0xa2   :  { %17153 = vmatpush3.bf16.msra.mxu0 %v19085_v10  ;;  %v19142_v10 = vld [vmem:[#allocation2 + $0x500] sm:$0xff]  }
  0xa3   :  { %17154 = vmatprep.subr.bf16.mxu0 %v19088_v13  ;;  %v2949_v13 = vrot.slane %v2927_v8, %v20533_v34  ;;  %v19193_v6 = vld [vmem:[#allocation2 + $0x6a0] sm:$0xff]   ;;  %v19195_v8 = vld [vmem:[#allocation2 + $0x628] sm:$0xff]  }
  0xa4   :  { %17175 = vmatpush3.bf16.msra.mxu1 %v19087_v12  ;;  %v19143_v12 = vld [vmem:[#allocation2 + $0x5c0] sm:$0xff]  }
  0xa5   :  { %17176 = vmatprep.subr.bf16.mxu1 %v19090_v15  ;;  %v2928_v15 = vcombine.high %v20569_v11, %v20569_v11 }
  0xa6   :  { %17155 = vmatpush3.bf16.msra.mxu0 %v19089_v14  ;;  %v19144_v14 = vld [vmem:[#allocation2 + $0x580] sm:$0xff]  }
  0xa7   :  { %17156 = vmatprep.subr.bf16.mxu0 %v19092_v17  ;;  %v19145_v17 = vld [vmem:[#allocation2 + $0x548] sm:$0xff]  }
  0xa8   :  { %17177 = vmatpush3.bf16.msra.mxu1 %v19091_v16  ;;  %v2957_v16 = vcombine.high %v2935_v9, %v2935_v9 }
  0xa9   :  { %17178 = vmatprep.subr.bf16.mxu1 %v19094_v19  ;;  %v19146_v19 = vld [vmem:[#allocation2 + $0x508] sm:$0xff]  }
  0xaa   :  { %17157 = vmatpush3.bf16.msra.mxu0 %v19093_v18  ;;  %v2959_v18 = vcombine.high %v2949_v13, %v2949_v13 }
  0xab   :  { %17158 = vmatprep.subr.bf16.mxu0 %v19096_v21  ;;  %v19147_v21 = vld [vmem:[#allocation2 + $0x5c8] sm:$0xff]  }
  0xac   :  { %17179 = vmatpush3.bf16.msra.mxu1 %v19095_v20  ;;  %v2956_v20 = vrot.slane %v2928_v15, %v20533_v34  ;;  %v19202_v15 = vld [vmem:[#allocation2 + $0x678] sm:$0xff]  }
  0xad   :  { %17180 = vmatprep.subr.bf16.mxu1 %v19098_v23 }
  0xae   :  { %17159 = vmatpush3.bf16.msra.mxu0 %v19097_v22  ;;  %v19148_v22 = vld [vmem:[#allocation2 + $0x588] sm:$0xff]   ;;  %v2960_v23 = vcombine.high %v2956_v20, %v2956_v20 }
  0xaf   :  { %17160 = vmatprep.subr.bf16.mxu0 %v19100_v25  ;;  %v19150_v25 = vld [vmem:[#allocation2 + $0x510] sm:$0xff]  }
  0xb0   :  { %17181 = vmatpush3.bf16.msra.mxu1 %v19099_v24  ;;  %v19149_v24 = vld [vmem:[#allocation2 + $0x550] sm:$0xff]  }
  0xb1   :  { %17182 = vmatprep.subr.bf16.mxu1 %v19102_v27  ;;  %v19152_v27 = vld [vmem:[#allocation2 + $0x590] sm:$0xff]  }
  0xb2   :  { %17161 = vmatpush3.bf16.msra.mxu0 %v19101_v26  ;;  %v19151_v26 = vld [vmem:[#allocation2 + $0x5d0] sm:$0xff]  }
  0xb3   :  { %17162 = vmatprep.subr.bf16.mxu0 %v19104_v29  ;;  %v19154_v29 = vld [vmem:[#allocation2 + $0x518] sm:$0xff]  }
  0xb4   :  { %17183 = vmatpush3.bf16.msra.mxu1 %v19103_v28  ;;  %v19153_v28 = vld [vmem:[#allocation2 + $0x558] sm:$0xff]  }
  0xb5   :  { %17184 = vmatprep.subr.bf16.mxu1 %v19106_v31  ;;  %v19156_v31 = vld [vmem:[#allocation2 + $0x598] sm:$0xff]  }
  0xb6   :  { %17163 = vmatpush3.bf16.msra.mxu0 %v19105_v30  ;;  %v19155_v30 = vld [vmem:[#allocation2 + $0x5d8] sm:$0xff]  }
  0xb7   :  { %17192 = vmatprep.subr.bf16.mxu0 %v19109_v35  ;;  %v19159_v35 = vld [vmem:[#allocation2 + $0x5e0] sm:$0xff]  }
  0xb8   :  { %17185 = vmatpush3.bf16.msra.mxu1 %v19108_v32  ;;  %v19157_v32 = vld [vmem:[#allocation2 + $0x560] sm:$0xff]  }
  0xb9   :  { %12411 = vmatmul.mubr.bf16.vlgmr.msra.gmra.mrb[12].mxu0 %v2893_v33  ;;  %17214 = vmatprep.subr.bf16.mxu1 %v19111_v37  ;;  %v19158_v33 = vld [vmem:[#allocation2 + $0x520] sm:$0xff]   ;;  %v19161_v37 = vld [vmem:[#allocation2 + $0x568] sm:$0xff]  }
  0xba   :  { %17193 = vmatpush3.bf16.msra.mxu0 %v19110_v36  ;;  %12490 = vmatprep.mubr.bf16.mxu0 %v2949_v13  ;;  %v19160_v36 = vld [vmem:[#allocation2 + $0x5a0] sm:$0xff]   ;;  %v19200_v13 = vld [vmem:[#allocation2 + $0x6f0] sm:$0xff]  }
  0xbb   :  { %12451 = vmatmul.mubr.bf16.vlgmr.msra.gmra.mrb[12].mxu1 %v2909_v39  ;;  %17194 = vmatprep.subr.bf16.mxu0 %v19113_v40  ;;  %v19163_v39 = vld [vmem:[#allocation2 + $0x5e8] sm:$0xff]  }
  0xbc   :  { %17215 = vmatpush3.bf16.msra.mxu1 %v19112_v38  ;;  %12530 = vmatprep.mubr.bf16.mxu1 %v2959_v18  ;;  %v19162_v38 = vld [vmem:[#allocation2 + $0x528] sm:$0xff]   ;;  %v62_v18 = vld [vmem:[%s20998_s0 + $0x18] sm:$0xff] }
  0xbd   :  { %17216 = vmatprep.subr.bf16.mxu1 %v19115_v42  ;;  %v19164_v40 = vld [vmem:[#allocation2 + $0x5a8] sm:$0xff]   ;;  %v19166_v42 = vld [vmem:[#allocation2 + $0x530] sm:$0xff]  }
  0xbe   :  { %17195 = vmatpush3.bf16.msra.mxu0 %v19114_v41  ;;  %v19165_v41 = vld [vmem:[#allocation2 + $0x570] sm:$0xff]  }
  0xbf   :  { %17196 = vmatprep.subr.bf16.mxu0 %v19117_v44  ;;  %v19168_v44 = vld [vmem:[#allocation2 + $0x5b0] sm:$0xff]  }
  0xc0   :  { %17217 = vmatpush3.bf16.msra.mxu1 %v19116_v43  ;;  %v19167_v43 = vld [vmem:[#allocation2 + $0x5f0] sm:$0xff]  }
  0xc1   :  { %17218 = vmatprep.subr.bf16.mxu1 %v19119_v46  ;;  %v19170_v46 = vld [vmem:[#allocation2 + $0x538] sm:$0xff]  }
  0xc2   :  { %17197 = vmatpush3.bf16.msra.mxu0 %v19118_v45  ;;  %v19169_v45 = vld [vmem:[#allocation2 + $0x578] sm:$0xff]  }
  0xc3   :  { %17198 = vmatprep.subr.bf16.mxu0 %v19121_v48  ;;  %v19173_v48 = vld [vmem:[#allocation2 + $0x5b8] sm:$0xff]  }
  0xc4   :  { %17219 = vmatpush3.bf16.msra.mxu1 %v19120_v47  ;;  %v19171_v47 = vld [vmem:[#allocation2 + $0x5f8] sm:$0xff]  }
  0xc5   :  { %17220 = vmatprep.subr.bf16.mxu1 %v19123_v50  ;;  %v19174_v50 = vld [vmem:[#allocation2 + $0x640] sm:$0xff]  }
  0xc6   :  { %17199 = vmatpush3.bf16.msra.mxu0 %v19122_v49  ;;  %v2942_v49 = vrot.slane %v20569_v11, %v20533_v34  ;;  %v19198_v11 = vld [vmem:[#allocation2 + $0x670] sm:$0xff]  }
  0xc7   :  { %17200 = vmatprep.subr.bf16.mxu0 %v19125_v52  ;;  %v19176_v52 = vld [vmem:[#allocation2 + $0x6c0] sm:$0xff]  }
  0xc8   :  { %17221 = vmatpush3.bf16.msra.mxu1 %v19124_v51  ;;  %v19175_v51 = vld [vmem:[#allocation2 + $0x600] sm:$0xff]  }
  0xc9   :  { %17222 = vmatprep.subr.bf16.mxu1 %v19127_v54  ;;  %v2958_v54 = vcombine.high %v2942_v49, %v2942_v49 }
  0xca   :  { %17201 = vmatpush3.bf16.msra.mxu0 %v19126_v53  ;;  %v19177_v53 = vld [vmem:[#allocation2 + $0x680] sm:$0xff]  }
  0xcb   :  { %17202 = vmatprep.subr.bf16.mxu0 %v19129_v56  ;;  %v19179_v56 = vld [vmem:[#allocation2 + $0x608] sm:$0xff]  }
  0xcc   :  { %17223 = vmatpush3.bf16.msra.mxu1 %v19128_v55  ;;  %v19178_v55 = vld [vmem:[#allocation2 + $0x648] sm:$0xff]  }
  0xcd   :  { %17224 = vmatprep.subr.bf16.mxu1 %v19131_v58  ;;  %v19181_v58 = vld [vmem:[#allocation2 + $0x688] sm:$0xff]  }
  0xce   :  { %17203 = vmatpush3.bf16.msra.mxu0 %v19130_v57  ;;  %v19180_v57 = vld [vmem:[#allocation2 + $0x6c8] sm:$0xff]  }
  0xcf   :  { %17204 = vmatprep.subr.bf16.mxu0 %v19133_v60  ;;  %v19183_v60 = vld [vmem:[#allocation2 + $0x610] sm:$0xff]  }
  0xd0   :  { %17225 = vmatpush3.bf16.msra.mxu1 %v19132_v59  ;;  %v19182_v59 = vld [vmem:[#allocation2 + $0x650] sm:$0xff]  }
  0xd1   :  { %17226 = vmatprep.subr.bf16.mxu1 %v19135_v62  ;;  %v19185_v62 = vld [vmem:[#allocation2 + $0x690] sm:$0xff]  }
  0xd2   :  { %17205 = vmatpush3.bf16.msra.mxu0 %v19134_v61  ;;  %v19184_v61 = vld [vmem:[#allocation2 + $0x6d0] sm:$0xff]  }
  0xd3   :  { %17206 = vmatprep.subr.bf16.mxu0 %v19137_v0  ;;  %v19187_v0 = vld [vmem:[#allocation2 + $0x618] sm:$0xff]  }
  0xd4   :  { %17227 = vmatpush3.bf16.msra.mxu1 %v19136_v63  ;;  %v19186_v63 = vld [vmem:[#allocation2 + $0x658] sm:$0xff]  }
  0xd5   :  { %17228 = vmatprep.subr.bf16.mxu1 %v19139_v2  ;;  %v19189_v2 = vld [vmem:[#allocation2 + $0x698] sm:$0xff]  }
  0xd6   :  { %17207 = vmatpush3.bf16.msra.mxu0 %v19138_v1  ;;  %v19188_v1 = vld [vmem:[#allocation2 + $0x6d8] sm:$0xff]  }
  0xd7   :  { %17236 = vmatprep.subr.bf16.mxu0 %v19141_v7  ;;  %v19194_v7 = vld [vmem:[#allocation2 + $0x668] sm:$0xff]  }
  0xd8   :  { %17229 = vmatpush3.bf16.msra.mxu1 %v19140_v5  ;;  %v19192_v5 = vld [vmem:[#allocation2 + $0x6e0] sm:$0xff]  }
  0xd9   :  { %12491 = vmatmul.mubr.bf16.vlgmr.msra.gmra.mrb[16].mxu0 %v2935_v9  ;;  %17258 = vmatprep.subr.bf16.mxu1 %v19143_v12  ;;  %v19196_v9 = vld [vmem:[#allocation2 + $0x6e8] sm:$0xff]   ;;  %v19199_v12 = vld [vmem:[#allocation2 + $0x630] sm:$0xff]  }
  0xda   :  { %17237 = vmatpush3.bf16.msra.mxu0 %v19142_v10  ;;  %12570 = vmatprep.mubr.bf16.mxu0 %v2956_v20  ;;  %v19197_v10 = vld [vmem:[#allocation2 + $0x6a8] sm:$0xff]   ;;  %v19205_v20 = vld [vmem:[#allocation2 + $0x6b8] sm:$0xff]  }
  0xdb   :  { %12531 = vmatmul.mubr.bf16.vlgmr.msra.gmra.mrb[16].mxu1 %v2957_v16  ;;  %17238 = vmatprep.subr.bf16.mxu0 %v19145_v17  ;;  %v19203_v16 = vld [vmem:[#allocation2 + $0x638] sm:$0xff]  }
  0xdc   :  { %17259 = vmatpush3.bf16.msra.mxu1 %v19144_v14  ;;  %12610 = vmatprep.mubr.bf16.mxu1 %v2960_v23  ;;  %v19201_v14 = vld [vmem:[#allocation2 + $0x6b0] sm:$0xff]   ;;  %v19204_v17 = vld [vmem:[#allocation2 + $0x6f8] sm:$0xff]  }
  0xdd   :  { %17260 = vmatprep.subr.bf16.mxu1 %v19147_v21  ;;  %v2961_v21 = vcombine.high %v62_v18, %v62_v18 }
  0xde   :  { %17239 = vmatpush3.bf16.msra.mxu0 %v19146_v19  ;;  %v2968_v19 = vrot.slane %v62_v18, %v20533_v34 }
  0xdf   :  { %17240 = vmatprep.subr.bf16.mxu0 %v19149_v24 }
  0xe0   :  { %17261 = vmatpush3.bf16.msra.mxu1 %v19148_v22  ;;  %v19206_v22 = vld [vmem:[#allocation2 + $0x740] sm:$0xff]   ;;  %v2976_v23 = vcombine.high %v2968_v19, %v2968_v19  ;;  %v2984_v24 = vrot.slane %v2968_v19, %v20533_v34  ;;  %v19243_v19 = vld [vmem:[#allocation2 + $0x848] sm:$0xff]  }
  0xe1   :  { %17262 = vmatprep.subr.bf16.mxu1 %v19151_v26  ;;  %v19208_v26 = vld [vmem:[#allocation2 + $0x7c0] sm:$0xff]  }
  0xe2   :  { %17241 = vmatpush3.bf16.msra.mxu0 %v19150_v25  ;;  %v20583_v25 = vrot.slane %v2961_v21, %v20533_v34  ;;  %v19245_v21 = vld [vmem:[#allocation2 + $0x8c8] sm:$0xff]  }
  0xe3   :  { %17242 = vmatprep.subr.bf16.mxu0 %v19153_v28  ;;  %v19207_v28 = vld [vmem:[#allocation2 + $0x700] sm:$0xff]  }
  0xe4   :  { %17263 = vmatpush3.bf16.msra.mxu1 %v19152_v27  ;;  %v2998_v27 = vrot.slane %v2976_v23, %v20533_v34  ;;  %v19247_v23 = vld [vmem:[#allocation2 + $0x850] sm:$0xff]  }
  0xe5   :  { %17264 = vmatprep.subr.bf16.mxu1 %v19155_v30  ;;  %v3006_v30 = vcombine.high %v2984_v24, %v2984_v24 }
  0xe6   :  { %17243 = vmatpush3.bf16.msra.mxu0 %v19154_v29  ;;  %v2977_v29 = vcombine.high %v20583_v25, %v20583_v25 }
  0xe7   :  { %17244 = vmatprep.subr.bf16.mxu0 %v19157_v32  ;;  %v3008_v32 = vcombine.high %v2998_v27, %v2998_v27 }
  0xe8   :  { %17265 = vmatpush3.bf16.msra.mxu1 %v19156_v31  ;;  %v19210_v31 = vld [vmem:[#allocation2 + $0x748] sm:$0xff]  }
  0xe9   :  { %17266 = vmatprep.subr.bf16.mxu1 %v19159_v35  ;;  %v3005_v35 = vrot.slane %v2977_v29, %v20533_v34  ;;  %v19253_v29 = vld [vmem:[#allocation2 + $0x8d8] sm:$0xff]  }
  0xea   :  { %17245 = vmatpush3.bf16.msra.mxu0 %v19158_v33  ;;  %v19209_v33 = vld [vmem:[#allocation2 + $0x780] sm:$0xff]  }
  0xeb   :  { %17246 = vmatprep.subr.bf16.mxu0 %v19161_v37  ;;  %v19211_v37 = vld [vmem:[#allocation2 + $0x708] sm:$0xff]  }
  0xec   :  { %17267 = vmatpush3.bf16.msra.mxu1 %v19160_v36  ;;  %v19212_v36 = vld [vmem:[#allocation2 + $0x7c8] sm:$0xff]  }
  0xed   :  { %17268 = vmatprep.subr.bf16.mxu1 %v19163_v39  ;;  %v19214_v39 = vld [vmem:[#allocation2 + $0x750] sm:$0xff]  }
  0xee   :  { %17247 = vmatpush3.bf16.msra.mxu0 %v19162_v38  ;;  %v3009_v38 = vcombine.high %v3005_v35, %v3005_v35 }
  0xef   :  { %17248 = vmatprep.subr.bf16.mxu0 %v19165_v41  ;;  %v19216_v41 = vld [vmem:[#allocation2 + $0x7d0] sm:$0xff]  }
  0xf0   :  { %17269 = vmatpush3.bf16.msra.mxu1 %v19164_v40  ;;  %v19213_v40 = vld [vmem:[#allocation2 + $0x788] sm:$0xff]  }
  0xf1   :  { %17270 = vmatprep.subr.bf16.mxu1 %v19167_v43  ;;  %v19218_v43 = vld [vmem:[#allocation2 + $0x758] sm:$0xff]  }
  0xf2   :  { %17249 = vmatpush3.bf16.msra.mxu0 %v19166_v42  ;;  %v19215_v42 = vld [vmem:[#allocation2 + $0x710] sm:$0xff]  }
  0xf3   :  { %17250 = vmatprep.subr.bf16.mxu0 %v19169_v45  ;;  %v19220_v45 = vld [vmem:[#allocation2 + $0x7d8] sm:$0xff]  }
  0xf4   :  { %17271 = vmatpush3.bf16.msra.mxu1 %v19168_v44  ;;  %v19217_v44 = vld [vmem:[#allocation2 + $0x790] sm:$0xff]  }
  0xf5   :  { %17272 = vmatprep.subr.bf16.mxu1 %v19171_v47  ;;  %v19222_v47 = vld [vmem:[#allocation2 + $0x760] sm:$0xff]  }
  0xf6   :  { %17251 = vmatpush3.bf16.msra.mxu0 %v19170_v46  ;;  %v19219_v46 = vld [vmem:[#allocation2 + $0x718] sm:$0xff]  }
  0xf7   :  { %17280 = vmatprep.subr.bf16.mxu0 %v19174_v50  ;;  %v19223_v50 = vld [vmem:[#allocation2 + $0x720] sm:$0xff]  }
  0xf8   :  { %17273 = vmatpush3.bf16.msra.mxu1 %v19173_v48  ;;  %v19221_v48 = vld [vmem:[#allocation2 + $0x798] sm:$0xff]  }
  0xf9   :  { %12571 = vmatmul.mubr.bf16.vlgmr.msra.gmra.mrb[20].mxu0 %v2942_v49  ;;  %17302 = vmatprep.subr.bf16.mxu1 %v19176_v52  ;;  %v19224_v49 = vld [vmem:[#allocation2 + $0x7e0] sm:$0xff]  }
  0xfa   :  { %17281 = vmatpush3.bf16.msra.mxu0 %v19175_v51  ;;  %12650 = vmatprep.mubr.bf16.mxu0 %v2998_v27  ;;  %v19226_v51 = vld [vmem:[#allocation2 + $0x768] sm:$0xff]   ;;  %v19225_v52 = vld [vmem:[#allocation2 + $0x7a0] sm:$0xff]   ;;  %v19251_v27 = vld [vmem:[#allocation2 + $0x858] sm:$0xff]  }
  0xfb   :  { %12611 = vmatmul.mubr.bf16.vlgmr.msra.gmra.mrb[20].mxu1 %v2958_v54  ;;  %17282 = vmatprep.subr.bf16.mxu0 %v19178_v55  ;;  %v15661_v54 = vld [vmem:[#allocation5] ss:$0 sm:$0xff]  ;;  %v19227_v55 = vld [vmem:[#allocation2 + $0x728] sm:$0xff]  }
  0xfc   :  { %17303 = vmatpush3.bf16.msra.mxu1 %v19177_v53  ;;  %12690 = vmatprep.mubr.bf16.mxu1 %v3008_v32  ;;  %v19228_v53 = vld [vmem:[#allocation2 + $0x7e8] sm:$0xff]   ;;  %v19256_v32 = vld [vmem:[#allocation2 + $0x820] sm:$0xff]  }
  0xfd   :  { %17304 = vmatprep.subr.bf16.mxu1 %v19180_v57  ;;  %v19230_v57 = vld [vmem:[#allocation2 + $0x770] sm:$0xff]  }
  0xfe   :  { %17283 = vmatpush3.bf16.msra.mxu0 %v19179_v56 }
  0xff   :  { %17284 = vmatprep.subr.bf16.mxu0 %v19182_v59  ;;  %v19229_v59 = vld [vmem:[#allocation2 + $0x7a8] sm:$0xff]  }
 0x100   :  { %17305 = vmatpush3.bf16.msra.mxu1 %v19181_v58 }
 0x101   :  { %17306 = vmatprep.subr.bf16.mxu1 %v19184_v61 }
 0x102   :  { %17285 = vmatpush3.bf16.msra.mxu0 %v19183_v60 }
 0x103   :  { %17286 = vmatprep.subr.bf16.mxu0 %v19186_v63  ;;  %v19231_v63 = vld [vmem:[#allocation2 + $0x730] sm:$0xff]  }
 0x104   :  { %17307 = vmatpush3.bf16.msra.mxu1 %v19185_v62 }
 0x105   :  { %17308 = vmatprep.subr.bf16.mxu1 %v19188_v1 }
 0x106   :  { %17287 = vmatpush3.bf16.msra.mxu0 %v19187_v0  ;;  %v19232_v0 = vld [vmem:[#allocation2 + $0x7f0] sm:$0xff]  }
 0x107   :  { %17288 = vmatprep.subr.bf16.mxu0 %v19190_v3  ;;  %v19233_v3 = vld [vmem:[#allocation2 + $0x7b0] sm:$0xff]  }
 0x108   :  { %17309 = vmatpush3.bf16.msra.mxu1 %v19189_v2 }
 0x109   :  { %17310 = vmatprep.subr.bf16.mxu1 %v19192_v5 }
 0x10a   :  { %17289 = vmatpush3.bf16.msra.mxu0 %v19191_v4 }
 0x10b   :  { %17290 = vmatprep.subr.bf16.mxu0 %v19194_v7 }
 0x10c   :  { %17311 = vmatpush3.bf16.msra.mxu1 %v19193_v6  ;;  %v19234_v6 = vld [vmem:[#allocation2 + $0x778] sm:$0xff]  }
 0x10d   :  { %17312 = vmatprep.subr.bf16.mxu1 %v19196_v9 }
 0x10e   :  { %17291 = vmatpush3.bf16.msra.mxu0 %v19195_v8  ;;  %v19235_v8 = vld [vmem:[#allocation2 + $0x738] sm:$0xff]  }
 0x10f   :  { %17292 = vmatprep.subr.bf16.mxu0 %v19198_v11  ;;  %v19236_v11 = vld [vmem:[#allocation2 + $0x7f8] sm:$0xff]  }
 0x110   :  { %17313 = vmatpush3.bf16.msra.mxu1 %v19197_v10 }
 0x111   :  { %17314 = vmatprep.subr.bf16.mxu1 %v19200_v13  ;;  %v2991_v13 = vrot.slane %v20583_v25, %v20533_v34  ;;  %v19249_v25 = vld [vmem:[#allocation2 + $0x8d0] sm:$0xff]  }
 0x112   :  { %17293 = vmatpush3.bf16.msra.mxu0 %v19199_v12  ;;  %v19238_v12 = vld [vmem:[#allocation2 + $0x7b8] sm:$0xff]  }
 0x113   :  { %17294 = vmatprep.subr.bf16.mxu0 %v19202_v15  ;;  %v19240_v15 = vld [vmem:[#allocation2 + $0x800] sm:$0xff]   ;;  %v3007_v18 = vcombine.high %v2991_v13, %v2991_v13 }
 0x114   :  { %17315 = vmatpush3.bf16.msra.mxu1 %v19201_v14  ;;  %v19239_v14 = vld [vmem:[#allocation2 + $0x840] sm:$0xff]  }
 0x115   :  { %17316 = vmatprep.subr.bf16.mxu1 %v19204_v17  ;;  %v19242_v17 = vld [vmem:[#allocation2 + $0x880] sm:$0xff]  }
 0x116   :  { %17295 = vmatpush3.bf16.msra.mxu0 %v19203_v16  ;;  %v19241_v16 = vld [vmem:[#allocation2 + $0x8c0] sm:$0xff]  }
 0x117   :  { %17324 = vmatprep.subr.bf16.mxu0 %v19206_v22  ;;  %v19246_v22 = vld [vmem:[#allocation2 + $0x888] sm:$0xff]  }
 0x118   :  { %17317 = vmatpush3.bf16.msra.mxu1 %v19205_v20  ;;  %v19244_v20 = vld [vmem:[#allocation2 + $0x808] sm:$0xff]  }
 0x119   :  { %17346 = vmatprep.subr.bf16.mxu1 %v19208_v26  ;;  %12651 = vmatmul.mubr.bf16.vlgmr.msra.gmra.mrb[24].mxu0 %v2984_v24  ;;  %v19248_v24 = vld [vmem:[#allocation2 + $0x810] sm:$0xff]  }
 0x11a   :  { %17325 = vmatpush3.bf16.msra.mxu0 %v19207_v28  ;;  %12730 = vmatprep.mubr.bf16.mxu0 %v3005_v35  ;;  %v19250_v26 = vld [vmem:[#allocation2 + $0x890] sm:$0xff]   ;;  %v19252_v28 = vld [vmem:[#allocation2 + $0x818] sm:$0xff]   ;;  %v19258_v35 = vld [vmem:[#allocation2 + $0x8a0] sm:$0xff]  }
 0x11b   :  { %12691 = vmatmul.mubr.bf16.vlgmr.msra.gmra.mrb[24].mxu1 %v3006_v30  ;;  %17326 = vmatprep.subr.bf16.mxu0 %v19210_v31  ;;  %v19254_v30 = vld [vmem:[#allocation2 + $0x898] sm:$0xff]   ;;  %v19255_v31 = vld [vmem:[#allocation2 + $0x860] sm:$0xff]  }
 0x11c   :  { %17347 = vmatpush3.bf16.msra.mxu1 %v19209_v33  ;;  %12770 = vmatprep.mubr.bf16.mxu1 %v3009_v38  ;;  %v19257_v33 = vld [vmem:[#allocation2 + $0x8e0] sm:$0xff]   ;;  %v19261_v38 = vld [vmem:[#allocation2 + $0x8e8] sm:$0xff]  }
 0x11d   :  { %17348 = vmatprep.subr.bf16.mxu1 %v19212_v36  ;;  %v19259_v36 = vld [vmem:[#allocation2 + $0x868] sm:$0xff]  }
 0x11e   :  { %17327 = vmatpush3.bf16.msra.mxu0 %v19211_v37  ;;  %v19260_v37 = vld [vmem:[#allocation2 + $0x828] sm:$0xff]  }
 0x11f   :  { %17328 = vmatprep.subr.bf16.mxu0 %v19214_v39  ;;  %v19262_v39 = vld [vmem:[#allocation2 + $0x8a8] sm:$0xff]  }
 0x120   :  { %17349 = vmatpush3.bf16.msra.mxu1 %v19213_v40 }
 0x121   :  { %17350 = vmatprep.subr.bf16.mxu1 %v19216_v41  ;;  %v19263_v41 = vld [vmem:[#allocation2 + $0x870] sm:$0xff]  }
 0x122   :  { %17329 = vmatpush3.bf16.msra.mxu0 %v19215_v42 }
 0x123   :  { %17330 = vmatprep.subr.bf16.mxu0 %v19218_v43  ;;  %v19264_v43 = vld [vmem:[#allocation2 + $0x830] sm:$0xff]  }
 0x124   :  { %17351 = vmatpush3.bf16.msra.mxu1 %v19217_v44 }
 0x125   :  { %17352 = vmatprep.subr.bf16.mxu1 %v19220_v45 }
 0x126   :  { %17331 = vmatpush3.bf16.msra.mxu0 %v19219_v46 }
 0x127   :  { %17332 = vmatprep.subr.bf16.mxu0 %v19222_v47 }
 0x128   :  { %17353 = vmatpush3.bf16.msra.mxu1 %v19221_v48 }
 0x129   :  { %17354 = vmatprep.subr.bf16.mxu1 %v19224_v49  ;;  %v19265_v49 = vld [vmem:[#allocation2 + $0x8f0] sm:$0xff]  }
 0x12a   :  { %17333 = vmatpush3.bf16.msra.mxu0 %v19223_v50  ;;  %v19266_v50 = vld [vmem:[#allocation2 + $0x8b0] sm:$0xff]  }
 0x12b   :  { %17334 = vmatprep.subr.bf16.mxu0 %v19226_v51 }
 0x12c   :  { %v17032_v56 = vpop.f32.mrb[0].mxu0  ;;  %17355 = vmatpush3.bf16.msra.mxu1 %v19225_v52 }
 0x12d   :  { %v17033_v58 = vpop.f32.mrb[1].mxu0  ;;  %17356 = vmatprep.subr.bf16.mxu1 %v19228_v53  ;;  %v19267_v53 = vld [vmem:[#allocation2 + $0x878] sm:$0xff]  }
 0x12e   :  { %v17034_v60 = vadd.f32 %v17033_v58, %v17032_v56  ;;  %v17035_v61 = vpop.f32.mrb[2].mxu0  ;;  %v17054_v62 = vpop.f32.mrb[0].mxu1  ;;  %17335 = vmatpush3.bf16.msra.mxu0 %v19227_v55  ;;  %v19268_v56 = vld [vmem:[#allocation2 + $0x838] sm:$0xff]  }
 0x12f   :  { %v17036_v1 = vpop.f32.mrb[3].mxu0  ;;  %v17055_v2 = vpop.f32.mrb[1].mxu1  ;;  %17336 = vmatprep.subr.bf16.mxu0 %v19230_v57  ;;  %v19269_v58 = vld [vmem:[#allocation2 + $0x8f8] sm:$0xff]  }
 0x130   :  { %v12173_v4 = vadd.f32 %v17034_v60, %v15661_v54  ;;  %v17056_v5 = vadd.f32 %v17055_v2, %v17054_v62  ;;  %v17057_v7 = vpop.f32.mrb[2].mxu1  ;;  %17357 = vmatpush3.bf16.msra.mxu1 %v19229_v59  ;;  %v63_v59 = vld [vmem:[%s20998_s0 + $0x20] sm:$0xff]  ;;  %v19270_v61 = vld [vmem:[#allocation2 + $0x8b8] sm:$0xff]  }
 0x131   :  { %v17058_v9 = vpop.f32.mrb[3].mxu1  ;;  %17358 = vmatprep.subr.bf16.mxu1 %v19232_v0  ;;  %v3017_v60 = vrot.slane %v63_v59, %v20533_v34  ;;  %v3010_v62 = vcombine.high %v63_v59, %v63_v59  ;;  %v19272_v2 = vld [vmem:[#allocation2 + $0x900] sm:$0xff]   ;;  %v19308_v59 = vld [vmem:[#allocation2 + $0xa48] sm:$0xff]  }
 0x132   :  { %v20589_v10 = vadd.f32 %v17056_v5, %v12173_v4  ;;  %17337 = vmatpush3.bf16.msra.mxu0 %v19231_v63  ;;  %v19271_v63 = vld [vmem:[#allocation2 + $0x940] sm:$0xff]   ;;  %v19275_v9 = vld [vmem:[#allocation2 + $0x948] sm:$0xff]  }
 0x133   :  { %17338 = vmatprep.subr.bf16.mxu0 %v19234_v6  ;;  %v3025_v0 = vcombine.high %v3017_v60, %v3017_v60  ;;  %v3033_v1 = vrot.slane %v3017_v60, %v20533_v34  ;;  %v19273_v4 = vld [vmem:[#allocation2 + $0x9c0] sm:$0xff]   ;;  %v19309_v60 = vld [vmem:[#allocation2 + $0xa08] sm:$0xff]  }
 0x134   :  { %17359 = vmatpush3.bf16.msra.mxu1 %v19233_v3  ;;  %v20602_v3 = vrot.slane %v3010_v62, %v20533_v34  ;;  %v19274_v6 = vld [vmem:[#allocation2 + $0x980] sm:$0xff]   ;;  %v19311_v62 = vld [vmem:[#allocation2 + $0xa88] sm:$0xff]  }
 0x135   :  { %17360 = vmatprep.subr.bf16.mxu1 %v19236_v11  ;;  %v3047_v5 = vrot.slane %v3025_v0, %v20533_v34  ;;  %v19276_v11 = vld [vmem:[#allocation2 + $0x908] sm:$0xff]   ;;  %v19313_v0 = vld [vmem:[#allocation2 + $0xa10] sm:$0xff]  }
 0x136   :  { %17339 = vmatpush3.bf16.msra.mxu0 %v19235_v8  ;;  %v3026_v7 = vcombine.high %v20602_v3, %v20602_v3  ;;  %v3055_v8 = vcombine.high %v3033_v1, %v3033_v1 }
 0x137   :  { %17368 = vmatprep.subr.bf16.mxu0 %v19239_v14  ;;  %v19278_v14 = vld [vmem:[#allocation2 + $0x988] sm:$0xff]  }
 0x138   :  { %17361 = vmatpush3.bf16.msra.mxu1 %v19238_v12  ;;  %v3054_v12 = vrot.slane %v3026_v7, %v20533_v34  ;;  %v19320_v7 = vld [vmem:[#allocation2 + $0xa60] sm:$0xff]  }
 0x139   :  { %12731 = vmatmul.mubr.bf16.vlgmr.msra.gmra.mrb[28].mxu0 %v2991_v13  ;;  %17390 = vmatprep.subr.bf16.mxu1 %v19241_v16  ;;  %v19277_v13 = vld [vmem:[#allocation2 + $0x9c8] sm:$0xff]   ;;  %v19279_v16 = vld [vmem:[#allocation2 + $0x950] sm:$0xff]  }
 0x13a   :  { %17369 = vmatpush3.bf16.msra.mxu0 %v19240_v15  ;;  %12810 = vmatprep.mubr.bf16.mxu0 %v3047_v5  ;;  %v3058_v15 = vcombine.high %v3054_v12, %v3054_v12 }
 0x13b   :  { %12771 = vmatmul.mubr.bf16.vlgmr.msra.gmra.mrb[28].mxu1 %v3007_v18  ;;  %17370 = vmatprep.subr.bf16.mxu0 %v19243_v19  ;;  %v19281_v18 = vld [vmem:[#allocation2 + $0x9d0] sm:$0xff]  }
 0x13c   :  { %17391 = vmatpush3.bf16.msra.mxu1 %v19242_v17  ;;  %v19280_v17 = vld [vmem:[#allocation2 + $0x910] sm:$0xff]  }
 0x13d   :  { %17392 = vmatprep.subr.bf16.mxu1 %v19245_v21  ;;  %v19282_v19 = vld [vmem:[#allocation2 + $0x990] sm:$0xff]   ;;  %v19284_v21 = vld [vmem:[#allocation2 + $0x918] sm:$0xff]  }
 0x13e   :  { %17371 = vmatpush3.bf16.msra.mxu0 %v19244_v20  ;;  %v19283_v20 = vld [vmem:[#allocation2 + $0x958] sm:$0xff]  }
 0x13f   :  { %17372 = vmatprep.subr.bf16.mxu0 %v19247_v23  ;;  %v19286_v23 = vld [vmem:[#allocation2 + $0x998] sm:$0xff]  }
 0x140   :  { %17393 = vmatpush3.bf16.msra.mxu1 %v19246_v22  ;;  %v19285_v22 = vld [vmem:[#allocation2 + $0x9d8] sm:$0xff]  }
 0x141   :  { %17394 = vmatprep.subr.bf16.mxu1 %v19249_v25  ;;  %v19288_v25 = vld [vmem:[#allocation2 + $0x920] sm:$0xff]  }
 0x142   :  { %17373 = vmatpush3.bf16.msra.mxu0 %v19248_v24  ;;  %v19287_v24 = vld [vmem:[#allocation2 + $0x960] sm:$0xff]  }
 0x143   :  { %17374 = vmatprep.subr.bf16.mxu0 %v19251_v27  ;;  %v19290_v27 = vld [vmem:[#allocation2 + $0x9a0] sm:$0xff]  }
 0x144   :  { %17395 = vmatpush3.bf16.msra.mxu1 %v19250_v26  ;;  %v19289_v26 = vld [vmem:[#allocation2 + $0x9e0] sm:$0xff]  }
 0x145   :  { %17396 = vmatprep.subr.bf16.mxu1 %v19253_v29  ;;  %v19292_v29 = vld [vmem:[#allocation2 + $0x928] sm:$0xff]  }
 0x146   :  { %17375 = vmatpush3.bf16.msra.mxu0 %v19252_v28  ;;  %v19291_v28 = vld [vmem:[#allocation2 + $0x968] sm:$0xff]  }
 0x147   :  { %17376 = vmatprep.subr.bf16.mxu0 %v19255_v31 }
 0x148   :  { %17397 = vmatpush3.bf16.msra.mxu1 %v19254_v30  ;;  %v19293_v30 = vld [vmem:[#allocation2 + $0x9e8] sm:$0xff]  }
 0x149   :  { %17398 = vmatprep.subr.bf16.mxu1 %v19257_v33 }
 0x14a   :  { %17377 = vmatpush3.bf16.msra.mxu0 %v19256_v32  ;;  %v19294_v32 = vld [vmem:[#allocation2 + $0x9a8] sm:$0xff]  }
 0x14b   :  { %17378 = vmatprep.subr.bf16.mxu0 %v19259_v36 }
 0x14c   :  { %v17076_v40 = vpop.f32.mrb[4].mxu0  ;;  %17399 = vmatpush3.bf16.msra.mxu1 %v19258_v35  ;;  %v19295_v35 = vld [vmem:[#allocation2 + $0x970] sm:$0xff]  }
 0x14d   :  { %v17077_v42 = vpop.f32.mrb[5].mxu0  ;;  %17400 = vmatprep.subr.bf16.mxu1 %v19261_v38 }
 0x14e   :  { %v17078_v44 = vadd.f32 %v17077_v42, %v17076_v40  ;;  %v17079_v45 = vpop.f32.mrb[6].mxu0  ;;  %v17098_v46 = vpop.f32.mrb[4].mxu1  ;;  %17379 = vmatpush3.bf16.msra.mxu0 %v19260_v37  ;;  %v19297_v40 = vld [vmem:[#allocation2 + $0x9f0] sm:$0xff]  }
 0x14f   :  { %v17080_v47 = vpop.f32.mrb[7].mxu0  ;;  %v17099_v48 = vpop.f32.mrb[5].mxu1  ;;  %17380 = vmatprep.subr.bf16.mxu0 %v19263_v41  ;;  %v19298_v45 = vld [vmem:[#allocation2 + $0x9b0] sm:$0xff]  }
 0x150   :  { %v12253_v51 = vadd.f32 %v17078_v44, %v20589_v10  ;;  %v17100_v52 = vadd.f32 %v17099_v48, %v17098_v46  ;;  %17401 = vmatpush3.bf16.msra.mxu1 %v19262_v39  ;;  %v17101_v54 = vpop.f32.mrb[6].mxu1  ;;  %v3057_v10 = vcombine.high %v3047_v5, %v3047_v5  ;;  %v19296_v39 = vld [vmem:[#allocation2 + $0x930] sm:$0xff]   ;;  %v19299_v47 = vld [vmem:[#allocation2 + $0x978] sm:$0xff]  }
 0x151   :  { %17402 = vmatprep.subr.bf16.mxu1 %v19265_v49  ;;  %v17102_v57 = vpop.f32.mrb[7].mxu1  ;;  %v19304_v54 = vld [vmem:[#allocation2 + $0xa40] sm:$0xff]   ;;  %v19318_v5 = vld [vmem:[#allocation2 + $0xad8] sm:$0xff]  }
 0x152   :  { %v20594_v55 = vadd.f32 %v17100_v52, %v12253_v51  ;;  %17381 = vmatpush3.bf16.msra.mxu0 %v19264_v43  ;;  %12850 = vmatprep.mubr.bf16.mxu1 %v3057_v10  ;;  %v19301_v51 = vld [vmem:[#allocation2 + $0x9f8] sm:$0xff]   ;;  %v19307_v57 = vld [vmem:[#allocation2 + $0xa80] sm:$0xff]  }
 0x153   :  { %17382 = vmatprep.subr.bf16.mxu0 %v19267_v53  ;;  %v19303_v52 = vld [vmem:[#allocation2 + $0x9b8] sm:$0xff]   ;;  %v3040_v53 = vrot.slane %v20602_v3, %v20533_v34  ;;  %v19323_v10 = vld [vmem:[#allocation2 + $0xaa0] sm:$0xff]  }
 0x154   :  { %17403 = vmatpush3.bf16.msra.mxu1 %v19266_v50  ;;  %v19300_v50 = vld [vmem:[#allocation2 + $0x938] sm:$0xff]  }
 0x155   :  { %17404 = vmatprep.subr.bf16.mxu1 %v19269_v58  ;;  %v3056_v58 = vcombine.high %v3040_v53, %v3040_v53  ;;  %v19316_v3 = vld [vmem:[#allocation2 + $0xa58] sm:$0xff]  }
 0x156   :  { %17383 = vmatpush3.bf16.msra.mxu0 %v19268_v56  ;;  %v19306_v56 = vld [vmem:[#allocation2 + $0xac0] sm:$0xff]  }
 0x157   :  { %17412 = vmatprep.subr.bf16.mxu0 %v19271_v63  ;;  %v19312_v63 = vld [vmem:[#allocation2 + $0xa50] sm:$0xff]  }
 0x158   :  { %17405 = vmatpush3.bf16.msra.mxu1 %v19270_v61  ;;  %v19310_v61 = vld [vmem:[#allocation2 + $0xac8] sm:$0xff]  }
 0x159   :  { %17434 = vmatprep.subr.bf16.mxu1 %v19273_v4  ;;  %12811 = vmatmul.mubr.bf16.vlgmr.msra.gmra.mrb[32].mxu0 %v3033_v1  ;;  %v19314_v1 = vld [vmem:[#allocation2 + $0xad0] sm:$0xff]   ;;  %v19317_v4 = vld [vmem:[#allocation2 + $0xa18] sm:$0xff]  }
 0x15a   :  { %17413 = vmatpush3.bf16.msra.mxu0 %v19272_v2  ;;  %12890 = vmatprep.mubr.bf16.mxu0 %v3054_v12  ;;  %v19315_v2 = vld [vmem:[#allocation2 + $0xa90] sm:$0xff]   ;;  %v19325_v12 = vld [vmem:[#allocation2 + $0xa28] sm:$0xff]  }
 0x15b   :  { %12851 = vmatmul.mubr.bf16.vlgmr.msra.gmra.mrb[32].mxu1 %v3055_v8  ;;  %17414 = vmatprep.subr.bf16.mxu0 %v19275_v9  ;;  %v19321_v8 = vld [vmem:[#allocation2 + $0xa20] sm:$0xff]  }
 0x15c   :  { %17435 = vmatpush3.bf16.msra.mxu1 %v19274_v6  ;;  %12930 = vmatprep.mubr.bf16.mxu1 %v3058_v15  ;;  %v19319_v6 = vld [vmem:[#allocation2 + $0xa98] sm:$0xff]   ;;  %v19322_v9 = vld [vmem:[#allocation2 + $0xae0] sm:$0xff]   ;;  %v19327_v15 = vld [vmem:[#allocation2 + $0xaa8] sm:$0xff]  }
 0x15d   :  { %17436 = vmatprep.subr.bf16.mxu1 %v19277_v13  ;;  %v19326_v13 = vld [vmem:[#allocation2 + $0xae8] sm:$0xff]  }
 0x15e   :  { %17415 = vmatpush3.bf16.msra.mxu0 %v19276_v11  ;;  %v19324_v11 = vld [vmem:[#allocation2 + $0xa68] sm:$0xff]  }
 0x15f   :  { %17416 = vmatprep.subr.bf16.mxu0 %v19279_v16 }
 0x160   :  { %17437 = vmatpush3.bf16.msra.mxu1 %v19278_v14 }
 0x161   :  { %17438 = vmatprep.subr.bf16.mxu1 %v19281_v18 }
 0x162   :  { %17417 = vmatpush3.bf16.msra.mxu0 %v19280_v17  ;;  %v19328_v17 = vld [vmem:[#allocation2 + $0xa70] sm:$0xff]  }
 0x163   :  { %17418 = vmatprep.subr.bf16.mxu0 %v19283_v20 }
 0x164   :  { %17439 = vmatpush3.bf16.msra.mxu1 %v19282_v19 }
 0x165   :  { %17440 = vmatprep.subr.bf16.mxu1 %v19285_v22 }
 0x166   :  { %17419 = vmatpush3.bf16.msra.mxu0 %v19284_v21 }
 0x167   :  { %17420 = vmatprep.subr.bf16.mxu0 %v19287_v24  ;;  %v19330_v24 = vld [vmem:[#allocation2 + $0xaf0] sm:$0xff]  }
 0x168   :  { %17441 = vmatpush3.bf16.msra.mxu1 %v19286_v23  ;;  %v19329_v23 = vld [vmem:[#allocation2 + $0xa30] sm:$0xff]  }
 0x169   :  { %17442 = vmatprep.subr.bf16.mxu1 %v19289_v26 }
 0x16a   :  { %17421 = vmatpush3.bf16.msra.mxu0 %v19288_v25 }
 0x16b   :  { %17422 = vmatprep.subr.bf16.mxu0 %v19291_v28 }
 0x16c   :  { %v17120_v31 = vpop.f32.mrb[8].mxu0  ;;  %17443 = vmatpush3.bf16.msra.mxu1 %v19290_v27  ;;  %v19331_v27 = vld [vmem:[#allocation2 + $0xab0] sm:$0xff]  }
 0x16d   :  { %v17121_v33 = vpop.f32.mrb[9].mxu0  ;;  %17444 = vmatprep.subr.bf16.mxu1 %v19293_v30  ;;  %v19332_v30 = vld [vmem:[#allocation2 + $0xa78] sm:$0xff]  }
 0x16e   :  { %v17122_v36 = vadd.f32 %v17121_v33, %v17120_v31  ;;  %v17123_v37 = vpop.f32.mrb[10].mxu0  ;;  %v17142_v38 = vpop.f32.mrb[8].mxu1  ;;  %17423 = vmatpush3.bf16.msra.mxu0 %v19292_v29  ;;  %v19334_v33 = vld [vmem:[#allocation2 + $0xaf8] sm:$0xff]  }
 0x16f   :  { %v17124_v41 = vpop.f32.mrb[11].mxu0  ;;  %v17143_v42 = vpop.f32.mrb[9].mxu1  ;;  %17424 = vmatprep.subr.bf16.mxu0 %v19295_v35  ;;  %v64_v35 = vld [vmem:[%s20998_s0 + $0x28] sm:$0xff]  ;;  %v19335_v37 = vld [vmem:[#allocation2 + $0xab8] sm:$0xff]  }
 0x170   :  { %v12333_v43 = vadd.f32 %v17122_v36, %v20594_v55  ;;  %v17144_v44 = vadd.f32 %v17143_v42, %v17142_v38  ;;  %v17145_v46 = vpop.f32.mrb[10].mxu1  ;;  %17445 = vmatpush3.bf16.msra.mxu1 %v19294_v32  ;;  %v19305_v55 = vld [vmem:[#allocation2 + $0xa00] sm:$0xff]   ;;  %v19333_v32 = vld [vmem:[#allocation2 + $0xa38] sm:$0xff]   ;;  %v3066_v36 = vrot.slane %v64_v35, %v20533_v34  ;;  %v3059_v38 = vcombine.high %v64_v35, %v64_v35  ;;  %v19373_v35 = vld [vmem:[#allocation2 + $0xc48] sm:$0xff]  }
 0x171   :  { %v17146_v48 = vpop.f32.mrb[11].mxu1  ;;  %17446 = vmatprep.subr.bf16.mxu1 %v19297_v40 }
 0x172   :  { %v20609_v49 = vadd.f32 %v17144_v44, %v12333_v43  ;;  %17425 = vmatpush3.bf16.msra.mxu0 %v19296_v39  ;;  %v19336_v39 = vld [vmem:[#allocation2 + $0xb40] sm:$0xff]   ;;  %v3074_v40 = vcombine.high %v3066_v36, %v3066_v36  ;;  %v3082_v41 = vrot.slane %v3066_v36, %v20533_v34  ;;  %v20622_v42 = vrot.slane %v3059_v38, %v20533_v34  ;;  %v19340_v48 = vld [vmem:[#allocation2 + $0xb48] sm:$0xff]  }
 0x173   :  { %17426 = vmatprep.subr.bf16.mxu0 %v19299_v47  ;;  %v19338_v43 = vld [vmem:[#allocation2 + $0xbc0] sm:$0xff]   ;;  %v19374_v36 = vld [vmem:[#allocation2 + $0xc08] sm:$0xff]  }
 0x174   :  { %17447 = vmatpush3.bf16.msra.mxu1 %v19298_v45  ;;  %v3096_v44 = vrot.slane %v3074_v40, %v20533_v34  ;;  %v19337_v45 = vld [vmem:[#allocation2 + $0xb00] sm:$0xff]   ;;  %v3075_v46 = vcombine.high %v20622_v42, %v20622_v42  ;;  %v3104_v47 = vcombine.high %v3082_v41, %v3082_v41  ;;  %v19376_v38 = vld [vmem:[#allocation2 + $0xc88] sm:$0xff]   ;;  %v19378_v40 = vld [vmem:[#allocation2 + $0xc10] sm:$0xff]  }
 0x175   :  { %17448 = vmatprep.subr.bf16.mxu1 %v19301_v51 }
 0x176   :  { %17427 = vmatpush3.bf16.msra.mxu0 %v19300_v50  ;;  %v19339_v50 = vld [vmem:[#allocation2 + $0xb80] sm:$0xff]   ;;  %v3103_v51 = vrot.slane %v3075_v46, %v20533_v34  ;;  %v19384_v46 = vld [vmem:[#allocation2 + $0xc98] sm:$0xff]  }
 0x177   :  { %17456 = vmatprep.subr.bf16.mxu0 %v19304_v54 }
 0x178   :  { %17449 = vmatpush3.bf16.msra.mxu1 %v19303_v52  ;;  %v19342_v52 = vld [vmem:[#allocation2 + $0xbc8] sm:$0xff]   ;;  %v3107_v54 = vcombine.high %v3103_v51, %v3103_v51 }
 0x179   :  { %12891 = vmatmul.mubr.bf16.vlgmr.msra.gmra.mrb[36].mxu0 %v3040_v53  ;;  %17478 = vmatprep.subr.bf16.mxu1 %v19306_v56  ;;  %v19341_v53 = vld [vmem:[#allocation2 + $0xb08] sm:$0xff]  }
 0x17a   :  { %17457 = vmatpush3.bf16.msra.mxu0 %v19305_v55  ;;  %12970 = vmatprep.mubr.bf16.mxu0 %v3096_v44  ;;  %v19344_v55 = vld [vmem:[#allocation2 + $0xb50] sm:$0xff]   ;;  %v19343_v56 = vld [vmem:[#allocation2 + $0xb88] sm:$0xff]  }
 0x17b   :  { %12931 = vmatmul.mubr.bf16.vlgmr.msra.gmra.mrb[36].mxu1 %v3056_v58  ;;  %17458 = vmatprep.subr.bf16.mxu0 %v19308_v59  ;;  %v19345_v58 = vld [vmem:[#allocation2 + $0xb10] sm:$0xff]   ;;  %v19348_v59 = vld [vmem:[#allocation2 + $0xb58] sm:$0xff]  }
 0x17c   :  { %17479 = vmatpush3.bf16.msra.mxu1 %v19307_v57  ;;  %v19346_v57 = vld [vmem:[#allocation2 + $0xbd0] sm:$0xff]  }
 0x17d   :  { %17480 = vmatprep.subr.bf16.mxu1 %v19310_v61  ;;  %v19350_v61 = vld [vmem:[#allocation2 + $0xbd8] sm:$0xff]  }
 0x17e   :  { %17459 = vmatpush3.bf16.msra.mxu0 %v19309_v60  ;;  %v19347_v60 = vld [vmem:[#allocation2 + $0xb90] sm:$0xff]  }
 0x17f   :  { %17460 = vmatprep.subr.bf16.mxu0 %v19312_v63  ;;  %v19352_v63 = vld [vmem:[#allocation2 + $0xb60] sm:$0xff]  }
 0x180   :  { %17481 = vmatpush3.bf16.msra.mxu1 %v19311_v62  ;;  %v19349_v62 = vld [vmem:[#allocation2 + $0xb18] sm:$0xff]  }
 0x181   :  { %17482 = vmatprep.subr.bf16.mxu1 %v19314_v1  ;;  %v19354_v1 = vld [vmem:[#allocation2 + $0xbe0] sm:$0xff]  }
 0x182   :  { %17461 = vmatpush3.bf16.msra.mxu0 %v19313_v0  ;;  %v19351_v0 = vld [vmem:[#allocation2 + $0xb98] sm:$0xff]  }
 0x183   :  { %17462 = vmatprep.subr.bf16.mxu0 %v19316_v3  ;;  %v19356_v3 = vld [vmem:[#allocation2 + $0xb68] sm:$0xff]  }
 0x184   :  { %17483 = vmatpush3.bf16.msra.mxu1 %v19315_v2  ;;  %v19353_v2 = vld [vmem:[#allocation2 + $0xb20] sm:$0xff]  }
 0x185   :  { %17484 = vmatprep.subr.bf16.mxu1 %v19318_v5 }
 0x186   :  { %17463 = vmatpush3.bf16.msra.mxu0 %v19317_v4  ;;  %v19355_v4 = vld [vmem:[#allocation2 + $0xba0] sm:$0xff]  }
 0x187   :  { %17464 = vmatprep.subr.bf16.mxu0 %v19320_v7 }
 0x188   :  { %17485 = vmatpush3.bf16.msra.mxu1 %v19319_v6  ;;  %v19358_v6 = vld [vmem:[#allocation2 + $0xbe8] sm:$0xff]  }
 0x189   :  { %17486 = vmatprep.subr.bf16.mxu1 %v19322_v9 }
 0x18a   :  { %17465 = vmatpush3.bf16.msra.mxu0 %v19321_v8  ;;  %v19357_v8 = vld [vmem:[#allocation2 + $0xb28] sm:$0xff]  }
 0x18b   :  { %17466 = vmatprep.subr.bf16.mxu0 %v19324_v11 }
 0x18c   :  { %v17164_v14 = vpop.f32.mrb[12].mxu0  ;;  %17487 = vmatpush3.bf16.msra.mxu1 %v19323_v10 }
 0x18d   :  { %v17165_v16 = vpop.f32.mrb[13].mxu0  ;;  %17488 = vmatprep.subr.bf16.mxu1 %v19326_v13  ;;  %v19360_v13 = vld [vmem:[#allocation2 + $0xb70] sm:$0xff]  }
 0x18e   :  { %v17166_v18 = vadd.f32 %v17165_v16, %v17164_v14  ;;  %v17167_v19 = vpop.f32.mrb[14].mxu0  ;;  %v17186_v20 = vpop.f32.mrb[12].mxu1  ;;  %17467 = vmatpush3.bf16.msra.mxu0 %v19325_v12  ;;  %v19359_v12 = vld [vmem:[#allocation2 + $0xba8] sm:$0xff]   ;;  %v19361_v16 = vld [vmem:[#allocation2 + $0xb30] sm:$0xff]  }
 0x18f   :  { %v17168_v21 = vpop.f32.mrb[15].mxu0  ;;  %v17187_v22 = vpop.f32.mrb[13].mxu1  ;;  %17468 = vmatprep.subr.bf16.mxu0 %v19328_v17  ;;  %v19362_v19 = vld [vmem:[#allocation2 + $0xbf0] sm:$0xff]  }
 0x190   :  { %v12413_v25 = vadd.f32 %v17166_v18, %v20609_v49  ;;  %v17188_v26 = vadd.f32 %v17187_v22, %v17186_v20  ;;  %v17189_v28 = vpop.f32.mrb[14].mxu1  ;;  %17489 = vmatpush3.bf16.msra.mxu1 %v19327_v15  ;;  %v3106_v49 = vcombine.high %v3096_v44, %v3096_v44  ;;  %v19363_v21 = vld [vmem:[#allocation2 + $0xbb0] sm:$0xff]   ;;  %v19382_v44 = vld [vmem:[#allocation2 + $0xc18] sm:$0xff]  }
 0x191   :  { %v17190_v31 = vpop.f32.mrb[15].mxu1  ;;  %17490 = vmatprep.subr.bf16.mxu1 %v19330_v24  ;;  %v19364_v24 = vld [vmem:[#allocation2 + $0xb78] sm:$0xff]   ;;  %v3089_v28 = vrot.slane %v20622_v42, %v20533_v34  ;;  %v19380_v42 = vld [vmem:[#allocation2 + $0xc90] sm:$0xff]  }
 0x192   :  { %v20614_v29 = vadd.f32 %v17188_v26, %v12413_v25  ;;  %17469 = vmatpush3.bf16.msra.mxu0 %v19329_v23  ;;  %13010 = vmatprep.mubr.bf16.mxu1 %v3106_v49  ;;  %v19365_v25 = vld [vmem:[#allocation2 + $0xb38] sm:$0xff]   ;;  %v19371_v31 = vld [vmem:[#allocation2 + $0xcc0] sm:$0xff]  }
 0x193   :  { %17470 = vmatprep.subr.bf16.mxu0 %v19332_v30  ;;  %v19366_v26 = vld [vmem:[#allocation2 + $0xbf8] sm:$0xff]   ;;  %v19370_v30 = vld [vmem:[#allocation2 + $0xc00] sm:$0xff]  }
 0x194   :  { %17491 = vmatpush3.bf16.msra.mxu1 %v19331_v27  ;;  %v19368_v27 = vld [vmem:[#allocation2 + $0xbb8] sm:$0xff]   ;;  %v19387_v49 = vld [vmem:[#allocation2 + $0xce0] sm:$0xff]  }
 0x195   :  { %17492 = vmatprep.subr.bf16.mxu1 %v19334_v33  ;;  %v3105_v33 = vcombine.high %v3089_v28, %v3089_v28 }
 0x196   :  { %17471 = vmatpush3.bf16.msra.mxu0 %v19333_v32  ;;  %v19372_v32 = vld [vmem:[#allocation2 + $0xc80] sm:$0xff]  }
 0x197   :  { %17500 = vmatprep.subr.bf16.mxu0 %v19336_v39  ;;  %v19377_v39 = vld [vmem:[#allocation2 + $0xc50] sm:$0xff]  }
 0x198   :  { %17493 = vmatpush3.bf16.msra.mxu1 %v19335_v37  ;;  %v19375_v37 = vld [vmem:[#allocation2 + $0xcc8] sm:$0xff]  }
 0x199   :  { %17522 = vmatprep.subr.bf16.mxu1 %v19338_v43  ;;  %12971 = vmatmul.mubr.bf16.vlgmr.msra.gmra.mrb[40].mxu0 %v3082_v41  ;;  %v19379_v41 = vld [vmem:[#allocation2 + $0xcd0] sm:$0xff]   ;;  %v19381_v43 = vld [vmem:[#allocation2 + $0xc58] sm:$0xff]  }
 0x19a   :  { %17501 = vmatpush3.bf16.msra.mxu0 %v19337_v45  ;;  %13050 = vmatprep.mubr.bf16.mxu0 %v3103_v51  ;;  %v19383_v45 = vld [vmem:[#allocation2 + $0xcd8] sm:$0xff]   ;;  %v19389_v51 = vld [vmem:[#allocation2 + $0xc68] sm:$0xff]  }
 0x19b   :  { %13011 = vmatmul.mubr.bf16.vlgmr.msra.gmra.mrb[40].mxu1 %v3104_v47  ;;  %17502 = vmatprep.subr.bf16.mxu0 %v19340_v48  ;;  %v19385_v47 = vld [vmem:[#allocation2 + $0xc60] sm:$0xff]  }
 0x19c   :  { %17523 = vmatpush3.bf16.msra.mxu1 %v19339_v50  ;;  %13090 = vmatprep.mubr.bf16.mxu1 %v3107_v54  ;;  %v19386_v48 = vld [vmem:[#allocation2 + $0xc20] sm:$0xff]   ;;  %v19391_v54 = vld [vmem:[#allocation2 + $0xce8] sm:$0xff]  }
 0x19d   :  { %17524 = vmatprep.subr.bf16.mxu1 %v19342_v52  ;;  %v19388_v50 = vld [vmem:[#allocation2 + $0xca0] sm:$0xff]   ;;  %v19390_v52 = vld [vmem:[#allocation2 + $0xc28] sm:$0xff]  }
 0x19e   :  { %17503 = vmatpush3.bf16.msra.mxu0 %v19341_v53 }
 0x19f   :  { %17504 = vmatprep.subr.bf16.mxu0 %v19344_v55 }
 0x1a0   :  { %17525 = vmatpush3.bf16.msra.mxu1 %v19343_v56  ;;  %v19392_v56 = vld [vmem:[#allocation2 + $0xca8] sm:$0xff]  }
 0x1a1   :  { %17526 = vmatprep.subr.bf16.mxu1 %v19346_v57 }
 0x1a2   :  { %17505 = vmatpush3.bf16.msra.mxu0 %v19345_v58 }
 0x1a3   :  { %17506 = vmatprep.subr.bf16.mxu0 %v19348_v59 }
 0x1a4   :  { %17527 = vmatpush3.bf16.msra.mxu1 %v19347_v60 }
 0x1a5   :  { %17528 = vmatprep.subr.bf16.mxu1 %v19350_v61 }
 0x1a6   :  { %17507 = vmatpush3.bf16.msra.mxu0 %v19349_v62  ;;  %v19393_v62 = vld [vmem:[#allocation2 + $0xc70] sm:$0xff]  }
 0x1a7   :  { %17508 = vmatprep.subr.bf16.mxu0 %v19352_v63  ;;  %v19394_v63 = vld [vmem:[#allocation2 + $0xc30] sm:$0xff]  }
 0x1a8   :  { %17529 = vmatpush3.bf16.msra.mxu1 %v19351_v0 }
 0x1a9   :  { %17530 = vmatprep.subr.bf16.mxu1 %v19354_v1 }
 0x1aa   :  { %17509 = vmatpush3.bf16.msra.mxu0 %v19353_v2  ;;  %v19395_v2 = vld [vmem:[#allocation2 + $0xcf0] sm:$0xff]  }
 0x1ab   :  { %17510 = vmatprep.subr.bf16.mxu0 %v19356_v3 }
 0x1ac   :  { %v17208_v5 = vpop.f32.mrb[16].mxu0  ;;  %17531 = vmatpush3.bf16.msra.mxu1 %v19355_v4 }
 0x1ad   :  { %v17209_v7 = vpop.f32.mrb[17].mxu0  ;;  %17532 = vmatprep.subr.bf16.mxu1 %v19358_v6 }
 0x1ae   :  { %v17210_v9 = vadd.f32 %v17209_v7, %v17208_v5  ;;  %v17211_v10 = vpop.f32.mrb[18].mxu0  ;;  %v17230_v11 = vpop.f32.mrb[16].mxu1  ;;  %17511 = vmatpush3.bf16.msra.mxu0 %v19357_v8  ;;  %v19396_v5 = vld [vmem:[#allocation2 + $0xcb0] sm:$0xff]   ;;  %v19397_v7 = vld [vmem:[#allocation2 + $0xc78] sm:$0xff]  }
 0x1af   :  { %v17212_v14 = vpop.f32.mrb[19].mxu0  ;;  %v17231_v15 = vpop.f32.mrb[17].mxu1  ;;  %17512 = vmatprep.subr.bf16.mxu0 %v19360_v13  ;;  %v19398_v8 = vld [vmem:[#allocation2 + $0xc38] sm:$0xff]   ;;  %v65_v10 = vld [vmem:[%s20998_s0 + $0x30] sm:$0xff] }
 0x1b0   :  { %v12493_v17 = vadd.f32 %v17210_v9, %v20614_v29  ;;  %v17232_v18 = vadd.f32 %v17231_v15, %v17230_v11  ;;  %v17233_v20 = vpop.f32.mrb[18].mxu1  ;;  %17533 = vmatpush3.bf16.msra.mxu1 %v19359_v12  ;;  %v19369_v29 = vld [vmem:[#allocation2 + $0xc40] sm:$0xff]   ;;  %v19399_v9 = vld [vmem:[#allocation2 + $0xcf8] sm:$0xff]   ;;  %v3115_v11 = vrot.slane %v65_v10, %v20533_v34  ;;  %v3108_v13 = vcombine.high %v65_v10, %v65_v10  ;;  %v19438_v10 = vld [vmem:[#allocation2 + $0xe48] sm:$0xff]  }
 0x1b1   :  { %v17234_v22 = vpop.f32.mrb[19].mxu1  ;;  %17534 = vmatprep.subr.bf16.mxu1 %v19362_v19  ;;  %v19400_v12 = vld [vmem:[#allocation2 + $0xcb8] sm:$0xff]   ;;  %v19401_v14 = vld [vmem:[#allocation2 + $0xd40] sm:$0xff]  }
 0x1b2   :  { %v20629_v23 = vadd.f32 %v17232_v18, %v12493_v17  ;;  %17513 = vmatpush3.bf16.msra.mxu0 %v19361_v16  ;;  %v3123_v15 = vcombine.high %v3115_v11, %v3115_v11  ;;  %v3131_v16 = vrot.slane %v3115_v11, %v20533_v34  ;;  %v20642_v17 = vrot.slane %v3108_v13, %v20533_v34  ;;  %v19403_v18 = vld [vmem:[#allocation2 + $0xdc0] sm:$0xff]   ;;  %v19439_v11 = vld [vmem:[#allocation2 + $0xe08] sm:$0xff]  }
 0x1b3   :  { %17514 = vmatprep.subr.bf16.mxu0 %v19364_v24  ;;  %v19402_v20 = vld [vmem:[#allocation2 + $0xd00] sm:$0xff]   ;;  %v19441_v13 = vld [vmem:[#allocation2 + $0xe88] sm:$0xff]  }
 0x1b4   :  { %17535 = vmatpush3.bf16.msra.mxu1 %v19363_v21  ;;  %v3145_v19 = vrot.slane %v3123_v15, %v20533_v34  ;;  %v3124_v21 = vcombine.high %v20642_v17, %v20642_v17  ;;  %v3153_v22 = vcombine.high %v3131_v16, %v3131_v16  ;;  %v19443_v15 = vld [vmem:[#allocation2 + $0xe10] sm:$0xff]  }
 0x1b5   :  { %17536 = vmatprep.subr.bf16.mxu1 %v19366_v26 }
 0x1b6   :  { %17515 = vmatpush3.bf16.msra.mxu0 %v19365_v25  ;;  %v3155_v24 = vcombine.high %v3145_v19, %v3145_v19  ;;  %v19404_v25 = vld [vmem:[#allocation2 + $0xd80] sm:$0xff]   ;;  %v3152_v26 = vrot.slane %v3124_v21, %v20533_v34  ;;  %v19449_v21 = vld [vmem:[#allocation2 + $0xe98] sm:$0xff]  }
 0x1b7   :  { %17544 = vmatprep.subr.bf16.mxu0 %v19369_v29 }
 0x1b8   :  { %17537 = vmatpush3.bf16.msra.mxu1 %v19368_v27  ;;  %v19407_v27 = vld [vmem:[#allocation2 + $0xdc8] sm:$0xff]   ;;  %v3156_v29 = vcombine.high %v3152_v26, %v3152_v26 }
 0x1b9   :  { %13051 = vmatmul.mubr.bf16.vlgmr.msra.gmra.mrb[44].mxu0 %v3089_v28  ;;  %17566 = vmatprep.subr.bf16.mxu1 %v19371_v31  ;;  %v19406_v28 = vld [vmem:[#allocation2 + $0xd08] sm:$0xff]  }
 0x1ba   :  { %17545 = vmatpush3.bf16.msra.mxu0 %v19370_v30  ;;  %13130 = vmatprep.mubr.bf16.mxu0 %v3145_v19  ;;  %v19409_v30 = vld [vmem:[#allocation2 + $0xd50] sm:$0xff]   ;;  %v19408_v31 = vld [vmem:[#allocation2 + $0xd88] sm:$0xff]   ;;  %v19447_v19 = vld [vmem:[#allocation2 + $0xe18] sm:$0xff]  }
 0x1bb   :  { %13091 = vmatmul.mubr.bf16.vlgmr.msra.gmra.mrb[44].mxu1 %v3105_v33  ;;  %17546 = vmatprep.subr.bf16.mxu0 %v19373_v35  ;;  %v19410_v33 = vld [vmem:[#allocation2 + $0xd10] sm:$0xff]   ;;  %v19413_v35 = vld [vmem:[#allocation2 + $0xd58] sm:$0xff]  }
 0x1bc   :  { %17567 = vmatpush3.bf16.msra.mxu1 %v19372_v32  ;;  %13170 = vmatprep.mubr.bf16.mxu1 %v3155_v24  ;;  %v19411_v32 = vld [vmem:[#allocation2 + $0xdd0] sm:$0xff]   ;;  %v19452_v24 = vld [vmem:[#allocation2 + $0xee0] sm:$0xff]  }
 0x1bd   :  { %17568 = vmatprep.subr.bf16.mxu1 %v19375_v37  ;;  %v19415_v37 = vld [vmem:[#allocation2 + $0xdd8] sm:$0xff]  }
 0x1be   :  { %17547 = vmatpush3.bf16.msra.mxu0 %v19374_v36  ;;  %v19412_v36 = vld [vmem:[#allocation2 + $0xd90] sm:$0xff]  }
 0x1bf   :  { %17548 = vmatprep.subr.bf16.mxu0 %v19377_v39  ;;  %v19417_v39 = vld [vmem:[#allocation2 + $0xd60] sm:$0xff]  }
 0x1c0   :  { %17569 = vmatpush3.bf16.msra.mxu1 %v19376_v38  ;;  %v19414_v38 = vld [vmem:[#allocation2 + $0xd18] sm:$0xff]  }
 0x1c1   :  { %17570 = vmatprep.subr.bf16.mxu1 %v19379_v41  ;;  %v19419_v41 = vld [vmem:[#allocation2 + $0xde0] sm:$0xff]  }
 0x1c2   :  { %17549 = vmatpush3.bf16.msra.mxu0 %v19378_v40  ;;  %v19416_v40 = vld [vmem:[#allocation2 + $0xd98] sm:$0xff]  }
 0x1c3   :  { %17550 = vmatprep.subr.bf16.mxu0 %v19381_v43  ;;  %v19421_v43 = vld [vmem:[#allocation2 + $0xd68] sm:$0xff]  }
 0x1c4   :  { %17571 = vmatpush3.bf16.msra.mxu1 %v19380_v42  ;;  %v19418_v42 = vld [vmem:[#allocation2 + $0xd20] sm:$0xff]  }
 0x1c5   :  { %17572 = vmatprep.subr.bf16.mxu1 %v19383_v45 }
 0x1c6   :  { %17551 = vmatpush3.bf16.msra.mxu0 %v19382_v44  ;;  %v19420_v44 = vld [vmem:[#allocation2 + $0xda0] sm:$0xff]  }
 0x1c7   :  { %17552 = vmatprep.subr.bf16.mxu0 %v19385_v47 }
 0x1c8   :  { %17573 = vmatpush3.bf16.msra.mxu1 %v19384_v46  ;;  %v19423_v46 = vld [vmem:[#allocation2 + $0xde8] sm:$0xff]  }
 0x1c9   :  { %17574 = vmatprep.subr.bf16.mxu1 %v19387_v49 }
 0x1ca   :  { %17553 = vmatpush3.bf16.msra.mxu0 %v19386_v48  ;;  %v19422_v48 = vld [vmem:[#allocation2 + $0xd28] sm:$0xff]  }
 0x1cb   :  { %17554 = vmatprep.subr.bf16.mxu0 %v19389_v51 }
 0x1cc   :  { %v17252_v53 = vpop.f32.mrb[20].mxu0  ;;  %17575 = vmatpush3.bf16.msra.mxu1 %v19388_v50 }
 0x1cd   :  { %v17253_v55 = vpop.f32.mrb[21].mxu0  ;;  %17576 = vmatprep.subr.bf16.mxu1 %v19391_v54 }
 0x1ce   :  { %v17254_v57 = vadd.f32 %v17253_v55, %v17252_v53  ;;  %v17255_v58 = vpop.f32.mrb[22].mxu0  ;;  %v17274_v59 = vpop.f32.mrb[20].mxu1  ;;  %17555 = vmatpush3.bf16.msra.mxu0 %v19390_v52  ;;  %v19424_v52 = vld [vmem:[#allocation2 + $0xda8] sm:$0xff]   ;;  %v19425_v53 = vld [vmem:[#allocation2 + $0xd70] sm:$0xff]  }
 0x1cf   :  { %v17256_v60 = vpop.f32.mrb[23].mxu0  ;;  %v17275_v61 = vpop.f32.mrb[21].mxu1  ;;  %17556 = vmatprep.subr.bf16.mxu0 %v19393_v62 }
 0x1d0   :  { %v12573_v0 = vadd.f32 %v17254_v57, %v20629_v23  ;;  %v17276_v1 = vadd.f32 %v17275_v61, %v17274_v59  ;;  %v17277_v3 = vpop.f32.mrb[22].mxu1  ;;  %17577 = vmatpush3.bf16.msra.mxu1 %v19392_v56  ;;  %v19405_v23 = vld [vmem:[#allocation2 + $0xd48] sm:$0xff]   ;;  %v19426_v56 = vld [vmem:[#allocation2 + $0xd30] sm:$0xff]  }
 0x1d1   :  { %v17278_v6 = vpop.f32.mrb[23].mxu1  ;;  %17578 = vmatprep.subr.bf16.mxu1 %v19395_v2  ;;  %v19427_v59 = vld [vmem:[#allocation2 + $0xdf0] sm:$0xff]   ;;  %v19431_v2 = vld [vmem:[#allocation2 + $0xdf8] sm:$0xff]  }
 0x1d2   :  { %v20634_v4 = vadd.f32 %v17276_v1, %v12573_v0  ;;  %17557 = vmatpush3.bf16.msra.mxu0 %v19394_v63  ;;  %v19428_v61 = vld [vmem:[#allocation2 + $0xdb0] sm:$0xff]   ;;  %v19429_v0 = vld [vmem:[#allocation2 + $0xd78] sm:$0xff]   ;;  %v19435_v6 = vld [vmem:[#allocation2 + $0xe00] sm:$0xff]  }
 0x1d3   :  { %17558 = vmatprep.subr.bf16.mxu0 %v19397_v7  ;;  %v19430_v1 = vld [vmem:[#allocation2 + $0xd38] sm:$0xff]   ;;  %v19436_v7 = vld [vmem:[#allocation2 + $0xec0] sm:$0xff]  }
 0x1d4   :  { %17579 = vmatpush3.bf16.msra.mxu1 %v19396_v5  ;;  %v19433_v3 = vld [vmem:[#allocation2 + $0xdb8] sm:$0xff]   ;;  %v19434_v5 = vld [vmem:[#allocation2 + $0xe40] sm:$0xff]  }
 0x1d5   :  { %17580 = vmatprep.subr.bf16.mxu1 %v19399_v9 }
 0x1d6   :  { %17559 = vmatpush3.bf16.msra.mxu0 %v19398_v8  ;;  %v19437_v8 = vld [vmem:[#allocation2 + $0xe80] sm:$0xff]  }
 0x1d7   :  { %17588 = vmatprep.subr.bf16.mxu0 %v19401_v14  ;;  %v19442_v14 = vld [vmem:[#allocation2 + $0xe50] sm:$0xff]  }
 0x1d8   :  { %17581 = vmatpush3.bf16.msra.mxu1 %v19400_v12  ;;  %v19440_v12 = vld [vmem:[#allocation2 + $0xec8] sm:$0xff]  }
 0x1d9   :  { %17610 = vmatprep.subr.bf16.mxu1 %v19403_v18  ;;  %13131 = vmatmul.mubr.bf16.vlgmr.msra.gmra.mrb[48].mxu0 %v3131_v16  ;;  %v19444_v16 = vld [vmem:[#allocation2 + $0xed0] sm:$0xff]   ;;  %v19446_v18 = vld [vmem:[#allocation2 + $0xe58] sm:$0xff]  }
 0x1da   :  { %17589 = vmatpush3.bf16.msra.mxu0 %v19402_v20  ;;  %13210 = vmatprep.mubr.bf16.mxu0 %v3152_v26  ;;  %v19448_v20 = vld [vmem:[#allocation2 + $0xed8] sm:$0xff]   ;;  %v19454_v26 = vld [vmem:[#allocation2 + $0xe68] sm:$0xff]  }
 0x1db   :  { %13171 = vmatmul.mubr.bf16.vlgmr.msra.gmra.mrb[48].mxu1 %v3153_v22  ;;  %17590 = vmatprep.subr.bf16.mxu0 %v19405_v23  ;;  %v19450_v22 = vld [vmem:[#allocation2 + $0xe60] sm:$0xff]  }
 0x1dc   :  { %17611 = vmatpush3.bf16.msra.mxu1 %v19404_v25  ;;  %13250 = vmatprep.mubr.bf16.mxu1 %v3156_v29  ;;  %v19451_v23 = vld [vmem:[#allocation2 + $0xe20] sm:$0xff]   ;;  %v19456_v29 = vld [vmem:[#allocation2 + $0xee8] sm:$0xff]  }
 0x1dd   :  { %17612 = vmatprep.subr.bf16.mxu1 %v19407_v27  ;;  %v19453_v25 = vld [vmem:[#allocation2 + $0xea0] sm:$0xff]   ;;  %v19455_v27 = vld [vmem:[#allocation2 + $0xe28] sm:$0xff]  }
 0x1de   :  { %17591 = vmatpush3.bf16.msra.mxu0 %v19406_v28 }
 0x1df   :  { %17592 = vmatprep.subr.bf16.mxu0 %v19409_v30 }
 0x1e0   :  { %17613 = vmatpush3.bf16.msra.mxu1 %v19408_v31  ;;  %v19457_v31 = vld [vmem:[#allocation2 + $0xea8] sm:$0xff]  }
 0x1e1   :  { %17614 = vmatprep.subr.bf16.mxu1 %v19411_v32 }
 0x1e2   :  { %17593 = vmatpush3.bf16.msra.mxu0 %v19410_v33 }
 0x1e3   :  { %17594 = vmatprep.subr.bf16.mxu0 %v19413_v35 }
 0x1e4   :  { %17615 = vmatpush3.bf16.msra.mxu1 %v19412_v36 }
 0x1e5   :  { %17616 = vmatprep.subr.bf16.mxu1 %v19415_v37 }
 0x1e6   :  { %17595 = vmatpush3.bf16.msra.mxu0 %v19414_v38  ;;  %v19458_v38 = vld [vmem:[#allocation2 + $0xe70] sm:$0xff]  }
 0x1e7   :  { %17596 = vmatprep.subr.bf16.mxu0 %v19417_v39  ;;  %v19459_v39 = vld [vmem:[#allocation2 + $0xe30] sm:$0xff]  }
 0x1e8   :  { %17617 = vmatpush3.bf16.msra.mxu1 %v19416_v40 }
 0x1e9   :  { %17618 = vmatprep.subr.bf16.mxu1 %v19419_v41 }
 0x1ea   :  { %17597 = vmatpush3.bf16.msra.mxu0 %v19418_v42  ;;  %v19460_v42 = vld [vmem:[#allocation2 + $0xef0] sm:$0xff]  }
 0x1eb   :  { %17598 = vmatprep.subr.bf16.mxu0 %v19421_v43 }
 0x1ec   :  { %v17296_v45 = vpop.f32.mrb[24].mxu0  ;;  %17619 = vmatpush3.bf16.msra.mxu1 %v19420_v44 }
 0x1ed   :  { %v17297_v47 = vpop.f32.mrb[25].mxu0  ;;  %17620 = vmatprep.subr.bf16.mxu1 %v19423_v46 }
 0x1ee   :  { %v17298_v49 = vadd.f32 %v17297_v47, %v17296_v45  ;;  %v17299_v50 = vpop.f32.mrb[26].mxu0  ;;  %v17318_v51 = vpop.f32.mrb[24].mxu1  ;;  %17599 = vmatpush3.bf16.msra.mxu0 %v19422_v48  ;;  %v19461_v45 = vld [vmem:[#allocation2 + $0xeb0] sm:$0xff]   ;;  %v19462_v47 = vld [vmem:[#allocation2 + $0xe78] sm:$0xff]  }
 0x1ef   :  { %v17300_v54 = vpop.f32.mrb[27].mxu0  ;;  %v17319_v55 = vpop.f32.mrb[25].mxu1  ;;  %17600 = vmatprep.subr.bf16.mxu0 %v19425_v53  ;;  %v19463_v48 = vld [vmem:[#allocation2 + $0xe38] sm:$0xff]  }
 0x1f0   :  { %v12653_v57 = vadd.f32 %v17298_v49, %v20634_v4  ;;  %v17320_v58 = vadd.f32 %v17319_v55, %v17318_v51  ;;  %v17321_v60 = vpop.f32.mrb[26].mxu1  ;;  %17621 = vmatpush3.bf16.msra.mxu1 %v19424_v52  ;;  %v3138_v4 = vrot.slane %v20642_v17, %v20533_v34  ;;  %v19445_v17 = vld [vmem:[#allocation2 + $0xe90] sm:$0xff]   ;;  %v19464_v49 = vld [vmem:[#allocation2 + $0xef8] sm:$0xff]   ;;  %v19466_v54 = vld [vmem:[#allocation2 + $0xf40] sm:$0xff]  }
 0x1f1   :  { %v17322_v62 = vpop.f32.mrb[27].mxu1  ;;  %17622 = vmatprep.subr.bf16.mxu1 %v19427_v59  ;;  %v66_v50 = vld [vmem:[%s20998_s0 + $0x38] sm:$0xff]  ;;  %v19467_v60 = vld [vmem:[#allocation2 + $0xf00] sm:$0xff]  }
 0x1f2   :  { %v20649_v63 = vadd.f32 %v17320_v58, %v12653_v57  ;;  %17601 = vmatpush3.bf16.msra.mxu0 %v19426_v56  ;;  %v3154_v9 = vcombine.high %v3138_v4, %v3138_v4  ;;  %v3164_v51 = vrot.slane %v66_v50, %v20533_v34  ;;  %v19465_v52 = vld [vmem:[#allocation2 + $0xeb8] sm:$0xff]   ;;  %v3157_v53 = vcombine.high %v66_v50, %v66_v50  ;;  %v19468_v58 = vld [vmem:[#allocation2 + $0xfc0] sm:$0xff]   ;;  %v19503_v50 = vld [vmem:[#allocation2 + $0x1048] sm:$0xff]  }
 0x1f3   :  { %17602 = vmatprep.subr.bf16.mxu0 %v19429_v0 }
 0x1f4   :  { %17623 = vmatpush3.bf16.msra.mxu1 %v19428_v61  ;;  %v3172_v55 = vcombine.high %v3164_v51, %v3164_v51  ;;  %v3180_v56 = vrot.slane %v3164_v51, %v20533_v34  ;;  %v20662_v57 = vrot.slane %v3157_v53, %v20533_v34  ;;  %v19504_v51 = vld [vmem:[#allocation2 + $0x1008] sm:$0xff]  }
 0x1f5   :  { %17624 = vmatprep.subr.bf16.mxu1 %v19431_v2  ;;  %v19506_v53 = vld [vmem:[#allocation2 + $0x1088] sm:$0xff]  }
 0x1f6   :  { %17603 = vmatpush3.bf16.msra.mxu0 %v19430_v1  ;;  %v3194_v59 = vrot.slane %v3172_v55, %v20533_v34  ;;  %v3173_v61 = vcombine.high %v20662_v57, %v20662_v57  ;;  %v3202_v62 = vcombine.high %v3180_v56, %v3180_v56  ;;  %v19469_v1 = vld [vmem:[#allocation2 + $0xf80] sm:$0xff]   ;;  %v19508_v55 = vld [vmem:[#allocation2 + $0x1010] sm:$0xff]  }
 0x1f7   :  { %17632 = vmatprep.subr.bf16.mxu0 %v19434_v5 }
 0x1f8   :  { %17625 = vmatpush3.bf16.msra.mxu1 %v19433_v3  ;;  %v3204_v0 = vcombine.high %v3194_v59, %v3194_v59  ;;  %v3201_v2 = vrot.slane %v3173_v61, %v20533_v34  ;;  %v19472_v3 = vld [vmem:[#allocation2 + $0xfc8] sm:$0xff]   ;;  %v19514_v61 = vld [vmem:[#allocation2 + $0x1098] sm:$0xff]  }
 0x1f9   :  { %13211 = vmatmul.mubr.bf16.vlgmr.msra.gmra.mrb[52].mxu0 %v3138_v4  ;;  %17654 = vmatprep.subr.bf16.mxu1 %v19436_v7  ;;  %v19471_v4 = vld [vmem:[#allocation2 + $0xf08] sm:$0xff]  }
 0x1fa   :  { %17633 = vmatpush3.bf16.msra.mxu0 %v19435_v6  ;;  %13290 = vmatprep.mubr.bf16.mxu0 %v3194_v59  ;;  %v3205_v5 = vcombine.high %v3201_v2, %v3201_v2  ;;  %v19474_v6 = vld [vmem:[#allocation2 + $0xf50] sm:$0xff]   ;;  %v19473_v7 = vld [vmem:[#allocation2 + $0xf88] sm:$0xff]   ;;  %v19512_v59 = vld [vmem:[#allocation2 + $0x1018] sm:$0xff]  }
 0x1fb   :  { %13251 = vmatmul.mubr.bf16.vlgmr.msra.gmra.mrb[52].mxu1 %v3154_v9  ;;  %17634 = vmatprep.subr.bf16.mxu0 %v19438_v10  ;;  %v19475_v9 = vld [vmem:[#allocation2 + $0xf10] sm:$0xff]   ;;  %v19478_v10 = vld [vmem:[#allocation2 + $0xf58] sm:$0xff]  }
 0x1fc   :  { %17655 = vmatpush3.bf16.msra.mxu1 %v19437_v8  ;;  %13330 = vmatprep.mubr.bf16.mxu1 %v3204_v0  ;;  %v19476_v8 = vld [vmem:[#allocation2 + $0xfd0] sm:$0xff]   ;;  %v19517_v0 = vld [vmem:[#allocation2 + $0x10e0] sm:$0xff]  }
 0x1fd   :  { %17656 = vmatprep.subr.bf16.mxu1 %v19440_v12  ;;  %v19480_v12 = vld [vmem:[#allocation2 + $0xfd8] sm:$0xff]  }
 0x1fe   :  { %17635 = vmatpush3.bf16.msra.mxu0 %v19439_v11  ;;  %v19477_v11 = vld [vmem:[#allocation2 + $0xf90] sm:$0xff]  }
 0x1ff   :  { %17636 = vmatprep.subr.bf16.mxu0 %v19442_v14  ;;  %v19482_v14 = vld [vmem:[#allocation2 + $0xf60] sm:$0xff]  }
 0x200   :  { %17657 = vmatpush3.bf16.msra.mxu1 %v19441_v13  ;;  %v19479_v13 = vld [vmem:[#allocation2 + $0xf18] sm:$0xff]  }
 0x201   :  { %17658 = vmatprep.subr.bf16.mxu1 %v19444_v16  ;;  %v19484_v16 = vld [vmem:[#allocation2 + $0xfe0] sm:$0xff]  }
 0x202   :  { %17637 = vmatpush3.bf16.msra.mxu0 %v19443_v15  ;;  %v19481_v15 = vld [vmem:[#allocation2 + $0xf98] sm:$0xff]  }
 0x203   :  { %17638 = vmatprep.subr.bf16.mxu0 %v19446_v18  ;;  %v19486_v18 = vld [vmem:[#allocation2 + $0xf68] sm:$0xff]  }
 0x204   :  { %17659 = vmatpush3.bf16.msra.mxu1 %v19445_v17  ;;  %v19483_v17 = vld [vmem:[#allocation2 + $0xf20] sm:$0xff]  }
 0x205   :  { %17660 = vmatprep.subr.bf16.mxu1 %v19448_v20 }
 0x206   :  { %17639 = vmatpush3.bf16.msra.mxu0 %v19447_v19  ;;  %v19485_v19 = vld [vmem:[#allocation2 + $0xfa0] sm:$0xff]  }
 0x207   :  { %17640 = vmatprep.subr.bf16.mxu0 %v19450_v22 }
 0x208   :  { %17661 = vmatpush3.bf16.msra.mxu1 %v19449_v21  ;;  %v19488_v21 = vld [vmem:[#allocation2 + $0xfe8] sm:$0xff]  }
 0x209   :  { %17662 = vmatprep.subr.bf16.mxu1 %v19452_v24 }
 0x20a   :  { %17641 = vmatpush3.bf16.msra.mxu0 %v19451_v23  ;;  %v19487_v23 = vld [vmem:[#allocation2 + $0xf28] sm:$0xff]  }
 0x20b   :  { %17642 = vmatprep.subr.bf16.mxu0 %v19454_v26 }
 0x20c   :  { %v17340_v28 = vpop.f32.mrb[28].mxu0  ;;  %17663 = vmatpush3.bf16.msra.mxu1 %v19453_v25 }
 0x20d   :  { %v17341_v30 = vpop.f32.mrb[29].mxu0  ;;  %17664 = vmatprep.subr.bf16.mxu1 %v19456_v29 }
 0x20e   :  { %v17342_v32 = vadd.f32 %v17341_v30, %v17340_v28  ;;  %v17343_v33 = vpop.f32.mrb[30].mxu0  ;;  %v17362_v35 = vpop.f32.mrb[28].mxu1  ;;  %17643 = vmatpush3.bf16.msra.mxu0 %v19455_v27  ;;  %v19489_v27 = vld [vmem:[#allocation2 + $0xfa8] sm:$0xff]   ;;  %v19490_v28 = vld [vmem:[#allocation2 + $0xf70] sm:$0xff]  }
 0x20f   :  { %v17344_v36 = vpop.f32.mrb[31].mxu0  ;;  %v17363_v37 = vpop.f32.mrb[29].mxu1  ;;  %17644 = vmatprep.subr.bf16.mxu0 %v19458_v38 }
 0x210   :  { %v12733_v40 = vadd.f32 %v17342_v32, %v20649_v63  ;;  %v17364_v41 = vadd.f32 %v17363_v37, %v17362_v35  ;;  %v17365_v43 = vpop.f32.mrb[30].mxu1  ;;  %17665 = vmatpush3.bf16.msra.mxu1 %v19457_v31  ;;  %v19470_v63 = vld [vmem:[#allocation2 + $0xf48] sm:$0xff]   ;;  %v19491_v31 = vld [vmem:[#allocation2 + $0xf30] sm:$0xff]  }
 0x211   :  { %v17366_v46 = vpop.f32.mrb[31].mxu1  ;;  %17666 = vmatprep.subr.bf16.mxu1 %v19460_v42  ;;  %v19492_v35 = vld [vmem:[#allocation2 + $0xff0] sm:$0xff]   ;;  %v19496_v42 = vld [vmem:[#allocation2 + $0xff8] sm:$0xff]  }
 0x212   :  { %v20654_v44 = vadd.f32 %v17364_v41, %v12733_v40  ;;  %17645 = vmatpush3.bf16.msra.mxu0 %v19459_v39  ;;  %v19493_v37 = vld [vmem:[#allocation2 + $0xfb0] sm:$0xff]   ;;  %v19494_v40 = vld [vmem:[#allocation2 + $0xf78] sm:$0xff]   ;;  %v19500_v46 = vld [vmem:[#allocation2 + $0x1000] sm:$0xff]  }
 0x213   :  { %17646 = vmatprep.subr.bf16.mxu0 %v19462_v47  ;;  %v19495_v41 = vld [vmem:[#allocation2 + $0xf38] sm:$0xff]   ;;  %v19501_v47 = vld [vmem:[#allocation2 + $0x10c0] sm:$0xff]  }
 0x214   :  { %17667 = vmatpush3.bf16.msra.mxu1 %v19461_v45  ;;  %v19498_v43 = vld [vmem:[#allocation2 + $0xfb8] sm:$0xff]   ;;  %v19499_v45 = vld [vmem:[#allocation2 + $0x1040] sm:$0xff]  }
 0x215   :  { %17668 = vmatprep.subr.bf16.mxu1 %v19464_v49 }
 0x216   :  { %17647 = vmatpush3.bf16.msra.mxu0 %v19463_v48  ;;  %v19502_v48 = vld [vmem:[#allocation2 + $0x1080] sm:$0xff]  }
 0x217   :  { %17676 = vmatprep.subr.bf16.mxu0 %v19466_v54  ;;  %v19507_v54 = vld [vmem:[#allocation2 + $0x1050] sm:$0xff]  }
 0x218   :  { %17669 = vmatpush3.bf16.msra.mxu1 %v19465_v52  ;;  %v19505_v52 = vld [vmem:[#allocation2 + $0x10c8] sm:$0xff]  }
 0x219   :  { %17698 = vmatprep.subr.bf16.mxu1 %v19468_v58  ;;  %13291 = vmatmul.mubr.bf16.vlgmr.msra.gmra.mrb[56].mxu0 %v3180_v56  ;;  %v19509_v56 = vld [vmem:[#allocation2 + $0x10d0] sm:$0xff]   ;;  %v19511_v58 = vld [vmem:[#allocation2 + $0x1058] sm:$0xff]  }
 0x21a   :  { %17677 = vmatpush3.bf16.msra.mxu0 %v19467_v60  ;;  %13370 = vmatprep.mubr.bf16.mxu0 %v3201_v2  ;;  %v19513_v60 = vld [vmem:[#allocation2 + $0x10d8] sm:$0xff]   ;;  %v19519_v2 = vld [vmem:[#allocation2 + $0x1068] sm:$0xff]  }
 0x21b   :  { %13331 = vmatmul.mubr.bf16.vlgmr.msra.gmra.mrb[56].mxu1 %v3202_v62  ;;  %17678 = vmatprep.subr.bf16.mxu0 %v19470_v63  ;;  %v19515_v62 = vld [vmem:[#allocation2 + $0x1060] sm:$0xff]  }
 0x21c   :  { %17699 = vmatpush3.bf16.msra.mxu1 %v19469_v1  ;;  %13410 = vmatprep.mubr.bf16.mxu1 %v3205_v5  ;;  %v19516_v63 = vld [vmem:[#allocation2 + $0x1020] sm:$0xff]   ;;  %v19521_v5 = vld [vmem:[#allocation2 + $0x10e8] sm:$0xff]  }
 0x21d   :  { %17700 = vmatprep.subr.bf16.mxu1 %v19472_v3  ;;  %v19518_v1 = vld [vmem:[#allocation2 + $0x10a0] sm:$0xff]   ;;  %v19520_v3 = vld [vmem:[#allocation2 + $0x1028] sm:$0xff]  }
 0x21e   :  { %17679 = vmatpush3.bf16.msra.mxu0 %v19471_v4 }
 0x21f   :  { %17680 = vmatprep.subr.bf16.mxu0 %v19474_v6 }
 0x220   :  { %17701 = vmatpush3.bf16.msra.mxu1 %v19473_v7  ;;  %v19522_v7 = vld [vmem:[#allocation2 + $0x10a8] sm:$0xff]  }
 0x221   :  { %17702 = vmatprep.subr.bf16.mxu1 %v19476_v8 }
 0x222   :  { %17681 = vmatpush3.bf16.msra.mxu0 %v19475_v9 }
 0x223   :  { %17682 = vmatprep.subr.bf16.mxu0 %v19478_v10 }
 0x224   :  { %17703 = vmatpush3.bf16.msra.mxu1 %v19477_v11 }
 0x225   :  { %17704 = vmatprep.subr.bf16.mxu1 %v19480_v12 }
 0x226   :  { %17683 = vmatpush3.bf16.msra.mxu0 %v19479_v13  ;;  %v19523_v13 = vld [vmem:[#allocation2 + $0x1070] sm:$0xff]  }
 0x227   :  { %17684 = vmatprep.subr.bf16.mxu0 %v19482_v14  ;;  %v19524_v14 = vld [vmem:[#allocation2 + $0x1030] sm:$0xff]  }
 0x228   :  { %17705 = vmatpush3.bf16.msra.mxu1 %v19481_v15 }
 0x229   :  { %17706 = vmatprep.subr.bf16.mxu1 %v19484_v16 }
 0x22a   :  { %17685 = vmatpush3.bf16.msra.mxu0 %v19483_v17  ;;  %v19525_v17 = vld [vmem:[#allocation2 + $0x10f0] sm:$0xff]  }
 0x22b   :  { %17686 = vmatprep.subr.bf16.mxu0 %v19486_v18 }
 0x22c   :  { %v17384_v20 = vpop.f32.mrb[32].mxu0  ;;  %17707 = vmatpush3.bf16.msra.mxu1 %v19485_v19 }
 0x22d   :  { %v17385_v22 = vpop.f32.mrb[33].mxu0  ;;  %17708 = vmatprep.subr.bf16.mxu1 %v19488_v21 }
 0x22e   :  { %v17386_v24 = vadd.f32 %v17385_v22, %v17384_v20  ;;  %v17387_v25 = vpop.f32.mrb[34].mxu0  ;;  %v17406_v26 = vpop.f32.mrb[32].mxu1  ;;  %17687 = vmatpush3.bf16.msra.mxu0 %v19487_v23  ;;  %v19526_v20 = vld [vmem:[#allocation2 + $0x10b0] sm:$0xff]   ;;  %v19527_v22 = vld [vmem:[#allocation2 + $0x1078] sm:$0xff]  }
 0x22f   :  { %v17388_v29 = vpop.f32.mrb[35].mxu0  ;;  %v17407_v30 = vpop.f32.mrb[33].mxu1  ;;  %17688 = vmatprep.subr.bf16.mxu0 %v19490_v28  ;;  %v19528_v23 = vld [vmem:[#allocation2 + $0x1038] sm:$0xff]   ;;  %v67_v25 = vld [vmem:[%s20998_s0 + $0x40] sm:$0xff] }
 0x230   :  { %v12813_v32 = vadd.f32 %v17386_v24, %v20654_v44  ;;  %v17408_v33 = vadd.f32 %v17407_v30, %v17406_v26  ;;  %v17409_v36 = vpop.f32.mrb[34].mxu1  ;;  %17709 = vmatpush3.bf16.msra.mxu1 %v19489_v27  ;;  %v3187_v44 = vrot.slane %v20662_v57, %v20533_v34  ;;  %v19510_v57 = vld [vmem:[#allocation2 + $0x1090] sm:$0xff]   ;;  %v19529_v24 = vld [vmem:[#allocation2 + $0x10f8] sm:$0xff]   ;;  %v3213_v26 = vrot.slane %v67_v25, %v20533_v34  ;;  %v19531_v29 = vld [vmem:[#allocation2 + $0x1140] sm:$0xff]  }
 0x231   :  { %v17410_v38 = vpop.f32.mrb[35].mxu1  ;;  %17710 = vmatprep.subr.bf16.mxu1 %v19492_v35  ;;  %v19530_v27 = vld [vmem:[#allocation2 + $0x10b8] sm:$0xff]   ;;  %v3206_v28 = vcombine.high %v67_v25, %v67_v25  ;;  %v19532_v36 = vld [vmem:[#allocation2 + $0x1100] sm:$0xff]   ;;  %v19568_v25 = vld [vmem:[#allocation2 + $0x1248] sm:$0xff]  }
 0x232   :  { %v20669_v39 = vadd.f32 %v17408_v33, %v12813_v32  ;;  %17689 = vmatpush3.bf16.msra.mxu0 %v19491_v31  ;;  %v3203_v49 = vcombine.high %v3187_v44, %v3187_v44  ;;  %v3221_v30 = vcombine.high %v3213_v26, %v3213_v26  ;;  %v3229_v31 = vrot.slane %v3213_v26, %v20533_v34  ;;  %v19533_v33 = vld [vmem:[#allocation2 + $0x11c0] sm:$0xff]   ;;  %v19569_v26 = vld [vmem:[#allocation2 + $0x1208] sm:$0xff]  }
 0x233   :  { %17690 = vmatprep.subr.bf16.mxu0 %v19494_v40  ;;  %v20682_v32 = vrot.slane %v3206_v28, %v20533_v34  ;;  %v19571_v28 = vld [vmem:[#allocation2 + $0x1288] sm:$0xff]  }
 0x234   :  { %17711 = vmatpush3.bf16.msra.mxu1 %v19493_v37  ;;  %v3243_v35 = vrot.slane %v3221_v30, %v20533_v34  ;;  %v3251_v38 = vcombine.high %v3229_v31, %v3229_v31  ;;  %v19573_v30 = vld [vmem:[#allocation2 + $0x1210] sm:$0xff]  }
 0x235   :  { %17712 = vmatprep.subr.bf16.mxu1 %v19496_v42  ;;  %v3222_v37 = vcombine.high %v20682_v32, %v20682_v32 }
 0x236   :  { %17691 = vmatpush3.bf16.msra.mxu0 %v19495_v41  ;;  %v3253_v40 = vcombine.high %v3243_v35, %v3243_v35  ;;  %v19534_v41 = vld [vmem:[#allocation2 + $0x1180] sm:$0xff]  }
 0x237   :  { %17720 = vmatprep.subr.bf16.mxu0 %v19499_v45  ;;  %v3250_v42 = vrot.slane %v3222_v37, %v20533_v34  ;;  %v19579_v37 = vld [vmem:[#allocation2 + $0x1298] sm:$0xff]  }
 0x238   :  { %17713 = vmatpush3.bf16.msra.mxu1 %v19498_v43  ;;  %v19537_v43 = vld [vmem:[#allocation2 + $0x11c8] sm:$0xff]  }
 0x239   :  { %13371 = vmatmul.mubr.bf16.vlgmr.msra.gmra.mrb[60].mxu0 %v3187_v44  ;;  %17742 = vmatprep.subr.bf16.mxu1 %v19501_v47  ;;  %v19536_v44 = vld [vmem:[#allocation2 + $0x1108] sm:$0xff]   ;;  %v3254_v45 = vcombine.high %v3250_v42, %v3250_v42 }
 0x23a   :  { %17721 = vmatpush3.bf16.msra.mxu0 %v19500_v46  ;;  %13450 = vmatprep.mubr.bf16.mxu0 %v3243_v35  ;;  %v19539_v46 = vld [vmem:[#allocation2 + $0x1150] sm:$0xff]   ;;  %v19538_v47 = vld [vmem:[#allocation2 + $0x1188] sm:$0xff]   ;;  %v19577_v35 = vld [vmem:[#allocation2 + $0x1218] sm:$0xff]  }
 0x23b   :  { %13411 = vmatmul.mubr.bf16.vlgmr.msra.gmra.mrb[60].mxu1 %v3203_v49  ;;  %17722 = vmatprep.subr.bf16.mxu0 %v19503_v50  ;;  %v19540_v49 = vld [vmem:[#allocation2 + $0x1110] sm:$0xff]   ;;  %v19543_v50 = vld [vmem:[#allocation2 + $0x1158] sm:$0xff]  }
 0x23c   :  { %17743 = vmatpush3.bf16.msra.mxu1 %v19502_v48  ;;  %13490 = vmatprep.mubr.bf16.mxu1 %v3253_v40  ;;  %v19541_v48 = vld [vmem:[#allocation2 + $0x11d0] sm:$0xff]   ;;  %v19582_v40 = vld [vmem:[#allocation2 + $0x12e0] sm:$0xff]  }
 0x23d   :  { %17744 = vmatprep.subr.bf16.mxu1 %v19505_v52  ;;  %v19545_v52 = vld [vmem:[#allocation2 + $0x11d8] sm:$0xff]  }
 0x23e   :  { %17723 = vmatpush3.bf16.msra.mxu0 %v19504_v51  ;;  %v19542_v51 = vld [vmem:[#allocation2 + $0x1190] sm:$0xff]  }
 0x23f   :  { %17724 = vmatprep.subr.bf16.mxu0 %v19507_v54  ;;  %v19547_v54 = vld [vmem:[#allocation2 + $0x1160] sm:$0xff]  }
 0x240   :  { %17745 = vmatpush3.bf16.msra.mxu1 %v19506_v53  ;;  %v19544_v53 = vld [vmem:[#allocation2 + $0x1118] sm:$0xff]  }
 0x241   :  { %17746 = vmatprep.subr.bf16.mxu1 %v19509_v56  ;;  %v19549_v56 = vld [vmem:[#allocation2 + $0x11e0] sm:$0xff]  }
 0x242   :  { %17725 = vmatpush3.bf16.msra.mxu0 %v19508_v55  ;;  %v19546_v55 = vld [vmem:[#allocation2 + $0x1198] sm:$0xff]  }
 0x243   :  { %17726 = vmatprep.subr.bf16.mxu0 %v19511_v58  ;;  %v19551_v58 = vld [vmem:[#allocation2 + $0x1168] sm:$0xff]  }
 0x244   :  { %17747 = vmatpush3.bf16.msra.mxu1 %v19510_v57  ;;  %v19548_v57 = vld [vmem:[#allocation2 + $0x1120] sm:$0xff]  }
 0x245   :  { %17748 = vmatprep.subr.bf16.mxu1 %v19513_v60 }
 0x246   :  { %17727 = vmatpush3.bf16.msra.mxu0 %v19512_v59  ;;  %v19550_v59 = vld [vmem:[#allocation2 + $0x11a0] sm:$0xff]  }
 0x247   :  { %17728 = vmatprep.subr.bf16.mxu0 %v19515_v62 }
 0x248   :  { %17749 = vmatpush3.bf16.msra.mxu1 %v19514_v61  ;;  %v19553_v61 = vld [vmem:[#allocation2 + $0x11e8] sm:$0xff]  }
 0x249   :  { %17750 = vmatprep.subr.bf16.mxu1 %v19517_v0 }
 0x24a   :  { %17729 = vmatpush3.bf16.msra.mxu0 %v19516_v63  ;;  %v19552_v63 = vld [vmem:[#allocation2 + $0x1128] sm:$0xff]  }
 0x24b   :  { %17730 = vmatprep.subr.bf16.mxu0 %v19519_v2 }
 0x24c   :  { %v17428_v4 = vpop.f32.mrb[36].mxu0  ;;  %17751 = vmatpush3.bf16.msra.mxu1 %v19518_v1 }
 0x24d   :  { %v17429_v6 = vpop.f32.mrb[37].mxu0  ;;  %17752 = vmatprep.subr.bf16.mxu1 %v19521_v5 }
 0x24e   :  { %v17430_v8 = vadd.f32 %v17429_v6, %v17428_v4  ;;  %v17431_v9 = vpop.f32.mrb[38].mxu0  ;;  %v17450_v10 = vpop.f32.mrb[36].mxu1  ;;  %17731 = vmatpush3.bf16.msra.mxu0 %v19520_v3  ;;  %v19554_v3 = vld [vmem:[#allocation2 + $0x11a8] sm:$0xff]   ;;  %v19555_v4 = vld [vmem:[#allocation2 + $0x1170] sm:$0xff]  }
 0x24f   :  { %v17432_v11 = vpop.f32.mrb[39].mxu0  ;;  %v17451_v12 = vpop.f32.mrb[37].mxu1  ;;  %17732 = vmatprep.subr.bf16.mxu0 %v19523_v13 }
 0x250   :  { %v12893_v15 = vadd.f32 %v17430_v8, %v20669_v39  ;;  %v17452_v16 = vadd.f32 %v17451_v12, %v17450_v10  ;;  %v17453_v18 = vpop.f32.mrb[38].mxu1  ;;  %17753 = vmatpush3.bf16.msra.mxu1 %v19522_v7  ;;  %v19535_v39 = vld [vmem:[#allocation2 + $0x1148] sm:$0xff]   ;;  %v19556_v7 = vld [vmem:[#allocation2 + $0x1130] sm:$0xff]  }
 0x251   :  { %v17454_v21 = vpop.f32.mrb[39].mxu1  ;;  %17754 = vmatprep.subr.bf16.mxu1 %v19525_v17  ;;  %v19557_v10 = vld [vmem:[#allocation2 + $0x11f0] sm:$0xff]   ;;  %v19561_v17 = vld [vmem:[#allocation2 + $0x11f8] sm:$0xff]  }
 0x252   :  { %v20674_v19 = vadd.f32 %v17452_v16, %v12893_v15  ;;  %17733 = vmatpush3.bf16.msra.mxu0 %v19524_v14  ;;  %v19558_v12 = vld [vmem:[#allocation2 + $0x11b0] sm:$0xff]   ;;  %v19559_v15 = vld [vmem:[#allocation2 + $0x1178] sm:$0xff]   ;;  %v19565_v21 = vld [vmem:[#allocation2 + $0x1200] sm:$0xff]  }
 0x253   :  { %17734 = vmatprep.subr.bf16.mxu0 %v19527_v22  ;;  %v19560_v16 = vld [vmem:[#allocation2 + $0x1138] sm:$0xff]   ;;  %v19566_v22 = vld [vmem:[#allocation2 + $0x12c0] sm:$0xff]  }
 0x254   :  { %17755 = vmatpush3.bf16.msra.mxu1 %v19526_v20  ;;  %v19563_v18 = vld [vmem:[#allocation2 + $0x11b8] sm:$0xff]   ;;  %v19564_v20 = vld [vmem:[#allocation2 + $0x1240] sm:$0xff]  }
 0x255   :  { %17756 = vmatprep.subr.bf16.mxu1 %v19529_v24 }
 0x256   :  { %17735 = vmatpush3.bf16.msra.mxu0 %v19528_v23  ;;  %v19567_v23 = vld [vmem:[#allocation2 + $0x1280] sm:$0xff]  }
 0x257   :  { %17764 = vmatprep.subr.bf16.mxu0 %v19531_v29  ;;  %v19572_v29 = vld [vmem:[#allocation2 + $0x1250] sm:$0xff]  }
 0x258   :  { %17757 = vmatpush3.bf16.msra.mxu1 %v19530_v27  ;;  %v19570_v27 = vld [vmem:[#allocation2 + $0x12c8] sm:$0xff]  }
 0x259   :  { %17786 = vmatprep.subr.bf16.mxu1 %v19533_v33  ;;  %13451 = vmatmul.mubr.bf16.vlgmr.msra.gmra.mrb[64].mxu0 %v3229_v31  ;;  %v19574_v31 = vld [vmem:[#allocation2 + $0x12d0] sm:$0xff]   ;;  %v19576_v33 = vld [vmem:[#allocation2 + $0x1258] sm:$0xff]  }
 0x25a   :  { %17765 = vmatpush3.bf16.msra.mxu0 %v19532_v36  ;;  %13530 = vmatprep.mubr.bf16.mxu0 %v3250_v42  ;;  %v19578_v36 = vld [vmem:[#allocation2 + $0x12d8] sm:$0xff]   ;;  %v19584_v42 = vld [vmem:[#allocation2 + $0x1268] sm:$0xff]  }
 0x25b   :  { %13491 = vmatmul.mubr.bf16.vlgmr.msra.gmra.mrb[64].mxu1 %v3251_v38  ;;  %17766 = vmatprep.subr.bf16.mxu0 %v19535_v39  ;;  %v19580_v38 = vld [vmem:[#allocation2 + $0x1260] sm:$0xff]  }
 0x25c   :  { %17787 = vmatpush3.bf16.msra.mxu1 %v19534_v41  ;;  %13570 = vmatprep.mubr.bf16.mxu1 %v3254_v45  ;;  %v19581_v39 = vld [vmem:[#allocation2 + $0x1220] sm:$0xff]   ;;  %v19586_v45 = vld [vmem:[#allocation2 + $0x12e8] sm:$0xff]  }
 0x25d   :  { %17788 = vmatprep.subr.bf16.mxu1 %v19537_v43  ;;  %v19583_v41 = vld [vmem:[#allocation2 + $0x12a0] sm:$0xff]   ;;  %v19585_v43 = vld [vmem:[#allocation2 + $0x1228] sm:$0xff]  }
 0x25e   :  { %17767 = vmatpush3.bf16.msra.mxu0 %v19536_v44 }
 0x25f   :  { %17768 = vmatprep.subr.bf16.mxu0 %v19539_v46 }
 0x260   :  { %17789 = vmatpush3.bf16.msra.mxu1 %v19538_v47  ;;  %v19587_v47 = vld [vmem:[#allocation2 + $0x12a8] sm:$0xff]  }
 0x261   :  { %17790 = vmatprep.subr.bf16.mxu1 %v19541_v48 }
 0x262   :  { %17769 = vmatpush3.bf16.msra.mxu0 %v19540_v49 }
 0x263   :  { %17770 = vmatprep.subr.bf16.mxu0 %v19543_v50 }
 0x264   :  { %17791 = vmatpush3.bf16.msra.mxu1 %v19542_v51 }
 0x265   :  { %17792 = vmatprep.subr.bf16.mxu1 %v19545_v52 }
 0x266   :  { %17771 = vmatpush3.bf16.msra.mxu0 %v19544_v53  ;;  %v19588_v53 = vld [vmem:[#allocation2 + $0x1270] sm:$0xff]  }
 0x267   :  { %17772 = vmatprep.subr.bf16.mxu0 %v19547_v54  ;;  %v19589_v54 = vld [vmem:[#allocation2 + $0x1230] sm:$0xff]  }
 0x268   :  { %17793 = vmatpush3.bf16.msra.mxu1 %v19546_v55 }
 0x269   :  { %17794 = vmatprep.subr.bf16.mxu1 %v19549_v56 }
 0x26a   :  { %17773 = vmatpush3.bf16.msra.mxu0 %v19548_v57  ;;  %v19590_v57 = vld [vmem:[#allocation2 + $0x12f0] sm:$0xff]  }
 0x26b   :  { %17774 = vmatprep.subr.bf16.mxu0 %v19551_v58 }
 0x26c   :  { %v17472_v60 = vpop.f32.mrb[40].mxu0  ;;  %17795 = vmatpush3.bf16.msra.mxu1 %v19550_v59 }
 0x26d   :  { %v17473_v62 = vpop.f32.mrb[41].mxu0  ;;  %17796 = vmatprep.subr.bf16.mxu1 %v19553_v61 }
 0x26e   :  { %v17474_v0 = vadd.f32 %v17473_v62, %v17472_v60  ;;  %v17475_v1 = vpop.f32.mrb[42].mxu0  ;;  %v17494_v2 = vpop.f32.mrb[40].mxu1  ;;  %17775 = vmatpush3.bf16.msra.mxu0 %v19552_v63  ;;  %v19591_v60 = vld [vmem:[#allocation2 + $0x12b0] sm:$0xff]   ;;  %v19592_v62 = vld [vmem:[#allocation2 + $0x1278] sm:$0xff]  }
 0x26f   :  { %v17476_v5 = vpop.f32.mrb[43].mxu0  ;;  %v17495_v6 = vpop.f32.mrb[41].mxu1  ;;  %17776 = vmatprep.subr.bf16.mxu0 %v19555_v4  ;;  %v19593_v63 = vld [vmem:[#allocation2 + $0x1238] sm:$0xff]   ;;  %v68_v1 = vld [vmem:[%s20998_s0 + $0x48] sm:$0xff] }
 0x270   :  { %v12973_v8 = vadd.f32 %v17474_v0, %v20674_v19  ;;  %v17496_v9 = vadd.f32 %v17495_v6, %v17494_v2  ;;  %v17497_v11 = vpop.f32.mrb[42].mxu1  ;;  %17797 = vmatpush3.bf16.msra.mxu1 %v19554_v3  ;;  %v3236_v19 = vrot.slane %v20682_v32, %v20533_v34  ;;  %v19575_v32 = vld [vmem:[#allocation2 + $0x1290] sm:$0xff]   ;;  %v19594_v0 = vld [vmem:[#allocation2 + $0x12f8] sm:$0xff]   ;;  %v3262_v2 = vrot.slane %v68_v1, %v20533_v34  ;;  %v19596_v5 = vld [vmem:[#allocation2 + $0x1340] sm:$0xff]  }
 0x271   :  { %v17498_v13 = vpop.f32.mrb[43].mxu1  ;;  %17798 = vmatprep.subr.bf16.mxu1 %v19557_v10  ;;  %v19595_v3 = vld [vmem:[#allocation2 + $0x12b8] sm:$0xff]   ;;  %v3255_v4 = vcombine.high %v68_v1, %v68_v1  ;;  %v19597_v11 = vld [vmem:[#allocation2 + $0x1300] sm:$0xff]   ;;  %v19633_v1 = vld [vmem:[#allocation2 + $0x1448] sm:$0xff]  }
 0x272   :  { %v20689_v14 = vadd.f32 %v17496_v9, %v12973_v8  ;;  %17777 = vmatpush3.bf16.msra.mxu0 %v19556_v7  ;;  %v3252_v24 = vcombine.high %v3236_v19, %v3236_v19  ;;  %v3270_v6 = vcombine.high %v3262_v2, %v3262_v2  ;;  %v3278_v7 = vrot.slane %v3262_v2, %v20533_v34  ;;  %v19598_v9 = vld [vmem:[#allocation2 + $0x13c0] sm:$0xff]   ;;  %v19634_v2 = vld [vmem:[#allocation2 + $0x1408] sm:$0xff]  }
 0x273   :  { %17778 = vmatprep.subr.bf16.mxu0 %v19559_v15  ;;  %v20702_v8 = vrot.slane %v3255_v4, %v20533_v34  ;;  %v19636_v4 = vld [vmem:[#allocation2 + $0x1488] sm:$0xff]  }
 0x274   :  { %17799 = vmatpush3.bf16.msra.mxu1 %v19558_v12  ;;  %v3292_v10 = vrot.slane %v3270_v6, %v20533_v34  ;;  %v3300_v13 = vcombine.high %v3278_v7, %v3278_v7  ;;  %v19638_v6 = vld [vmem:[#allocation2 + $0x1410] sm:$0xff]  }
 0x275   :  { %17800 = vmatprep.subr.bf16.mxu1 %v19561_v17  ;;  %v3271_v12 = vcombine.high %v20702_v8, %v20702_v8 }
 0x276   :  { %17779 = vmatpush3.bf16.msra.mxu0 %v19560_v16  ;;  %v3302_v15 = vcombine.high %v3292_v10, %v3292_v10  ;;  %v19599_v16 = vld [vmem:[#allocation2 + $0x1380] sm:$0xff]  }
 0x277   :  { %17808 = vmatprep.subr.bf16.mxu0 %v19564_v20  ;;  %v3299_v17 = vrot.slane %v3271_v12, %v20533_v34  ;;  %v19644_v12 = vld [vmem:[#allocation2 + $0x1498] sm:$0xff]  }
 0x278   :  { %17801 = vmatpush3.bf16.msra.mxu1 %v19563_v18  ;;  %v19602_v18 = vld [vmem:[#allocation2 + $0x13c8] sm:$0xff]  }
 0x279   :  { %13531 = vmatmul.mubr.bf16.vlgmr.msra.gmra.mrb[68].mxu0 %v3236_v19  ;;  %17830 = vmatprep.subr.bf16.mxu1 %v19566_v22  ;;  %v19601_v19 = vld [vmem:[#allocation2 + $0x1308] sm:$0xff]   ;;  %v3303_v20 = vcombine.high %v3299_v17, %v3299_v17 }
 0x27a   :  { %17809 = vmatpush3.bf16.msra.mxu0 %v19565_v21  ;;  %13610 = vmatprep.mubr.bf16.mxu0 %v3292_v10  ;;  %v19604_v21 = vld [vmem:[#allocation2 + $0x1350] sm:$0xff]   ;;  %v19603_v22 = vld [vmem:[#allocation2 + $0x1388] sm:$0xff]   ;;  %v19642_v10 = vld [vmem:[#allocation2 + $0x1418] sm:$0xff]  }
 0x27b   :  { %13571 = vmatmul.mubr.bf16.vlgmr.msra.gmra.mrb[68].mxu1 %v3252_v24  ;;  %17810 = vmatprep.subr.bf16.mxu0 %v19568_v25  ;;  %v19605_v24 = vld [vmem:[#allocation2 + $0x1310] sm:$0xff]   ;;  %v19608_v25 = vld [vmem:[#allocation2 + $0x1358] sm:$0xff]  }
 0x27c   :  { %17831 = vmatpush3.bf16.msra.mxu1 %v19567_v23  ;;  %13650 = vmatprep.mubr.bf16.mxu1 %v3302_v15  ;;  %v19606_v23 = vld [vmem:[#allocation2 + $0x13d0] sm:$0xff]   ;;  %v19647_v15 = vld [vmem:[#allocation2 + $0x14e0] sm:$0xff]  }
 0x27d   :  { %17832 = vmatprep.subr.bf16.mxu1 %v19570_v27  ;;  %v19610_v27 = vld [vmem:[#allocation2 + $0x13d8] sm:$0xff]  }
 0x27e   :  { %17811 = vmatpush3.bf16.msra.mxu0 %v19569_v26  ;;  %v19607_v26 = vld [vmem:[#allocation2 + $0x1390] sm:$0xff]  }
 0x27f   :  { %17812 = vmatprep.subr.bf16.mxu0 %v19572_v29  ;;  %v19612_v29 = vld [vmem:[#allocation2 + $0x1360] sm:$0xff]  }
 0x280   :  { %17833 = vmatpush3.bf16.msra.mxu1 %v19571_v28  ;;  %v19609_v28 = vld [vmem:[#allocation2 + $0x1318] sm:$0xff]  }
 0x281   :  { %17834 = vmatprep.subr.bf16.mxu1 %v19574_v31  ;;  %v19614_v31 = vld [vmem:[#allocation2 + $0x13e0] sm:$0xff]  }
 0x282   :  { %17813 = vmatpush3.bf16.msra.mxu0 %v19573_v30  ;;  %v19611_v30 = vld [vmem:[#allocation2 + $0x1398] sm:$0xff]  }
 0x283   :  { %17814 = vmatprep.subr.bf16.mxu0 %v19576_v33  ;;  %v19616_v33 = vld [vmem:[#allocation2 + $0x1368] sm:$0xff]  }
 0x284   :  { %17835 = vmatpush3.bf16.msra.mxu1 %v19575_v32  ;;  %v19613_v32 = vld [vmem:[#allocation2 + $0x1320] sm:$0xff]  }
 0x285   :  { %17836 = vmatprep.subr.bf16.mxu1 %v19578_v36 }
 0x286   :  { %17815 = vmatpush3.bf16.msra.mxu0 %v19577_v35  ;;  %v19615_v35 = vld [vmem:[#allocation2 + $0x13a0] sm:$0xff]  }
 0x287   :  { %17816 = vmatprep.subr.bf16.mxu0 %v19580_v38 }
 0x288   :  { %17837 = vmatpush3.bf16.msra.mxu1 %v19579_v37  ;;  %v19618_v37 = vld [vmem:[#allocation2 + $0x13e8] sm:$0xff]  }
 0x289   :  { %17838 = vmatprep.subr.bf16.mxu1 %v19582_v40 }
 0x28a   :  { %17817 = vmatpush3.bf16.msra.mxu0 %v19581_v39  ;;  %v19617_v39 = vld [vmem:[#allocation2 + $0x1328] sm:$0xff]  }
 0x28b   :  { %17818 = vmatprep.subr.bf16.mxu0 %v19584_v42 }
 0x28c   :  { %v17516_v44 = vpop.f32.mrb[44].mxu0  ;;  %17839 = vmatpush3.bf16.msra.mxu1 %v19583_v41 }
 0x28d   :  { %v17517_v46 = vpop.f32.mrb[45].mxu0  ;;  %17840 = vmatprep.subr.bf16.mxu1 %v19586_v45 }
 0x28e   :  { %v17518_v48 = vadd.f32 %v17517_v46, %v17516_v44  ;;  %v17519_v49 = vpop.f32.mrb[46].mxu0  ;;  %v17538_v50 = vpop.f32.mrb[44].mxu1  ;;  %17819 = vmatpush3.bf16.msra.mxu0 %v19585_v43  ;;  %v19619_v43 = vld [vmem:[#allocation2 + $0x13a8] sm:$0xff]   ;;  %v19620_v44 = vld [vmem:[#allocation2 + $0x1370] sm:$0xff]  }
 0x28f   :  { %v17520_v51 = vpop.f32.mrb[47].mxu0  ;;  %v17539_v52 = vpop.f32.mrb[45].mxu1  ;;  %17820 = vmatprep.subr.bf16.mxu0 %v19588_v53 }
 0x290   :  { %v13053_v55 = vadd.f32 %v17518_v48, %v20689_v14  ;;  %v17540_v56 = vadd.f32 %v17539_v52, %v17538_v50  ;;  %v17541_v58 = vpop.f32.mrb[46].mxu1  ;;  %17841 = vmatpush3.bf16.msra.mxu1 %v19587_v47  ;;  %v19600_v14 = vld [vmem:[#allocation2 + $0x1348] sm:$0xff]   ;;  %v19621_v47 = vld [vmem:[#allocation2 + $0x1330] sm:$0xff]  }
 0x291   :  { %v17542_v61 = vpop.f32.mrb[47].mxu1  ;;  %17842 = vmatprep.subr.bf16.mxu1 %v19590_v57  ;;  %v19622_v50 = vld [vmem:[#allocation2 + $0x13f0] sm:$0xff]   ;;  %v19626_v57 = vld [vmem:[#allocation2 + $0x13f8] sm:$0xff]  }
 0x292   :  { %v20694_v59 = vadd.f32 %v17540_v56, %v13053_v55  ;;  %17821 = vmatpush3.bf16.msra.mxu0 %v19589_v54  ;;  %v19623_v52 = vld [vmem:[#allocation2 + $0x13b0] sm:$0xff]   ;;  %v19624_v55 = vld [vmem:[#allocation2 + $0x1378] sm:$0xff]   ;;  %v19630_v61 = vld [vmem:[#allocation2 + $0x1400] sm:$0xff]  }
 0x293   :  { %17822 = vmatprep.subr.bf16.mxu0 %v19592_v62  ;;  %v19625_v56 = vld [vmem:[#allocation2 + $0x1338] sm:$0xff]   ;;  %v19631_v62 = vld [vmem:[#allocation2 + $0x14c0] sm:$0xff]  }
 0x294   :  { %17843 = vmatpush3.bf16.msra.mxu1 %v19591_v60  ;;  %v19628_v58 = vld [vmem:[#allocation2 + $0x13b8] sm:$0xff]   ;;  %v19629_v60 = vld [vmem:[#allocation2 + $0x1440] sm:$0xff]  }
 0x295   :  { %17844 = vmatprep.subr.bf16.mxu1 %v19594_v0 }
 0x296   :  { %17823 = vmatpush3.bf16.msra.mxu0 %v19593_v63  ;;  %v19632_v63 = vld [vmem:[#allocation2 + $0x1480] sm:$0xff]  }
 0x297   :  { %17852 = vmatprep.subr.bf16.mxu0 %v19596_v5  ;;  %v19637_v5 = vld [vmem:[#allocation2 + $0x1450] sm:$0xff]  }
 0x298   :  { %17845 = vmatpush3.bf16.msra.mxu1 %v19595_v3  ;;  %v19635_v3 = vld [vmem:[#allocation2 + $0x14c8] sm:$0xff]  }
 0x299   :  { %17874 = vmatprep.subr.bf16.mxu1 %v19598_v9  ;;  %13611 = vmatmul.mubr.bf16.vlgmr.msra.gmra.mrb[72].mxu0 %v3278_v7  ;;  %v19639_v7 = vld [vmem:[#allocation2 + $0x14d0] sm:$0xff]   ;;  %v19641_v9 = vld [vmem:[#allocation2 + $0x1458] sm:$0xff]  }
 0x29a   :  { %17853 = vmatpush3.bf16.msra.mxu0 %v19597_v11  ;;  %13690 = vmatprep.mubr.bf16.mxu0 %v3299_v17  ;;  %v19643_v11 = vld [vmem:[#allocation2 + $0x14d8] sm:$0xff]   ;;  %v19649_v17 = vld [vmem:[#allocation2 + $0x1468] sm:$0xff]  }
 0x29b   :  { %13651 = vmatmul.mubr.bf16.vlgmr.msra.gmra.mrb[72].mxu1 %v3300_v13  ;;  %17854 = vmatprep.subr.bf16.mxu0 %v19600_v14  ;;  %v19645_v13 = vld [vmem:[#allocation2 + $0x1460] sm:$0xff]  }
 0x29c   :  { %17875 = vmatpush3.bf16.msra.mxu1 %v19599_v16  ;;  %13730 = vmatprep.mubr.bf16.mxu1 %v3303_v20  ;;  %v19646_v14 = vld [vmem:[#allocation2 + $0x1420] sm:$0xff]   ;;  %v19651_v20 = vld [vmem:[#allocation2 + $0x14e8] sm:$0xff]  }
 0x29d   :  { %17876 = vmatprep.subr.bf16.mxu1 %v19602_v18  ;;  %v19648_v16 = vld [vmem:[#allocation2 + $0x14a0] sm:$0xff]   ;;  %v19650_v18 = vld [vmem:[#allocation2 + $0x1428] sm:$0xff]  }
 0x29e   :  { %17855 = vmatpush3.bf16.msra.mxu0 %v19601_v19 }
 0x29f   :  { %17856 = vmatprep.subr.bf16.mxu0 %v19604_v21 }
 0x2a0   :  { %17877 = vmatpush3.bf16.msra.mxu1 %v19603_v22  ;;  %v19652_v22 = vld [vmem:[#allocation2 + $0x14a8] sm:$0xff]  }
 0x2a1   :  { %17878 = vmatprep.subr.bf16.mxu1 %v19606_v23 }
 0x2a2   :  { %17857 = vmatpush3.bf16.msra.mxu0 %v19605_v24 }
 0x2a3   :  { %17858 = vmatprep.subr.bf16.mxu0 %v19608_v25 }
 0x2a4   :  { %17879 = vmatpush3.bf16.msra.mxu1 %v19607_v26 }
 0x2a5   :  { %17880 = vmatprep.subr.bf16.mxu1 %v19610_v27 }
 0x2a6   :  { %17859 = vmatpush3.bf16.msra.mxu0 %v19609_v28  ;;  %v19653_v28 = vld [vmem:[#allocation2 + $0x1470] sm:$0xff]  }
 0x2a7   :  { %17860 = vmatprep.subr.bf16.mxu0 %v19612_v29  ;;  %v19654_v29 = vld [vmem:[#allocation2 + $0x1430] sm:$0xff]  }
 0x2a8   :  { %17881 = vmatpush3.bf16.msra.mxu1 %v19611_v30 }
 0x2a9   :  { %17882 = vmatprep.subr.bf16.mxu1 %v19614_v31 }
 0x2aa   :  { %17861 = vmatpush3.bf16.msra.mxu0 %v19613_v32  ;;  %v19655_v32 = vld [vmem:[#allocation2 + $0x14f0] sm:$0xff]  }
 0x2ab   :  { %17862 = vmatprep.subr.bf16.mxu0 %v19616_v33 }
 0x2ac   :  { %v17560_v36 = vpop.f32.mrb[48].mxu0  ;;  %17883 = vmatpush3.bf16.msra.mxu1 %v19615_v35 }
 0x2ad   :  { %v17561_v38 = vpop.f32.mrb[49].mxu0  ;;  %17884 = vmatprep.subr.bf16.mxu1 %v19618_v37 }
 0x2ae   :  { %v17562_v40 = vadd.f32 %v17561_v38, %v17560_v36  ;;  %v17563_v41 = vpop.f32.mrb[50].mxu0  ;;  %v17582_v42 = vpop.f32.mrb[48].mxu1  ;;  %17863 = vmatpush3.bf16.msra.mxu0 %v19617_v39  ;;  %v19656_v36 = vld [vmem:[#allocation2 + $0x14b0] sm:$0xff]   ;;  %v19657_v38 = vld [vmem:[#allocation2 + $0x1478] sm:$0xff]  }
 0x2af   :  { %v17564_v45 = vpop.f32.mrb[51].mxu0  ;;  %v17583_v46 = vpop.f32.mrb[49].mxu1  ;;  %17864 = vmatprep.subr.bf16.mxu0 %v19620_v44  ;;  %v19658_v39 = vld [vmem:[#allocation2 + $0x1438] sm:$0xff]   ;;  %v69_v41 = vld [vmem:[%s20998_s0 + $0x50] sm:$0xff] }
 0x2b0   :  { %v13133_v48 = vadd.f32 %v17562_v40, %v20694_v59  ;;  %v17584_v49 = vadd.f32 %v17583_v46, %v17582_v42  ;;  %v17585_v51 = vpop.f32.mrb[50].mxu1  ;;  %17885 = vmatpush3.bf16.msra.mxu1 %v19619_v43  ;;  %v3285_v59 = vrot.slane %v20702_v8, %v20533_v34  ;;  %v19640_v8 = vld [vmem:[#allocation2 + $0x1490] sm:$0xff]   ;;  %v19659_v40 = vld [vmem:[#allocation2 + $0x14f8] sm:$0xff]   ;;  %v3311_v42 = vrot.slane %v69_v41, %v20533_v34  ;;  %v19661_v45 = vld [vmem:[#allocation2 + $0x1540] sm:$0xff]  }
 0x2b1   :  { %v17586_v53 = vpop.f32.mrb[51].mxu1  ;;  %17886 = vmatprep.subr.bf16.mxu1 %v19622_v50  ;;  %v19660_v43 = vld [vmem:[#allocation2 + $0x14b8] sm:$0xff]   ;;  %v3304_v44 = vcombine.high %v69_v41, %v69_v41  ;;  %v19662_v51 = vld [vmem:[#allocation2 + $0x1500] sm:$0xff]   ;;  %v19698_v41 = vld [vmem:[#allocation2 + $0x1648] sm:$0xff]  }
 0x2b2   :  { %v20709_v54 = vadd.f32 %v17584_v49, %v13133_v48  ;;  %17865 = vmatpush3.bf16.msra.mxu0 %v19621_v47  ;;  %v3301_v0 = vcombine.high %v3285_v59, %v3285_v59  ;;  %v3319_v46 = vcombine.high %v3311_v42, %v3311_v42  ;;  %v3327_v47 = vrot.slane %v3311_v42, %v20533_v34  ;;  %v19663_v49 = vld [vmem:[#allocation2 + $0x15c0] sm:$0xff]   ;;  %v19699_v42 = vld [vmem:[#allocation2 + $0x1608] sm:$0xff]  }
 0x2b3   :  { %17866 = vmatprep.subr.bf16.mxu0 %v19624_v55  ;;  %v20722_v48 = vrot.slane %v3304_v44, %v20533_v34  ;;  %v19701_v44 = vld [vmem:[#allocation2 + $0x1688] sm:$0xff]  }
 0x2b4   :  { %17887 = vmatpush3.bf16.msra.mxu1 %v19623_v52  ;;  %v3341_v50 = vrot.slane %v3319_v46, %v20533_v34  ;;  %v3349_v53 = vcombine.high %v3327_v47, %v3327_v47  ;;  %v19703_v46 = vld [vmem:[#allocation2 + $0x1610] sm:$0xff]  }
 0x2b5   :  { %17888 = vmatprep.subr.bf16.mxu1 %v19626_v57  ;;  %v3320_v52 = vcombine.high %v20722_v48, %v20722_v48 }
 0x2b6   :  { %17867 = vmatpush3.bf16.msra.mxu0 %v19625_v56  ;;  %v3351_v55 = vcombine.high %v3341_v50, %v3341_v50  ;;  %v19664_v56 = vld [vmem:[#allocation2 + $0x1580] sm:$0xff]  }
 0x2b7   :  { %17896 = vmatprep.subr.bf16.mxu0 %v19629_v60  ;;  %v3348_v57 = vrot.slane %v3320_v52, %v20533_v34  ;;  %v19709_v52 = vld [vmem:[#allocation2 + $0x1698] sm:$0xff]  }
 0x2b8   :  { %17889 = vmatpush3.bf16.msra.mxu1 %v19628_v58  ;;  %v19667_v58 = vld [vmem:[#allocation2 + $0x15c8] sm:$0xff]  }
 0x2b9   :  { %13691 = vmatmul.mubr.bf16.vlgmr.msra.gmra.mrb[76].mxu0 %v3285_v59  ;;  %17918 = vmatprep.subr.bf16.mxu1 %v19631_v62  ;;  %v19666_v59 = vld [vmem:[#allocation2 + $0x1508] sm:$0xff]   ;;  %v3352_v60 = vcombine.high %v3348_v57, %v3348_v57 }
 0x2ba   :  { %17897 = vmatpush3.bf16.msra.mxu0 %v19630_v61  ;;  %13770 = vmatprep.mubr.bf16.mxu0 %v3341_v50  ;;  %v19669_v61 = vld [vmem:[#allocation2 + $0x1550] sm:$0xff]   ;;  %v19668_v62 = vld [vmem:[#allocation2 + $0x1588] sm:$0xff]   ;;  %v19707_v50 = vld [vmem:[#allocation2 + $0x1618] sm:$0xff]  }
 0x2bb   :  { %13731 = vmatmul.mubr.bf16.vlgmr.msra.gmra.mrb[76].mxu1 %v3301_v0  ;;  %17898 = vmatprep.subr.bf16.mxu0 %v19633_v1  ;;  %v19670_v0 = vld [vmem:[#allocation2 + $0x1510] sm:$0xff]   ;;  %v19673_v1 = vld [vmem:[#allocation2 + $0x1558] sm:$0xff]  }
 0x2bc   :  { %17919 = vmatpush3.bf16.msra.mxu1 %v19632_v63  ;;  %13810 = vmatprep.mubr.bf16.mxu1 %v3351_v55  ;;  %v19671_v63 = vld [vmem:[#allocation2 + $0x15d0] sm:$0xff]   ;;  %v19712_v55 = vld [vmem:[#allocation2 + $0x16e0] sm:$0xff]  }
 0x2bd   :  { %17920 = vmatprep.subr.bf16.mxu1 %v19635_v3  ;;  %v19675_v3 = vld [vmem:[#allocation2 + $0x15d8] sm:$0xff]  }
 0x2be   :  { %17899 = vmatpush3.bf16.msra.mxu0 %v19634_v2  ;;  %v19672_v2 = vld [vmem:[#allocation2 + $0x1590] sm:$0xff]  }
 0x2bf   :  { %17900 = vmatprep.subr.bf16.mxu0 %v19637_v5  ;;  %v19677_v5 = vld [vmem:[#allocation2 + $0x1560] sm:$0xff]  }
 0x2c0   :  { %17921 = vmatpush3.bf16.msra.mxu1 %v19636_v4  ;;  %v19674_v4 = vld [vmem:[#allocation2 + $0x1518] sm:$0xff]  }
 0x2c1   :  { %17922 = vmatprep.subr.bf16.mxu1 %v19639_v7  ;;  %v19679_v7 = vld [vmem:[#allocation2 + $0x15e0] sm:$0xff]  }
 0x2c2   :  { %17901 = vmatpush3.bf16.msra.mxu0 %v19638_v6  ;;  %v19676_v6 = vld [vmem:[#allocation2 + $0x1598] sm:$0xff]  }
 0x2c3   :  { %17902 = vmatprep.subr.bf16.mxu0 %v19641_v9  ;;  %v19681_v9 = vld [vmem:[#allocation2 + $0x1568] sm:$0xff]  }
 0x2c4   :  { %17923 = vmatpush3.bf16.msra.mxu1 %v19640_v8  ;;  %v19678_v8 = vld [vmem:[#allocation2 + $0x1520] sm:$0xff]  }
 0x2c5   :  { %17924 = vmatprep.subr.bf16.mxu1 %v19643_v11 }
 0x2c6   :  { %17903 = vmatpush3.bf16.msra.mxu0 %v19642_v10  ;;  %v19680_v10 = vld [vmem:[#allocation2 + $0x15a0] sm:$0xff]  }
 0x2c7   :  { %17904 = vmatprep.subr.bf16.mxu0 %v19645_v13 }
 0x2c8   :  { %17925 = vmatpush3.bf16.msra.mxu1 %v19644_v12  ;;  %v19683_v12 = vld [vmem:[#allocation2 + $0x15e8] sm:$0xff]  }
 0x2c9   :  { %17926 = vmatprep.subr.bf16.mxu1 %v19647_v15 }
 0x2ca   :  { %17905 = vmatpush3.bf16.msra.mxu0 %v19646_v14  ;;  %v19682_v14 = vld [vmem:[#allocation2 + $0x1528] sm:$0xff]  }
 0x2cb   :  { %17906 = vmatprep.subr.bf16.mxu0 %v19649_v17 }
 0x2cc   :  { %v17604_v19 = vpop.f32.mrb[52].mxu0  ;;  %17927 = vmatpush3.bf16.msra.mxu1 %v19648_v16 }
 0x2cd   :  { %v17605_v21 = vpop.f32.mrb[53].mxu0  ;;  %17928 = vmatprep.subr.bf16.mxu1 %v19651_v20 }
 0x2ce   :  { %v17606_v23 = vadd.f32 %v17605_v21, %v17604_v19  ;;  %v17607_v24 = vpop.f32.mrb[54].mxu0  ;;  %v17626_v25 = vpop.f32.mrb[52].mxu1  ;;  %17907 = vmatpush3.bf16.msra.mxu0 %v19650_v18  ;;  %v19684_v18 = vld [vmem:[#allocation2 + $0x15a8] sm:$0xff]   ;;  %v19685_v19 = vld [vmem:[#allocation2 + $0x1570] sm:$0xff]  }
 0x2cf   :  { %v17608_v26 = vpop.f32.mrb[55].mxu0  ;;  %v17627_v27 = vpop.f32.mrb[53].mxu1  ;;  %17908 = vmatprep.subr.bf16.mxu0 %v19653_v28 }
 0x2d0   :  { %v13213_v30 = vadd.f32 %v17606_v23, %v20709_v54  ;;  %v17628_v31 = vadd.f32 %v17627_v27, %v17626_v25  ;;  %v17629_v33 = vpop.f32.mrb[54].mxu1  ;;  %17929 = vmatpush3.bf16.msra.mxu1 %v19652_v22  ;;  %v19665_v54 = vld [vmem:[#allocation2 + $0x1548] sm:$0xff]   ;;  %v19686_v22 = vld [vmem:[#allocation2 + $0x1530] sm:$0xff]  }
 0x2d1   :  { %v17630_v37 = vpop.f32.mrb[55].mxu1  ;;  %17930 = vmatprep.subr.bf16.mxu1 %v19655_v32  ;;  %v19687_v25 = vld [vmem:[#allocation2 + $0x15f0] sm:$0xff]   ;;  %v19691_v32 = vld [vmem:[#allocation2 + $0x15f8] sm:$0xff]  }
 0x2d2   :  { %v20714_v35 = vadd.f32 %v17628_v31, %v13213_v30  ;;  %17909 = vmatpush3.bf16.msra.mxu0 %v19654_v29  ;;  %v19688_v27 = vld [vmem:[#allocation2 + $0x15b0] sm:$0xff]   ;;  %v19689_v30 = vld [vmem:[#allocation2 + $0x1578] sm:$0xff]   ;;  %v19695_v37 = vld [vmem:[#allocation2 + $0x1600] sm:$0xff]  }
 0x2d3   :  { %17910 = vmatprep.subr.bf16.mxu0 %v19657_v38  ;;  %v19690_v31 = vld [vmem:[#allocation2 + $0x1538] sm:$0xff]   ;;  %v19696_v38 = vld [vmem:[#allocation2 + $0x16c0] sm:$0xff]  }
 0x2d4   :  { %17931 = vmatpush3.bf16.msra.mxu1 %v19656_v36  ;;  %v19693_v33 = vld [vmem:[#allocation2 + $0x15b8] sm:$0xff]   ;;  %v19694_v36 = vld [vmem:[#allocation2 + $0x1640] sm:$0xff]  }
 0x2d5   :  { %17932 = vmatprep.subr.bf16.mxu1 %v19659_v40 }
 0x2d6   :  { %17911 = vmatpush3.bf16.msra.mxu0 %v19658_v39  ;;  %v19697_v39 = vld [vmem:[#allocation2 + $0x1680] sm:$0xff]  }
 0x2d7   :  { %17940 = vmatprep.subr.bf16.mxu0 %v19661_v45  ;;  %v19702_v45 = vld [vmem:[#allocation2 + $0x1650] sm:$0xff]  }
 0x2d8   :  { %17933 = vmatpush3.bf16.msra.mxu1 %v19660_v43  ;;  %v19700_v43 = vld [vmem:[#allocation2 + $0x16c8] sm:$0xff]  }
 0x2d9   :  { %17962 = vmatprep.subr.bf16.mxu1 %v19663_v49  ;;  %13771 = vmatmul.mubr.bf16.vlgmr.msra.gmra.mrb[80].mxu0 %v3327_v47  ;;  %v19704_v47 = vld [vmem:[#allocation2 + $0x16d0] sm:$0xff]   ;;  %v19706_v49 = vld [vmem:[#allocation2 + $0x1658] sm:$0xff]  }
 0x2da   :  { %17941 = vmatpush3.bf16.msra.mxu0 %v19662_v51  ;;  %13850 = vmatprep.mubr.bf16.mxu0 %v3348_v57  ;;  %v19708_v51 = vld [vmem:[#allocation2 + $0x16d8] sm:$0xff]   ;;  %v19714_v57 = vld [vmem:[#allocation2 + $0x1668] sm:$0xff]  }
 0x2db   :  { %13811 = vmatmul.mubr.bf16.vlgmr.msra.gmra.mrb[80].mxu1 %v3349_v53  ;;  %17942 = vmatprep.subr.bf16.mxu0 %v19665_v54  ;;  %v19710_v53 = vld [vmem:[#allocation2 + $0x1660] sm:$0xff]  }
 0x2dc   :  { %17963 = vmatpush3.bf16.msra.mxu1 %v19664_v56  ;;  %13890 = vmatprep.mubr.bf16.mxu1 %v3352_v60  ;;  %v19711_v54 = vld [vmem:[#allocation2 + $0x1620] sm:$0xff]   ;;  %v19716_v60 = vld [vmem:[#allocation2 + $0x16e8] sm:$0xff]  }
 0x2dd   :  { %17964 = vmatprep.subr.bf16.mxu1 %v19667_v58  ;;  %v19713_v56 = vld [vmem:[#allocation2 + $0x16a0] sm:$0xff]   ;;  %v19715_v58 = vld [vmem:[#allocation2 + $0x1628] sm:$0xff]  }
 0x2de   :  { %17943 = vmatpush3.bf16.msra.mxu0 %v19666_v59 }
 0x2df   :  { %17944 = vmatprep.subr.bf16.mxu0 %v19669_v61 }
 0x2e0   :  { %17965 = vmatpush3.bf16.msra.mxu1 %v19668_v62  ;;  %v19717_v62 = vld [vmem:[#allocation2 + $0x16a8] sm:$0xff]  }
 0x2e1   :  { %17966 = vmatprep.subr.bf16.mxu1 %v19671_v63 }
 0x2e2   :  { %17945 = vmatpush3.bf16.msra.mxu0 %v19670_v0 }
 0x2e3   :  { %17946 = vmatprep.subr.bf16.mxu0 %v19673_v1 }
 0x2e4   :  { %17967 = vmatpush3.bf16.msra.mxu1 %v19672_v2 }
 0x2e5   :  { %17968 = vmatprep.subr.bf16.mxu1 %v19675_v3 }
 0x2e6   :  { %17947 = vmatpush3.bf16.msra.mxu0 %v19674_v4  ;;  %v19718_v4 = vld [vmem:[#allocation2 + $0x1670] sm:$0xff]  }
 0x2e7   :  { %17948 = vmatprep.subr.bf16.mxu0 %v19677_v5  ;;  %v19719_v5 = vld [vmem:[#allocation2 + $0x1630] sm:$0xff]  }
 0x2e8   :  { %17969 = vmatpush3.bf16.msra.mxu1 %v19676_v6 }
 0x2e9   :  { %17970 = vmatprep.subr.bf16.mxu1 %v19679_v7 }
 0x2ea   :  { %17949 = vmatpush3.bf16.msra.mxu0 %v19678_v8  ;;  %v19720_v8 = vld [vmem:[#allocation2 + $0x16f0] sm:$0xff]  }
 0x2eb   :  { %17950 = vmatprep.subr.bf16.mxu0 %v19681_v9 }
 0x2ec   :  { %v17648_v11 = vpop.f32.mrb[56].mxu0  ;;  %17971 = vmatpush3.bf16.msra.mxu1 %v19680_v10 }
 0x2ed   :  { %v17649_v13 = vpop.f32.mrb[57].mxu0  ;;  %17972 = vmatprep.subr.bf16.mxu1 %v19683_v12 }
 0x2ee   :  { %v17650_v15 = vadd.f32 %v17649_v13, %v17648_v11  ;;  %v17651_v16 = vpop.f32.mrb[58].mxu0  ;;  %v17670_v17 = vpop.f32.mrb[56].mxu1  ;;  %17951 = vmatpush3.bf16.msra.mxu0 %v19682_v14  ;;  %v19721_v11 = vld [vmem:[#allocation2 + $0x16b0] sm:$0xff]   ;;  %v19722_v13 = vld [vmem:[#allocation2 + $0x1678] sm:$0xff]  }
 0x2ef   :  { %v17652_v20 = vpop.f32.mrb[59].mxu0  ;;  %v17671_v21 = vpop.f32.mrb[57].mxu1  ;;  %17952 = vmatprep.subr.bf16.mxu0 %v19685_v19  ;;  %v19723_v14 = vld [vmem:[#allocation2 + $0x1638] sm:$0xff]  }
 0x2f0   :  { %v13293_v23 = vadd.f32 %v17650_v15, %v20714_v35  ;;  %v17672_v24 = vadd.f32 %v17671_v21, %v17670_v17  ;;  %v17673_v26 = vpop.f32.mrb[58].mxu1  ;;  %17973 = vmatpush3.bf16.msra.mxu1 %v19684_v18  ;;  %v3334_v35 = vrot.slane %v20722_v48, %v20533_v34  ;;  %v19705_v48 = vld [vmem:[#allocation2 + $0x1690] sm:$0xff]   ;;  %v19724_v15 = vld [vmem:[#allocation2 + $0x16f8] sm:$0xff]   ;;  %v19726_v20 = vld [vmem:[#allocation2 + $0x1740] sm:$0xff]  }
 0x2f1   :  { %v17674_v28 = vpop.f32.mrb[59].mxu1  ;;  %17974 = vmatprep.subr.bf16.mxu1 %v19687_v25  ;;  %v70_v16 = vld [vmem:[%s20998_s0 + $0x58] sm:$0xff]  ;;  %v19727_v26 = vld [vmem:[#allocation2 + $0x1700] sm:$0xff]  }
 0x2f2   :  { %v20729_v29 = vadd.f32 %v17672_v24, %v13293_v23  ;;  %17953 = vmatpush3.bf16.msra.mxu0 %v19686_v22  ;;  %v3350_v40 = vcombine.high %v3334_v35, %v3334_v35  ;;  %v3360_v17 = vrot.slane %v70_v16, %v20533_v34  ;;  %v19725_v18 = vld [vmem:[#allocation2 + $0x16b8] sm:$0xff]   ;;  %v3353_v19 = vcombine.high %v70_v16, %v70_v16  ;;  %v19728_v24 = vld [vmem:[#allocation2 + $0x17c0] sm:$0xff]   ;;  %v19763_v16 = vld [vmem:[#allocation2 + $0x1848] sm:$0xff]  }
 0x2f3   :  { %17954 = vmatprep.subr.bf16.mxu0 %v19689_v30 }
 0x2f4   :  { %17975 = vmatpush3.bf16.msra.mxu1 %v19688_v27  ;;  %v3368_v21 = vcombine.high %v3360_v17, %v3360_v17  ;;  %v3376_v22 = vrot.slane %v3360_v17, %v20533_v34  ;;  %v20742_v23 = vrot.slane %v3353_v19, %v20533_v34  ;;  %v19764_v17 = vld [vmem:[#allocation2 + $0x1808] sm:$0xff]  }
 0x2f5   :  { %17976 = vmatprep.subr.bf16.mxu1 %v19691_v32  ;;  %v19766_v19 = vld [vmem:[#allocation2 + $0x1888] sm:$0xff]  }
 0x2f6   :  { %17955 = vmatpush3.bf16.msra.mxu0 %v19690_v31  ;;  %v3390_v25 = vrot.slane %v3368_v21, %v20533_v34  ;;  %v3369_v27 = vcombine.high %v20742_v23, %v20742_v23  ;;  %v3398_v28 = vcombine.high %v3376_v22, %v3376_v22  ;;  %v19729_v31 = vld [vmem:[#allocation2 + $0x1780] sm:$0xff]   ;;  %v19768_v21 = vld [vmem:[#allocation2 + $0x1810] sm:$0xff]  }
 0x2f7   :  { %17984 = vmatprep.subr.bf16.mxu0 %v19694_v36 }
 0x2f8   :  { %17977 = vmatpush3.bf16.msra.mxu1 %v19693_v33  ;;  %v3400_v30 = vcombine.high %v3390_v25, %v3390_v25  ;;  %v3397_v32 = vrot.slane %v3369_v27, %v20533_v34  ;;  %v19732_v33 = vld [vmem:[#allocation2 + $0x17c8] sm:$0xff]   ;;  %v19774_v27 = vld [vmem:[#allocation2 + $0x1898] sm:$0xff]  }
 0x2f9   :  { %13851 = vmatmul.mubr.bf16.vlgmr.msra.gmra.mrb[84].mxu0 %v3334_v35  ;;  %18006 = vmatprep.subr.bf16.mxu1 %v19696_v38  ;;  %v19731_v35 = vld [vmem:[#allocation2 + $0x1708] sm:$0xff]  }
 0x2fa   :  { %17985 = vmatpush3.bf16.msra.mxu0 %v19695_v37  ;;  %13930 = vmatprep.mubr.bf16.mxu0 %v3390_v25  ;;  %v3401_v36 = vcombine.high %v3397_v32, %v3397_v32  ;;  %v19734_v37 = vld [vmem:[#allocation2 + $0x1750] sm:$0xff]   ;;  %v19733_v38 = vld [vmem:[#allocation2 + $0x1788] sm:$0xff]   ;;  %v19772_v25 = vld [vmem:[#allocation2 + $0x1818] sm:$0xff]  }
 0x2fb   :  { %13891 = vmatmul.mubr.bf16.vlgmr.msra.gmra.mrb[84].mxu1 %v3350_v40  ;;  %17986 = vmatprep.subr.bf16.mxu0 %v19698_v41  ;;  %v19735_v40 = vld [vmem:[#allocation2 + $0x1710] sm:$0xff]   ;;  %v19738_v41 = vld [vmem:[#allocation2 + $0x1758] sm:$0xff]  }
 0x2fc   :  { %18007 = vmatpush3.bf16.msra.mxu1 %v19697_v39  ;;  %13970 = vmatprep.mubr.bf16.mxu1 %v3400_v30  ;;  %v19736_v39 = vld [vmem:[#allocation2 + $0x17d0] sm:$0xff]   ;;  %v19777_v30 = vld [vmem:[#allocation2 + $0x18e0] sm:$0xff]  }
 0x2fd   :  { %18008 = vmatprep.subr.bf16.mxu1 %v19700_v43  ;;  %v19740_v43 = vld [vmem:[#allocation2 + $0x17d8] sm:$0xff]  }
 0x2fe   :  { %17987 = vmatpush3.bf16.msra.mxu0 %v19699_v42  ;;  %v19737_v42 = vld [vmem:[#allocation2 + $0x1790] sm:$0xff]  }
 0x2ff   :  { %17988 = vmatprep.subr.bf16.mxu0 %v19702_v45  ;;  %v19742_v45 = vld [vmem:[#allocation2 + $0x1760] sm:$0xff]  }
 0x300   :  { %18009 = vmatpush3.bf16.msra.mxu1 %v19701_v44  ;;  %v19739_v44 = vld [vmem:[#allocation2 + $0x1718] sm:$0xff]  }
 0x301   :  { %18010 = vmatprep.subr.bf16.mxu1 %v19704_v47  ;;  %v19744_v47 = vld [vmem:[#allocation2 + $0x17e0] sm:$0xff]  }
 0x302   :  { %17989 = vmatpush3.bf16.msra.mxu0 %v19703_v46  ;;  %v19741_v46 = vld [vmem:[#allocation2 + $0x1798] sm:$0xff]  }
 0x303   :  { %17990 = vmatprep.subr.bf16.mxu0 %v19706_v49  ;;  %v19746_v49 = vld [vmem:[#allocation2 + $0x1768] sm:$0xff]  }
 0x304   :  { %18011 = vmatpush3.bf16.msra.mxu1 %v19705_v48  ;;  %v19743_v48 = vld [vmem:[#allocation2 + $0x1720] sm:$0xff]  }
 0x305   :  { %18012 = vmatprep.subr.bf16.mxu1 %v19708_v51 }
 0x306   :  { %17991 = vmatpush3.bf16.msra.mxu0 %v19707_v50  ;;  %v19745_v50 = vld [vmem:[#allocation2 + $0x17a0] sm:$0xff]  }
 0x307   :  { %17992 = vmatprep.subr.bf16.mxu0 %v19710_v53 }
 0x308   :  { %18013 = vmatpush3.bf16.msra.mxu1 %v19709_v52  ;;  %v19748_v52 = vld [vmem:[#allocation2 + $0x17e8] sm:$0xff]  }
 0x309   :  { %18014 = vmatprep.subr.bf16.mxu1 %v19712_v55 }
 0x30a   :  { %17993 = vmatpush3.bf16.msra.mxu0 %v19711_v54  ;;  %v19747_v54 = vld [vmem:[#allocation2 + $0x1728] sm:$0xff]  }
 0x30b   :  { %17994 = vmatprep.subr.bf16.mxu0 %v19714_v57 }
 0x30c   :  { %v17692_v59 = vpop.f32.mrb[60].mxu0  ;;  %18015 = vmatpush3.bf16.msra.mxu1 %v19713_v56 }
 0x30d   :  { %v17693_v61 = vpop.f32.mrb[61].mxu0  ;;  %18016 = vmatprep.subr.bf16.mxu1 %v19716_v60 }
 0x30e   :  { %v17694_v63 = vadd.f32 %v17693_v61, %v17692_v59  ;;  %v17695_v0 = vpop.f32.mrb[62].mxu0  ;;  %v17714_v1 = vpop.f32.mrb[60].mxu1  ;;  %17995 = vmatpush3.bf16.msra.mxu0 %v19715_v58  ;;  %v19749_v58 = vld [vmem:[#allocation2 + $0x17a8] sm:$0xff]   ;;  %v19750_v59 = vld [vmem:[#allocation2 + $0x1770] sm:$0xff]  }
 0x30f   :  { %v17696_v2 = vpop.f32.mrb[63].mxu0  ;;  %v17715_v3 = vpop.f32.mrb[61].mxu1  ;;  %17996 = vmatprep.subr.bf16.mxu0 %v19718_v4 }
 0x310   :  { %v13373_v6 = vadd.f32 %v17694_v63, %v20729_v29  ;;  %v17716_v7 = vadd.f32 %v17715_v3, %v17714_v1  ;;  %v17717_v9 = vpop.f32.mrb[62].mxu1  ;;  %18017 = vmatpush3.bf16.msra.mxu1 %v19717_v62  ;;  %v19730_v29 = vld [vmem:[#allocation2 + $0x1748] sm:$0xff]   ;;  %v19751_v62 = vld [vmem:[#allocation2 + $0x1730] sm:$0xff]  }
 0x311   :  { %v17718_v12 = vpop.f32.mrb[63].mxu1  ;;  %18018 = vmatprep.subr.bf16.mxu1 %v19720_v8  ;;  %v19752_v1 = vld [vmem:[#allocation2 + $0x17f0] sm:$0xff]   ;;  %v19756_v8 = vld [vmem:[#allocation2 + $0x17f8] sm:$0xff]  }
 0x312   :  { %v20734_v10 = vadd.f32 %v17716_v7, %v13373_v6  ;;  %17997 = vmatpush3.bf16.msra.mxu0 %v19719_v5  ;;  %v19753_v3 = vld [vmem:[#allocation2 + $0x17b0] sm:$0xff]   ;;  %v19754_v6 = vld [vmem:[#allocation2 + $0x1778] sm:$0xff]   ;;  %v19760_v12 = vld [vmem:[#allocation2 + $0x1800] sm:$0xff]  }
 0x313   :  { %17998 = vmatprep.subr.bf16.mxu0 %v19722_v13  ;;  %v19755_v7 = vld [vmem:[#allocation2 + $0x1738] sm:$0xff]   ;;  %v19761_v13 = vld [vmem:[#allocation2 + $0x18c0] sm:$0xff]  }
 0x314   :  { %18019 = vmatpush3.bf16.msra.mxu1 %v19721_v11  ;;  %v19758_v9 = vld [vmem:[#allocation2 + $0x17b8] sm:$0xff]   ;;  %v19759_v11 = vld [vmem:[#allocation2 + $0x1840] sm:$0xff]  }
 0x315   :  { %18020 = vmatprep.subr.bf16.mxu1 %v19724_v15 }
 0x316   :  { %17999 = vmatpush3.bf16.msra.mxu0 %v19723_v14  ;;  %v19762_v14 = vld [vmem:[#allocation2 + $0x1880] sm:$0xff]  }
 0x317   :  { %18028 = vmatprep.subr.bf16.mxu0 %v19726_v20  ;;  %v19767_v20 = vld [vmem:[#allocation2 + $0x1850] sm:$0xff]  }
 0x318   :  { %18021 = vmatpush3.bf16.msra.mxu1 %v19725_v18  ;;  %v19765_v18 = vld [vmem:[#allocation2 + $0x18c8] sm:$0xff]  }
 0x319   :  { %18050 = vmatprep.subr.bf16.mxu1 %v19728_v24  ;;  %13931 = vmatmul.mubr.bf16.vlgmr.msra.gmra.mrb[88].mxu0 %v3376_v22  ;;  %v19769_v22 = vld [vmem:[#allocation2 + $0x18d0] sm:$0xff]   ;;  %v19771_v24 = vld [vmem:[#allocation2 + $0x1858] sm:$0xff]  }
 0x31a   :  { %18029 = vmatpush3.bf16.msra.mxu0 %v19727_v26  ;;  %14010 = vmatprep.mubr.bf16.mxu0 %v3397_v32  ;;  %v19773_v26 = vld [vmem:[#allocation2 + $0x18d8] sm:$0xff]   ;;  %v19779_v32 = vld [vmem:[#allocation2 + $0x1868] sm:$0xff]  }
 0x31b   :  { %13971 = vmatmul.mubr.bf16.vlgmr.msra.gmra.mrb[88].mxu1 %v3398_v28  ;;  %18030 = vmatprep.subr.bf16.mxu0 %v19730_v29  ;;  %v19775_v28 = vld [vmem:[#allocation2 + $0x1860] sm:$0xff]  }
 0x31c   :  { %18051 = vmatpush3.bf16.msra.mxu1 %v19729_v31  ;;  %14050 = vmatprep.mubr.bf16.mxu1 %v3401_v36  ;;  %v19776_v29 = vld [vmem:[#allocation2 + $0x1820] sm:$0xff]   ;;  %v19781_v36 = vld [vmem:[#allocation2 + $0x18e8] sm:$0xff]  }
 0x31d   :  { %18052 = vmatprep.subr.bf16.mxu1 %v19732_v33  ;;  %v19778_v31 = vld [vmem:[#allocation2 + $0x18a0] sm:$0xff]   ;;  %v19780_v33 = vld [vmem:[#allocation2 + $0x1828] sm:$0xff]  }
 0x31e   :  { %18031 = vmatpush3.bf16.msra.mxu0 %v19731_v35 }
 0x31f   :  { %18032 = vmatprep.subr.bf16.mxu0 %v19734_v37 }
 0x320   :  { %18053 = vmatpush3.bf16.msra.mxu1 %v19733_v38  ;;  %v19782_v38 = vld [vmem:[#allocation2 + $0x18a8] sm:$0xff]  }
 0x321   :  { %18054 = vmatprep.subr.bf16.mxu1 %v19736_v39 }
 0x322   :  { %18033 = vmatpush3.bf16.msra.mxu0 %v19735_v40 }
 0x323   :  { %18034 = vmatprep.subr.bf16.mxu0 %v19738_v41 }
 0x324   :  { %18055 = vmatpush3.bf16.msra.mxu1 %v19737_v42 }
 0x325   :  { %18056 = vmatprep.subr.bf16.mxu1 %v19740_v43 }
 0x326   :  { %18035 = vmatpush3.bf16.msra.mxu0 %v19739_v44  ;;  %v19783_v44 = vld [vmem:[#allocation2 + $0x1870] sm:$0xff]  }
 0x327   :  { %18036 = vmatprep.subr.bf16.mxu0 %v19742_v45  ;;  %v19784_v45 = vld [vmem:[#allocation2 + $0x1830] sm:$0xff]  }
 0x328   :  { %18057 = vmatpush3.bf16.msra.mxu1 %v19741_v46 }
 0x329   :  { %18058 = vmatprep.subr.bf16.mxu1 %v19744_v47 }
 0x32a   :  { %18037 = vmatpush3.bf16.msra.mxu0 %v19743_v48  ;;  %v19785_v48 = vld [vmem:[#allocation2 + $0x18f0] sm:$0xff]  }
 0x32b   :  { %18038 = vmatprep.subr.bf16.mxu0 %v19746_v49 }
 0x32c   :  { %v17736_v51 = vpop.f32.mrb[64].mxu0  ;;  %18059 = vmatpush3.bf16.msra.mxu1 %v19745_v50 }
 0x32d   :  { %v17737_v53 = vpop.f32.mrb[65].mxu0  ;;  %18060 = vmatprep.subr.bf16.mxu1 %v19748_v52 }
 0x32e   :  { %v17738_v55 = vadd.f32 %v17737_v53, %v17736_v51  ;;  %v17739_v56 = vpop.f32.mrb[66].mxu0  ;;  %v17758_v57 = vpop.f32.mrb[64].mxu1  ;;  %18039 = vmatpush3.bf16.msra.mxu0 %v19747_v54  ;;  %v19786_v51 = vld [vmem:[#allocation2 + $0x18b0] sm:$0xff]   ;;  %v19787_v53 = vld [vmem:[#allocation2 + $0x1878] sm:$0xff]  }
 0x32f   :  { %v17740_v60 = vpop.f32.mrb[67].mxu0  ;;  %v17759_v61 = vpop.f32.mrb[65].mxu1  ;;  %18040 = vmatprep.subr.bf16.mxu0 %v19750_v59  ;;  %v19788_v54 = vld [vmem:[#allocation2 + $0x1838] sm:$0xff]   ;;  %v71_v56 = vld [vmem:[%s20998_s0 + $0x60] sm:$0xff] }
 0x330   :  { %v13453_v63 = vadd.f32 %v17738_v55, %v20734_v10  ;;  %v17760_v0 = vadd.f32 %v17759_v61, %v17758_v57  ;;  %v17761_v2 = vpop.f32.mrb[66].mxu1  ;;  %18061 = vmatpush3.bf16.msra.mxu1 %v19749_v58  ;;  %v3383_v10 = vrot.slane %v20742_v23, %v20533_v34  ;;  %v19770_v23 = vld [vmem:[#allocation2 + $0x1890] sm:$0xff]   ;;  %v19789_v55 = vld [vmem:[#allocation2 + $0x18f8] sm:$0xff]   ;;  %v3409_v57 = vrot.slane %v71_v56, %v20533_v34  ;;  %v19791_v60 = vld [vmem:[#allocation2 + $0x1940] sm:$0xff]  }
 0x331   :  { %v17762_v4 = vpop.f32.mrb[67].mxu1  ;;  %18062 = vmatprep.subr.bf16.mxu1 %v19752_v1  ;;  %v19790_v58 = vld [vmem:[#allocation2 + $0x18b8] sm:$0xff]   ;;  %v3402_v59 = vcombine.high %v71_v56, %v71_v56  ;;  %v19792_v2 = vld [vmem:[#allocation2 + $0x1900] sm:$0xff]   ;;  %v19828_v56 = vld [vmem:[#allocation2 + $0x1a48] sm:$0xff]  }
 0x332   :  { %v20749_v5 = vadd.f32 %v17760_v0, %v13453_v63  ;;  %18041 = vmatpush3.bf16.msra.mxu0 %v19751_v62  ;;  %v3399_v15 = vcombine.high %v3383_v10, %v3383_v10  ;;  %v3417_v61 = vcombine.high %v3409_v57, %v3409_v57  ;;  %v3425_v62 = vrot.slane %v3409_v57, %v20533_v34  ;;  %v19793_v0 = vld [vmem:[#allocation2 + $0x19c0] sm:$0xff]   ;;  %v19829_v57 = vld [vmem:[#allocation2 + $0x1a08] sm:$0xff]  }
 0x333   :  { %18042 = vmatprep.subr.bf16.mxu0 %v19754_v6  ;;  %v20762_v63 = vrot.slane %v3402_v59, %v20533_v34  ;;  %v19831_v59 = vld [vmem:[#allocation2 + $0x1a88] sm:$0xff]  }
 0x334   :  { %18063 = vmatpush3.bf16.msra.mxu1 %v19753_v3  ;;  %v3439_v1 = vrot.slane %v3417_v61, %v20533_v34  ;;  %v3447_v4 = vcombine.high %v3425_v62, %v3425_v62  ;;  %v19833_v61 = vld [vmem:[#allocation2 + $0x1a10] sm:$0xff]  }
 0x335   :  { %18064 = vmatprep.subr.bf16.mxu1 %v19756_v8  ;;  %v3418_v3 = vcombine.high %v20762_v63, %v20762_v63 }
 0x336   :  { %18043 = vmatpush3.bf16.msra.mxu0 %v19755_v7  ;;  %v3449_v6 = vcombine.high %v3439_v1, %v3439_v1  ;;  %v19794_v7 = vld [vmem:[#allocation2 + $0x1980] sm:$0xff]  }
 0x337   :  { %18072 = vmatprep.subr.bf16.mxu0 %v19759_v11  ;;  %v3446_v8 = vrot.slane %v3418_v3, %v20533_v34  ;;  %v19839_v3 = vld [vmem:[#allocation2 + $0x1a98] sm:$0xff]  }
 0x338   :  { %18065 = vmatpush3.bf16.msra.mxu1 %v19758_v9  ;;  %v19797_v9 = vld [vmem:[#allocation2 + $0x19c8] sm:$0xff]  }
 0x339   :  { %14011 = vmatmul.mubr.bf16.vlgmr.msra.gmra.mrb[92].mxu0 %v3383_v10  ;;  %18094 = vmatprep.subr.bf16.mxu1 %v19761_v13  ;;  %v19796_v10 = vld [vmem:[#allocation2 + $0x1908] sm:$0xff]   ;;  %v3450_v11 = vcombine.high %v3446_v8, %v3446_v8 }
 0x33a   :  { %18073 = vmatpush3.bf16.msra.mxu0 %v19760_v12  ;;  %14090 = vmatprep.mubr.bf16.mxu0 %v3439_v1  ;;  %v19799_v12 = vld [vmem:[#allocation2 + $0x1950] sm:$0xff]   ;;  %v19798_v13 = vld [vmem:[#allocation2 + $0x1988] sm:$0xff]   ;;  %v19837_v1 = vld [vmem:[#allocation2 + $0x1a18] sm:$0xff]  }
 0x33b   :  { %14051 = vmatmul.mubr.bf16.vlgmr.msra.gmra.mrb[92].mxu1 %v3399_v15  ;;  %18074 = vmatprep.subr.bf16.mxu0 %v19763_v16  ;;  %v19800_v15 = vld [vmem:[#allocation2 + $0x1910] sm:$0xff]   ;;  %v19803_v16 = vld [vmem:[#allocation2 + $0x1958] sm:$0xff]  }
 0x33c   :  { %18095 = vmatpush3.bf16.msra.mxu1 %v19762_v14  ;;  %14130 = vmatprep.mubr.bf16.mxu1 %v3449_v6  ;;  %v19801_v14 = vld [vmem:[#allocation2 + $0x19d0] sm:$0xff]   ;;  %v19842_v6 = vld [vmem:[#allocation2 + $0x1ae0] sm:$0xff]  }
 0x33d   :  { %18096 = vmatprep.subr.bf16.mxu1 %v19765_v18  ;;  %v19805_v18 = vld [vmem:[#allocation2 + $0x19d8] sm:$0xff]  }
 0x33e   :  { %18075 = vmatpush3.bf16.msra.mxu0 %v19764_v17  ;;  %v19802_v17 = vld [vmem:[#allocation2 + $0x1990] sm:$0xff]  }
 0x33f   :  { %18076 = vmatprep.subr.bf16.mxu0 %v19767_v20  ;;  %v19807_v20 = vld [vmem:[#allocation2 + $0x1960] sm:$0xff]  }
 0x340   :  { %18097 = vmatpush3.bf16.msra.mxu1 %v19766_v19  ;;  %v19804_v19 = vld [vmem:[#allocation2 + $0x1918] sm:$0xff]  }
 0x341   :  { %18098 = vmatprep.subr.bf16.mxu1 %v19769_v22  ;;  %v19809_v22 = vld [vmem:[#allocation2 + $0x19e0] sm:$0xff]  }
 0x342   :  { %18077 = vmatpush3.bf16.msra.mxu0 %v19768_v21  ;;  %v19806_v21 = vld [vmem:[#allocation2 + $0x1998] sm:$0xff]  }
 0x343   :  { %18078 = vmatprep.subr.bf16.mxu0 %v19771_v24  ;;  %v19811_v24 = vld [vmem:[#allocation2 + $0x1968] sm:$0xff]  }
 0x344   :  { %18099 = vmatpush3.bf16.msra.mxu1 %v19770_v23  ;;  %v19808_v23 = vld [vmem:[#allocation2 + $0x1920] sm:$0xff]  }
 0x345   :  { %18100 = vmatprep.subr.bf16.mxu1 %v19773_v26 }
 0x346   :  { %18079 = vmatpush3.bf16.msra.mxu0 %v19772_v25  ;;  %v19810_v25 = vld [vmem:[#allocation2 + $0x19a0] sm:$0xff]  }
 0x347   :  { %18080 = vmatprep.subr.bf16.mxu0 %v19775_v28 }
 0x348   :  { %18101 = vmatpush3.bf16.msra.mxu1 %v19774_v27  ;;  %v19813_v27 = vld [vmem:[#allocation2 + $0x19e8] sm:$0xff]  }
 0x349   :  { %18102 = vmatprep.subr.bf16.mxu1 %v19777_v30 }
 0x34a   :  { %18081 = vmatpush3.bf16.msra.mxu0 %v19776_v29  ;;  %v19812_v29 = vld [vmem:[#allocation2 + $0x1928] sm:$0xff]  }
 0x34b   :  { %18082 = vmatprep.subr.bf16.mxu0 %v19779_v32 }
 0x34c   :  { %v17780_v35 = vpop.f32.mrb[68].mxu0  ;;  %18103 = vmatpush3.bf16.msra.mxu1 %v19778_v31 }
 0x34d   :  { %v17781_v37 = vpop.f32.mrb[69].mxu0  ;;  %18104 = vmatprep.subr.bf16.mxu1 %v19781_v36 }
 0x34e   :  { %v17782_v39 = vadd.f32 %v17781_v37, %v17780_v35  ;;  %v17783_v40 = vpop.f32.mrb[70].mxu0  ;;  %v17802_v41 = vpop.f32.mrb[68].mxu1  ;;  %18083 = vmatpush3.bf16.msra.mxu0 %v19780_v33  ;;  %v19814_v33 = vld [vmem:[#allocation2 + $0x19a8] sm:$0xff]   ;;  %v19815_v35 = vld [vmem:[#allocation2 + $0x1970] sm:$0xff]  }
 0x34f   :  { %v17784_v42 = vpop.f32.mrb[71].mxu0  ;;  %v17803_v43 = vpop.f32.mrb[69].mxu1  ;;  %18084 = vmatprep.subr.bf16.mxu0 %v19783_v44 }
 0x350   :  { %v13533_v46 = vadd.f32 %v17782_v39, %v20749_v5  ;;  %v17804_v47 = vadd.f32 %v17803_v43, %v17802_v41  ;;  %v17805_v49 = vpop.f32.mrb[70].mxu1  ;;  %18105 = vmatpush3.bf16.msra.mxu1 %v19782_v38  ;;  %v19795_v5 = vld [vmem:[#allocation2 + $0x1948] sm:$0xff]   ;;  %v19816_v38 = vld [vmem:[#allocation2 + $0x1930] sm:$0xff]  }
 0x351   :  { %v17806_v52 = vpop.f32.mrb[71].mxu1  ;;  %18106 = vmatprep.subr.bf16.mxu1 %v19785_v48  ;;  %v19817_v41 = vld [vmem:[#allocation2 + $0x19f0] sm:$0xff]   ;;  %v19821_v48 = vld [vmem:[#allocation2 + $0x19f8] sm:$0xff]  }
 0x352   :  { %v20754_v50 = vadd.f32 %v17804_v47, %v13533_v46  ;;  %18085 = vmatpush3.bf16.msra.mxu0 %v19784_v45  ;;  %v19818_v43 = vld [vmem:[#allocation2 + $0x19b0] sm:$0xff]   ;;  %v19819_v46 = vld [vmem:[#allocation2 + $0x1978] sm:$0xff]   ;;  %v19825_v52 = vld [vmem:[#allocation2 + $0x1a00] sm:$0xff]  }
 0x353   :  { %18086 = vmatprep.subr.bf16.mxu0 %v19787_v53  ;;  %v19820_v47 = vld [vmem:[#allocation2 + $0x1938] sm:$0xff]   ;;  %v19826_v53 = vld [vmem:[#allocation2 + $0x1ac0] sm:$0xff]  }
 0x354   :  { %18107 = vmatpush3.bf16.msra.mxu1 %v19786_v51  ;;  %v19823_v49 = vld [vmem:[#allocation2 + $0x19b8] sm:$0xff]   ;;  %v19824_v51 = vld [vmem:[#allocation2 + $0x1a40] sm:$0xff]  }
 0x355   :  { %18108 = vmatprep.subr.bf16.mxu1 %v19789_v55 }
 0x356   :  { %18087 = vmatpush3.bf16.msra.mxu0 %v19788_v54  ;;  %v19827_v54 = vld [vmem:[#allocation2 + $0x1a80] sm:$0xff]  }
 0x357   :  { %18116 = vmatprep.subr.bf16.mxu0 %v19791_v60  ;;  %v19832_v60 = vld [vmem:[#allocation2 + $0x1a50] sm:$0xff]  }
 0x358   :  { %18109 = vmatpush3.bf16.msra.mxu1 %v19790_v58  ;;  %v19830_v58 = vld [vmem:[#allocation2 + $0x1ac8] sm:$0xff]  }
 0x359   :  { %18138 = vmatprep.subr.bf16.mxu1 %v19793_v0  ;;  %14091 = vmatmul.mubr.bf16.vlgmr.msra.gmra.mrb[96].mxu0 %v3425_v62  ;;  %v19834_v62 = vld [vmem:[#allocation2 + $0x1ad0] sm:$0xff]   ;;  %v19836_v0 = vld [vmem:[#allocation2 + $0x1a58] sm:$0xff]  }
 0x35a   :  { %18117 = vmatpush3.bf16.msra.mxu0 %v19792_v2  ;;  %14170 = vmatprep.mubr.bf16.mxu0 %v3446_v8  ;;  %v19838_v2 = vld [vmem:[#allocation2 + $0x1ad8] sm:$0xff]   ;;  %v19844_v8 = vld [vmem:[#allocation2 + $0x1a68] sm:$0xff]  }
 0x35b   :  { %14131 = vmatmul.mubr.bf16.vlgmr.msra.gmra.mrb[96].mxu1 %v3447_v4  ;;  %18118 = vmatprep.subr.bf16.mxu0 %v19795_v5  ;;  %v19840_v4 = vld [vmem:[#allocation2 + $0x1a60] sm:$0xff]  }
 0x35c   :  { %18139 = vmatpush3.bf16.msra.mxu1 %v19794_v7  ;;  %14210 = vmatprep.mubr.bf16.mxu1 %v3450_v11  ;;  %v19841_v5 = vld [vmem:[#allocation2 + $0x1a20] sm:$0xff]   ;;  %v19846_v11 = vld [vmem:[#allocation2 + $0x1ae8] sm:$0xff]  }
 0x35d   :  { %18140 = vmatprep.subr.bf16.mxu1 %v19797_v9  ;;  %v19843_v7 = vld [vmem:[#allocation2 + $0x1aa0] sm:$0xff]   ;;  %v19845_v9 = vld [vmem:[#allocation2 + $0x1a28] sm:$0xff]  }
 0x35e   :  { %18119 = vmatpush3.bf16.msra.mxu0 %v19796_v10 }
 0x35f   :  { %18120 = vmatprep.subr.bf16.mxu0 %v19799_v12 }
 0x360   :  { %18141 = vmatpush3.bf16.msra.mxu1 %v19798_v13  ;;  %v19847_v13 = vld [vmem:[#allocation2 + $0x1aa8] sm:$0xff]  }
 0x361   :  { %18142 = vmatprep.subr.bf16.mxu1 %v19801_v14 }
 0x362   :  { %18121 = vmatpush3.bf16.msra.mxu0 %v19800_v15 }
 0x363   :  { %18122 = vmatprep.subr.bf16.mxu0 %v19803_v16 }
 0x364   :  { %18143 = vmatpush3.bf16.msra.mxu1 %v19802_v17 }
 0x365   :  { %18144 = vmatprep.subr.bf16.mxu1 %v19805_v18 }
 0x366   :  { %18123 = vmatpush3.bf16.msra.mxu0 %v19804_v19  ;;  %v19848_v19 = vld [vmem:[#allocation2 + $0x1a70] sm:$0xff]  }
 0x367   :  { %18124 = vmatprep.subr.bf16.mxu0 %v19807_v20  ;;  %v19849_v20 = vld [vmem:[#allocation2 + $0x1a30] sm:$0xff]  }
 0x368   :  { %18145 = vmatpush3.bf16.msra.mxu1 %v19806_v21 }
 0x369   :  { %18146 = vmatprep.subr.bf16.mxu1 %v19809_v22 }
 0x36a   :  { %18125 = vmatpush3.bf16.msra.mxu0 %v19808_v23  ;;  %v19850_v23 = vld [vmem:[#allocation2 + $0x1af0] sm:$0xff]  }
 0x36b   :  { %18126 = vmatprep.subr.bf16.mxu0 %v19811_v24 }
 0x36c   :  { %v17824_v26 = vpop.f32.mrb[72].mxu0  ;;  %18147 = vmatpush3.bf16.msra.mxu1 %v19810_v25 }
 0x36d   :  { %v17825_v28 = vpop.f32.mrb[73].mxu0  ;;  %18148 = vmatprep.subr.bf16.mxu1 %v19813_v27 }
 0x36e   :  { %v17826_v30 = vadd.f32 %v17825_v28, %v17824_v26  ;;  %v17827_v31 = vpop.f32.mrb[74].mxu0  ;;  %v17846_v32 = vpop.f32.mrb[72].mxu1  ;;  %18127 = vmatpush3.bf16.msra.mxu0 %v19812_v29  ;;  %v19851_v26 = vld [vmem:[#allocation2 + $0x1ab0] sm:$0xff]   ;;  %v19852_v28 = vld [vmem:[#allocation2 + $0x1a78] sm:$0xff]  }
 0x36f   :  { %v17828_v36 = vpop.f32.mrb[75].mxu0  ;;  %v17847_v37 = vpop.f32.mrb[73].mxu1  ;;  %18128 = vmatprep.subr.bf16.mxu0 %v19815_v35  ;;  %v19853_v29 = vld [vmem:[#allocation2 + $0x1a38] sm:$0xff]   ;;  %v72_v31 = vld [vmem:[%s20998_s0 + $0x68] sm:$0xff] }
 0x370   :  { %v13613_v39 = vadd.f32 %v17826_v30, %v20754_v50  ;;  %v17848_v40 = vadd.f32 %v17847_v37, %v17846_v32  ;;  %v17849_v42 = vpop.f32.mrb[74].mxu1  ;;  %18149 = vmatpush3.bf16.msra.mxu1 %v19814_v33  ;;  %v3432_v50 = vrot.slane %v20762_v63, %v20533_v34  ;;  %v19835_v63 = vld [vmem:[#allocation2 + $0x1a90] sm:$0xff]   ;;  %v19854_v30 = vld [vmem:[#allocation2 + $0x1af8] sm:$0xff]   ;;  %v3458_v32 = vrot.slane %v72_v31, %v20533_v34  ;;  %v19856_v36 = vld [vmem:[#allocation2 + $0x1b40] sm:$0xff]  }
 0x371   :  { %v17850_v44 = vpop.f32.mrb[75].mxu1  ;;  %18150 = vmatprep.subr.bf16.mxu1 %v19817_v41  ;;  %v19855_v33 = vld [vmem:[#allocation2 + $0x1ab8] sm:$0xff]   ;;  %v3451_v35 = vcombine.high %v72_v31, %v72_v31  ;;  %v19857_v42 = vld [vmem:[#allocation2 + $0x1b00] sm:$0xff]   ;;  %v19893_v31 = vld [vmem:[#allocation2 + $0x1c48] sm:$0xff]  }
 0x372   :  { %v20769_v45 = vadd.f32 %v17848_v40, %v13613_v39  ;;  %18129 = vmatpush3.bf16.msra.mxu0 %v19816_v38  ;;  %v3448_v55 = vcombine.high %v3432_v50, %v3432_v50  ;;  %v3466_v37 = vcombine.high %v3458_v32, %v3458_v32  ;;  %v3474_v38 = vrot.slane %v3458_v32, %v20533_v34  ;;  %v19858_v40 = vld [vmem:[#allocation2 + $0x1bc0] sm:$0xff]   ;;  %v19894_v32 = vld [vmem:[#allocation2 + $0x1c08] sm:$0xff]  }
 0x373   :  { %18130 = vmatprep.subr.bf16.mxu0 %v19819_v46  ;;  %v20782_v39 = vrot.slane %v3451_v35, %v20533_v34  ;;  %v19896_v35 = vld [vmem:[#allocation2 + $0x1c88] sm:$0xff]  }
 0x374   :  { %18151 = vmatpush3.bf16.msra.mxu1 %v19818_v43  ;;  %v3488_v41 = vrot.slane %v3466_v37, %v20533_v34  ;;  %v3496_v44 = vcombine.high %v3474_v38, %v3474_v38  ;;  %v19898_v37 = vld [vmem:[#allocation2 + $0x1c10] sm:$0xff]  }
 0x375   :  { %18152 = vmatprep.subr.bf16.mxu1 %v19821_v48  ;;  %v3467_v43 = vcombine.high %v20782_v39, %v20782_v39 }
 0x376   :  { %18131 = vmatpush3.bf16.msra.mxu0 %v19820_v47  ;;  %v3498_v46 = vcombine.high %v3488_v41, %v3488_v41  ;;  %v19859_v47 = vld [vmem:[#allocation2 + $0x1b80] sm:$0xff]  }
 0x377   :  { %18160 = vmatprep.subr.bf16.mxu0 %v19824_v51  ;;  %v3495_v48 = vrot.slane %v3467_v43, %v20533_v34  ;;  %v19904_v43 = vld [vmem:[#allocation2 + $0x1c98] sm:$0xff]  }
 0x378   :  { %18153 = vmatpush3.bf16.msra.mxu1 %v19823_v49  ;;  %v19862_v49 = vld [vmem:[#allocation2 + $0x1bc8] sm:$0xff]  }
 0x379   :  { %14171 = vmatmul.mubr.bf16.vlgmr.msra.gmra.mrb[100].mxu0 %v3432_v50  ;;  %18182 = vmatprep.subr.bf16.mxu1 %v19826_v53  ;;  %v19861_v50 = vld [vmem:[#allocation2 + $0x1b08] sm:$0xff]   ;;  %v3499_v51 = vcombine.high %v3495_v48, %v3495_v48 }
 0x37a   :  { %18161 = vmatpush3.bf16.msra.mxu0 %v19825_v52  ;;  %14250 = vmatprep.mubr.bf16.mxu0 %v3488_v41  ;;  %v19864_v52 = vld [vmem:[#allocation2 + $0x1b50] sm:$0xff]   ;;  %v19863_v53 = vld [vmem:[#allocation2 + $0x1b88] sm:$0xff]   ;;  %v19902_v41 = vld [vmem:[#allocation2 + $0x1c18] sm:$0xff]  }
 0x37b   :  { %14211 = vmatmul.mubr.bf16.vlgmr.msra.gmra.mrb[100].mxu1 %v3448_v55  ;;  %18162 = vmatprep.subr.bf16.mxu0 %v19828_v56  ;;  %v19865_v55 = vld [vmem:[#allocation2 + $0x1b10] sm:$0xff]   ;;  %v19868_v56 = vld [vmem:[#allocation2 + $0x1b58] sm:$0xff]  }
 0x37c   :  { %18183 = vmatpush3.bf16.msra.mxu1 %v19827_v54  ;;  %14290 = vmatprep.mubr.bf16.mxu1 %v3498_v46  ;;  %v19866_v54 = vld [vmem:[#allocation2 + $0x1bd0] sm:$0xff]   ;;  %v19907_v46 = vld [vmem:[#allocation2 + $0x1ce0] sm:$0xff]  }
 0x37d   :  { %18184 = vmatprep.subr.bf16.mxu1 %v19830_v58  ;;  %v19870_v58 = vld [vmem:[#allocation2 + $0x1bd8] sm:$0xff]  }
 0x37e   :  { %18163 = vmatpush3.bf16.msra.mxu0 %v19829_v57  ;;  %v19867_v57 = vld [vmem:[#allocation2 + $0x1b90] sm:$0xff]  }
 0x37f   :  { %18164 = vmatprep.subr.bf16.mxu0 %v19832_v60  ;;  %v19872_v60 = vld [vmem:[#allocation2 + $0x1b60] sm:$0xff]  }
 0x380   :  { %18185 = vmatpush3.bf16.msra.mxu1 %v19831_v59  ;;  %v19869_v59 = vld [vmem:[#allocation2 + $0x1b18] sm:$0xff]  }
 0x381   :  { %18186 = vmatprep.subr.bf16.mxu1 %v19834_v62  ;;  %v19874_v62 = vld [vmem:[#allocation2 + $0x1be0] sm:$0xff]  }
 0x382   :  { %18165 = vmatpush3.bf16.msra.mxu0 %v19833_v61  ;;  %v19871_v61 = vld [vmem:[#allocation2 + $0x1b98] sm:$0xff]  }
 0x383   :  { %18166 = vmatprep.subr.bf16.mxu0 %v19836_v0  ;;  %v19876_v0 = vld [vmem:[#allocation2 + $0x1b68] sm:$0xff]  }
 0x384   :  { %18187 = vmatpush3.bf16.msra.mxu1 %v19835_v63  ;;  %v19873_v63 = vld [vmem:[#allocation2 + $0x1b20] sm:$0xff]  }
 0x385   :  { %18188 = vmatprep.subr.bf16.mxu1 %v19838_v2 }
 0x386   :  { %18167 = vmatpush3.bf16.msra.mxu0 %v19837_v1  ;;  %v19875_v1 = vld [vmem:[#allocation2 + $0x1ba0] sm:$0xff]  }
 0x387   :  { %18168 = vmatprep.subr.bf16.mxu0 %v19840_v4 }
 0x388   :  { %18189 = vmatpush3.bf16.msra.mxu1 %v19839_v3  ;;  %v19878_v3 = vld [vmem:[#allocation2 + $0x1be8] sm:$0xff]  }
 0x389   :  { %18190 = vmatprep.subr.bf16.mxu1 %v19842_v6 }
 0x38a   :  { %18169 = vmatpush3.bf16.msra.mxu0 %v19841_v5  ;;  %v19877_v5 = vld [vmem:[#allocation2 + $0x1b28] sm:$0xff]  }
 0x38b   :  { %18170 = vmatprep.subr.bf16.mxu0 %v19844_v8 }
 0x38c   :  { %v17868_v10 = vpop.f32.mrb[76].mxu0  ;;  %18191 = vmatpush3.bf16.msra.mxu1 %v19843_v7 }
 0x38d   :  { %v17869_v12 = vpop.f32.mrb[77].mxu0  ;;  %18192 = vmatprep.subr.bf16.mxu1 %v19846_v11 }
 0x38e   :  { %v17870_v14 = vadd.f32 %v17869_v12, %v17868_v10  ;;  %v17871_v15 = vpop.f32.mrb[78].mxu0  ;;  %v17890_v16 = vpop.f32.mrb[76].mxu1  ;;  %18171 = vmatpush3.bf16.msra.mxu0 %v19845_v9  ;;  %v19879_v9 = vld [vmem:[#allocation2 + $0x1ba8] sm:$0xff]   ;;  %v19880_v10 = vld [vmem:[#allocation2 + $0x1b70] sm:$0xff]  }
 0x38f   :  { %v17872_v17 = vpop.f32.mrb[79].mxu0  ;;  %v17891_v18 = vpop.f32.mrb[77].mxu1  ;;  %18172 = vmatprep.subr.bf16.mxu0 %v19848_v19 }
 0x390   :  { %v13693_v21 = vadd.f32 %v17870_v14, %v20769_v45  ;;  %v17892_v22 = vadd.f32 %v17891_v18, %v17890_v16  ;;  %v17893_v24 = vpop.f32.mrb[78].mxu1  ;;  %18193 = vmatpush3.bf16.msra.mxu1 %v19847_v13  ;;  %v19860_v45 = vld [vmem:[#allocation2 + $0x1b48] sm:$0xff]   ;;  %v19881_v13 = vld [vmem:[#allocation2 + $0x1b30] sm:$0xff]  }
 0x391   :  { %v17894_v27 = vpop.f32.mrb[79].mxu1  ;;  %18194 = vmatprep.subr.bf16.mxu1 %v19850_v23  ;;  %v19882_v16 = vld [vmem:[#allocation2 + $0x1bf0] sm:$0xff]   ;;  %v19886_v23 = vld [vmem:[#allocation2 + $0x1bf8] sm:$0xff]  }
 0x392   :  { %v20774_v25 = vadd.f32 %v17892_v22, %v13693_v21  ;;  %18173 = vmatpush3.bf16.msra.mxu0 %v19849_v20  ;;  %v19883_v18 = vld [vmem:[#allocation2 + $0x1bb0] sm:$0xff]   ;;  %v19884_v21 = vld [vmem:[#allocation2 + $0x1b78] sm:$0xff]   ;;  %v19890_v27 = vld [vmem:[#allocation2 + $0x1c00] sm:$0xff]  }
 0x393   :  { %18174 = vmatprep.subr.bf16.mxu0 %v19852_v28  ;;  %v19885_v22 = vld [vmem:[#allocation2 + $0x1b38] sm:$0xff]   ;;  %v19891_v28 = vld [vmem:[#allocation2 + $0x1cc0] sm:$0xff]  }
 0x394   :  { %18195 = vmatpush3.bf16.msra.mxu1 %v19851_v26  ;;  %v19888_v24 = vld [vmem:[#allocation2 + $0x1bb8] sm:$0xff]   ;;  %v19889_v26 = vld [vmem:[#allocation2 + $0x1c40] sm:$0xff]  }
 0x395   :  { %18196 = vmatprep.subr.bf16.mxu1 %v19854_v30 }
 0x396   :  { %18175 = vmatpush3.bf16.msra.mxu0 %v19853_v29  ;;  %v19892_v29 = vld [vmem:[#allocation2 + $0x1c80] sm:$0xff]  }
 0x397   :  { %18204 = vmatprep.subr.bf16.mxu0 %v19856_v36  ;;  %v19897_v36 = vld [vmem:[#allocation2 + $0x1c50] sm:$0xff]  }
 0x398   :  { %18197 = vmatpush3.bf16.msra.mxu1 %v19855_v33  ;;  %v19895_v33 = vld [vmem:[#allocation2 + $0x1cc8] sm:$0xff]  }
 0x399   :  { %18226 = vmatprep.subr.bf16.mxu1 %v19858_v40  ;;  %14251 = vmatmul.mubr.bf16.vlgmr.msra.gmra.mrb[104].mxu0 %v3474_v38  ;;  %v19899_v38 = vld [vmem:[#allocation2 + $0x1cd0] sm:$0xff]   ;;  %v19901_v40 = vld [vmem:[#allocation2 + $0x1c58] sm:$0xff]  }
 0x39a   :  { %18205 = vmatpush3.bf16.msra.mxu0 %v19857_v42  ;;  %14330 = vmatprep.mubr.bf16.mxu0 %v3495_v48  ;;  %v19903_v42 = vld [vmem:[#allocation2 + $0x1cd8] sm:$0xff]   ;;  %v19909_v48 = vld [vmem:[#allocation2 + $0x1c68] sm:$0xff]  }
 0x39b   :  { %14291 = vmatmul.mubr.bf16.vlgmr.msra.gmra.mrb[104].mxu1 %v3496_v44  ;;  %18206 = vmatprep.subr.bf16.mxu0 %v19860_v45  ;;  %v19905_v44 = vld [vmem:[#allocation2 + $0x1c60] sm:$0xff]  }
 0x39c   :  { %18227 = vmatpush3.bf16.msra.mxu1 %v19859_v47  ;;  %14370 = vmatprep.mubr.bf16.mxu1 %v3499_v51  ;;  %v19906_v45 = vld [vmem:[#allocation2 + $0x1c20] sm:$0xff]   ;;  %v19911_v51 = vld [vmem:[#allocation2 + $0x1ce8] sm:$0xff]  }
 0x39d   :  { %18228 = vmatprep.subr.bf16.mxu1 %v19862_v49  ;;  %v19908_v47 = vld [vmem:[#allocation2 + $0x1ca0] sm:$0xff]   ;;  %v19910_v49 = vld [vmem:[#allocation2 + $0x1c28] sm:$0xff]  }
 0x39e   :  { %18207 = vmatpush3.bf16.msra.mxu0 %v19861_v50 }
 0x39f   :  { %18208 = vmatprep.subr.bf16.mxu0 %v19864_v52 }
 0x3a0   :  { %18229 = vmatpush3.bf16.msra.mxu1 %v19863_v53  ;;  %v19912_v53 = vld [vmem:[#allocation2 + $0x1ca8] sm:$0xff]  }
 0x3a1   :  { %18230 = vmatprep.subr.bf16.mxu1 %v19866_v54 }
 0x3a2   :  { %18209 = vmatpush3.bf16.msra.mxu0 %v19865_v55 }
 0x3a3   :  { %18210 = vmatprep.subr.bf16.mxu0 %v19868_v56 }
 0x3a4   :  { %18231 = vmatpush3.bf16.msra.mxu1 %v19867_v57 }
 0x3a5   :  { %18232 = vmatprep.subr.bf16.mxu1 %v19870_v58 }
 0x3a6   :  { %18211 = vmatpush3.bf16.msra.mxu0 %v19869_v59  ;;  %v19913_v59 = vld [vmem:[#allocation2 + $0x1c70] sm:$0xff]  }
 0x3a7   :  { %18212 = vmatprep.subr.bf16.mxu0 %v19872_v60  ;;  %v19914_v60 = vld [vmem:[#allocation2 + $0x1c30] sm:$0xff]  }
 0x3a8   :  { %18233 = vmatpush3.bf16.msra.mxu1 %v19871_v61 }
 0x3a9   :  { %18234 = vmatprep.subr.bf16.mxu1 %v19874_v62 }
 0x3aa   :  { %18213 = vmatpush3.bf16.msra.mxu0 %v19873_v63  ;;  %v19915_v63 = vld [vmem:[#allocation2 + $0x1cf0] sm:$0xff]  }
 0x3ab   :  { %18214 = vmatprep.subr.bf16.mxu0 %v19876_v0 }
 0x3ac   :  { %v17912_v2 = vpop.f32.mrb[80].mxu0  ;;  %18235 = vmatpush3.bf16.msra.mxu1 %v19875_v1 }
 0x3ad   :  { %v17913_v4 = vpop.f32.mrb[81].mxu0  ;;  %18236 = vmatprep.subr.bf16.mxu1 %v19878_v3 }
 0x3ae   :  { %v17914_v6 = vadd.f32 %v17913_v4, %v17912_v2  ;;  %v17915_v7 = vpop.f32.mrb[82].mxu0  ;;  %v17934_v8 = vpop.f32.mrb[80].mxu1  ;;  %18215 = vmatpush3.bf16.msra.mxu0 %v19877_v5  ;;  %v19916_v2 = vld [vmem:[#allocation2 + $0x1cb0] sm:$0xff]   ;;  %v19917_v4 = vld [vmem:[#allocation2 + $0x1c78] sm:$0xff]  }
 0x3af   :  { %v17916_v11 = vpop.f32.mrb[83].mxu0  ;;  %v17935_v12 = vpop.f32.mrb[81].mxu1  ;;  %18216 = vmatprep.subr.bf16.mxu0 %v19880_v10  ;;  %v19918_v5 = vld [vmem:[#allocation2 + $0x1c38] sm:$0xff]   ;;  %v73_v7 = vld [vmem:[%s20998_s0 + $0x70] sm:$0xff] }
 0x3b0   :  { %v13773_v14 = vadd.f32 %v17914_v6, %v20774_v25  ;;  %v17936_v15 = vadd.f32 %v17935_v12, %v17934_v8  ;;  %v17937_v17 = vpop.f32.mrb[82].mxu1  ;;  %18237 = vmatpush3.bf16.msra.mxu1 %v19879_v9  ;;  %v3481_v25 = vrot.slane %v20782_v39, %v20533_v34  ;;  %v19900_v39 = vld [vmem:[#allocation2 + $0x1c90] sm:$0xff]   ;;  %v19919_v6 = vld [vmem:[#allocation2 + $0x1cf8] sm:$0xff]   ;;  %v3507_v8 = vrot.slane %v73_v7, %v20533_v34  ;;  %v19921_v11 = vld [vmem:[#allocation2 + $0x1d40] sm:$0xff]  }
 0x3b1   :  { %v17938_v19 = vpop.f32.mrb[83].mxu1  ;;  %18238 = vmatprep.subr.bf16.mxu1 %v19882_v16  ;;  %v19920_v9 = vld [vmem:[#allocation2 + $0x1cb8] sm:$0xff]   ;;  %v3500_v10 = vcombine.high %v73_v7, %v73_v7  ;;  %v19922_v17 = vld [vmem:[#allocation2 + $0x1d00] sm:$0xff]   ;;  %v19958_v7 = vld [vmem:[#allocation2 + $0x1e48] sm:$0xff]  }
 0x3b2   :  { %v20789_v20 = vadd.f32 %v17936_v15, %v13773_v14  ;;  %18217 = vmatpush3.bf16.msra.mxu0 %v19881_v13  ;;  %v3497_v30 = vcombine.high %v3481_v25, %v3481_v25  ;;  %v3515_v12 = vcombine.high %v3507_v8, %v3507_v8  ;;  %v3523_v13 = vrot.slane %v3507_v8, %v20533_v34  ;;  %v19923_v15 = vld [vmem:[#allocation2 + $0x1dc0] sm:$0xff]   ;;  %v19959_v8 = vld [vmem:[#allocation2 + $0x1e08] sm:$0xff]  }
 0x3b3   :  { %18218 = vmatprep.subr.bf16.mxu0 %v19884_v21  ;;  %v20802_v14 = vrot.slane %v3500_v10, %v20533_v34  ;;  %v19961_v10 = vld [vmem:[#allocation2 + $0x1e88] sm:$0xff]  }
 0x3b4   :  { %18239 = vmatpush3.bf16.msra.mxu1 %v19883_v18  ;;  %v3537_v16 = vrot.slane %v3515_v12, %v20533_v34  ;;  %v3545_v19 = vcombine.high %v3523_v13, %v3523_v13  ;;  %v19963_v12 = vld [vmem:[#allocation2 + $0x1e10] sm:$0xff]  }
 0x3b5   :  { %18240 = vmatprep.subr.bf16.mxu1 %v19886_v23  ;;  %v3516_v18 = vcombine.high %v20802_v14, %v20802_v14 }
 0x3b6   :  { %18219 = vmatpush3.bf16.msra.mxu0 %v19885_v22  ;;  %v3547_v21 = vcombine.high %v3537_v16, %v3537_v16  ;;  %v19924_v22 = vld [vmem:[#allocation2 + $0x1d80] sm:$0xff]  }
 0x3b7   :  { %18248 = vmatprep.subr.bf16.mxu0 %v19889_v26  ;;  %v3544_v23 = vrot.slane %v3516_v18, %v20533_v34  ;;  %v19969_v18 = vld [vmem:[#allocation2 + $0x1e98] sm:$0xff]  }
 0x3b8   :  { %18241 = vmatpush3.bf16.msra.mxu1 %v19888_v24  ;;  %v19927_v24 = vld [vmem:[#allocation2 + $0x1dc8] sm:$0xff]  }
 0x3b9   :  { %14331 = vmatmul.mubr.bf16.vlgmr.msra.gmra.mrb[108].mxu0 %v3481_v25  ;;  %18270 = vmatprep.subr.bf16.mxu1 %v19891_v28  ;;  %v19926_v25 = vld [vmem:[#allocation2 + $0x1d08] sm:$0xff]   ;;  %v3548_v26 = vcombine.high %v3544_v23, %v3544_v23 }
 0x3ba   :  { %18249 = vmatpush3.bf16.msra.mxu0 %v19890_v27  ;;  %14410 = vmatprep.mubr.bf16.mxu0 %v3537_v16  ;;  %v19929_v27 = vld [vmem:[#allocation2 + $0x1d50] sm:$0xff]   ;;  %v19928_v28 = vld [vmem:[#allocation2 + $0x1d88] sm:$0xff]   ;;  %v19967_v16 = vld [vmem:[#allocation2 + $0x1e18] sm:$0xff]  }
 0x3bb   :  { %14371 = vmatmul.mubr.bf16.vlgmr.msra.gmra.mrb[108].mxu1 %v3497_v30  ;;  %18250 = vmatprep.subr.bf16.mxu0 %v19893_v31  ;;  %v19930_v30 = vld [vmem:[#allocation2 + $0x1d10] sm:$0xff]   ;;  %v19933_v31 = vld [vmem:[#allocation2 + $0x1d58] sm:$0xff]  }
 0x3bc   :  { %18271 = vmatpush3.bf16.msra.mxu1 %v19892_v29  ;;  %14450 = vmatprep.mubr.bf16.mxu1 %v3547_v21  ;;  %v19931_v29 = vld [vmem:[#allocation2 + $0x1dd0] sm:$0xff]   ;;  %v19972_v21 = vld [vmem:[#allocation2 + $0x1ee0] sm:$0xff]  }
 0x3bd   :  { %18272 = vmatprep.subr.bf16.mxu1 %v19895_v33  ;;  %v19935_v33 = vld [vmem:[#allocation2 + $0x1dd8] sm:$0xff]  }
 0x3be   :  { %18251 = vmatpush3.bf16.msra.mxu0 %v19894_v32  ;;  %v19932_v32 = vld [vmem:[#allocation2 + $0x1d90] sm:$0xff]  }
 0x3bf   :  { %18252 = vmatprep.subr.bf16.mxu0 %v19897_v36  ;;  %v19937_v36 = vld [vmem:[#allocation2 + $0x1d60] sm:$0xff]  }
 0x3c0   :  { %18273 = vmatpush3.bf16.msra.mxu1 %v19896_v35  ;;  %v19934_v35 = vld [vmem:[#allocation2 + $0x1d18] sm:$0xff]  }
 0x3c1   :  { %18274 = vmatprep.subr.bf16.mxu1 %v19899_v38  ;;  %v19939_v38 = vld [vmem:[#allocation2 + $0x1de0] sm:$0xff]  }
 0x3c2   :  { %18253 = vmatpush3.bf16.msra.mxu0 %v19898_v37  ;;  %v19936_v37 = vld [vmem:[#allocation2 + $0x1d98] sm:$0xff]  }
 0x3c3   :  { %18254 = vmatprep.subr.bf16.mxu0 %v19901_v40  ;;  %v19941_v40 = vld [vmem:[#allocation2 + $0x1d68] sm:$0xff]  }
 0x3c4   :  { %18275 = vmatpush3.bf16.msra.mxu1 %v19900_v39  ;;  %v19938_v39 = vld [vmem:[#allocation2 + $0x1d20] sm:$0xff]  }
 0x3c5   :  { %18276 = vmatprep.subr.bf16.mxu1 %v19903_v42 }
 0x3c6   :  { %18255 = vmatpush3.bf16.msra.mxu0 %v19902_v41  ;;  %v19940_v41 = vld [vmem:[#allocation2 + $0x1da0] sm:$0xff]  }
 0x3c7   :  { %18256 = vmatprep.subr.bf16.mxu0 %v19905_v44 }
 0x3c8   :  { %18277 = vmatpush3.bf16.msra.mxu1 %v19904_v43  ;;  %v19943_v43 = vld [vmem:[#allocation2 + $0x1de8] sm:$0xff]  }
 0x3c9   :  { %18278 = vmatprep.subr.bf16.mxu1 %v19907_v46 }
 0x3ca   :  { %18257 = vmatpush3.bf16.msra.mxu0 %v19906_v45  ;;  %v19942_v45 = vld [vmem:[#allocation2 + $0x1d28] sm:$0xff]  }
 0x3cb   :  { %18258 = vmatprep.subr.bf16.mxu0 %v19909_v48 }
 0x3cc   :  { %v17956_v50 = vpop.f32.mrb[84].mxu0  ;;  %18279 = vmatpush3.bf16.msra.mxu1 %v19908_v47 }
 0x3cd   :  { %v17957_v52 = vpop.f32.mrb[85].mxu0  ;;  %18280 = vmatprep.subr.bf16.mxu1 %v19911_v51 }
 0x3ce   :  { %v17958_v54 = vadd.f32 %v17957_v52, %v17956_v50  ;;  %v17959_v55 = vpop.f32.mrb[86].mxu0  ;;  %v17978_v56 = vpop.f32.mrb[84].mxu1  ;;  %18259 = vmatpush3.bf16.msra.mxu0 %v19910_v49  ;;  %v19944_v49 = vld [vmem:[#allocation2 + $0x1da8] sm:$0xff]   ;;  %v19945_v50 = vld [vmem:[#allocation2 + $0x1d70] sm:$0xff]  }
 0x3cf   :  { %v17960_v57 = vpop.f32.mrb[87].mxu0  ;;  %v17979_v58 = vpop.f32.mrb[85].mxu1  ;;  %18260 = vmatprep.subr.bf16.mxu0 %v19913_v59 }
 0x3d0   :  { %v13853_v61 = vadd.f32 %v17958_v54, %v20789_v20  ;;  %v17980_v62 = vadd.f32 %v17979_v58, %v17978_v56  ;;  %v17981_v0 = vpop.f32.mrb[86].mxu1  ;;  %18281 = vmatpush3.bf16.msra.mxu1 %v19912_v53  ;;  %v19925_v20 = vld [vmem:[#allocation2 + $0x1d48] sm:$0xff]   ;;  %v19946_v53 = vld [vmem:[#allocation2 + $0x1d30] sm:$0xff]  }
 0x3d1   :  { %v17982_v3 = vpop.f32.mrb[87].mxu1  ;;  %18282 = vmatprep.subr.bf16.mxu1 %v19915_v63  ;;  %v19947_v56 = vld [vmem:[#allocation2 + $0x1df0] sm:$0xff]   ;;  %v19951_v63 = vld [vmem:[#allocation2 + $0x1df8] sm:$0xff]  }
 0x3d2   :  { %v20794_v1 = vadd.f32 %v17980_v62, %v13853_v61  ;;  %18261 = vmatpush3.bf16.msra.mxu0 %v19914_v60  ;;  %v19948_v58 = vld [vmem:[#allocation2 + $0x1db0] sm:$0xff]   ;;  %v19949_v61 = vld [vmem:[#allocation2 + $0x1d78] sm:$0xff]   ;;  %v19955_v3 = vld [vmem:[#allocation2 + $0x1e00] sm:$0xff]  }
 0x3d3   :  { %18262 = vmatprep.subr.bf16.mxu0 %v19917_v4  ;;  %v19950_v62 = vld [vmem:[#allocation2 + $0x1d38] sm:$0xff]   ;;  %v19956_v4 = vld [vmem:[#allocation2 + $0x1ec0] sm:$0xff]  }
 0x3d4   :  { %18283 = vmatpush3.bf16.msra.mxu1 %v19916_v2  ;;  %v19953_v0 = vld [vmem:[#allocation2 + $0x1db8] sm:$0xff]   ;;  %v19954_v2 = vld [vmem:[#allocation2 + $0x1e40] sm:$0xff]  }
 0x3d5   :  { %18284 = vmatprep.subr.bf16.mxu1 %v19919_v6 }
 0x3d6   :  { %18263 = vmatpush3.bf16.msra.mxu0 %v19918_v5  ;;  %v19957_v5 = vld [vmem:[#allocation2 + $0x1e80] sm:$0xff]  }
 0x3d7   :  { %18292 = vmatprep.subr.bf16.mxu0 %v19921_v11  ;;  %v19962_v11 = vld [vmem:[#allocation2 + $0x1e50] sm:$0xff]  }
 0x3d8   :  { %18285 = vmatpush3.bf16.msra.mxu1 %v19920_v9  ;;  %v19960_v9 = vld [vmem:[#allocation2 + $0x1ec8] sm:$0xff]  }
 0x3d9   :  { %18314 = vmatprep.subr.bf16.mxu1 %v19923_v15  ;;  %14411 = vmatmul.mubr.bf16.vlgmr.msra.gmra.mrb[112].mxu0 %v3523_v13  ;;  %v19964_v13 = vld [vmem:[#allocation2 + $0x1ed0] sm:$0xff]   ;;  %v19966_v15 = vld [vmem:[#allocation2 + $0x1e58] sm:$0xff]  }
 0x3da   :  { %18293 = vmatpush3.bf16.msra.mxu0 %v19922_v17  ;;  %14490 = vmatprep.mubr.bf16.mxu0 %v3544_v23  ;;  %v19968_v17 = vld [vmem:[#allocation2 + $0x1ed8] sm:$0xff]   ;;  %v19974_v23 = vld [vmem:[#allocation2 + $0x1e68] sm:$0xff]  }
 0x3db   :  { %14451 = vmatmul.mubr.bf16.vlgmr.msra.gmra.mrb[112].mxu1 %v3545_v19  ;;  %18294 = vmatprep.subr.bf16.mxu0 %v19925_v20  ;;  %v19970_v19 = vld [vmem:[#allocation2 + $0x1e60] sm:$0xff]  }
 0x3dc   :  { %18315 = vmatpush3.bf16.msra.mxu1 %v19924_v22  ;;  %14530 = vmatprep.mubr.bf16.mxu1 %v3548_v26  ;;  %v19971_v20 = vld [vmem:[#allocation2 + $0x1e20] sm:$0xff]   ;;  %v19976_v26 = vld [vmem:[#allocation2 + $0x1ee8] sm:$0xff]  }
 0x3dd   :  { %18316 = vmatprep.subr.bf16.mxu1 %v19927_v24  ;;  %v19973_v22 = vld [vmem:[#allocation2 + $0x1ea0] sm:$0xff]   ;;  %v19975_v24 = vld [vmem:[#allocation2 + $0x1e28] sm:$0xff]  }
 0x3de   :  { %18295 = vmatpush3.bf16.msra.mxu0 %v19926_v25 }
 0x3df   :  { %18296 = vmatprep.subr.bf16.mxu0 %v19929_v27 }
 0x3e0   :  { %18317 = vmatpush3.bf16.msra.mxu1 %v19928_v28  ;;  %v19977_v28 = vld [vmem:[#allocation2 + $0x1ea8] sm:$0xff]  }
 0x3e1   :  { %18318 = vmatprep.subr.bf16.mxu1 %v19931_v29 }
 0x3e2   :  { %18297 = vmatpush3.bf16.msra.mxu0 %v19930_v30 }
 0x3e3   :  { %18298 = vmatprep.subr.bf16.mxu0 %v19933_v31 }
 0x3e4   :  { %18319 = vmatpush3.bf16.msra.mxu1 %v19932_v32 }
 0x3e5   :  { %18320 = vmatprep.subr.bf16.mxu1 %v19935_v33 }
 0x3e6   :  { %18299 = vmatpush3.bf16.msra.mxu0 %v19934_v35  ;;  %v19978_v35 = vld [vmem:[#allocation2 + $0x1e70] sm:$0xff]  }
 0x3e7   :  { %18300 = vmatprep.subr.bf16.mxu0 %v19937_v36  ;;  %v19979_v36 = vld [vmem:[#allocation2 + $0x1e30] sm:$0xff]  }
 0x3e8   :  { %18321 = vmatpush3.bf16.msra.mxu1 %v19936_v37 }
 0x3e9   :  { %18322 = vmatprep.subr.bf16.mxu1 %v19939_v38 }
 0x3ea   :  { %18301 = vmatpush3.bf16.msra.mxu0 %v19938_v39  ;;  %v19980_v39 = vld [vmem:[#allocation2 + $0x1ef0] sm:$0xff]  }
 0x3eb   :  { %18302 = vmatprep.subr.bf16.mxu0 %v19941_v40 }
 0x3ec   :  { %v18000_v42 = vpop.f32.mrb[88].mxu0  ;;  %18323 = vmatpush3.bf16.msra.mxu1 %v19940_v41 }
 0x3ed   :  { %v18001_v44 = vpop.f32.mrb[89].mxu0  ;;  %18324 = vmatprep.subr.bf16.mxu1 %v19943_v43 }
 0x3ee   :  { %v18002_v46 = vadd.f32 %v18001_v44, %v18000_v42  ;;  %v18003_v47 = vpop.f32.mrb[90].mxu0  ;;  %v18022_v48 = vpop.f32.mrb[88].mxu1  ;;  %18303 = vmatpush3.bf16.msra.mxu0 %v19942_v45  ;;  %v19981_v42 = vld [vmem:[#allocation2 + $0x1eb0] sm:$0xff]   ;;  %v19982_v44 = vld [vmem:[#allocation2 + $0x1e78] sm:$0xff]  }
 0x3ef   :  { %v18004_v51 = vpop.f32.mrb[91].mxu0  ;;  %v18023_v52 = vpop.f32.mrb[89].mxu1  ;;  %18304 = vmatprep.subr.bf16.mxu0 %v19945_v50  ;;  %v19983_v45 = vld [vmem:[#allocation2 + $0x1e38] sm:$0xff]  }
 0x3f0   :  { %v13933_v54 = vadd.f32 %v18002_v46, %v20794_v1  ;;  %v18024_v55 = vadd.f32 %v18023_v52, %v18022_v48  ;;  %v18025_v57 = vpop.f32.mrb[90].mxu1  ;;  %18325 = vmatpush3.bf16.msra.mxu1 %v19944_v49  ;;  %v3530_v1 = vrot.slane %v20802_v14, %v20533_v34  ;;  %v19965_v14 = vld [vmem:[#allocation2 + $0x1e90] sm:$0xff]   ;;  %v19984_v46 = vld [vmem:[#allocation2 + $0x1ef8] sm:$0xff]   ;;  %v19986_v51 = vld [vmem:[#allocation2 + $0x1f40] sm:$0xff]  }
 0x3f1   :  { %v18026_v59 = vpop.f32.mrb[91].mxu1  ;;  %18326 = vmatprep.subr.bf16.mxu1 %v19947_v56  ;;  %v74_v47 = vld [vmem:[%s20998_s0 + $0x78] sm:$0xff]  ;;  %v19987_v57 = vld [vmem:[#allocation2 + $0x1f00] sm:$0xff]  }
 0x3f2   :  { %v20809_v60 = vadd.f32 %v18024_v55, %v13933_v54  ;;  %18305 = vmatpush3.bf16.msra.mxu0 %v19946_v53  ;;  %v3546_v6 = vcombine.high %v3530_v1, %v3530_v1  ;;  %v3556_v48 = vrot.slane %v74_v47, %v20533_v34  ;;  %v19985_v49 = vld [vmem:[#allocation2 + $0x1eb8] sm:$0xff]   ;;  %v3549_v50 = vcombine.high %v74_v47, %v74_v47  ;;  %v19988_v55 = vld [vmem:[#allocation2 + $0x1fc0] sm:$0xff]   ;;  %v20023_v47 = vld [vmem:[#allocation2 + $0x2048] sm:$0xff]  }
 0x3f3   :  { %18306 = vmatprep.subr.bf16.mxu0 %v19949_v61 }
 0x3f4   :  { %18327 = vmatpush3.bf16.msra.mxu1 %v19948_v58  ;;  %v3564_v52 = vcombine.high %v3556_v48, %v3556_v48  ;;  %v3572_v53 = vrot.slane %v3556_v48, %v20533_v34  ;;  %v20822_v54 = vrot.slane %v3549_v50, %v20533_v34  ;;  %v20024_v48 = vld [vmem:[#allocation2 + $0x2008] sm:$0xff]  }
 0x3f5   :  { %18328 = vmatprep.subr.bf16.mxu1 %v19951_v63  ;;  %v20026_v50 = vld [vmem:[#allocation2 + $0x2088] sm:$0xff]  }
 0x3f6   :  { %18307 = vmatpush3.bf16.msra.mxu0 %v19950_v62  ;;  %v3586_v56 = vrot.slane %v3564_v52, %v20533_v34  ;;  %v3565_v58 = vcombine.high %v20822_v54, %v20822_v54  ;;  %v3594_v59 = vcombine.high %v3572_v53, %v3572_v53  ;;  %v19989_v62 = vld [vmem:[#allocation2 + $0x1f80] sm:$0xff]   ;;  %v20028_v52 = vld [vmem:[#allocation2 + $0x2010] sm:$0xff]  }
 0x3f7   :  { %18336 = vmatprep.subr.bf16.mxu0 %v19954_v2 }
 0x3f8   :  { %18329 = vmatpush3.bf16.msra.mxu1 %v19953_v0  ;;  %v3596_v61 = vcombine.high %v3586_v56, %v3586_v56  ;;  %v3593_v63 = vrot.slane %v3565_v58, %v20533_v34  ;;  %v19992_v0 = vld [vmem:[#allocation2 + $0x1fc8] sm:$0xff]   ;;  %v20034_v58 = vld [vmem:[#allocation2 + $0x2098] sm:$0xff]  }
 0x3f9   :  { %14491 = vmatmul.mubr.bf16.vlgmr.msra.gmra.mrb[116].mxu0 %v3530_v1  ;;  %18358 = vmatprep.subr.bf16.mxu1 %v19956_v4  ;;  %v19991_v1 = vld [vmem:[#allocation2 + $0x1f08] sm:$0xff]  }
 0x3fa   :  { %18337 = vmatpush3.bf16.msra.mxu0 %v19955_v3  ;;  %14570 = vmatprep.mubr.bf16.mxu0 %v3586_v56  ;;  %v3597_v2 = vcombine.high %v3593_v63, %v3593_v63  ;;  %v19994_v3 = vld [vmem:[#allocation2 + $0x1f50] sm:$0xff]   ;;  %v19993_v4 = vld [vmem:[#allocation2 + $0x1f88] sm:$0xff]   ;;  %v20032_v56 = vld [vmem:[#allocation2 + $0x2018] sm:$0xff]  }
 0x3fb   :  { %14531 = vmatmul.mubr.bf16.vlgmr.msra.gmra.mrb[116].mxu1 %v3546_v6  ;;  %18338 = vmatprep.subr.bf16.mxu0 %v19958_v7  ;;  %v19995_v6 = vld [vmem:[#allocation2 + $0x1f10] sm:$0xff]   ;;  %v19998_v7 = vld [vmem:[#allocation2 + $0x1f58] sm:$0xff]  }
 0x3fc   :  { %18359 = vmatpush3.bf16.msra.mxu1 %v19957_v5  ;;  %14610 = vmatprep.mubr.bf16.mxu1 %v3596_v61  ;;  %v19996_v5 = vld [vmem:[#allocation2 + $0x1fd0] sm:$0xff]   ;;  %v20037_v61 = vld [vmem:[#allocation2 + $0x20e0] sm:$0xff]  }
 0x3fd   :  { %18360 = vmatprep.subr.bf16.mxu1 %v19960_v9  ;;  %v20000_v9 = vld [vmem:[#allocation2 + $0x1fd8] sm:$0xff]  }
 0x3fe   :  { %18339 = vmatpush3.bf16.msra.mxu0 %v19959_v8  ;;  %v19997_v8 = vld [vmem:[#allocation2 + $0x1f90] sm:$0xff]  }
 0x3ff   :  { %18340 = vmatprep.subr.bf16.mxu0 %v19962_v11  ;;  %v20002_v11 = vld [vmem:[#allocation2 + $0x1f60] sm:$0xff]  }
 0x400   :  { %18361 = vmatpush3.bf16.msra.mxu1 %v19961_v10  ;;  %v19999_v10 = vld [vmem:[#allocation2 + $0x1f18] sm:$0xff]  }
 0x401   :  { %18362 = vmatprep.subr.bf16.mxu1 %v19964_v13  ;;  %v20004_v13 = vld [vmem:[#allocation2 + $0x1fe0] sm:$0xff]  }
 0x402   :  { %18341 = vmatpush3.bf16.msra.mxu0 %v19963_v12  ;;  %v20001_v12 = vld [vmem:[#allocation2 + $0x1f98] sm:$0xff]  }
 0x403   :  { %18342 = vmatprep.subr.bf16.mxu0 %v19966_v15  ;;  %v20006_v15 = vld [vmem:[#allocation2 + $0x1f68] sm:$0xff]  }
 0x404   :  { %18363 = vmatpush3.bf16.msra.mxu1 %v19965_v14  ;;  %v20003_v14 = vld [vmem:[#allocation2 + $0x1f20] sm:$0xff]  }
 0x405   :  { %18364 = vmatprep.subr.bf16.mxu1 %v19968_v17 }
 0x406   :  { %18343 = vmatpush3.bf16.msra.mxu0 %v19967_v16  ;;  %v20005_v16 = vld [vmem:[#allocation2 + $0x1fa0] sm:$0xff]  }
 0x407   :  { %18344 = vmatprep.subr.bf16.mxu0 %v19970_v19 }
 0x408   :  { %18365 = vmatpush3.bf16.msra.mxu1 %v19969_v18  ;;  %v20008_v18 = vld [vmem:[#allocation2 + $0x1fe8] sm:$0xff]  }
 0x409   :  { %18366 = vmatprep.subr.bf16.mxu1 %v19972_v21 }
 0x40a   :  { %18345 = vmatpush3.bf16.msra.mxu0 %v19971_v20  ;;  %v20007_v20 = vld [vmem:[#allocation2 + $0x1f28] sm:$0xff]  }
 0x40b   :  { %18346 = vmatprep.subr.bf16.mxu0 %v19974_v23 }
 0x40c   :  { %v18044_v25 = vpop.f32.mrb[92].mxu0  ;;  %18367 = vmatpush3.bf16.msra.mxu1 %v19973_v22 }
 0x40d   :  { %v18045_v27 = vpop.f32.mrb[93].mxu0  ;;  %18368 = vmatprep.subr.bf16.mxu1 %v19976_v26 }
 0x40e   :  { %v18046_v29 = vadd.f32 %v18045_v27, %v18044_v25  ;;  %v18047_v30 = vpop.f32.mrb[94].mxu0  ;;  %v18066_v31 = vpop.f32.mrb[92].mxu1  ;;  %18347 = vmatpush3.bf16.msra.mxu0 %v19975_v24  ;;  %v20009_v24 = vld [vmem:[#allocation2 + $0x1fa8] sm:$0xff]   ;;  %v20010_v25 = vld [vmem:[#allocation2 + $0x1f70] sm:$0xff]  }
 0x40f   :  { %v18048_v32 = vpop.f32.mrb[95].mxu0  ;;  %v18067_v33 = vpop.f32.mrb[93].mxu1  ;;  %18348 = vmatprep.subr.bf16.mxu0 %v19978_v35 }
 0x410   :  { %v14013_v37 = vadd.f32 %v18046_v29, %v20809_v60  ;;  %v18068_v38 = vadd.f32 %v18067_v33, %v18066_v31  ;;  %v18069_v40 = vpop.f32.mrb[94].mxu1  ;;  %18369 = vmatpush3.bf16.msra.mxu1 %v19977_v28  ;;  %v19990_v60 = vld [vmem:[#allocation2 + $0x1f48] sm:$0xff]   ;;  %v20011_v28 = vld [vmem:[#allocation2 + $0x1f30] sm:$0xff]  }
 0x411   :  { %v18070_v43 = vpop.f32.mrb[95].mxu1  ;;  %18370 = vmatprep.subr.bf16.mxu1 %v19980_v39  ;;  %v20012_v31 = vld [vmem:[#allocation2 + $0x1ff0] sm:$0xff]   ;;  %v20016_v39 = vld [vmem:[#allocation2 + $0x1ff8] sm:$0xff]  }
 0x412   :  { %v20814_v41 = vadd.f32 %v18068_v38, %v14013_v37  ;;  %18349 = vmatpush3.bf16.msra.mxu0 %v19979_v36  ;;  %v20013_v33 = vld [vmem:[#allocation2 + $0x1fb0] sm:$0xff]   ;;  %v20014_v37 = vld [vmem:[#allocation2 + $0x1f78] sm:$0xff]   ;;  %v20020_v43 = vld [vmem:[#allocation2 + $0x2000] sm:$0xff]  }
 0x413   :  { %18350 = vmatprep.subr.bf16.mxu0 %v19982_v44  ;;  %v20015_v38 = vld [vmem:[#allocation2 + $0x1f38] sm:$0xff]   ;;  %v20021_v44 = vld [vmem:[#allocation2 + $0x20c0] sm:$0xff]  }
 0x414   :  { %18371 = vmatpush3.bf16.msra.mxu1 %v19981_v42  ;;  %v20018_v40 = vld [vmem:[#allocation2 + $0x1fb8] sm:$0xff]   ;;  %v20019_v42 = vld [vmem:[#allocation2 + $0x2040] sm:$0xff]  }
 0x415   :  { %18372 = vmatprep.subr.bf16.mxu1 %v19984_v46 }
 0x416   :  { %18351 = vmatpush3.bf16.msra.mxu0 %v19983_v45  ;;  %v20022_v45 = vld [vmem:[#allocation2 + $0x2080] sm:$0xff]  }
 0x417   :  { %18380 = vmatprep.subr.bf16.mxu0 %v19986_v51  ;;  %v20027_v51 = vld [vmem:[#allocation2 + $0x2050] sm:$0xff]  }
 0x418   :  { %18373 = vmatpush3.bf16.msra.mxu1 %v19985_v49  ;;  %v20025_v49 = vld [vmem:[#allocation2 + $0x20c8] sm:$0xff]  }
 0x419   :  { %18402 = vmatprep.subr.bf16.mxu1 %v19988_v55  ;;  %14571 = vmatmul.mubr.bf16.vlgmr.msra.gmra.mrb[120].mxu0 %v3572_v53  ;;  %v20029_v53 = vld [vmem:[#allocation2 + $0x20d0] sm:$0xff]   ;;  %v20031_v55 = vld [vmem:[#allocation2 + $0x2058] sm:$0xff]  }
 0x41a   :  { %18381 = vmatpush3.bf16.msra.mxu0 %v19987_v57  ;;  %14650 = vmatprep.mubr.bf16.mxu0 %v3593_v63  ;;  %v20033_v57 = vld [vmem:[#allocation2 + $0x20d8] sm:$0xff]   ;;  %v20039_v63 = vld [vmem:[#allocation2 + $0x2068] sm:$0xff]  }
 0x41b   :  { %14611 = vmatmul.mubr.bf16.vlgmr.msra.gmra.mrb[120].mxu1 %v3594_v59  ;;  %18382 = vmatprep.subr.bf16.mxu0 %v19990_v60  ;;  %v20035_v59 = vld [vmem:[#allocation2 + $0x2060] sm:$0xff]  }
 0x41c   :  { %18403 = vmatpush3.bf16.msra.mxu1 %v19989_v62  ;;  %14690 = vmatprep.mubr.bf16.mxu1 %v3597_v2  ;;  %v20036_v60 = vld [vmem:[#allocation2 + $0x2020] sm:$0xff]   ;;  %v20041_v2 = vld [vmem:[#allocation2 + $0x20e8] sm:$0xff]  }
 0x41d   :  { %18404 = vmatprep.subr.bf16.mxu1 %v19992_v0  ;;  %v20038_v62 = vld [vmem:[#allocation2 + $0x20a0] sm:$0xff]   ;;  %v20040_v0 = vld [vmem:[#allocation2 + $0x2028] sm:$0xff]  }
 0x41e   :  { %18383 = vmatpush3.bf16.msra.mxu0 %v19991_v1 }
 0x41f   :  { %18384 = vmatprep.subr.bf16.mxu0 %v19994_v3 }
 0x420   :  { %18405 = vmatpush3.bf16.msra.mxu1 %v19993_v4  ;;  %v20042_v4 = vld [vmem:[#allocation2 + $0x20a8] sm:$0xff]  }
 0x421   :  { %18406 = vmatprep.subr.bf16.mxu1 %v19996_v5 }
 0x422   :  { %18385 = vmatpush3.bf16.msra.mxu0 %v19995_v6 }
 0x423   :  { %18386 = vmatprep.subr.bf16.mxu0 %v19998_v7 }
 0x424   :  { %18407 = vmatpush3.bf16.msra.mxu1 %v19997_v8 }
 0x425   :  { %18408 = vmatprep.subr.bf16.mxu1 %v20000_v9 }
 0x426   :  { %18387 = vmatpush3.bf16.msra.mxu0 %v19999_v10  ;;  %v20043_v10 = vld [vmem:[#allocation2 + $0x2070] sm:$0xff]  }
 0x427   :  { %18388 = vmatprep.subr.bf16.mxu0 %v20002_v11  ;;  %v20044_v11 = vld [vmem:[#allocation2 + $0x2030] sm:$0xff]  }
 0x428   :  { %18409 = vmatpush3.bf16.msra.mxu1 %v20001_v12 }
 0x429   :  { %18410 = vmatprep.subr.bf16.mxu1 %v20004_v13 }
 0x42a   :  { %18389 = vmatpush3.bf16.msra.mxu0 %v20003_v14  ;;  %v20045_v14 = vld [vmem:[#allocation2 + $0x20f0] sm:$0xff]  }
 0x42b   :  { %18390 = vmatprep.subr.bf16.mxu0 %v20006_v15 }
 0x42c   :  { %v18088_v17 = vpop.f32.mrb[96].mxu0  ;;  %18411 = vmatpush3.bf16.msra.mxu1 %v20005_v16 }
 0x42d   :  { %v18089_v19 = vpop.f32.mrb[97].mxu0  ;;  %18412 = vmatprep.subr.bf16.mxu1 %v20008_v18 }
 0x42e   :  { %v18090_v21 = vadd.f32 %v18089_v19, %v18088_v17  ;;  %v18091_v22 = vpop.f32.mrb[98].mxu0  ;;  %v18110_v23 = vpop.f32.mrb[96].mxu1  ;;  %18391 = vmatpush3.bf16.msra.mxu0 %v20007_v20  ;;  %v20046_v17 = vld [vmem:[#allocation2 + $0x20b0] sm:$0xff]   ;;  %v20047_v19 = vld [vmem:[#allocation2 + $0x2078] sm:$0xff]  }
 0x42f   :  { %v18092_v26 = vpop.f32.mrb[99].mxu0  ;;  %v18111_v27 = vpop.f32.mrb[97].mxu1  ;;  %18392 = vmatprep.subr.bf16.mxu0 %v20010_v25  ;;  %v20048_v20 = vld [vmem:[#allocation2 + $0x2038] sm:$0xff]   ;;  %v75_v22 = vld [vmem:[%s20998_s0 + $0x80] sm:$0xff] }
 0x430   :  { %v14093_v29 = vadd.f32 %v18090_v21, %v20814_v41  ;;  %v18112_v30 = vadd.f32 %v18111_v27, %v18110_v23  ;;  %v18113_v32 = vpop.f32.mrb[98].mxu1  ;;  %18413 = vmatpush3.bf16.msra.mxu1 %v20009_v24  ;;  %v3579_v41 = vrot.slane %v20822_v54, %v20533_v34  ;;  %v20030_v54 = vld [vmem:[#allocation2 + $0x2090] sm:$0xff]   ;;  %v20049_v21 = vld [vmem:[#allocation2 + $0x20f8] sm:$0xff]   ;;  %v3605_v23 = vrot.slane %v75_v22, %v20533_v34  ;;  %v20051_v26 = vld [vmem:[#allocation2 + $0x2140] sm:$0xff]  }
 0x431   :  { %v18114_v35 = vpop.f32.mrb[99].mxu1  ;;  %18414 = vmatprep.subr.bf16.mxu1 %v20012_v31  ;;  %v20050_v24 = vld [vmem:[#allocation2 + $0x20b8] sm:$0xff]   ;;  %v3598_v25 = vcombine.high %v75_v22, %v75_v22  ;;  %v20052_v32 = vld [vmem:[#allocation2 + $0x2100] sm:$0xff]   ;;  %v20088_v22 = vld [vmem:[#allocation2 + $0x2248] sm:$0xff]  }
 0x432   :  { %v20829_v36 = vadd.f32 %v18112_v30, %v14093_v29  ;;  %18393 = vmatpush3.bf16.msra.mxu0 %v20011_v28  ;;  %v3595_v46 = vcombine.high %v3579_v41, %v3579_v41  ;;  %v3613_v27 = vcombine.high %v3605_v23, %v3605_v23  ;;  %v3621_v28 = vrot.slane %v3605_v23, %v20533_v34  ;;  %v20053_v30 = vld [vmem:[#allocation2 + $0x21c0] sm:$0xff]   ;;  %v20089_v23 = vld [vmem:[#allocation2 + $0x2208] sm:$0xff]  }
 0x433   :  { %18394 = vmatprep.subr.bf16.mxu0 %v20014_v37  ;;  %v20842_v29 = vrot.slane %v3598_v25, %v20533_v34  ;;  %v20091_v25 = vld [vmem:[#allocation2 + $0x2288] sm:$0xff]  }
 0x434   :  { %18415 = vmatpush3.bf16.msra.mxu1 %v20013_v33  ;;  %v3635_v31 = vrot.slane %v3613_v27, %v20533_v34  ;;  %v3643_v35 = vcombine.high %v3621_v28, %v3621_v28  ;;  %v20093_v27 = vld [vmem:[#allocation2 + $0x2210] sm:$0xff]  }
 0x435   :  { %18416 = vmatprep.subr.bf16.mxu1 %v20016_v39  ;;  %v3614_v33 = vcombine.high %v20842_v29, %v20842_v29 }
 0x436   :  { %18395 = vmatpush3.bf16.msra.mxu0 %v20015_v38  ;;  %v3645_v37 = vcombine.high %v3635_v31, %v3635_v31  ;;  %v20054_v38 = vld [vmem:[#allocation2 + $0x2180] sm:$0xff]  }
 0x437   :  { %18424 = vmatprep.subr.bf16.mxu0 %v20019_v42  ;;  %v3642_v39 = vrot.slane %v3614_v33, %v20533_v34  ;;  %v20099_v33 = vld [vmem:[#allocation2 + $0x2298] sm:$0xff]  }
 0x438   :  { %18417 = vmatpush3.bf16.msra.mxu1 %v20018_v40  ;;  %v20057_v40 = vld [vmem:[#allocation2 + $0x21c8] sm:$0xff]  }
 0x439   :  { %14651 = vmatmul.mubr.bf16.vlgmr.msra.gmra.mrb[124].mxu0 %v3579_v41  ;;  %18446 = vmatprep.subr.bf16.mxu1 %v20021_v44  ;;  %v20056_v41 = vld [vmem:[#allocation2 + $0x2108] sm:$0xff]   ;;  %v3646_v42 = vcombine.high %v3642_v39, %v3642_v39 }
 0x43a   :  { %18425 = vmatpush3.bf16.msra.mxu0 %v20020_v43  ;;  %14730 = vmatprep.mubr.bf16.mxu0 %v3635_v31  ;;  %v20059_v43 = vld [vmem:[#allocation2 + $0x2150] sm:$0xff]   ;;  %v20058_v44 = vld [vmem:[#allocation2 + $0x2188] sm:$0xff]   ;;  %v20097_v31 = vld [vmem:[#allocation2 + $0x2218] sm:$0xff]  }
 0x43b   :  { %14691 = vmatmul.mubr.bf16.vlgmr.msra.gmra.mrb[124].mxu1 %v3595_v46  ;;  %18426 = vmatprep.subr.bf16.mxu0 %v20023_v47  ;;  %v20060_v46 = vld [vmem:[#allocation2 + $0x2110] sm:$0xff]   ;;  %v20063_v47 = vld [vmem:[#allocation2 + $0x2158] sm:$0xff]  }
 0x43c   :  { %18447 = vmatpush3.bf16.msra.mxu1 %v20022_v45  ;;  %14770 = vmatprep.mubr.bf16.mxu1 %v3645_v37  ;;  %v20061_v45 = vld [vmem:[#allocation2 + $0x21d0] sm:$0xff]   ;;  %v20102_v37 = vld [vmem:[#allocation2 + $0x22e0] sm:$0xff]  }
 0x43d   :  { %18448 = vmatprep.subr.bf16.mxu1 %v20025_v49  ;;  %v20065_v49 = vld [vmem:[#allocation2 + $0x21d8] sm:$0xff]  }
 0x43e   :  { %18427 = vmatpush3.bf16.msra.mxu0 %v20024_v48  ;;  %v20062_v48 = vld [vmem:[#allocation2 + $0x2190] sm:$0xff]  }
 0x43f   :  { %18428 = vmatprep.subr.bf16.mxu0 %v20027_v51  ;;  %v20067_v51 = vld [vmem:[#allocation2 + $0x2160] sm:$0xff]  }
 0x440   :  { %18449 = vmatpush3.bf16.msra.mxu1 %v20026_v50  ;;  %v20064_v50 = vld [vmem:[#allocation2 + $0x2118] sm:$0xff]  }
 0x441   :  { %18450 = vmatprep.subr.bf16.mxu1 %v20029_v53  ;;  %v20069_v53 = vld [vmem:[#allocation2 + $0x21e0] sm:$0xff]  }
 0x442   :  { %18429 = vmatpush3.bf16.msra.mxu0 %v20028_v52  ;;  %v20066_v52 = vld [vmem:[#allocation2 + $0x2198] sm:$0xff]  }
 0x443   :  { %18430 = vmatprep.subr.bf16.mxu0 %v20031_v55  ;;  %v20071_v55 = vld [vmem:[#allocation2 + $0x2168] sm:$0xff]  }
 0x444   :  { %18451 = vmatpush3.bf16.msra.mxu1 %v20030_v54  ;;  %v20068_v54 = vld [vmem:[#allocation2 + $0x2120] sm:$0xff]  }
 0x445   :  { %18452 = vmatprep.subr.bf16.mxu1 %v20033_v57 }
 0x446   :  { %18431 = vmatpush3.bf16.msra.mxu0 %v20032_v56  ;;  %v20070_v56 = vld [vmem:[#allocation2 + $0x21a0] sm:$0xff]  }
 0x447   :  { %18432 = vmatprep.subr.bf16.mxu0 %v20035_v59 }
 0x448   :  { %18453 = vmatpush3.bf16.msra.mxu1 %v20034_v58  ;;  %v20073_v58 = vld [vmem:[#allocation2 + $0x21e8] sm:$0xff]  }
 0x449   :  { %18454 = vmatprep.subr.bf16.mxu1 %v20037_v61 }
 0x44a   :  { %18433 = vmatpush3.bf16.msra.mxu0 %v20036_v60  ;;  %v20072_v60 = vld [vmem:[#allocation2 + $0x2128] sm:$0xff]  }
 0x44b   :  { %18434 = vmatprep.subr.bf16.mxu0 %v20039_v63 }
 0x44c   :  { %v18132_v1 = vpop.f32.mrb[100].mxu0  ;;  %18455 = vmatpush3.bf16.msra.mxu1 %v20038_v62 }
 0x44d   :  { %v18133_v3 = vpop.f32.mrb[101].mxu0  ;;  %18456 = vmatprep.subr.bf16.mxu1 %v20041_v2 }
 0x44e   :  { %v18134_v5 = vadd.f32 %v18133_v3, %v18132_v1  ;;  %v18135_v6 = vpop.f32.mrb[102].mxu0  ;;  %v18154_v7 = vpop.f32.mrb[100].mxu1  ;;  %18435 = vmatpush3.bf16.msra.mxu0 %v20040_v0  ;;  %v20074_v0 = vld [vmem:[#allocation2 + $0x21a8] sm:$0xff]   ;;  %v20075_v1 = vld [vmem:[#allocation2 + $0x2170] sm:$0xff]  }
 0x44f   :  { %v18136_v8 = vpop.f32.mrb[103].mxu0  ;;  %v18155_v9 = vpop.f32.mrb[101].mxu1  ;;  %18436 = vmatprep.subr.bf16.mxu0 %v20043_v10 }
 0x450   :  { %v14173_v12 = vadd.f32 %v18134_v5, %v20829_v36  ;;  %v18156_v13 = vadd.f32 %v18155_v9, %v18154_v7  ;;  %v18157_v15 = vpop.f32.mrb[102].mxu1  ;;  %18457 = vmatpush3.bf16.msra.mxu1 %v20042_v4  ;;  %v20055_v36 = vld [vmem:[#allocation2 + $0x2148] sm:$0xff]   ;;  %v20076_v4 = vld [vmem:[#allocation2 + $0x2130] sm:$0xff]  }
 0x451   :  { %v18158_v18 = vpop.f32.mrb[103].mxu1  ;;  %18458 = vmatprep.subr.bf16.mxu1 %v20045_v14  ;;  %v20077_v7 = vld [vmem:[#allocation2 + $0x21f0] sm:$0xff]   ;;  %v20081_v14 = vld [vmem:[#allocation2 + $0x21f8] sm:$0xff]  }
 0x452   :  { %v20834_v16 = vadd.f32 %v18156_v13, %v14173_v12  ;;  %18437 = vmatpush3.bf16.msra.mxu0 %v20044_v11  ;;  %v20078_v9 = vld [vmem:[#allocation2 + $0x21b0] sm:$0xff]   ;;  %v20079_v12 = vld [vmem:[#allocation2 + $0x2178] sm:$0xff]   ;;  %v20085_v18 = vld [vmem:[#allocation2 + $0x2200] sm:$0xff]  }
 0x453   :  { %18438 = vmatprep.subr.bf16.mxu0 %v20047_v19  ;;  %v20080_v13 = vld [vmem:[#allocation2 + $0x2138] sm:$0xff]   ;;  %v20086_v19 = vld [vmem:[#allocation2 + $0x22c0] sm:$0xff]  }
 0x454   :  { %18459 = vmatpush3.bf16.msra.mxu1 %v20046_v17  ;;  %v20083_v15 = vld [vmem:[#allocation2 + $0x21b8] sm:$0xff]   ;;  %v20084_v17 = vld [vmem:[#allocation2 + $0x2240] sm:$0xff]  }
 0x455   :  { %18460 = vmatprep.subr.bf16.mxu1 %v20049_v21 }
 0x456   :  { %18439 = vmatpush3.bf16.msra.mxu0 %v20048_v20  ;;  %v20087_v20 = vld [vmem:[#allocation2 + $0x2280] sm:$0xff]  }
 0x457   :  { %18468 = vmatprep.subr.bf16.mxu0 %v20051_v26  ;;  %v20092_v26 = vld [vmem:[#allocation2 + $0x2250] sm:$0xff]  }
 0x458   :  { %18461 = vmatpush3.bf16.msra.mxu1 %v20050_v24  ;;  %v20090_v24 = vld [vmem:[#allocation2 + $0x22c8] sm:$0xff]  }
 0x459   :  { %18490 = vmatprep.subr.bf16.mxu1 %v20053_v30  ;;  %14731 = vmatmul.mubr.bf16.vlgmr.msra.gmra.mrb[128].mxu0 %v3621_v28  ;;  %v20094_v28 = vld [vmem:[#allocation2 + $0x22d0] sm:$0xff]   ;;  %v20096_v30 = vld [vmem:[#allocation2 + $0x2258] sm:$0xff]  }
 0x45a   :  { %18469 = vmatpush3.bf16.msra.mxu0 %v20052_v32  ;;  %14810 = vmatprep.mubr.bf16.mxu0 %v3642_v39  ;;  %v20098_v32 = vld [vmem:[#allocation2 + $0x22d8] sm:$0xff]   ;;  %v20104_v39 = vld [vmem:[#allocation2 + $0x2268] sm:$0xff]  }
 0x45b   :  { %14771 = vmatmul.mubr.bf16.vlgmr.msra.gmra.mrb[128].mxu1 %v3643_v35  ;;  %18470 = vmatprep.subr.bf16.mxu0 %v20055_v36  ;;  %v20100_v35 = vld [vmem:[#allocation2 + $0x2260] sm:$0xff]  }
 0x45c   :  { %18491 = vmatpush3.bf16.msra.mxu1 %v20054_v38  ;;  %14850 = vmatprep.mubr.bf16.mxu1 %v3646_v42  ;;  %v20101_v36 = vld [vmem:[#allocation2 + $0x2220] sm:$0xff]   ;;  %v20106_v42 = vld [vmem:[#allocation2 + $0x22e8] sm:$0xff]  }
 0x45d   :  { %18492 = vmatprep.subr.bf16.mxu1 %v20057_v40  ;;  %v20103_v38 = vld [vmem:[#allocation2 + $0x22a0] sm:$0xff]   ;;  %v20105_v40 = vld [vmem:[#allocation2 + $0x2228] sm:$0xff]  }
 0x45e   :  { %18471 = vmatpush3.bf16.msra.mxu0 %v20056_v41 }
 0x45f   :  { %18472 = vmatprep.subr.bf16.mxu0 %v20059_v43 }
 0x460   :  { %18493 = vmatpush3.bf16.msra.mxu1 %v20058_v44  ;;  %v20107_v44 = vld [vmem:[#allocation2 + $0x22a8] sm:$0xff]  }
 0x461   :  { %18494 = vmatprep.subr.bf16.mxu1 %v20061_v45 }
 0x462   :  { %18473 = vmatpush3.bf16.msra.mxu0 %v20060_v46 }
 0x463   :  { %18474 = vmatprep.subr.bf16.mxu0 %v20063_v47 }
 0x464   :  { %18495 = vmatpush3.bf16.msra.mxu1 %v20062_v48 }
 0x465   :  { %18496 = vmatprep.subr.bf16.mxu1 %v20065_v49 }
 0x466   :  { %18475 = vmatpush3.bf16.msra.mxu0 %v20064_v50  ;;  %v20108_v50 = vld [vmem:[#allocation2 + $0x2270] sm:$0xff]  }
 0x467   :  { %18476 = vmatprep.subr.bf16.mxu0 %v20067_v51  ;;  %v20109_v51 = vld [vmem:[#allocation2 + $0x2230] sm:$0xff]  }
 0x468   :  { %18497 = vmatpush3.bf16.msra.mxu1 %v20066_v52 }
 0x469   :  { %18498 = vmatprep.subr.bf16.mxu1 %v20069_v53 }
 0x46a   :  { %18477 = vmatpush3.bf16.msra.mxu0 %v20068_v54  ;;  %v20110_v54 = vld [vmem:[#allocation2 + $0x22f0] sm:$0xff]  }
 0x46b   :  { %18478 = vmatprep.subr.bf16.mxu0 %v20071_v55 }
 0x46c   :  { %v18176_v57 = vpop.f32.mrb[104].mxu0  ;;  %18499 = vmatpush3.bf16.msra.mxu1 %v20070_v56 }
 0x46d   :  { %v18177_v59 = vpop.f32.mrb[105].mxu0  ;;  %18500 = vmatprep.subr.bf16.mxu1 %v20073_v58 }
 0x46e   :  { %v18178_v61 = vadd.f32 %v18177_v59, %v18176_v57  ;;  %v18179_v62 = vpop.f32.mrb[106].mxu0  ;;  %v18198_v63 = vpop.f32.mrb[104].mxu1  ;;  %18479 = vmatpush3.bf16.msra.mxu0 %v20072_v60  ;;  %v20111_v57 = vld [vmem:[#allocation2 + $0x22b0] sm:$0xff]   ;;  %v20112_v59 = vld [vmem:[#allocation2 + $0x2278] sm:$0xff]  }
 0x46f   :  { %v18180_v2 = vpop.f32.mrb[107].mxu0  ;;  %v18199_v3 = vpop.f32.mrb[105].mxu1  ;;  %18480 = vmatprep.subr.bf16.mxu0 %v20075_v1  ;;  %v20113_v60 = vld [vmem:[#allocation2 + $0x2238] sm:$0xff]   ;;  %v76_v62 = vld [vmem:[%s20998_s0 + $0x88] sm:$0xff] }
 0x470   :  { %v14253_v5 = vadd.f32 %v18178_v61, %v20834_v16  ;;  %v18200_v6 = vadd.f32 %v18199_v3, %v18198_v63  ;;  %v18201_v8 = vpop.f32.mrb[106].mxu1  ;;  %18501 = vmatpush3.bf16.msra.mxu1 %v20074_v0  ;;  %v3628_v16 = vrot.slane %v20842_v29, %v20533_v34  ;;  %v20095_v29 = vld [vmem:[#allocation2 + $0x2290] sm:$0xff]   ;;  %v20114_v61 = vld [vmem:[#allocation2 + $0x22f8] sm:$0xff]   ;;  %v3654_v63 = vrot.slane %v76_v62, %v20533_v34  ;;  %v20116_v2 = vld [vmem:[#allocation2 + $0x2340] sm:$0xff]  }
 0x471   :  { %v18202_v10 = vpop.f32.mrb[107].mxu1  ;;  %18502 = vmatprep.subr.bf16.mxu1 %v20077_v7  ;;  %v20115_v0 = vld [vmem:[#allocation2 + $0x22b8] sm:$0xff]   ;;  %v3647_v1 = vcombine.high %v76_v62, %v76_v62  ;;  %v20117_v8 = vld [vmem:[#allocation2 + $0x2300] sm:$0xff]   ;;  %v20153_v62 = vld [vmem:[#allocation2 + $0x2448] sm:$0xff]  }
 0x472   :  { %v20849_v11 = vadd.f32 %v18200_v6, %v14253_v5  ;;  %18481 = vmatpush3.bf16.msra.mxu0 %v20076_v4  ;;  %v3644_v21 = vcombine.high %v3628_v16, %v3628_v16  ;;  %v3662_v3 = vcombine.high %v3654_v63, %v3654_v63  ;;  %v3670_v4 = vrot.slane %v3654_v63, %v20533_v34  ;;  %v20118_v6 = vld [vmem:[#allocation2 + $0x23c0] sm:$0xff]   ;;  %v20154_v63 = vld [vmem:[#allocation2 + $0x2408] sm:$0xff]  }
 0x473   :  { %18482 = vmatprep.subr.bf16.mxu0 %v20079_v12  ;;  %v20862_v5 = vrot.slane %v3647_v1, %v20533_v34  ;;  %v20156_v1 = vld [vmem:[#allocation2 + $0x2488] sm:$0xff]  }
 0x474   :  { %18503 = vmatpush3.bf16.msra.mxu1 %v20078_v9  ;;  %v3684_v7 = vrot.slane %v3662_v3, %v20533_v34  ;;  %v3692_v10 = vcombine.high %v3670_v4, %v3670_v4  ;;  %v20158_v3 = vld [vmem:[#allocation2 + $0x2410] sm:$0xff]  }
 0x475   :  { %18504 = vmatprep.subr.bf16.mxu1 %v20081_v14  ;;  %v3663_v9 = vcombine.high %v20862_v5, %v20862_v5 }
 0x476   :  { %18483 = vmatpush3.bf16.msra.mxu0 %v20080_v13  ;;  %v3694_v12 = vcombine.high %v3684_v7, %v3684_v7  ;;  %v20119_v13 = vld [vmem:[#allocation2 + $0x2380] sm:$0xff]  }
 0x477   :  { %18512 = vmatprep.subr.bf16.mxu0 %v20084_v17  ;;  %v3691_v14 = vrot.slane %v3663_v9, %v20533_v34  ;;  %v20164_v9 = vld [vmem:[#allocation2 + $0x2498] sm:$0xff]  }
 0x478   :  { %18505 = vmatpush3.bf16.msra.mxu1 %v20083_v15  ;;  %v20122_v15 = vld [vmem:[#allocation2 + $0x23c8] sm:$0xff]  }
 0x479   :  { %14811 = vmatmul.mubr.bf16.vlgmr.msra.gmra.mrb[132].mxu0 %v3628_v16  ;;  %18534 = vmatprep.subr.bf16.mxu1 %v20086_v19  ;;  %v20121_v16 = vld [vmem:[#allocation2 + $0x2308] sm:$0xff]   ;;  %v3695_v17 = vcombine.high %v3691_v14, %v3691_v14 }
 0x47a   :  { %18513 = vmatpush3.bf16.msra.mxu0 %v20085_v18  ;;  %14890 = vmatprep.mubr.bf16.mxu0 %v3684_v7  ;;  %v20124_v18 = vld [vmem:[#allocation2 + $0x2350] sm:$0xff]   ;;  %v20123_v19 = vld [vmem:[#allocation2 + $0x2388] sm:$0xff]   ;;  %v20162_v7 = vld [vmem:[#allocation2 + $0x2418] sm:$0xff]  }
 0x47b   :  { %14851 = vmatmul.mubr.bf16.vlgmr.msra.gmra.mrb[132].mxu1 %v3644_v21  ;;  %18514 = vmatprep.subr.bf16.mxu0 %v20088_v22  ;;  %v20125_v21 = vld [vmem:[#allocation2 + $0x2310] sm:$0xff]   ;;  %v20128_v22 = vld [vmem:[#allocation2 + $0x2358] sm:$0xff]  }
 0x47c   :  { %18535 = vmatpush3.bf16.msra.mxu1 %v20087_v20  ;;  %14930 = vmatprep.mubr.bf16.mxu1 %v3694_v12  ;;  %v20126_v20 = vld [vmem:[#allocation2 + $0x23d0] sm:$0xff]   ;;  %v20167_v12 = vld [vmem:[#allocation2 + $0x24e0] sm:$0xff]  }
 0x47d   :  { %18536 = vmatprep.subr.bf16.mxu1 %v20090_v24  ;;  %v20130_v24 = vld [vmem:[#allocation2 + $0x23d8] sm:$0xff]  }
 0x47e   :  { %18515 = vmatpush3.bf16.msra.mxu0 %v20089_v23  ;;  %v20127_v23 = vld [vmem:[#allocation2 + $0x2390] sm:$0xff]  }
 0x47f   :  { %18516 = vmatprep.subr.bf16.mxu0 %v20092_v26  ;;  %v20132_v26 = vld [vmem:[#allocation2 + $0x2360] sm:$0xff]  }
 0x480   :  { %18537 = vmatpush3.bf16.msra.mxu1 %v20091_v25  ;;  %v20129_v25 = vld [vmem:[#allocation2 + $0x2318] sm:$0xff]  }
 0x481   :  { %18538 = vmatprep.subr.bf16.mxu1 %v20094_v28  ;;  %v20134_v28 = vld [vmem:[#allocation2 + $0x23e0] sm:$0xff]  }
 0x482   :  { %18517 = vmatpush3.bf16.msra.mxu0 %v20093_v27  ;;  %v20131_v27 = vld [vmem:[#allocation2 + $0x2398] sm:$0xff]  }
 0x483   :  { %18518 = vmatprep.subr.bf16.mxu0 %v20096_v30  ;;  %v20136_v30 = vld [vmem:[#allocation2 + $0x2368] sm:$0xff]  }
 0x484   :  { %18539 = vmatpush3.bf16.msra.mxu1 %v20095_v29  ;;  %v20133_v29 = vld [vmem:[#allocation2 + $0x2320] sm:$0xff]  }
 0x485   :  { %18540 = vmatprep.subr.bf16.mxu1 %v20098_v32 }
 0x486   :  { %18519 = vmatpush3.bf16.msra.mxu0 %v20097_v31  ;;  %v20135_v31 = vld [vmem:[#allocation2 + $0x23a0] sm:$0xff]  }
 0x487   :  { %18520 = vmatprep.subr.bf16.mxu0 %v20100_v35 }
 0x488   :  { %18541 = vmatpush3.bf16.msra.mxu1 %v20099_v33  ;;  %v20138_v33 = vld [vmem:[#allocation2 + $0x23e8] sm:$0xff]  }
 0x489   :  { %18542 = vmatprep.subr.bf16.mxu1 %v20102_v37 }
 0x48a   :  { %18521 = vmatpush3.bf16.msra.mxu0 %v20101_v36  ;;  %v20137_v36 = vld [vmem:[#allocation2 + $0x2328] sm:$0xff]  }
 0x48b   :  { %18522 = vmatprep.subr.bf16.mxu0 %v20104_v39 }
 0x48c   :  { %v18220_v41 = vpop.f32.mrb[108].mxu0  ;;  %18543 = vmatpush3.bf16.msra.mxu1 %v20103_v38 }
 0x48d   :  { %v18221_v43 = vpop.f32.mrb[109].mxu0  ;;  %18544 = vmatprep.subr.bf16.mxu1 %v20106_v42 }
 0x48e   :  { %v18222_v45 = vadd.f32 %v18221_v43, %v18220_v41  ;;  %v18223_v46 = vpop.f32.mrb[110].mxu0  ;;  %v18242_v47 = vpop.f32.mrb[108].mxu1  ;;  %18523 = vmatpush3.bf16.msra.mxu0 %v20105_v40  ;;  %v20139_v40 = vld [vmem:[#allocation2 + $0x23a8] sm:$0xff]   ;;  %v20140_v41 = vld [vmem:[#allocation2 + $0x2370] sm:$0xff]  }
 0x48f   :  { %v18224_v48 = vpop.f32.mrb[111].mxu0  ;;  %v18243_v49 = vpop.f32.mrb[109].mxu1  ;;  %18524 = vmatprep.subr.bf16.mxu0 %v20108_v50 }
 0x490   :  { %v14333_v52 = vadd.f32 %v18222_v45, %v20849_v11  ;;  %v18244_v53 = vadd.f32 %v18243_v49, %v18242_v47  ;;  %v18245_v55 = vpop.f32.mrb[110].mxu1  ;;  %18545 = vmatpush3.bf16.msra.mxu1 %v20107_v44  ;;  %v20120_v11 = vld [vmem:[#allocation2 + $0x2348] sm:$0xff]   ;;  %v20141_v44 = vld [vmem:[#allocation2 + $0x2330] sm:$0xff]  }
 0x491   :  { %v18246_v58 = vpop.f32.mrb[111].mxu1  ;;  %18546 = vmatprep.subr.bf16.mxu1 %v20110_v54  ;;  %v20142_v47 = vld [vmem:[#allocation2 + $0x23f0] sm:$0xff]   ;;  %v20146_v54 = vld [vmem:[#allocation2 + $0x23f8] sm:$0xff]  }
 0x492   :  { %v20854_v56 = vadd.f32 %v18244_v53, %v14333_v52  ;;  %18525 = vmatpush3.bf16.msra.mxu0 %v20109_v51  ;;  %v20143_v49 = vld [vmem:[#allocation2 + $0x23b0] sm:$0xff]   ;;  %v20144_v52 = vld [vmem:[#allocation2 + $0x2378] sm:$0xff]   ;;  %v20150_v58 = vld [vmem:[#allocation2 + $0x2400] sm:$0xff]  }
 0x493   :  { %18526 = vmatprep.subr.bf16.mxu0 %v20112_v59  ;;  %v20145_v53 = vld [vmem:[#allocation2 + $0x2338] sm:$0xff]   ;;  %v20151_v59 = vld [vmem:[#allocation2 + $0x24c0] sm:$0xff]  }
 0x494   :  { %18547 = vmatpush3.bf16.msra.mxu1 %v20111_v57  ;;  %v20148_v55 = vld [vmem:[#allocation2 + $0x23b8] sm:$0xff]   ;;  %v20149_v57 = vld [vmem:[#allocation2 + $0x2440] sm:$0xff]  }
 0x495   :  { %18548 = vmatprep.subr.bf16.mxu1 %v20114_v61 }
 0x496   :  { %18527 = vmatpush3.bf16.msra.mxu0 %v20113_v60  ;;  %v20152_v60 = vld [vmem:[#allocation2 + $0x2480] sm:$0xff]  }
 0x497   :  { %18556 = vmatprep.subr.bf16.mxu0 %v20116_v2  ;;  %v20157_v2 = vld [vmem:[#allocation2 + $0x2450] sm:$0xff]  }
 0x498   :  { %18549 = vmatpush3.bf16.msra.mxu1 %v20115_v0  ;;  %v20155_v0 = vld [vmem:[#allocation2 + $0x24c8] sm:$0xff]  }
 0x499   :  { %18578 = vmatprep.subr.bf16.mxu1 %v20118_v6  ;;  %14891 = vmatmul.mubr.bf16.vlgmr.msra.gmra.mrb[136].mxu0 %v3670_v4  ;;  %v20159_v4 = vld [vmem:[#allocation2 + $0x24d0] sm:$0xff]   ;;  %v20161_v6 = vld [vmem:[#allocation2 + $0x2458] sm:$0xff]  }
 0x49a   :  { %18557 = vmatpush3.bf16.msra.mxu0 %v20117_v8  ;;  %14970 = vmatprep.mubr.bf16.mxu0 %v3691_v14  ;;  %v20163_v8 = vld [vmem:[#allocation2 + $0x24d8] sm:$0xff]   ;;  %v20169_v14 = vld [vmem:[#allocation2 + $0x2468] sm:$0xff]  }
 0x49b   :  { %14931 = vmatmul.mubr.bf16.vlgmr.msra.gmra.mrb[136].mxu1 %v3692_v10  ;;  %18558 = vmatprep.subr.bf16.mxu0 %v20120_v11  ;;  %v20165_v10 = vld [vmem:[#allocation2 + $0x2460] sm:$0xff]  }
 0x49c   :  { %18579 = vmatpush3.bf16.msra.mxu1 %v20119_v13  ;;  %15010 = vmatprep.mubr.bf16.mxu1 %v3695_v17  ;;  %v20166_v11 = vld [vmem:[#allocation2 + $0x2420] sm:$0xff]   ;;  %v20171_v17 = vld [vmem:[#allocation2 + $0x24e8] sm:$0xff]  }
 0x49d   :  { %18580 = vmatprep.subr.bf16.mxu1 %v20122_v15  ;;  %v20168_v13 = vld [vmem:[#allocation2 + $0x24a0] sm:$0xff]   ;;  %v20170_v15 = vld [vmem:[#allocation2 + $0x2428] sm:$0xff]  }
 0x49e   :  { %18559 = vmatpush3.bf16.msra.mxu0 %v20121_v16 }
 0x49f   :  { %18560 = vmatprep.subr.bf16.mxu0 %v20124_v18 }
 0x4a0   :  { %18581 = vmatpush3.bf16.msra.mxu1 %v20123_v19  ;;  %v20172_v19 = vld [vmem:[#allocation2 + $0x24a8] sm:$0xff]  }
 0x4a1   :  { %18582 = vmatprep.subr.bf16.mxu1 %v20126_v20 }
 0x4a2   :  { %18561 = vmatpush3.bf16.msra.mxu0 %v20125_v21 }
 0x4a3   :  { %18562 = vmatprep.subr.bf16.mxu0 %v20128_v22 }
 0x4a4   :  { %18583 = vmatpush3.bf16.msra.mxu1 %v20127_v23 }
 0x4a5   :  { %18584 = vmatprep.subr.bf16.mxu1 %v20130_v24 }
 0x4a6   :  { %18563 = vmatpush3.bf16.msra.mxu0 %v20129_v25  ;;  %v20173_v25 = vld [vmem:[#allocation2 + $0x2470] sm:$0xff]  }
 0x4a7   :  { %18564 = vmatprep.subr.bf16.mxu0 %v20132_v26  ;;  %v20174_v26 = vld [vmem:[#allocation2 + $0x2430] sm:$0xff]  }
 0x4a8   :  { %18585 = vmatpush3.bf16.msra.mxu1 %v20131_v27 }
 0x4a9   :  { %18586 = vmatprep.subr.bf16.mxu1 %v20134_v28 }
 0x4aa   :  { %18565 = vmatpush3.bf16.msra.mxu0 %v20133_v29  ;;  %v20175_v29 = vld [vmem:[#allocation2 + $0x24f0] sm:$0xff]  }
 0x4ab   :  { %18566 = vmatprep.subr.bf16.mxu0 %v20136_v30 }
 0x4ac   :  { %v18264_v32 = vpop.f32.mrb[112].mxu0  ;;  %18587 = vmatpush3.bf16.msra.mxu1 %v20135_v31 }
 0x4ad   :  { %v18265_v35 = vpop.f32.mrb[113].mxu0  ;;  %18588 = vmatprep.subr.bf16.mxu1 %v20138_v33 }
 0x4ae   :  { %v18266_v37 = vadd.f32 %v18265_v35, %v18264_v32  ;;  %v18267_v38 = vpop.f32.mrb[114].mxu0  ;;  %v18286_v39 = vpop.f32.mrb[112].mxu1  ;;  %18567 = vmatpush3.bf16.msra.mxu0 %v20137_v36  ;;  %v20176_v32 = vld [vmem:[#allocation2 + $0x24b0] sm:$0xff]   ;;  %v20177_v35 = vld [vmem:[#allocation2 + $0x2478] sm:$0xff]  }
 0x4af   :  { %v18268_v42 = vpop.f32.mrb[115].mxu0  ;;  %v18287_v43 = vpop.f32.mrb[113].mxu1  ;;  %18568 = vmatprep.subr.bf16.mxu0 %v20140_v41  ;;  %v20178_v36 = vld [vmem:[#allocation2 + $0x2438] sm:$0xff]   ;;  %v77_v38 = vld [vmem:[%s20998_s0 + $0x90] sm:$0xff] }
 0x4b0   :  { %v14413_v45 = vadd.f32 %v18266_v37, %v20854_v56  ;;  %v18288_v46 = vadd.f32 %v18287_v43, %v18286_v39  ;;  %v18289_v48 = vpop.f32.mrb[114].mxu1  ;;  %18589 = vmatpush3.bf16.msra.mxu1 %v20139_v40  ;;  %v3677_v56 = vrot.slane %v20862_v5, %v20533_v34  ;;  %v20160_v5 = vld [vmem:[#allocation2 + $0x2490] sm:$0xff]   ;;  %v20179_v37 = vld [vmem:[#allocation2 + $0x24f8] sm:$0xff]   ;;  %v3703_v39 = vrot.slane %v77_v38, %v20533_v34  ;;  %v20181_v42 = vld [vmem:[#allocation2 + $0x2540] sm:$0xff]  }
 0x4b1   :  { %v18290_v50 = vpop.f32.mrb[115].mxu1  ;;  %18590 = vmatprep.subr.bf16.mxu1 %v20142_v47  ;;  %v20180_v40 = vld [vmem:[#allocation2 + $0x24b8] sm:$0xff]   ;;  %v3696_v41 = vcombine.high %v77_v38, %v77_v38  ;;  %v20182_v48 = vld [vmem:[#allocation2 + $0x2500] sm:$0xff]   ;;  %v20218_v38 = vld [vmem:[#allocation2 + $0x2648] sm:$0xff]  }
 0x4b2   :  { %v20869_v51 = vadd.f32 %v18288_v46, %v14413_v45  ;;  %18569 = vmatpush3.bf16.msra.mxu0 %v20141_v44  ;;  %v3693_v61 = vcombine.high %v3677_v56, %v3677_v56  ;;  %v3711_v43 = vcombine.high %v3703_v39, %v3703_v39  ;;  %v3719_v44 = vrot.slane %v3703_v39, %v20533_v34  ;;  %v20183_v46 = vld [vmem:[#allocation2 + $0x25c0] sm:$0xff]   ;;  %v20219_v39 = vld [vmem:[#allocation2 + $0x2608] sm:$0xff]  }
 0x4b3   :  { %18570 = vmatprep.subr.bf16.mxu0 %v20144_v52  ;;  %v20882_v45 = vrot.slane %v3696_v41, %v20533_v34  ;;  %v20221_v41 = vld [vmem:[#allocation2 + $0x2688] sm:$0xff]  }
 0x4b4   :  { %18591 = vmatpush3.bf16.msra.mxu1 %v20143_v49  ;;  %v3733_v47 = vrot.slane %v3711_v43, %v20533_v34  ;;  %v3741_v50 = vcombine.high %v3719_v44, %v3719_v44  ;;  %v20223_v43 = vld [vmem:[#allocation2 + $0x2610] sm:$0xff]  }
 0x4b5   :  { %18592 = vmatprep.subr.bf16.mxu1 %v20146_v54  ;;  %v3712_v49 = vcombine.high %v20882_v45, %v20882_v45 }
 0x4b6   :  { %18571 = vmatpush3.bf16.msra.mxu0 %v20145_v53  ;;  %v3743_v52 = vcombine.high %v3733_v47, %v3733_v47  ;;  %v20184_v53 = vld [vmem:[#allocation2 + $0x2580] sm:$0xff]  }
 0x4b7   :  { %18600 = vmatprep.subr.bf16.mxu0 %v20149_v57  ;;  %v3740_v54 = vrot.slane %v3712_v49, %v20533_v34  ;;  %v20229_v49 = vld [vmem:[#allocation2 + $0x2698] sm:$0xff]  }
 0x4b8   :  { %18593 = vmatpush3.bf16.msra.mxu1 %v20148_v55  ;;  %v20187_v55 = vld [vmem:[#allocation2 + $0x25c8] sm:$0xff]  }
 0x4b9   :  { %14971 = vmatmul.mubr.bf16.vlgmr.msra.gmra.mrb[140].mxu0 %v3677_v56  ;;  %18622 = vmatprep.subr.bf16.mxu1 %v20151_v59  ;;  %v20186_v56 = vld [vmem:[#allocation2 + $0x2508] sm:$0xff]   ;;  %v3744_v57 = vcombine.high %v3740_v54, %v3740_v54 }
 0x4ba   :  { %18601 = vmatpush3.bf16.msra.mxu0 %v20150_v58  ;;  %15050 = vmatprep.mubr.bf16.mxu0 %v3733_v47  ;;  %v20189_v58 = vld [vmem:[#allocation2 + $0x2550] sm:$0xff]   ;;  %v20188_v59 = vld [vmem:[#allocation2 + $0x2588] sm:$0xff]   ;;  %v20227_v47 = vld [vmem:[#allocation2 + $0x2618] sm:$0xff]  }
 0x4bb   :  { %15011 = vmatmul.mubr.bf16.vlgmr.msra.gmra.mrb[140].mxu1 %v3693_v61  ;;  %18602 = vmatprep.subr.bf16.mxu0 %v20153_v62  ;;  %v20190_v61 = vld [vmem:[#allocation2 + $0x2510] sm:$0xff]   ;;  %v20193_v62 = vld [vmem:[#allocation2 + $0x2558] sm:$0xff]  }
 0x4bc   :  { %18623 = vmatpush3.bf16.msra.mxu1 %v20152_v60  ;;  %15090 = vmatprep.mubr.bf16.mxu1 %v3743_v52  ;;  %v20191_v60 = vld [vmem:[#allocation2 + $0x25d0] sm:$0xff]   ;;  %v20232_v52 = vld [vmem:[#allocation2 + $0x26e0] sm:$0xff]  }
 0x4bd   :  { %18624 = vmatprep.subr.bf16.mxu1 %v20155_v0  ;;  %v20195_v0 = vld [vmem:[#allocation2 + $0x25d8] sm:$0xff]  }
 0x4be   :  { %18603 = vmatpush3.bf16.msra.mxu0 %v20154_v63  ;;  %v20192_v63 = vld [vmem:[#allocation2 + $0x2590] sm:$0xff]  }
 0x4bf   :  { %18604 = vmatprep.subr.bf16.mxu0 %v20157_v2  ;;  %v20197_v2 = vld [vmem:[#allocation2 + $0x2560] sm:$0xff]  }
 0x4c0   :  { %18625 = vmatpush3.bf16.msra.mxu1 %v20156_v1  ;;  %v20194_v1 = vld [vmem:[#allocation2 + $0x2518] sm:$0xff]  }
 0x4c1   :  { %18626 = vmatprep.subr.bf16.mxu1 %v20159_v4  ;;  %v20199_v4 = vld [vmem:[#allocation2 + $0x25e0] sm:$0xff]  }
 0x4c2   :  { %18605 = vmatpush3.bf16.msra.mxu0 %v20158_v3  ;;  %v20196_v3 = vld [vmem:[#allocation2 + $0x2598] sm:$0xff]  }
 0x4c3   :  { %18606 = vmatprep.subr.bf16.mxu0 %v20161_v6  ;;  %v20201_v6 = vld [vmem:[#allocation2 + $0x2568] sm:$0xff]  }
 0x4c4   :  { %18627 = vmatpush3.bf16.msra.mxu1 %v20160_v5  ;;  %v20198_v5 = vld [vmem:[#allocation2 + $0x2520] sm:$0xff]  }
 0x4c5   :  { %18628 = vmatprep.subr.bf16.mxu1 %v20163_v8 }
 0x4c6   :  { %18607 = vmatpush3.bf16.msra.mxu0 %v20162_v7  ;;  %v20200_v7 = vld [vmem:[#allocation2 + $0x25a0] sm:$0xff]  }
 0x4c7   :  { %18608 = vmatprep.subr.bf16.mxu0 %v20165_v10 }
 0x4c8   :  { %18629 = vmatpush3.bf16.msra.mxu1 %v20164_v9  ;;  %v20203_v9 = vld [vmem:[#allocation2 + $0x25e8] sm:$0xff]  }
 0x4c9   :  { %18630 = vmatprep.subr.bf16.mxu1 %v20167_v12 }
 0x4ca   :  { %18609 = vmatpush3.bf16.msra.mxu0 %v20166_v11  ;;  %v20202_v11 = vld [vmem:[#allocation2 + $0x2528] sm:$0xff]  }
 0x4cb   :  { %18610 = vmatprep.subr.bf16.mxu0 %v20169_v14 }
 0x4cc   :  { %v18308_v16 = vpop.f32.mrb[116].mxu0  ;;  %18631 = vmatpush3.bf16.msra.mxu1 %v20168_v13 }
 0x4cd   :  { %v18309_v18 = vpop.f32.mrb[117].mxu0  ;;  %18632 = vmatprep.subr.bf16.mxu1 %v20171_v17 }
 0x4ce   :  { %v18310_v20 = vadd.f32 %v18309_v18, %v18308_v16  ;;  %v18311_v21 = vpop.f32.mrb[118].mxu0  ;;  %v18330_v22 = vpop.f32.mrb[116].mxu1  ;;  %18611 = vmatpush3.bf16.msra.mxu0 %v20170_v15  ;;  %v20204_v15 = vld [vmem:[#allocation2 + $0x25a8] sm:$0xff]   ;;  %v20205_v16 = vld [vmem:[#allocation2 + $0x2570] sm:$0xff]  }
 0x4cf   :  { %v18312_v23 = vpop.f32.mrb[119].mxu0  ;;  %v18331_v24 = vpop.f32.mrb[117].mxu1  ;;  %18612 = vmatprep.subr.bf16.mxu0 %v20173_v25 }
 0x4d0   :  { %v14493_v27 = vadd.f32 %v18310_v20, %v20869_v51  ;;  %v18332_v28 = vadd.f32 %v18331_v24, %v18330_v22  ;;  %v18333_v30 = vpop.f32.mrb[118].mxu1  ;;  %18633 = vmatpush3.bf16.msra.mxu1 %v20172_v19  ;;  %v20185_v51 = vld [vmem:[#allocation2 + $0x2548] sm:$0xff]   ;;  %v20206_v19 = vld [vmem:[#allocation2 + $0x2530] sm:$0xff]  }
 0x4d1   :  { %v18334_v33 = vpop.f32.mrb[119].mxu1  ;;  %18634 = vmatprep.subr.bf16.mxu1 %v20175_v29  ;;  %v20207_v22 = vld [vmem:[#allocation2 + $0x25f0] sm:$0xff]   ;;  %v20211_v29 = vld [vmem:[#allocation2 + $0x25f8] sm:$0xff]  }
 0x4d2   :  { %v20874_v31 = vadd.f32 %v18332_v28, %v14493_v27  ;;  %18613 = vmatpush3.bf16.msra.mxu0 %v20174_v26  ;;  %v20208_v24 = vld [vmem:[#allocation2 + $0x25b0] sm:$0xff]   ;;  %v20209_v27 = vld [vmem:[#allocation2 + $0x2578] sm:$0xff]   ;;  %v20215_v33 = vld [vmem:[#allocation2 + $0x2600] sm:$0xff]  }
 0x4d3   :  { %18614 = vmatprep.subr.bf16.mxu0 %v20177_v35  ;;  %v20210_v28 = vld [vmem:[#allocation2 + $0x2538] sm:$0xff]   ;;  %v20216_v35 = vld [vmem:[#allocation2 + $0x26c0] sm:$0xff]  }
 0x4d4   :  { %18635 = vmatpush3.bf16.msra.mxu1 %v20176_v32  ;;  %v20213_v30 = vld [vmem:[#allocation2 + $0x25b8] sm:$0xff]   ;;  %v20214_v32 = vld [vmem:[#allocation2 + $0x2640] sm:$0xff]  }
 0x4d5   :  { %18636 = vmatprep.subr.bf16.mxu1 %v20179_v37 }
 0x4d6   :  { %18615 = vmatpush3.bf16.msra.mxu0 %v20178_v36  ;;  %v20217_v36 = vld [vmem:[#allocation2 + $0x2680] sm:$0xff]  }
 0x4d7   :  { %18644 = vmatprep.subr.bf16.mxu0 %v20181_v42  ;;  %v20222_v42 = vld [vmem:[#allocation2 + $0x2650] sm:$0xff]  }
 0x4d8   :  { %18637 = vmatpush3.bf16.msra.mxu1 %v20180_v40  ;;  %v20220_v40 = vld [vmem:[#allocation2 + $0x26c8] sm:$0xff]  }
 0x4d9   :  { %18666 = vmatprep.subr.bf16.mxu1 %v20183_v46  ;;  %15051 = vmatmul.mubr.bf16.vlgmr.msra.gmra.mrb[144].mxu0 %v3719_v44  ;;  %v20224_v44 = vld [vmem:[#allocation2 + $0x26d0] sm:$0xff]   ;;  %v20226_v46 = vld [vmem:[#allocation2 + $0x2658] sm:$0xff]  }
 0x4da   :  { %18645 = vmatpush3.bf16.msra.mxu0 %v20182_v48  ;;  %15130 = vmatprep.mubr.bf16.mxu0 %v3740_v54  ;;  %v20228_v48 = vld [vmem:[#allocation2 + $0x26d8] sm:$0xff]   ;;  %v20234_v54 = vld [vmem:[#allocation2 + $0x2668] sm:$0xff]  }
 0x4db   :  { %15091 = vmatmul.mubr.bf16.vlgmr.msra.gmra.mrb[144].mxu1 %v3741_v50  ;;  %18646 = vmatprep.subr.bf16.mxu0 %v20185_v51  ;;  %v20230_v50 = vld [vmem:[#allocation2 + $0x2660] sm:$0xff]  }
 0x4dc   :  { %18667 = vmatpush3.bf16.msra.mxu1 %v20184_v53  ;;  %15170 = vmatprep.mubr.bf16.mxu1 %v3744_v57  ;;  %v20231_v51 = vld [vmem:[#allocation2 + $0x2620] sm:$0xff]   ;;  %v20236_v57 = vld [vmem:[#allocation2 + $0x26e8] sm:$0xff]  }
 0x4dd   :  { %18668 = vmatprep.subr.bf16.mxu1 %v20187_v55  ;;  %v20233_v53 = vld [vmem:[#allocation2 + $0x26a0] sm:$0xff]   ;;  %v20235_v55 = vld [vmem:[#allocation2 + $0x2628] sm:$0xff]  }
 0x4de   :  { %18647 = vmatpush3.bf16.msra.mxu0 %v20186_v56 }
 0x4df   :  { %18648 = vmatprep.subr.bf16.mxu0 %v20189_v58 }
 0x4e0   :  { %18669 = vmatpush3.bf16.msra.mxu1 %v20188_v59  ;;  %v20237_v59 = vld [vmem:[#allocation2 + $0x26a8] sm:$0xff]  }
 0x4e1   :  { %18670 = vmatprep.subr.bf16.mxu1 %v20191_v60 }
 0x4e2   :  { %18649 = vmatpush3.bf16.msra.mxu0 %v20190_v61 }
 0x4e3   :  { %18650 = vmatprep.subr.bf16.mxu0 %v20193_v62 }
 0x4e4   :  { %18671 = vmatpush3.bf16.msra.mxu1 %v20192_v63 }
 0x4e5   :  { %18672 = vmatprep.subr.bf16.mxu1 %v20195_v0 }
 0x4e6   :  { %18651 = vmatpush3.bf16.msra.mxu0 %v20194_v1  ;;  %v20238_v1 = vld [vmem:[#allocation2 + $0x2670] sm:$0xff]  }
 0x4e7   :  { %18652 = vmatprep.subr.bf16.mxu0 %v20197_v2  ;;  %v20239_v2 = vld [vmem:[#allocation2 + $0x2630] sm:$0xff]  }
 0x4e8   :  { %18673 = vmatpush3.bf16.msra.mxu1 %v20196_v3 }
 0x4e9   :  { %18674 = vmatprep.subr.bf16.mxu1 %v20199_v4 }
 0x4ea   :  { %18653 = vmatpush3.bf16.msra.mxu0 %v20198_v5  ;;  %v20240_v5 = vld [vmem:[#allocation2 + $0x26f0] sm:$0xff]  }
 0x4eb   :  { %18654 = vmatprep.subr.bf16.mxu0 %v20201_v6 }
 0x4ec   :  { %v18352_v8 = vpop.f32.mrb[120].mxu0  ;;  %18675 = vmatpush3.bf16.msra.mxu1 %v20200_v7 }
 0x4ed   :  { %v18353_v10 = vpop.f32.mrb[121].mxu0  ;;  %18676 = vmatprep.subr.bf16.mxu1 %v20203_v9 }
 0x4ee   :  { %v18354_v12 = vadd.f32 %v18353_v10, %v18352_v8  ;;  %v18355_v13 = vpop.f32.mrb[122].mxu0  ;;  %v18374_v14 = vpop.f32.mrb[120].mxu1  ;;  %18655 = vmatpush3.bf16.msra.mxu0 %v20202_v11  ;;  %v20241_v8 = vld [vmem:[#allocation2 + $0x26b0] sm:$0xff]   ;;  %v20242_v10 = vld [vmem:[#allocation2 + $0x2678] sm:$0xff]  }
 0x4ef   :  { %v18356_v17 = vpop.f32.mrb[123].mxu0  ;;  %v18375_v18 = vpop.f32.mrb[121].mxu1  ;;  %18656 = vmatprep.subr.bf16.mxu0 %v20205_v16  ;;  %v20243_v11 = vld [vmem:[#allocation2 + $0x2638] sm:$0xff]  }
 0x4f0   :  { %v14573_v20 = vadd.f32 %v18354_v12, %v20874_v31  ;;  %v18376_v21 = vadd.f32 %v18375_v18, %v18374_v14  ;;  %v18377_v23 = vpop.f32.mrb[122].mxu1  ;;  %18677 = vmatpush3.bf16.msra.mxu1 %v20204_v15  ;;  %v3726_v31 = vrot.slane %v20882_v45, %v20533_v34  ;;  %v20225_v45 = vld [vmem:[#allocation2 + $0x2690] sm:$0xff]   ;;  %v20244_v12 = vld [vmem:[#allocation2 + $0x26f8] sm:$0xff]   ;;  %v20246_v17 = vld [vmem:[#allocation2 + $0x2740] sm:$0xff]  }
 0x4f1   :  { %v18378_v25 = vpop.f32.mrb[123].mxu1  ;;  %18678 = vmatprep.subr.bf16.mxu1 %v20207_v22  ;;  %v78_v13 = vld [vmem:[%s20998_s0 + $0x98] sm:$0xff]  ;;  %v20247_v23 = vld [vmem:[#allocation2 + $0x2700] sm:$0xff]  }
 0x4f2   :  { %v20889_v26 = vadd.f32 %v18376_v21, %v14573_v20  ;;  %18657 = vmatpush3.bf16.msra.mxu0 %v20206_v19  ;;  %v3742_v37 = vcombine.high %v3726_v31, %v3726_v31  ;;  %v3752_v14 = vrot.slane %v78_v13, %v20533_v34  ;;  %v20245_v15 = vld [vmem:[#allocation2 + $0x26b8] sm:$0xff]   ;;  %v3745_v16 = vcombine.high %v78_v13, %v78_v13  ;;  %v20248_v21 = vld [vmem:[#allocation2 + $0x27c0] sm:$0xff]   ;;  %v20283_v13 = vld [vmem:[#allocation2 + $0x2848] sm:$0xff]  }
 0x4f3   :  { %18658 = vmatprep.subr.bf16.mxu0 %v20209_v27 }
 0x4f4   :  { %18679 = vmatpush3.bf16.msra.mxu1 %v20208_v24  ;;  %v3760_v18 = vcombine.high %v3752_v14, %v3752_v14  ;;  %v3768_v19 = vrot.slane %v3752_v14, %v20533_v34  ;;  %v20902_v20 = vrot.slane %v3745_v16, %v20533_v34  ;;  %v20284_v14 = vld [vmem:[#allocation2 + $0x2808] sm:$0xff]  }
 0x4f5   :  { %18680 = vmatprep.subr.bf16.mxu1 %v20211_v29  ;;  %v20286_v16 = vld [vmem:[#allocation2 + $0x2888] sm:$0xff]  }
 0x4f6   :  { %18659 = vmatpush3.bf16.msra.mxu0 %v20210_v28  ;;  %v3782_v22 = vrot.slane %v3760_v18, %v20533_v34  ;;  %v3761_v24 = vcombine.high %v20902_v20, %v20902_v20  ;;  %v3790_v25 = vcombine.high %v3768_v19, %v3768_v19  ;;  %v20249_v28 = vld [vmem:[#allocation2 + $0x2780] sm:$0xff]   ;;  %v20288_v18 = vld [vmem:[#allocation2 + $0x2810] sm:$0xff]  }
 0x4f7   :  { %18688 = vmatprep.subr.bf16.mxu0 %v20214_v32 }
 0x4f8   :  { %18681 = vmatpush3.bf16.msra.mxu1 %v20213_v30  ;;  %v3792_v27 = vcombine.high %v3782_v22, %v3782_v22  ;;  %v3789_v29 = vrot.slane %v3761_v24, %v20533_v34  ;;  %v20252_v30 = vld [vmem:[#allocation2 + $0x27c8] sm:$0xff]   ;;  %v20294_v24 = vld [vmem:[#allocation2 + $0x2898] sm:$0xff]  }
 0x4f9   :  { %15131 = vmatmul.mubr.bf16.vlgmr.msra.gmra.mrb[148].mxu0 %v3726_v31  ;;  %18710 = vmatprep.subr.bf16.mxu1 %v20216_v35  ;;  %v20251_v31 = vld [vmem:[#allocation2 + $0x2708] sm:$0xff]  }
 0x4fa   :  { %18689 = vmatpush3.bf16.msra.mxu0 %v20215_v33  ;;  %15210 = vmatprep.mubr.bf16.mxu0 %v3782_v22  ;;  %v3793_v32 = vcombine.high %v3789_v29, %v3789_v29  ;;  %v20254_v33 = vld [vmem:[#allocation2 + $0x2750] sm:$0xff]   ;;  %v20253_v35 = vld [vmem:[#allocation2 + $0x2788] sm:$0xff]   ;;  %v20292_v22 = vld [vmem:[#allocation2 + $0x2818] sm:$0xff]  }
 0x4fb   :  { %15171 = vmatmul.mubr.bf16.vlgmr.msra.gmra.mrb[148].mxu1 %v3742_v37  ;;  %18690 = vmatprep.subr.bf16.mxu0 %v20218_v38  ;;  %v20255_v37 = vld [vmem:[#allocation2 + $0x2710] sm:$0xff]   ;;  %v20258_v38 = vld [vmem:[#allocation2 + $0x2758] sm:$0xff]  }
 0x4fc   :  { %18711 = vmatpush3.bf16.msra.mxu1 %v20217_v36  ;;  %15250 = vmatprep.mubr.bf16.mxu1 %v3792_v27  ;;  %v20256_v36 = vld [vmem:[#allocation2 + $0x27d0] sm:$0xff]   ;;  %v20297_v27 = vld [vmem:[#allocation2 + $0x28e0] sm:$0xff]  }
 0x4fd   :  { %18712 = vmatprep.subr.bf16.mxu1 %v20220_v40  ;;  %v20260_v40 = vld [vmem:[#allocation2 + $0x27d8] sm:$0xff]  }
 0x4fe   :  { %18691 = vmatpush3.bf16.msra.mxu0 %v20219_v39  ;;  %v20257_v39 = vld [vmem:[#allocation2 + $0x2790] sm:$0xff]  }
 0x4ff   :  { %18692 = vmatprep.subr.bf16.mxu0 %v20222_v42  ;;  %v20262_v42 = vld [vmem:[#allocation2 + $0x2760] sm:$0xff]  }
 0x500   :  { %18713 = vmatpush3.bf16.msra.mxu1 %v20221_v41  ;;  %v20259_v41 = vld [vmem:[#allocation2 + $0x2718] sm:$0xff]  }
 0x501   :  { %18714 = vmatprep.subr.bf16.mxu1 %v20224_v44  ;;  %v20264_v44 = vld [vmem:[#allocation2 + $0x27e0] sm:$0xff]  }
 0x502   :  { %18693 = vmatpush3.bf16.msra.mxu0 %v20223_v43  ;;  %v20261_v43 = vld [vmem:[#allocation2 + $0x2798] sm:$0xff]  }
 0x503   :  { %18694 = vmatprep.subr.bf16.mxu0 %v20226_v46  ;;  %v20266_v46 = vld [vmem:[#allocation2 + $0x2768] sm:$0xff]  }
 0x504   :  { %18715 = vmatpush3.bf16.msra.mxu1 %v20225_v45  ;;  %v20263_v45 = vld [vmem:[#allocation2 + $0x2720] sm:$0xff]  }
 0x505   :  { %18716 = vmatprep.subr.bf16.mxu1 %v20228_v48 }
 0x506   :  { %18695 = vmatpush3.bf16.msra.mxu0 %v20227_v47  ;;  %v20265_v47 = vld [vmem:[#allocation2 + $0x27a0] sm:$0xff]  }
 0x507   :  { %18696 = vmatprep.subr.bf16.mxu0 %v20230_v50 }
 0x508   :  { %18717 = vmatpush3.bf16.msra.mxu1 %v20229_v49  ;;  %v20268_v49 = vld [vmem:[#allocation2 + $0x27e8] sm:$0xff]  }
 0x509   :  { %18718 = vmatprep.subr.bf16.mxu1 %v20232_v52 }
 0x50a   :  { %18697 = vmatpush3.bf16.msra.mxu0 %v20231_v51  ;;  %v20267_v51 = vld [vmem:[#allocation2 + $0x2728] sm:$0xff]  }
 0x50b   :  { %18698 = vmatprep.subr.bf16.mxu0 %v20234_v54 }
 0x50c   :  { %v18396_v56 = vpop.f32.mrb[124].mxu0  ;;  %18719 = vmatpush3.bf16.msra.mxu1 %v20233_v53 }
 0x50d   :  { %v18397_v58 = vpop.f32.mrb[125].mxu0  ;;  %18720 = vmatprep.subr.bf16.mxu1 %v20236_v57 }
 0x50e   :  { %v18398_v60 = vadd.f32 %v18397_v58, %v18396_v56  ;;  %v18399_v61 = vpop.f32.mrb[126].mxu0  ;;  %v18418_v62 = vpop.f32.mrb[124].mxu1  ;;  %18699 = vmatpush3.bf16.msra.mxu0 %v20235_v55  ;;  %v20269_v55 = vld [vmem:[#allocation2 + $0x27a8] sm:$0xff]   ;;  %v20270_v56 = vld [vmem:[#allocation2 + $0x2770] sm:$0xff]  }
 0x50f   :  { %v18400_v63 = vpop.f32.mrb[127].mxu0  ;;  %v18419_v0 = vpop.f32.mrb[125].mxu1  ;;  %18700 = vmatprep.subr.bf16.mxu0 %v20238_v1 }
 0x510   :  { %v14653_v3 = vadd.f32 %v18398_v60, %v20889_v26  ;;  %v18420_v4 = vadd.f32 %v18419_v0, %v18418_v62  ;;  %v18421_v6 = vpop.f32.mrb[126].mxu1  ;;  %18721 = vmatpush3.bf16.msra.mxu1 %v20237_v59  ;;  %v20250_v26 = vld [vmem:[#allocation2 + $0x2748] sm:$0xff]   ;;  %v20271_v59 = vld [vmem:[#allocation2 + $0x2730] sm:$0xff]  }
 0x511   :  { %v18422_v9 = vpop.f32.mrb[127].mxu1  ;;  %18722 = vmatprep.subr.bf16.mxu1 %v20240_v5  ;;  %v20272_v62 = vld [vmem:[#allocation2 + $0x27f0] sm:$0xff]   ;;  %v20276_v5 = vld [vmem:[#allocation2 + $0x27f8] sm:$0xff]  }
 0x512   :  { %v20894_v7 = vadd.f32 %v18420_v4, %v14653_v3  ;;  %18701 = vmatpush3.bf16.msra.mxu0 %v20239_v2  ;;  %v20273_v0 = vld [vmem:[#allocation2 + $0x27b0] sm:$0xff]   ;;  %v20274_v3 = vld [vmem:[#allocation2 + $0x2778] sm:$0xff]   ;;  %v20280_v9 = vld [vmem:[#allocation2 + $0x2800] sm:$0xff]  }
 0x513   :  { %18702 = vmatprep.subr.bf16.mxu0 %v20242_v10  ;;  %v20275_v4 = vld [vmem:[#allocation2 + $0x2738] sm:$0xff]   ;;  %v20281_v10 = vld [vmem:[#allocation2 + $0x28c0] sm:$0xff]  }
 0x514   :  { %18723 = vmatpush3.bf16.msra.mxu1 %v20241_v8  ;;  %v20278_v6 = vld [vmem:[#allocation2 + $0x27b8] sm:$0xff]   ;;  %v20279_v8 = vld [vmem:[#allocation2 + $0x2840] sm:$0xff]  }
 0x515   :  { %18724 = vmatprep.subr.bf16.mxu1 %v20244_v12 }
 0x516   :  { %18703 = vmatpush3.bf16.msra.mxu0 %v20243_v11  ;;  %v20282_v11 = vld [vmem:[#allocation2 + $0x2880] sm:$0xff]  }
 0x517   :  { %18732 = vmatprep.subr.bf16.mxu0 %v20246_v17  ;;  %v20287_v17 = vld [vmem:[#allocation2 + $0x2850] sm:$0xff]  }
 0x518   :  { %18725 = vmatpush3.bf16.msra.mxu1 %v20245_v15  ;;  %v20285_v15 = vld [vmem:[#allocation2 + $0x28c8] sm:$0xff]  }
 0x519   :  { %18754 = vmatprep.subr.bf16.mxu1 %v20248_v21  ;;  %15211 = vmatmul.mubr.bf16.vlgmr.msra.gmra.mrb[152].mxu0 %v3768_v19  ;;  %v20289_v19 = vld [vmem:[#allocation2 + $0x28d0] sm:$0xff]   ;;  %v20291_v21 = vld [vmem:[#allocation2 + $0x2858] sm:$0xff]  }
 0x51a   :  { %18733 = vmatpush3.bf16.msra.mxu0 %v20247_v23  ;;  %15290 = vmatprep.mubr.bf16.mxu0 %v3789_v29  ;;  %v20293_v23 = vld [vmem:[#allocation2 + $0x28d8] sm:$0xff]   ;;  %v20299_v29 = vld [vmem:[#allocation2 + $0x2868] sm:$0xff]  }
 0x51b   :  { %15251 = vmatmul.mubr.bf16.vlgmr.msra.gmra.mrb[152].mxu1 %v3790_v25  ;;  %18734 = vmatprep.subr.bf16.mxu0 %v20250_v26  ;;  %v20295_v25 = vld [vmem:[#allocation2 + $0x2860] sm:$0xff]  }
 0x51c   :  { %18755 = vmatpush3.bf16.msra.mxu1 %v20249_v28  ;;  %15330 = vmatprep.mubr.bf16.mxu1 %v3793_v32  ;;  %v20296_v26 = vld [vmem:[#allocation2 + $0x2820] sm:$0xff]   ;;  %v20301_v32 = vld [vmem:[#allocation2 + $0x28e8] sm:$0xff]  }
 0x51d   :  { %18756 = vmatprep.subr.bf16.mxu1 %v20252_v30  ;;  %v20298_v28 = vld [vmem:[#allocation2 + $0x28a0] sm:$0xff]   ;;  %v20300_v30 = vld [vmem:[#allocation2 + $0x2828] sm:$0xff]  }
 0x51e   :  { %18735 = vmatpush3.bf16.msra.mxu0 %v20251_v31 }
 0x51f   :  { %18736 = vmatprep.subr.bf16.mxu0 %v20254_v33 }
 0x520   :  { %18757 = vmatpush3.bf16.msra.mxu1 %v20253_v35  ;;  %v20302_v35 = vld [vmem:[#allocation2 + $0x28a8] sm:$0xff]  }
 0x521   :  { %18758 = vmatprep.subr.bf16.mxu1 %v20256_v36 }
 0x522   :  { %18737 = vmatpush3.bf16.msra.mxu0 %v20255_v37 }
 0x523   :  { %18738 = vmatprep.subr.bf16.mxu0 %v20258_v38 }
 0x524   :  { %18759 = vmatpush3.bf16.msra.mxu1 %v20257_v39 }
 0x525   :  { %18760 = vmatprep.subr.bf16.mxu1 %v20260_v40 }
 0x526   :  { %18739 = vmatpush3.bf16.msra.mxu0 %v20259_v41  ;;  %v20303_v41 = vld [vmem:[#allocation2 + $0x2870] sm:$0xff]  }
 0x527   :  { %18740 = vmatprep.subr.bf16.mxu0 %v20262_v42  ;;  %v20304_v42 = vld [vmem:[#allocation2 + $0x2830] sm:$0xff]  }
 0x528   :  { %18761 = vmatpush3.bf16.msra.mxu1 %v20261_v43 }
 0x529   :  { %18762 = vmatprep.subr.bf16.mxu1 %v20264_v44 }
 0x52a   :  { %18741 = vmatpush3.bf16.msra.mxu0 %v20263_v45  ;;  %v20305_v45 = vld [vmem:[#allocation2 + $0x28f0] sm:$0xff]  }
 0x52b   :  { %18742 = vmatprep.subr.bf16.mxu0 %v20266_v46 }
 0x52c   :  { %v18440_v48 = vpop.f32.mrb[128].mxu0  ;;  %18763 = vmatpush3.bf16.msra.mxu1 %v20265_v47 }
 0x52d   :  { %v18441_v50 = vpop.f32.mrb[129].mxu0  ;;  %18764 = vmatprep.subr.bf16.mxu1 %v20268_v49 }
 0x52e   :  { %v18442_v52 = vadd.f32 %v18441_v50, %v18440_v48  ;;  %v18443_v53 = vpop.f32.mrb[130].mxu0  ;;  %v18462_v54 = vpop.f32.mrb[128].mxu1  ;;  %18743 = vmatpush3.bf16.msra.mxu0 %v20267_v51  ;;  %v20306_v48 = vld [vmem:[#allocation2 + $0x28b0] sm:$0xff]   ;;  %v20307_v50 = vld [vmem:[#allocation2 + $0x2878] sm:$0xff]  }
 0x52f   :  { %v18444_v57 = vpop.f32.mrb[131].mxu0  ;;  %v18463_v58 = vpop.f32.mrb[129].mxu1  ;;  %18744 = vmatprep.subr.bf16.mxu0 %v20270_v56  ;;  %v20308_v51 = vld [vmem:[#allocation2 + $0x2838] sm:$0xff]   ;;  %v79_v53 = vld [vmem:[%s20998_s0 + $0xa0] sm:$0xff] }
 0x530   :  { %v14733_v60 = vadd.f32 %v18442_v52, %v20894_v7  ;;  %v18464_v61 = vadd.f32 %v18463_v58, %v18462_v54  ;;  %v18465_v63 = vpop.f32.mrb[130].mxu1  ;;  %18765 = vmatpush3.bf16.msra.mxu1 %v20269_v55  ;;  %v3775_v7 = vrot.slane %v20902_v20, %v20533_v34  ;;  %v20290_v20 = vld [vmem:[#allocation2 + $0x2890] sm:$0xff]   ;;  %v20309_v52 = vld [vmem:[#allocation2 + $0x28f8] sm:$0xff]   ;;  %v3801_v54 = vrot.slane %v79_v53, %v20533_v34  ;;  %v20311_v57 = vld [vmem:[#allocation2 + $0x2940] sm:$0xff]  }
 0x531   :  { %v18466_v1 = vpop.f32.mrb[131].mxu1  ;;  %18766 = vmatprep.subr.bf16.mxu1 %v20272_v62  ;;  %v20310_v55 = vld [vmem:[#allocation2 + $0x28b8] sm:$0xff]   ;;  %v3794_v56 = vcombine.high %v79_v53, %v79_v53  ;;  %v20312_v63 = vld [vmem:[#allocation2 + $0x2900] sm:$0xff]  }
 0x532   :  { %v20909_v2 = vadd.f32 %v18464_v61, %v14733_v60  ;;  %18745 = vmatpush3.bf16.msra.mxu0 %v20271_v59  ;;  %v3791_v12 = vcombine.high %v3775_v7, %v3775_v7  ;;  %v3809_v58 = vcombine.high %v3801_v54, %v3801_v54  ;;  %v3817_v59 = vrot.slane %v3801_v54, %v20533_v34  ;;  %v20313_v61 = vld [vmem:[#allocation2 + $0x29c0] sm:$0xff]   ;;  %v20347_v53 = vld [vmem:[#allocation2 + $0x2a18] sm:$0xff]  }
 0x533   :  { %18746 = vmatprep.subr.bf16.mxu0 %v20274_v3  ;;  %v20922_v60 = vrot.slane %v3794_v56, %v20533_v34  ;;  %v20348_v54 = vld [vmem:[#allocation2 + $0x2a20] sm:$0xff]  }
 0x534   :  { %18767 = vmatpush3.bf16.msra.mxu1 %v20273_v0  ;;  %v3831_v62 = vrot.slane %v3809_v58, %v20533_v34  ;;  %v3839_v1 = vcombine.high %v3817_v59, %v3817_v59 }
 0x535   :  { %18768 = vmatprep.subr.bf16.mxu1 %v20276_v5  ;;  %v3810_v0 = vcombine.high %v20922_v60, %v20922_v60 }
 0x536   :  { %18747 = vmatpush3.bf16.msra.mxu0 %v20275_v4  ;;  %v3841_v3 = vcombine.high %v3831_v62, %v3831_v62  ;;  %v20314_v4 = vld [vmem:[#allocation2 + $0x2980] sm:$0xff]  }
 0x537   :  { %18776 = vmatprep.subr.bf16.mxu0 %v20279_v8  ;;  %v3838_v5 = vrot.slane %v3810_v0, %v20533_v34 }
 0x538   :  { %18769 = vmatpush3.bf16.msra.mxu1 %v20278_v6  ;;  %v20317_v6 = vld [vmem:[#allocation2 + $0x29c8] sm:$0xff]  }
 0x539   :  { %15291 = vmatmul.mubr.bf16.vlgmr.msra.gmra.mrb[156].mxu0 %v3775_v7  ;;  %18798 = vmatprep.subr.bf16.mxu1 %v20281_v10  ;;  %v20316_v7 = vld [vmem:[#allocation2 + $0x2908] sm:$0xff]   ;;  %v3842_v8 = vcombine.high %v3838_v5, %v3838_v5 }
 0x53a   :  { %18777 = vmatpush3.bf16.msra.mxu0 %v20280_v9  ;;  %15370 = vmatprep.mubr.bf16.mxu0 %v3831_v62  ;;  %v20319_v9 = vld [vmem:[#allocation2 + $0x2950] sm:$0xff]   ;;  %v20318_v10 = vld [vmem:[#allocation2 + $0x2988] sm:$0xff]  }
 0x53b   :  { %15331 = vmatmul.mubr.bf16.vlgmr.msra.gmra.mrb[156].mxu1 %v3791_v12  ;;  %18778 = vmatprep.subr.bf16.mxu0 %v20283_v13  ;;  %v20320_v12 = vld [vmem:[#allocation2 + $0x2910] sm:$0xff]   ;;  %v20323_v13 = vld [vmem:[#allocation2 + $0x2958] sm:$0xff]  }
 0x53c   :  { %18799 = vmatpush3.bf16.msra.mxu1 %v20282_v11  ;;  %15410 = vmatprep.mubr.bf16.mxu1 %v3841_v3  ;;  %v20321_v11 = vld [vmem:[#allocation2 + $0x29d0] sm:$0xff]  }
 0x53d   :  { %18800 = vmatprep.subr.bf16.mxu1 %v20285_v15  ;;  %v20325_v15 = vld [vmem:[#allocation2 + $0x29d8] sm:$0xff]  }
 0x53e   :  { %18779 = vmatpush3.bf16.msra.mxu0 %v20284_v14  ;;  %v20322_v14 = vld [vmem:[#allocation2 + $0x2990] sm:$0xff]  }
 0x53f   :  { %18780 = vmatprep.subr.bf16.mxu0 %v20287_v17  ;;  %v20327_v17 = vld [vmem:[#allocation2 + $0x2960] sm:$0xff]  }
 0x540   :  { %18801 = vmatpush3.bf16.msra.mxu1 %v20286_v16  ;;  %v20324_v16 = vld [vmem:[#allocation2 + $0x2918] sm:$0xff]  }
 0x541   :  { %18802 = vmatprep.subr.bf16.mxu1 %v20289_v19  ;;  %v20329_v19 = vld [vmem:[#allocation2 + $0x29e0] sm:$0xff]  }
 0x542   :  { %18781 = vmatpush3.bf16.msra.mxu0 %v20288_v18  ;;  %v20326_v18 = vld [vmem:[#allocation2 + $0x2998] sm:$0xff]  }
 0x543   :  { %18782 = vmatprep.subr.bf16.mxu0 %v20291_v21  ;;  %v20331_v21 = vld [vmem:[#allocation2 + $0x2968] sm:$0xff]  }
 0x544   :  { %18803 = vmatpush3.bf16.msra.mxu1 %v20290_v20  ;;  %v20328_v20 = vld [vmem:[#allocation2 + $0x2920] sm:$0xff]  }
 0x545   :  { %18804 = vmatprep.subr.bf16.mxu1 %v20293_v23 }
 0x546   :  { %18783 = vmatpush3.bf16.msra.mxu0 %v20292_v22  ;;  %v20330_v22 = vld [vmem:[#allocation2 + $0x29a0] sm:$0xff]  }
 0x547   :  { %18784 = vmatprep.subr.bf16.mxu0 %v20295_v25 }
 0x548   :  { %18805 = vmatpush3.bf16.msra.mxu1 %v20294_v24  ;;  %v20333_v24 = vld [vmem:[#allocation2 + $0x29e8] sm:$0xff]  }
 0x549   :  { %18806 = vmatprep.subr.bf16.mxu1 %v20297_v27 }
 0x54a   :  { %18785 = vmatpush3.bf16.msra.mxu0 %v20296_v26  ;;  %v20332_v26 = vld [vmem:[#allocation2 + $0x2928] sm:$0xff]  }
 0x54b   :  { %18786 = vmatprep.subr.bf16.mxu0 %v20299_v29 }
 0x54c   :  { %v18484_v31 = vpop.f32.mrb[132].mxu0  ;;  %18807 = vmatpush3.bf16.msra.mxu1 %v20298_v28 }
 0x54d   :  { %v18485_v33 = vpop.f32.mrb[133].mxu0  ;;  %18808 = vmatprep.subr.bf16.mxu1 %v20301_v32 }
 0x54e   :  { %v18486_v36 = vadd.f32 %v18485_v33, %v18484_v31  ;;  %v18487_v37 = vpop.f32.mrb[134].mxu0  ;;  %v18506_v38 = vpop.f32.mrb[132].mxu1  ;;  %18787 = vmatpush3.bf16.msra.mxu0 %v20300_v30  ;;  %v20334_v30 = vld [vmem:[#allocation2 + $0x29a8] sm:$0xff]   ;;  %v20335_v31 = vld [vmem:[#allocation2 + $0x2970] sm:$0xff]  }
 0x54f   :  { %v18488_v39 = vpop.f32.mrb[135].mxu0  ;;  %v18507_v40 = vpop.f32.mrb[133].mxu1  ;;  %18788 = vmatprep.subr.bf16.mxu0 %v20303_v41  ;;  %v20337_v37 = vld [vmem:[#allocation2 + $0x29f0] sm:$0xff]  }
 0x550   :  { %v14813_v43 = vadd.f32 %v18486_v36, %v20909_v2  ;;  %v18508_v44 = vadd.f32 %v18507_v40, %v18506_v38  ;;  %v18509_v46 = vpop.f32.mrb[134].mxu1  ;;  %18809 = vmatpush3.bf16.msra.mxu1 %v20302_v35  ;;  %v20315_v2 = vld [vmem:[#allocation2 + $0x2948] sm:$0xff]   ;;  %v20336_v39 = vld [vmem:[#allocation2 + $0x2930] sm:$0xff]  }
 0x551   :  { %v18510_v49 = vpop.f32.mrb[135].mxu1  ;;  %18810 = vmatprep.subr.bf16.mxu1 %v20305_v45  ;;  %v20340_v45 = vld [vmem:[#allocation2 + $0x2938] sm:$0xff]   ;;  %v3824_v46 = vrot.slane %v20922_v60, %v20533_v34 }
 0x552   :  { %v20914_v47 = vadd.f32 %v18508_v44, %v14813_v43  ;;  %18789 = vmatpush3.bf16.msra.mxu0 %v20304_v42  ;;  %v20339_v42 = vld [vmem:[#allocation2 + $0x2978] sm:$0xff]   ;;  %v20338_v43 = vld [vmem:[#allocation2 + $0x29b0] sm:$0xff]   ;;  %v20456_v49 = vmov 0.0  }
 0x553   :  { %18790 = vmatprep.subr.bf16.mxu0 %v20307_v50  ;;  %v20341_v44 = vld [vmem:[#allocation2 + $0x29f8] sm:$0xff]   ;;  %v3840_v50 = vcombine.high %v3824_v46, %v3824_v46 }
 0x554   :  { %18811 = vmatpush3.bf16.msra.mxu1 %v20306_v48  ;;  %v20344_v48 = vld [vmem:[#allocation2 + $0x2a00] sm:$0xff]  }
 0x555   :  { %18812 = vmatprep.subr.bf16.mxu1 %v20309_v52  ;;  %v20346_v52 = vld [vmem:[#allocation2 + $0x2a10] sm:$0xff]  }
 0x556   :  { %18791 = vmatpush3.bf16.msra.mxu0 %v20308_v51  ;;  %v20345_v51 = vld [vmem:[#allocation2 + $0x2a08] sm:$0xff]  }
 0x557   :  { %18820 = vmatprep.subr.bf16.mxu0 %v20311_v57  ;;  %v20349_v57 = vld [vmem:[#allocation2 + $0x2a28] sm:$0xff]  }
 0x558   :  { %18813 = vmatpush3.bf16.msra.mxu1 %v20310_v55 }
 0x559   :  { %18842 = vmatprep.subr.bf16.mxu1 %v20313_v61  ;;  %15371 = vmatmul.mubr.bf16.vlgmr.msra.gmra.mrb[160].mxu0 %v3817_v59 }
 0x55a   :  { %18821 = vmatpush3.bf16.msra.mxu0 %v20312_v63  ;;  %15450 = vmatprep.mubr.bf16.mxu0 %v3838_v5  ;;  %v20351_v5 = vld [vmem:[#allocation2 + $0x2a38] sm:$0xff]  }
 0x55b   :  { %15411 = vmatmul.mubr.bf16.vlgmr.msra.gmra.mrb[160].mxu1 %v3839_v1  ;;  %18822 = vmatprep.subr.bf16.mxu0 %v20315_v2  ;;  %v20350_v2 = vld [vmem:[#allocation2 + $0x2a30] sm:$0xff]  }
 0x55c   :  { %18843 = vmatpush3.bf16.msra.mxu1 %v20314_v4  ;;  %15490 = vmatprep.mubr.bf16.mxu1 %v3842_v8 }
 0x55d   :  { %18844 = vmatprep.subr.bf16.mxu1 %v20317_v6  ;;  %v15662_v6 = vld.sshfl [vmem:[%s20998_s0 + $0xa8] sm:$0x1 pattern:$0x75316420] }
 0x55e   :  { %18823 = vmatpush3.bf16.msra.mxu0 %v20316_v7  ;;  %v3856_v7 = vrot.slane %v15662_v6, %v20533_v34 }
 0x55f   :  { %18824 = vmatprep.subr.bf16.mxu0 %v20319_v9 }
 0x560   :  { %18845 = vmatpush3.bf16.msra.mxu1 %v20318_v10 }
 0x561   :  { %18846 = vmatprep.subr.bf16.mxu1 %v20321_v11 }
 0x562   :  { %18825 = vmatpush3.bf16.msra.mxu0 %v20320_v12 }
 0x563   :  { %18826 = vmatprep.subr.bf16.mxu0 %v20323_v13 }
 0x564   :  { %18847 = vmatpush3.bf16.msra.mxu1 %v20322_v14 }
 0x565   :  { %18848 = vmatprep.subr.bf16.mxu1 %v20325_v15 }
 0x566   :  { %18827 = vmatpush3.bf16.msra.mxu0 %v20324_v16 }
 0x567   :  { %18828 = vmatprep.subr.bf16.mxu0 %v20327_v17 }
 0x568   :  { %18849 = vmatpush3.bf16.msra.mxu1 %v20326_v18 }
 0x569   :  { %18850 = vmatprep.subr.bf16.mxu1 %v20329_v19 }
 0x56a   :  { %18829 = vmatpush3.bf16.msra.mxu0 %v20328_v20 }
 0x56b   :  { %18830 = vmatprep.subr.bf16.mxu0 %v20331_v21 }
 0x56c   :  { %v18528_v23 = vpop.f32.mrb[136].mxu0  ;;  %18851 = vmatpush3.bf16.msra.mxu1 %v20330_v22 }
 0x56d   :  { %v18529_v25 = vpop.f32.mrb[137].mxu0  ;;  %18852 = vmatprep.subr.bf16.mxu1 %v20333_v24 }
 0x56e   :  { %v18530_v27 = vadd.f32 %v18529_v25, %v18528_v23  ;;  %v18531_v28 = vpop.f32.mrb[138].mxu0  ;;  %v18550_v29 = vpop.f32.mrb[136].mxu1  ;;  %18831 = vmatpush3.bf16.msra.mxu0 %v20332_v26 }
 0x56f   :  { %v18532_v32 = vpop.f32.mrb[139].mxu0  ;;  %v18551_v33 = vpop.f32.mrb[137].mxu1  ;;  %18832 = vmatprep.subr.bf16.mxu0 %v20335_v31  ;;  %v15540_v31 = vld [vmem:[%s21001_s3 + $0x8] sm:$0xff] }
 0x570   :  { %v14893_v35 = vadd.f32 %v18530_v27, %v20914_v47  ;;  %v18552_v36 = vadd.f32 %v18551_v33, %v18550_v29  ;;  %v18553_v38 = vpop.f32.mrb[138].mxu1  ;;  %18853 = vmatpush3.bf16.msra.mxu1 %v20334_v30  ;;  %v20343_v47 = vld [vmem:[#allocation2 + $0x29b8] sm:$0xff]   ;;  %v15539_v30 = vld [vmem:[%s21001_s3] sm:$0xff] }
 0x571   :  { %v18554_v40 = vpop.f32.mrb[139].mxu1  ;;  %18854 = vmatprep.subr.bf16.mxu1 %v20337_v37  ;;  %v18946_v33 = vpack.c.bf16 %v15540_v31, %v15539_v30  ;;  %v20458_v37 = vmov 0.0|0.0  }
 0x572   :  { %v14933_v41 = vadd.f32 %v18552_v36, %v14893_v35  ;;  %18833 = vmatpush3.bf16.msra.mxu0 %v20336_v39  ;;  %v15541_v35 = vld [vmem:[%s21001_s3 + $0x10] sm:$0xff]  ;;  %v15542_v36 = vld [vmem:[%s21001_s3 + $0x18] sm:$0xff]  ;;  %v15543_v39 = vld [vmem:[%s21001_s3 + $0x20] sm:$0xff] }
 0x573   :  { %18834 = vmatprep.subr.bf16.mxu0 %v20339_v42  ;;  %v18949_v38 = vpack.c.bf16 %v15542_v36, %v15541_v35  ;;  %v15544_v40 = vld [vmem:[%s21001_s3 + $0x28] sm:$0xff]  ;;  %v15545_v42 = vld [vmem:[%s21001_s3 + $0x30] sm:$0xff] }
 0x574   :  { %18855 = vmatpush3.bf16.msra.mxu1 %v20338_v43  ;;  %v15546_v43 = vld [vmem:[%s21001_s3 + $0x38] sm:$0xff] }
 0x575   :  { %18856 = vmatprep.subr.bf16.mxu1 %v20341_v44  ;;  %v18955_v44 = vpack.c.bf16 %v15546_v43, %v15545_v42 }
 0x576   :  { %18835 = vmatpush3.bf16.msra.mxu0 %v20340_v45  ;;  %v15547_v45 = vld [vmem:[%s21001_s3 + $0x40] sm:$0xff] }
 0x577   :  { %18890 = vmatprep.subr.bf16.mxu0 %v20456_v49 }
 0x578   :  { %18857 = vmatpush3.bf16.msra.mxu1 %v20343_v47 }
 0x579   :  { %15451 = vmatmul.mubr.bf16.vlgmr.msra.gmra.mrb[164].mxu0 %v3824_v46  ;;  %18945 = vmatprep.subr.bf16.mxu1 %v20458_v37  ;;  %v15548_v46 = vld [vmem:[%s21001_s3 + $0x48] sm:$0xff] }
 0x57a   :  { %18891 = vmatpush3.bf16.msra.mxu0 %v20344_v48  ;;  %18906 = vmatprep.mubr.msk.bf16.mxu0 %vm20457_vm0, %v20456_v49  ;;  %v18958_v47 = vpack.c.bf16 %v15548_v46, %v15547_v45  ;;  %v15549_v48 = vld [vmem:[%s21001_s3 + $0x50] sm:$0xff] }
 0x57b   :  { %15491 = vmatmul.mubr.bf16.vlgmr.msra.gmra.mrb[164].mxu1 %v3840_v50  ;;  %18892 = vmatprep.subr.bf16.mxu0 %v20456_v49 }
 0x57c   :  { %18942 = vmatprep.mubr.msk.f32.mxu1 %vm20457_vm0, %v20456_v49  ;;  %18947 = vmatpush3.bf16.msra.mxu1 %v18946_v33 }
 0x57d   :  { %18948 = vmatprep.subr.bf16.mxu1 %v20458_v37 }
 0x57e   :  { %18893 = vmatpush3.bf16.msra.mxu0 %v20345_v51  ;;  %v15551_v51 = vld [vmem:[%s21001_s3 + $0x60] sm:$0xff] }
 0x57f   :  { %18894 = vmatprep.subr.bf16.mxu0 %v20456_v49 }
 0x580   :  { %18950 = vmatpush3.bf16.msra.mxu1 %v18949_v38 }
 0x581   :  { %18951 = vmatprep.subr.bf16.mxu1 %v20458_v37 }
 0x582   :  { %18895 = vmatpush3.bf16.msra.mxu0 %v20346_v52  ;;  %v15552_v52 = vld [vmem:[%s21001_s3 + $0x68] sm:$0xff] }
 0x583   :  { %18896 = vmatprep.subr.bf16.mxu0 %v20456_v49 }
 0x586   :  { %18897 = vmatpush3.bf16.msra.mxu0 %v20347_v53  ;;  %v18964_v53 = vpack.c.bf16 %v15552_v52, %v15551_v51 }
 0x587   :  { %18898 = vmatprep.subr.bf16.mxu0 %v20456_v49 }
 0x58a   :  { %18899 = vmatpush3.bf16.msra.mxu0 %v20348_v54 }
 0x58b   :  { %18900 = vmatprep.subr.bf16.mxu0 %v20456_v49 }
 0x58c   :  { %v18572_v55 = vpop.f32.mrb[140].mxu0 }
 0x58d   :  { %v18573_v56 = vpop.f32.mrb[141].mxu0 }
 0x58e   :  { %v18574_v58 = vadd.f32 %v18573_v56, %v18572_v55  ;;  %v18575_v59 = vpop.f32.mrb[142].mxu0  ;;  %v18594_v60 = vpop.f32.mrb[140].mxu1  ;;  %18901 = vmatpush3.bf16.msra.mxu0 %v20349_v57  ;;  %v15553_v55 = vld [vmem:[%s21001_s3 + $0x70] sm:$0xff]  ;;  %v15554_v56 = vld [vmem:[%s21001_s3 + $0x78] sm:$0xff] }
 0x58f   :  { %v18576_v61 = vpop.f32.mrb[143].mxu0  ;;  %v18595_v62 = vpop.f32.mrb[141].mxu1  ;;  %18902 = vmatprep.subr.bf16.mxu0 %v20456_v49 }
 0x590   :  { %v14973_v63 = vadd.f32 %v18574_v58, %v14933_v41  ;;  %v18596_v0 = vadd.f32 %v18595_v62, %v18594_v60  ;;  %v18597_v1 = vpop.f32.mrb[142].mxu1  ;;  %v18952_v41 = vpack.c.bf16 %v15544_v40, %v15543_v39  ;;  %v18967_v58 = vpack.c.bf16 %v15554_v56, %v15553_v55 }
 0x591   :  { %v18598_v3 = vpop.f32.mrb[143].mxu1 }
 0x592   :  { %v15013_v4 = vadd.f32 %v18596_v0, %v14973_v63  ;;  %18903 = vmatpush3.bf16.msra.mxu0 %v20350_v2  ;;  %18953 = vmatpush3.bf16.msra.mxu1 %v18952_v41 }
 0x593   :  { %18904 = vmatprep.subr.bf16.mxu0 %v20456_v49  ;;  %18954 = vmatprep.subr.bf16.mxu1 %v20458_v37  ;;  %v15550_v49 = vld [vmem:[%s21001_s3 + $0x58] sm:$0xff]  ;;  %s20459_s3 = smov [#allocation8]  }
 0x594   :  { %v18961_v50 = vpack.c.bf16 %v15550_v49, %v15549_v48  ;;  %s15651_s23 = sshll.u32 %s20459_s3, 4  ;;  %s15652_s23 = int_to_ptr.vmem [resolvable:$true] %s15651_s23 }
 0x595   :  { %s20422_s24 = scalar_lea.vmem %s15652_s23, 32  ;;  %p20427_p11 = scmp.lt.s32.totalorder %s15652_s23, %s15652_s23 }
 0x596   :  { %18905 = vmatpush3.bf16.msra.mxu0 %v20351_v5  ;;  %18956 = vmatpush3.bf16.msra.mxu1 %v18955_v44  ;;  %p20423_p10 = scmp.ne.s32.totalorder %s15652_s23, %s20422_s24  ;;  %p20428_p12 = scmp.lt.s32.totalorder %s20422_s24, %s20422_s24 }
 0x597   :  { %18957 = vmatprep.subr.bf16.mxu1 %v20458_v37 }
 0x598   :  { %p20429_p13 = por %p20428_p12, %p20427_p11 }
 0x599   :  { %18907 = vmatmul.mubr.bf16.vlgmr.msra.gmra.mrb[168].mxu0 %v3856_v7 }
 0x59a   :  { %18959 = vmatpush3.bf16.msra.mxu1 %v18958_v47  ;;  %v17015_v47 = vld [vmem:[#allocation7] ss:$0 sm:$0xff]  ;;  %p20430_p0 = pnand %p20429_p13, %p20423_p10 }
 0x59b   :  { %18960 = vmatprep.subr.bf16.mxu1 %v20458_v37 }
 0x59e   :  { %18962 = vmatpush3.bf16.msra.mxu1 %v18961_v50 }
 0x59f   :  { %18963 = vmatprep.subr.bf16.mxu1 %v20458_v37 }
 0x5a2   :  { %18965 = vmatpush3.bf16.msra.mxu1 %v18964_v53 }
 0x5a3   :  { %18966 = vmatprep.subr.bf16.mxu1 %v20458_v37 }
 0x5a6   :  { %18968 = vmatpush3.bf16.msra.mxu1 %v18967_v58 }
 0x5ac   :  { %v18616_v8 = vpop.f32.mrb[144].mxu0 }
 0x5ad   :  { %v18617_v9 = vpop.f32.mrb[145].mxu0 }
 0x5ae   :  { %v18618_v10 = vadd.f32 %v18617_v9, %v18616_v8  ;;  %v18619_v11 = vpop.f32.mrb[146].mxu0  ;;  %v18638_v12 = vpop.f32.mrb[144].mxu1 }
 0x5af   :  { %v18620_v13 = vpop.f32.mrb[147].mxu0  ;;  %v18639_v14 = vpop.f32.mrb[145].mxu1 }
 0x5b0   :  { %v15053_v15 = vadd.f32 %v18618_v10, %v15013_v4  ;;  %v18640_v16 = vadd.f32 %v18639_v14, %v18638_v12  ;;  %v18641_v17 = vpop.f32.mrb[146].mxu1 }
 0x5b1   :  { %v18642_v18 = vpop.f32.mrb[147].mxu1 }
 0x5b2   :  { %v15093_v19 = vadd.f32 %v18640_v16, %v15053_v15 }
 0x5cc   :  { %v18660_v20 = vpop.f32.mrb[148].mxu0 }
 0x5cd   :  { %v18661_v21 = vpop.f32.mrb[149].mxu0 }
 0x5ce   :  { %v18662_v22 = vadd.f32 %v18661_v21, %v18660_v20  ;;  %v18663_v23 = vpop.f32.mrb[150].mxu0  ;;  %v18682_v24 = vpop.f32.mrb[148].mxu1 }
 0x5cf   :  { %v18664_v34 = vpop.f32.mrb[151].mxu0  ;;  %v18683_v25 = vpop.f32.mrb[149].mxu1 }
 0x5d0   :  { %v15133_v26 = vadd.f32 %v18662_v22, %v15093_v19  ;;  %v18684_v27 = vadd.f32 %v18683_v25, %v18682_v24  ;;  %v18685_v28 = vpop.f32.mrb[150].mxu1 }
 0x5d1   :  { %v18686_v29 = vpop.f32.mrb[151].mxu1 }
 0x5d2   :  { %v15173_v32 = vadd.f32 %v18684_v27, %v15133_v26 }
 0x5ec   :  { %v18704_v54 = vpop.f32.mrb[152].mxu0 }
 0x5ed   :  { %v18705_v57 = vpop.f32.mrb[153].mxu0 }
 0x5ee   :  { %v18706_v59 = vadd.f32 %v18705_v57, %v18704_v54  ;;  %v18707_v60 = vpop.f32.mrb[154].mxu0  ;;  %v18726_v61 = vpop.f32.mrb[152].mxu1 }
 0x5ef   :  { %v18708_v62 = vpop.f32.mrb[155].mxu0  ;;  %v18727_v63 = vpop.f32.mrb[153].mxu1 }
 0x5f0   :  { %v15213_v0 = vadd.f32 %v18706_v59, %v15173_v32  ;;  %v18728_v1 = vadd.f32 %v18727_v63, %v18726_v61  ;;  %v18729_v2 = vpop.f32.mrb[154].mxu1 }
 0x5f1   :  { %v18730_v3 = vpop.f32.mrb[155].mxu1 }
 0x5f2   :  { %v15253_v4 = vadd.f32 %v18728_v1, %v15213_v0 }
 0x60c   :  { %v18748_v5 = vpop.f32.mrb[156].mxu0 }
 0x60d   :  { %v18749_v6 = vpop.f32.mrb[157].mxu0 }
 0x60e   :  { %v18750_v7 = vadd.f32 %v18749_v6, %v18748_v5  ;;  %v18751_v8 = vpop.f32.mrb[158].mxu0  ;;  %v18770_v9 = vpop.f32.mrb[156].mxu1 }
 0x60f   :  { %v18752_v10 = vpop.f32.mrb[159].mxu0  ;;  %v18771_v11 = vpop.f32.mrb[157].mxu1 }
 0x610   :  { %v15293_v12 = vadd.f32 %v18750_v7, %v15253_v4  ;;  %v18772_v13 = vadd.f32 %v18771_v11, %v18770_v9  ;;  %v18773_v14 = vpop.f32.mrb[158].mxu1 }
 0x611   :  { %v18774_v15 = vpop.f32.mrb[159].mxu1 }
 0x612   :  { %v15333_v16 = vadd.f32 %v18772_v13, %v15293_v12 }
 0x62c   :  { %v18792_v17 = vpop.f32.mrb[160].mxu0 }
 0x62d   :  { %v18793_v18 = vpop.f32.mrb[161].mxu0 }
 0x62e   :  { %v18794_v19 = vadd.f32 %v18793_v18, %v18792_v17  ;;  %v18795_v20 = vpop.f32.mrb[162].mxu0  ;;  %v18814_v21 = vpop.f32.mrb[160].mxu1 }
 0x62f   :  { %v18796_v22 = vpop.f32.mrb[163].mxu0  ;;  %v18815_v23 = vpop.f32.mrb[161].mxu1 }
 0x630   :  { %v15373_v24 = vadd.f32 %v18794_v19, %v15333_v16  ;;  %v18816_v34 = vadd.f32 %v18815_v23, %v18814_v21  ;;  %v18817_v25 = vpop.f32.mrb[162].mxu1 }
 0x631   :  { %v18818_v26 = vpop.f32.mrb[163].mxu1 }
 0x632   :  { %v15413_v27 = vadd.f32 %v18816_v34, %v15373_v24 }
 0x64c   :  { %v18836_v28 = vpop.f32.mrb[164].mxu0 }
 0x64d   :  { %v18837_v29 = vpop.f32.mrb[165].mxu0 }
 0x64e   :  { %v18838_v30 = vadd.f32 %v18837_v29, %v18836_v28  ;;  %v18839_v31 = vpop.f32.mrb[166].mxu0  ;;  %v18858_v32 = vpop.f32.mrb[164].mxu1 }
 0x64f   :  { %v18840_v33 = vpop.f32.mrb[167].mxu0  ;;  %v18859_v35 = vpop.f32.mrb[165].mxu1 }
 0x650   :  { %v15453_v36 = vadd.f32 %v18838_v30, %v15413_v27  ;;  %v18860_v37 = vadd.f32 %v18859_v35, %v18858_v32  ;;  %v18861_v38 = vpop.f32.mrb[166].mxu1 }
 0x651   :  { %v18862_v39 = vpop.f32.mrb[167].mxu1 }
 0x652   :  { %v15493_v40 = vadd.f32 %v18860_v37, %v15453_v36 }
 0x66c   :  { %v15532_v41 = vpop.f32.mrb[168].mxu0 }
 0x66d   :  { %v15533_v42 = vadd.f32 %v15532_v41, %v15493_v40  ;;  %v18908_v43 = vpop.f32.mrb[169].mxu0 }
 0x66e   :  { %v15535_v44 = vpop.f32.mrb[170].mxu0 }
 0x66f   :  { %v15538_v45 = vmax.f32 %v15533_v42, 0.0  ;;  %v18909_v46 = vpop.f32.mrb[171].mxu0 }
 0x671   :  { %18943 = vmatmul.mubr.f32.vlgmr.msra.gmra.mrb[168].mxu1 %v15538_v45 }
 0x744   :  { %v15628_v48 = vpop.f32.mrb[168].mxu1 }
 0x745   :  { %v15629_v49 = vadd.f32 %v17015_v47, %v15628_v48  ;;  %v18944_v50 = vpop.f32.mrb[169].mxu1 }
 0x747   :  { %v15633_v51 = vsel %vm15632_vm1, %v15629_v49, -inf }
 0x748   :  { %15634 = vmax.xlane.f32.xlu0 %v15633_v51 }
 0x7d5   :  { %v15635_v52 = vpop.xlane.xlu0 %15634 }
 0x7d6   :  { %v15636_v53 = vsub.f32 %v15629_v49, %v15635_v52 }
 0x7d8   :  { %v15637_v54 = vmul.f32 1.442695, %v15636_v53 }
 0x7da   :  { %20352 = vpow2.f32 %v15637_v54 }
 0x7e4   :  { %v20353_v55 = vpop.eup %20352 }
 0x7e5   :  { %v15639_v56 = vsel %vm15632_vm1, %v20353_v55, 0.0 }
 0x7e6   :  { %15640 = vadd.xlane.f32.xlu0 %v15639_v56 }
 0x873   :  { %v15641_v57 = vpop.xlane.xlu0 %15640 }
 0x874   :  { %20354 = vrcp.f32 %v15641_v57 }
 0x87e   :  { %v20355_v58 = vpop.eup %20354 }
 0x87f   :  { %v15643_v59 = vmul.f32 %v20355_v58, %v20353_v55 }
 0x881   :  { %15644 = vst.msk [vmem:[#allocation8] sm:$0x3] %vm15632_vm1, %v15643_v59 }
 0x882   :  { %20433 = shalt.err (!%p20430_p0)
}
 0x883   :  { %s20434_s27 = scalar_lea.hbm %s21003_s5, 32 }
 0x884   :  { %p20435_p1 = scmp.ne.s32.totalorder %s21003_s5, %s20434_s27  ;;  %p20438_p2 = scmp.lt.u32.totalorder %s20434_s27, %s21003_s5 }
 0x886   :  { %p20440_p3 = pnand %p20438_p2, %p20435_p1 }
 0x888   :  { %20443 = shalt.err (!%p20440_p3)
}
 0x889   :  { %15654 = dma.vmem_to_hbm [thread:$0]  %s15652_s23, 32, %s21003_s5, [#allocation4]  }
 0x88a   :  { %20448 = dma.done.wait [#allocation4], 32  }
 0x88b   :  { %20449 = vsyncadd [#allocation4], 4294967264 }
 0x88c   :  { %15658 = vsyncpa [#allocation3], 1 }
 0x88d   :  { %15659 = vsyncpa [#allocation6], 1 }
 0x88e   :  { %15660 = vsyncpa [#allocation4], 1 }

</bundles_post_ra>
